<compile_context>
chip_gen: v7x
topology: tpu7x:2x2x1
jax: 0.10.0
libtpu: 0.0.40
codegen_flags: <defaults>
</compile_context>

<pallas_src>
import functools

import jax
import jax.numpy as jnp
from jax.experimental import pallas as pl
from jax.experimental.pallas import tpu as pltpu


# ----------------------------- Pallas kernels ------------------------------

def _gn_affine(x, g_ref, b_ref, gmat_ref, *, eps, inv_count):
    """GroupNorm + affine on an (HW, C) float32 activation (one sample)."""
    s = jnp.sum(x, axis=0, keepdims=True)                     # (1, C)
    ss = jnp.sum(x * x, axis=0, keepdims=True)                # (1, C)
    # Within-group totals broadcast back per channel via a (C, C) indicator
    # matmul (avoids awkward lane-splitting reshapes; MXU slot is idle anyway).
    gs = jnp.dot(s, gmat_ref[...], preferred_element_type=jnp.float32)
    gss = jnp.dot(ss, gmat_ref[...], preferred_element_type=jnp.float32)
    mean = gs * inv_count
    var = gss * inv_count - mean * mean
    y = (x - mean) * jax.lax.rsqrt(var + eps)
    return y * g_ref[...] + b_ref[...]


def _conv_gn_body(p_ref, w_ref, g_ref, b_ref, gmat_ref, *, eps, inv_count):
    """GEMM + GroupNorm affine for one sample; returns (HW, C) float32."""
    x = jnp.dot(p_ref[...], w_ref[...], preferred_element_type=jnp.float32)
    return _gn_affine(x, g_ref, b_ref, gmat_ref, eps=eps, inv_count=inv_count)


def _conv_gn_kernel(p_ref, w_ref, g_ref, b_ref, gmat_ref, o_ref, *,
                    eps, inv_count, relu):
    y = _conv_gn_body(p_ref, w_ref, g_ref, b_ref, gmat_ref,
                      eps=eps, inv_count=inv_count)
    if relu:
        y = jnp.maximum(y, 0.0)
    o_ref[...] = y.astype(o_ref.dtype)


def _conv_gn_res_kernel(p_ref, w_ref, g_ref, b_ref, gmat_ref, r_ref, o_ref, *,
                        eps, inv_count):
    y = _conv_gn_body(p_ref, w_ref, g_ref, b_ref, gmat_ref,
                      eps=eps, inv_count=inv_count)
    y = jnp.maximum(y + r_ref[...], 0.0)                      # residual + ReLU
    o_ref[...] = y.astype(o_ref.dtype)


def _conv_gn_downres_kernel(p_ref, w_ref, g_ref, b_ref, gmat_ref,
                            dp_ref, dw_ref, dg_ref, db_ref, o_ref, *,
                            eps, inv_count):
    """conv2+GN fused with the 1x1 downsample conv+GN; add; ReLU."""
    y = _conv_gn_body(p_ref, w_ref, g_ref, b_ref, gmat_ref,
                      eps=eps, inv_count=inv_count)
    ident = _conv_gn_body(dp_ref, dw_ref, dg_ref, db_ref, gmat_ref,
                          eps=eps, inv_count=inv_count)
    o_ref[...] = jnp.maximum(y + ident, 0.0).astype(o_ref.dtype)


def _window_max_kernel(x_ref, o_ref):
    o_ref[...] = jnp.max(x_ref[...], axis=0)


# ------------------------------ fused conv op -------------------------------

def _im2col_nhwc(x, kh, kw, stride, pad):
    """NHWC im2col; K ordered as (kh, kw, Cin). Returns (N, Ho*Wo, K)."""
    N, H, W, C = x.shape
    Ho = (H + 2 * pad - kh) // stride + 1
    Wo = (W + 2 * pad - kw) // stride + 1
    xp = jnp.pad(x, ((0, 0), (pad, pad), (pad, pad), (0, 0))) if pad else x
    cols = []
    for i in range(kh):
        for j in range(kw):
            cols.append(jax.lax.slice(
                xp, (0, i, j, 0),
                (N, i + (Ho - 1) * stride + 1, j + (Wo - 1) * stride + 1, C),
                (1, stride, stride, 1)))
    patches = jnp.stack(cols, axis=3)                  # (N, Ho, Wo, kh*kw, C)
    return patches.reshape(N, Ho * Wo, kh * kw * C), Ho, Wo


def conv_gn(x, w, gamma, beta, *, stride, pad, relu,
            residual=None, down=None, num_groups=32, eps=1e-5):
    """Fused conv (im2col GEMM) + GroupNorm, optional ReLU / residual /
    fused downsample branch.

    x: (N, H, W, Cin) NHWC float32. w: (Cout, Cin, kh, kw) (PyTorch layout).
    residual (optional): (N, Ho, Wo, Cout) NHWC; added then ReLU'ed.
    down (optional): (x_in, dw, dgamma, dbeta, dstride) — identity branch
    GN(conv1x1_s(x_in)) computed inside the same kernel, added, then ReLU.
    Returns (N, Ho, Wo, Cout) float32 NHWC.
    """
    N = x.shape[0]
    OC, IC, kh, kw = w.shape
    patches, Ho, Wo = _im2col_nhwc(x, kh, kw, stride, pad)
    HW = Ho * Wo
    K = kh * kw * IC
    wmat = jnp.transpose(w, (2, 3, 1, 0)).reshape(K, OC)       # (K, Cout)
    cs = OC // num_groups
    cidx = jnp.arange(OC) // cs
    gmat = (cidx[:, None] == cidx[None, :]).astype(jnp.float32)  # (OC, OC)
    g2 = gamma.reshape(1, OC).astype(jnp.float32)
    b2 = beta.reshape(1, OC).astype(jnp.float32)
    inv_count = 1.0 / float(HW * cs)

    in_specs = [
        pl.BlockSpec((None, HW, K), lambda n: (n, 0, 0)),      # per-sample rows
        pl.BlockSpec((K, OC), lambda n: (0, 0)),
        pl.BlockSpec((1, OC), lambda n: (0, 0)),
        pl.BlockSpec((1, OC), lambda n: (0, 0)),
        pl.BlockSpec((OC, OC), lambda n: (0, 0)),
    ]
    args = [patches, wmat, g2, b2, gmat]

    if down is not None:
        # 1x1 stride-s projection: "patches" are just a strided spatial slice.
        x_in, dw, dgamma, dbeta, dstride = down
        dIC = dw.shape[1]
        dpat = x_in[:, ::dstride, ::dstride, :].reshape(N, HW, dIC)
        dwmat = jnp.transpose(dw, (2, 3, 1, 0)).reshape(dIC, OC)
        in_specs += [
            pl.BlockSpec((None, HW, dIC), lambda n: (n, 0, 0)),
            pl.BlockSpec((dIC, OC), lambda n: (0, 0)),
            pl.BlockSpec((1, OC), lambda n: (0, 0)),
            pl.BlockSpec((1, OC), lambda n: (0, 0)),
        ]
        args += [dpat, dwmat, dgamma.reshape(1, OC).astype(jnp.float32),
                 dbeta.reshape(1, OC).astype(jnp.float32)]
        kernel = functools.partial(_conv_gn_downres_kernel, eps=eps,
                                   inv_count=inv_count)
    elif residual is not None:
        in_specs.append(pl.BlockSpec((None, HW, OC), lambda n: (n, 0, 0)))
        args.append(residual.reshape(N, HW, OC))
        kernel = functools.partial(_conv_gn_res_kernel, eps=eps,
                                   inv_count=inv_count)
    else:
        kernel = functools.partial(_conv_gn_kernel, eps=eps,
                                   inv_count=inv_count, relu=relu)

    out = pl.pallas_call(
        kernel,
        out_shape=jax.ShapeDtypeStruct((N, HW, OC), jnp.float32),
        grid=(N,),
        in_specs=in_specs,
        out_specs=pl.BlockSpec((None, HW, OC), lambda n: (n, 0, 0)),
        compiler_params=pltpu.CompilerParams(
            dimension_semantics=("parallel",)),
    )(*args)
    return out.reshape(N, Ho, Wo, OC)


def maxpool2d_nhwc(x, k=3, stride=2, pad=1):
    N, H, W, C = x.shape
    Ho = (H + 2 * pad - k) // stride + 1
    Wo = (W + 2 * pad - k) // stride + 1
    xp = jnp.pad(x, ((0, 0), (pad, pad), (pad, pad), (0, 0)),
                 constant_values=float("-inf"))
    wins = []
    for i in range(k):
        for j in range(k):
            wins.append(jax.lax.slice(
                xp, (0, i, j, 0),
                (N, i + (Ho - 1) * stride + 1, j + (Wo - 1) * stride + 1, C),
                (1, stride, stride, 1)))
    stk = jnp.stack(wins, axis=0)                      # (k*k, N, Ho, Wo, C)
    total = N * Ho * Wo * C
    if total % 128 == 0:                               # lane-dense stores
        rows, lanes = total // 128, 128
    else:
        rows, lanes = N * Ho * Wo, C
    stk = stk.reshape(k * k, rows, lanes)
    out = pl.pallas_call(
        _window_max_kernel,
        out_shape=jax.ShapeDtypeStruct((rows, lanes), x.dtype),
    )(stk)
    return out.reshape(N, Ho, Wo, C)


# ------------------------------ model ---------------------------------------

def basic_block_forward(x, blk, cfg):
    stride = cfg["stride"]
    h = conv_gn(x, blk["conv1_w"], blk["bn1_g"], blk["bn1_b"],
                stride=stride, pad=1, relu=True)
    if cfg["down"]:
        # Second conv + GN + (fused 1x1 downsample conv + GN) + add + ReLU.
        return conv_gn(h, blk["conv2_w"], blk["bn2_g"], blk["bn2_b"],
                       stride=1, pad=1, relu=True,
                       down=(x, blk["down_w"], blk["down_g"], blk["down_b"],
                             stride))
    # Second conv + GN + residual add + ReLU.
    return conv_gn(h, blk["conv2_w"], blk["bn2_g"], blk["bn2_b"],
                   stride=1, pad=1, relu=True, residual=x)


def make_resnet_forward(arch):
    def forward(x, params):
        x = jnp.transpose(x, (0, 2, 3, 1))             # NCHW -> NHWC once
        x = conv_gn(x, params["conv1_w"], params["bn1_g"], params["bn1_b"],
                    stride=2, pad=3, relu=True)
        x = maxpool2d_nhwc(x, k=3, stride=2, pad=1)
        feats = []
        for layer_params, layer_cfg in zip(params["layers"], arch):
            for blk, cfg in zip(layer_params, layer_cfg):
                x = basic_block_forward(x, blk, cfg)
            feats.append(x)
        feats = [jnp.transpose(f, (0, 3, 1, 2)) for f in feats]  # back to NCHW
        return feats[-1], feats                        # (C5, [C2, C3, C4, C5])
    return forward


# --------------------------- deterministic init ------------------------------

def _conv_init(key, oc, ic, kh, kw):
    fan_in = ic * kh * kw
    return jax.random.normal(key, (oc, ic, kh, kw), jnp.float32) * (2.0 / fan_in) ** 0.5


def init_params(key, inch, ch, blocks_num, strides):
    """Returns (params pytree of arrays only, static arch config)."""
    expansion = 1  # BasicBlock
    keys = iter(jax.random.split(key, 512))
    p = {}
    p["conv1_w"] = _conv_init(next(keys), 64, inch, 7, 7)
    p["bn1_g"] = jnp.ones((64,), jnp.float32) + 0.1 * jax.random.normal(next(keys), (64,))
    p["bn1_b"] = 0.1 * jax.random.normal(next(keys), (64,))
    in_ch = 64
    layers, arch = [], []
    for li in range(4):
        chn = ch[li]
        blocks, cfgs = [], []
        for bi in range(blocks_num[li]):
            stride = strides[li] if bi == 0 else 1
            down = bi == 0 and (stride != 1 or in_ch != chn * expansion)
            blk = {}
            blk["conv1_w"] = _conv_init(next(keys), chn, in_ch, 3, 3)
            blk["bn1_g"] = jnp.ones((chn,), jnp.float32) + 0.1 * jax.random.normal(next(keys), (chn,))
            blk["bn1_b"] = 0.1 * jax.random.normal(next(keys), (chn,))
            blk["conv2_w"] = _conv_init(next(keys), chn, chn, 3, 3)
            blk["bn2_g"] = jnp.ones((chn,), jnp.float32) + 0.1 * jax.random.normal(next(keys), (chn,))
            blk["bn2_b"] = 0.1 * jax.random.normal(next(keys), (chn,))
            if down:
                blk["down_w"] = _conv_init(next(keys), chn * expansion, in_ch, 1, 1)
                blk["down_g"] = jnp.ones((chn * expansion,), jnp.float32) + \
                    0.1 * jax.random.normal(next(keys), (chn * expansion,))
                blk["down_b"] = 0.1 * jax.random.normal(next(keys), (chn * expansion,))
            in_ch = chn * expansion
            blocks.append(blk)
            cfgs.append({"stride": stride, "down": down})
        layers.append(blocks)
        arch.append(cfgs)
    p["layers"] = layers
    return p, arch


if __name__ == "__main__":
    key = jax.random.PRNGKey(0)
    inch = 4
    # ResNet(inch=4, block=BasicBlock, ch=[64,64,128,128],
    #        blocks_num=[1,1,1,1], strides=[1,2,2,2], norm='group')
    params, arch = init_params(key, inch,
                               ch=[64, 64, 128, 128],
                               blocks_num=[1, 1, 1, 1],
                               strides=[1, 2, 2, 2])
    x = jax.random.normal(jax.random.fold_in(key, 123), (2, inch, 16, 16),
                          jnp.float32)

    forward = jax.jit(make_resnet_forward(arch))
    out, feats = forward(x, params)
    jax.block_until_ready(out)
    for f in feats:
        jax.block_until_ready(f)

    # sanity on shapes (C2..C5)
    assert out.shape == (2, 128, 1, 1)
    assert [f.shape for f in feats] == [(2, 64, 4, 4), (2, 64, 2, 2),
                                        (2, 128, 1, 1), (2, 128, 1, 1)]
    print("KERNEL_OK")
</pallas_src>

<mosaic_0001>
module attributes {stable_mosaic.version = 11 : i64} {
  func.func @_conv_gn_kernel(%arg0: i32, %arg1: memref<1x64x196xf32, #tpu.memory_space<vmem>>, %arg2: memref<196x64xf32, #tpu.memory_space<vmem>>, %arg3: memref<1x64xf32, #tpu.memory_space<vmem>>, %arg4: memref<1x64xf32, #tpu.memory_space<vmem>>, %arg5: memref<64x64xf32, #tpu.memory_space<vmem>>, %arg6: memref<1x64x64xf32, #tpu.memory_space<vmem>>) attributes {dimension_semantics = [#tpu.dimension_semantics<parallel>], iteration_bounds = array<i64: 2>, scalar_prefetch = 0 : i64, scratch_operands = 0 : i64, tpu.core_type = #tpu.core_type<tc>, window_params = [{transform_indices = @transform_0, window_bounds = array<i64: 1, 64, 196>}, {pipeline_mode = #tpu.pipeline_mode<synchronous>, transform_indices = @transform_1, window_bounds = array<i64: 196, 64>}, {pipeline_mode = #tpu.pipeline_mode<synchronous>, transform_indices = @transform_2, window_bounds = array<i64: 1, 64>}, {pipeline_mode = #tpu.pipeline_mode<synchronous>, transform_indices = @transform_3, window_bounds = array<i64: 1, 64>}, {pipeline_mode = #tpu.pipeline_mode<synchronous>, transform_indices = @transform_4, window_bounds = array<i64: 64, 64>}, {transform_indices = @transform_5, window_bounds = array<i64: 1, 64, 64>}]} {
    %c0 = arith.constant 0 : index
    %c0_0 = arith.constant 0 : index
    %c0_1 = arith.constant 0 : index
    %0 = vector.load %arg1[%c0, %c0_0, %c0_1] : memref<1x64x196xf32, #tpu.memory_space<vmem>>, vector<1x64x196xf32>
    %1 = vector.shape_cast %0 : vector<1x64x196xf32> to vector<64x196xf32>
    %c0_2 = arith.constant 0 : index
    %c0_3 = arith.constant 0 : index
    %2 = vector.load %arg2[%c0_2, %c0_3] : memref<196x64xf32, #tpu.memory_space<vmem>>, vector<196x64xf32>
    %cst = arith.constant dense<0.000000e+00> : vector<64x64xf32>
    %3 = tpu.matmul %1, %2, %cst {dimension_numbers = #tpu.dot_dimension_numbers<[1], [0], [0], [1], [0, 0, 1, 1], [], []>} : vector<64x196xf32>, vector<196x64xf32>, vector<64x64xf32> -> vector<64x64xf32>
    %cst_4 = arith.constant dense<0.000000e+00> : vector<64xf32>
    %4 = vector.multi_reduction <add>, %3, %cst_4 [0] : vector<64x64xf32> to vector<64xf32>
    %5 = vector.shape_cast %4 : vector<64xf32> to vector<1x64xf32>
    %6 = arith.mulf %3, %3 : vector<64x64xf32>
    %cst_5 = arith.constant dense<0.000000e+00> : vector<64xf32>
    %7 = vector.multi_reduction <add>, %6, %cst_5 [0] : vector<64x64xf32> to vector<64xf32>
    %8 = vector.shape_cast %7 : vector<64xf32> to vector<1x64xf32>
    %c0_6 = arith.constant 0 : index
    %c0_7 = arith.constant 0 : index
    %9 = vector.load %arg5[%c0_6, %c0_7] : memref<64x64xf32, #tpu.memory_space<vmem>>, vector<64x64xf32>
    %cst_8 = arith.constant dense<0.000000e+00> : vector<1x64xf32>
    %10 = tpu.matmul %5, %9, %cst_8 {dimension_numbers = #tpu.dot_dimension_numbers<[1], [0], [0], [1], [0, 0, 1, 1], [], []>} : vector<1x64xf32>, vector<64x64xf32>, vector<1x64xf32> -> vector<1x64xf32>
    %c0_9 = arith.constant 0 : index
    %c0_10 = arith.constant 0 : index
    %11 = vector.load %arg5[%c0_9, %c0_10] : memref<64x64xf32, #tpu.memory_space<vmem>>, vector<64x64xf32>
    %cst_11 = arith.constant dense<0.000000e+00> : vector<1x64xf32>
    %12 = tpu.matmul %8, %11, %cst_11 {dimension_numbers = #tpu.dot_dimension_numbers<[1], [0], [0], [1], [0, 0, 1, 1], [], []>} : vector<1x64xf32>, vector<64x64xf32>, vector<1x64xf32> -> vector<1x64xf32>
    %cst_12 = arith.constant 7.812500e-03 : f32
    %13 = vector.broadcast %cst_12 : f32 to vector<1x64xf32>
    %14 = arith.mulf %10, %13 : vector<1x64xf32>
    %cst_13 = arith.constant 7.812500e-03 : f32
    %15 = vector.broadcast %cst_13 : f32 to vector<1x64xf32>
    %16 = arith.mulf %12, %15 : vector<1x64xf32>
    %17 = arith.mulf %14, %14 : vector<1x64xf32>
    %18 = arith.subf %16, %17 : vector<1x64xf32>
    %19 = vector.broadcast %14 : vector<1x64xf32> to vector<64x64xf32>
    %20 = arith.subf %3, %19 : vector<64x64xf32>
    %cst_14 = arith.constant 9.99999974E-6 : f32
    %21 = vector.broadcast %cst_14 : f32 to vector<1x64xf32>
    %22 = arith.addf %18, %21 : vector<1x64xf32>
    %23 = math.rsqrt %22 : vector<1x64xf32>
    %24 = vector.broadcast %23 : vector<1x64xf32> to vector<64x64xf32>
    %25 = arith.mulf %20, %24 : vector<64x64xf32>
    %c0_15 = arith.constant 0 : index
    %c0_16 = arith.constant 0 : index
    %26 = vector.load %arg3[%c0_15, %c0_16] : memref<1x64xf32, #tpu.memory_space<vmem>>, vector<1x64xf32>
    %27 = vector.broadcast %26 : vector<1x64xf32> to vector<64x64xf32>
    %28 = arith.mulf %25, %27 : vector<64x64xf32>
    %c0_17 = arith.constant 0 : index
    %c0_18 = arith.constant 0 : index
    %29 = vector.load %arg4[%c0_17, %c0_18] : memref<1x64xf32, #tpu.memory_space<vmem>>, vector<1x64xf32>
    %30 = vector.broadcast %29 : vector<1x64xf32> to vector<64x64xf32>
    %31 = arith.addf %28, %30 : vector<64x64xf32>
    %cst_19 = arith.constant 0.000000e+00 : f32
    %32 = vector.broadcast %cst_19 : f32 to vector<64x64xf32>
    %33 = arith.maximumf %31, %32 : vector<64x64xf32>
    %c0_20 = arith.constant 0 : index
    %c0_21 = arith.constant 0 : index
    %c0_22 = arith.constant 0 : index
    %34 = vector.load %arg6[%c0_20, %c0_21, %c0_22] : memref<1x64x64xf32, #tpu.memory_space<vmem>>, vector<1x64x64xf32>
    %35 = vector.shape_cast %34 : vector<1x64x64xf32> to vector<64x64xf32>
    %36 = vector.shape_cast %33 : vector<64x64xf32> to vector<1x64x64xf32>
    tpu.vector_store %arg6[%c0_20, %c0_21, %c0_22], %36 {strides = array<i32>} : memref<1x64x64xf32, #tpu.memory_space<vmem>>, vector<1x64x64xf32>,
    return
  }
  func.func @transform_0(%arg0: i32) -> (i32, i32, i32) {
    %c0_i32 = arith.constant 0 : i32
    %c0_i32_0 = arith.constant 0 : i32
    %c0_i32_1 = arith.constant 0 : i32
    return %arg0, %c0_i32, %c0_i32_0 : i32, i32, i32
  }
  func.func @transform_1(%arg0: i32) -> (i32, i32) {
    %c0_i32 = arith.constant 0 : i32
    %c0_i32_0 = arith.constant 0 : i32
    %c0_i32_1 = arith.constant 0 : i32
    return %c0_i32, %c0_i32_0 : i32, i32
  }
  func.func @transform_2(%arg0: i32) -> (i32, i32) {
    %c0_i32 = arith.constant 0 : i32
    %c0_i32_0 = arith.constant 0 : i32
    %c0_i32_1 = arith.constant 0 : i32
    return %c0_i32, %c0_i32_0 : i32, i32
  }
  func.func @transform_3(%arg0: i32) -> (i32, i32) {
    %c0_i32 = arith.constant 0 : i32
    %c0_i32_0 = arith.constant 0 : i32
    %c0_i32_1 = arith.constant 0 : i32
    return %c0_i32, %c0_i32_0 : i32, i32
  }
  func.func @transform_4(%arg0: i32) -> (i32, i32) {
    %c0_i32 = arith.constant 0 : i32
    %c0_i32_0 = arith.constant 0 : i32
    %c0_i32_1 = arith.constant 0 : i32
    return %c0_i32, %c0_i32_0 : i32, i32
  }
  func.func @transform_5(%arg0: i32) -> (i32, i32, i32) {
    %c0_i32 = arith.constant 0 : i32
    %c0_i32_0 = arith.constant 0 : i32
    %c0_i32_1 = arith.constant 0 : i32
    return %arg0, %c0_i32, %c0_i32_0 : i32, i32, i32
  }
}

module attributes {stable_mosaic.version = 11 : i64} {
  func.func @_window_max_kernel(%arg0: memref<9x16x128xf32, #tpu.memory_space<vmem>>, %arg1: memref<16x128xf32, #tpu.memory_space<vmem>>) attributes {dimension_semantics = [], scalar_prefetch = 0 : i64, scratch_operands = 0 : i64, tpu.core_type = #tpu.core_type<tc>} {
    %c0 = arith.constant 0 : index
    %c0_0 = arith.constant 0 : index
    %c0_1 = arith.constant 0 : index
    %0 = vector.load %arg0[%c0, %c0_0, %c0_1] : memref<9x16x128xf32, #tpu.memory_space<vmem>>, vector<9x16x128xf32>
    %cst = arith.constant dense<0xFF800000> : vector<16x128xf32>
    %1 = vector.multi_reduction <maximumf>, %0, %cst [0] : vector<9x16x128xf32> to vector<16x128xf32>
    %c0_2 = arith.constant 0 : index
    %c0_3 = arith.constant 0 : index
    %2 = vector.load %arg1[%c0_2, %c0_3] : memref<16x128xf32, #tpu.memory_space<vmem>>, vector<16x128xf32>
    tpu.vector_store %arg1[%c0_2, %c0_3], %1 {strides = array<i32>} : memref<16x128xf32, #tpu.memory_space<vmem>>, vector<16x128xf32>,
    return
  }
}

module attributes {stable_mosaic.version = 11 : i64} {
  func.func @_conv_gn_kernel(%arg0: i32, %arg1: memref<1x16x576xf32, #tpu.memory_space<vmem>>, %arg2: memref<576x64xf32, #tpu.memory_space<vmem>>, %arg3: memref<1x64xf32, #tpu.memory_space<vmem>>, %arg4: memref<1x64xf32, #tpu.memory_space<vmem>>, %arg5: memref<64x64xf32, #tpu.memory_space<vmem>>, %arg6: memref<1x16x64xf32, #tpu.memory_space<vmem>>) attributes {dimension_semantics = [#tpu.dimension_semantics<parallel>], iteration_bounds = array<i64: 2>, scalar_prefetch = 0 : i64, scratch_operands = 0 : i64, tpu.core_type = #tpu.core_type<tc>, window_params = [{transform_indices = @transform_0, window_bounds = array<i64: 1, 16, 576>}, {pipeline_mode = #tpu.pipeline_mode<synchronous>, transform_indices = @transform_1, window_bounds = array<i64: 576, 64>}, {pipeline_mode = #tpu.pipeline_mode<synchronous>, transform_indices = @transform_2, window_bounds = array<i64: 1, 64>}, {pipeline_mode = #tpu.pipeline_mode<synchronous>, transform_indices = @transform_3, window_bounds = array<i64: 1, 64>}, {pipeline_mode = #tpu.pipeline_mode<synchronous>, transform_indices = @transform_4, window_bounds = array<i64: 64, 64>}, {transform_indices = @transform_5, window_bounds = array<i64: 1, 16, 64>}]} {
    %c0 = arith.constant 0 : index
    %c0_0 = arith.constant 0 : index
    %c0_1 = arith.constant 0 : index
    %0 = vector.load %arg1[%c0, %c0_0, %c0_1] : memref<1x16x576xf32, #tpu.memory_space<vmem>>, vector<1x16x576xf32>
    %1 = vector.shape_cast %0 : vector<1x16x576xf32> to vector<16x576xf32>
    %c0_2 = arith.constant 0 : index
    %c0_3 = arith.constant 0 : index
    %2 = vector.load %arg2[%c0_2, %c0_3] : memref<576x64xf32, #tpu.memory_space<vmem>>, vector<576x64xf32>
    %cst = arith.constant dense<0.000000e+00> : vector<16x64xf32>
    %3 = tpu.matmul %1, %2, %cst {dimension_numbers = #tpu.dot_dimension_numbers<[1], [0], [0], [1], [0, 0, 1, 1], [], []>} : vector<16x576xf32>, vector<576x64xf32>, vector<16x64xf32> -> vector<16x64xf32>
    %cst_4 = arith.constant dense<0.000000e+00> : vector<64xf32>
    %4 = vector.multi_reduction <add>, %3, %cst_4 [0] : vector<16x64xf32> to vector<64xf32>
    %5 = vector.shape_cast %4 : vector<64xf32> to vector<1x64xf32>
    %6 = arith.mulf %3, %3 : vector<16x64xf32>
    %cst_5 = arith.constant dense<0.000000e+00> : vector<64xf32>
    %7 = vector.multi_reduction <add>, %6, %cst_5 [0] : vector<16x64xf32> to vector<64xf32>
    %8 = vector.shape_cast %7 : vector<64xf32> to vector<1x64xf32>
    %c0_6 = arith.constant 0 : index
    %c0_7 = arith.constant 0 : index
    %9 = vector.load %arg5[%c0_6, %c0_7] : memref<64x64xf32, #tpu.memory_space<vmem>>, vector<64x64xf32>
    %cst_8 = arith.constant dense<0.000000e+00> : vector<1x64xf32>
    %10 = tpu.matmul %5, %9, %cst_8 {dimension_numbers = #tpu.dot_dimension_numbers<[1], [0], [0], [1], [0, 0, 1, 1], [], []>} : vector<1x64xf32>, vector<64x64xf32>, vector<1x64xf32> -> vector<1x64xf32>
    %c0_9 = arith.constant 0 : index
    %c0_10 = arith.constant 0 : index
    %11 = vector.load %arg5[%c0_9, %c0_10] : memref<64x64xf32, #tpu.memory_space<vmem>>, vector<64x64xf32>
    %cst_11 = arith.constant dense<0.000000e+00> : vector<1x64xf32>
    %12 = tpu.matmul %8, %11, %cst_11 {dimension_numbers = #tpu.dot_dimension_numbers<[1], [0], [0], [1], [0, 0, 1, 1], [], []>} : vector<1x64xf32>, vector<64x64xf32>, vector<1x64xf32> -> vector<1x64xf32>
    %cst_12 = arith.constant 3.125000e-02 : f32
    %13 = vector.broadcast %cst_12 : f32 to vector<1x64xf32>
    %14 = arith.mulf %10, %13 : vector<1x64xf32>
    %cst_13 = arith.constant 3.125000e-02 : f32
    %15 = vector.broadcast %cst_13 : f32 to vector<1x64xf32>
    %16 = arith.mulf %12, %15 : vector<1x64xf32>
    %17 = arith.mulf %14, %14 : vector<1x64xf32>
    %18 = arith.subf %16, %17 : vector<1x64xf32>
    %19 = vector.broadcast %14 : vector<1x64xf32> to vector<16x64xf32>
    %20 = arith.subf %3, %19 : vector<16x64xf32>
    %cst_14 = arith.constant 9.99999974E-6 : f32
    %21 = vector.broadcast %cst_14 : f32 to vector<1x64xf32>
    %22 = arith.addf %18, %21 : vector<1x64xf32>
    %23 = math.rsqrt %22 : vector<1x64xf32>
    %24 = vector.broadcast %23 : vector<1x64xf32> to vector<16x64xf32>
    %25 = arith.mulf %20, %24 : vector<16x64xf32>
    %c0_15 = arith.constant 0 : index
    %c0_16 = arith.constant 0 : index
    %26 = vector.load %arg3[%c0_15, %c0_16] : memref<1x64xf32, #tpu.memory_space<vmem>>, vector<1x64xf32>
    %27 = vector.broadcast %26 : vector<1x64xf32> to vector<16x64xf32>
    %28 = arith.mulf %25, %27 : vector<16x64xf32>
    %c0_17 = arith.constant 0 : index
    %c0_18 = arith.constant 0 : index
    %29 = vector.load %arg4[%c0_17, %c0_18] : memref<1x64xf32, #tpu.memory_space<vmem>>, vector<1x64xf32>
    %30 = vector.broadcast %29 : vector<1x64xf32> to vector<16x64xf32>
    %31 = arith.addf %28, %30 : vector<16x64xf32>
    %cst_19 = arith.constant 0.000000e+00 : f32
    %32 = vector.broadcast %cst_19 : f32 to vector<16x64xf32>
    %33 = arith.maximumf %31, %32 : vector<16x64xf32>
    %c0_20 = arith.constant 0 : index
    %c0_21 = arith.constant 0 : index
    %c0_22 = arith.constant 0 : index
    %34 = vector.load %arg6[%c0_20, %c0_21, %c0_22] : memref<1x16x64xf32, #tpu.memory_space<vmem>>, vector<1x16x64xf32>
    %35 = vector.shape_cast %34 : vector<1x16x64xf32> to vector<16x64xf32>
    %36 = vector.shape_cast %33 : vector<16x64xf32> to vector<1x16x64xf32>
    tpu.vector_store %arg6[%c0_20, %c0_21, %c0_22], %36 {strides = array<i32>} : memref<1x16x64xf32, #tpu.memory_space<vmem>>, vector<1x16x64xf32>,
    return
  }
  func.func @transform_0(%arg0: i32) -> (i32, i32, i32) {
    %c0_i32 = arith.constant 0 : i32
    %c0_i32_0 = arith.constant 0 : i32
    %c0_i32_1 = arith.constant 0 : i32
    return %arg0, %c0_i32, %c0_i32_0 : i32, i32, i32
  }
  func.func @transform_1(%arg0: i32) -> (i32, i32) {
    %c0_i32 = arith.constant 0 : i32
    %c0_i32_0 = arith.constant 0 : i32
    %c0_i32_1 = arith.constant 0 : i32
    return %c0_i32, %c0_i32_0 : i32, i32
  }
  func.func @transform_2(%arg0: i32) -> (i32, i32) {
    %c0_i32 = arith.constant 0 : i32
    %c0_i32_0 = arith.constant 0 : i32
    %c0_i32_1 = arith.constant 0 : i32
    return %c0_i32, %c0_i32_0 : i32, i32
  }
  func.func @transform_3(%arg0: i32) -> (i32, i32) {
    %c0_i32 = arith.constant 0 : i32
    %c0_i32_0 = arith.constant 0 : i32
    %c0_i32_1 = arith.constant 0 : i32
    return %c0_i32, %c0_i32_0 : i32, i32
  }
  func.func @transform_4(%arg0: i32) -> (i32, i32) {
    %c0_i32 = arith.constant 0 : i32
    %c0_i32_0 = arith.constant 0 : i32
    %c0_i32_1 = arith.constant 0 : i32
    return %c0_i32, %c0_i32_0 : i32, i32
  }
  func.func @transform_5(%arg0: i32) -> (i32, i32, i32) {
    %c0_i32 = arith.constant 0 : i32
    %c0_i32_0 = arith.constant 0 : i32
    %c0_i32_1 = arith.constant 0 : i32
    return %arg0, %c0_i32, %c0_i32_0 : i32, i32, i32
  }
}

module attributes {stable_mosaic.version = 11 : i64} {
  func.func @_conv_gn_res_kernel(%arg0: i32, %arg1: memref<1x16x576xf32, #tpu.memory_space<vmem>>, %arg2: memref<576x64xf32, #tpu.memory_space<vmem>>, %arg3: memref<1x64xf32, #tpu.memory_space<vmem>>, %arg4: memref<1x64xf32, #tpu.memory_space<vmem>>, %arg5: memref<64x64xf32, #tpu.memory_space<vmem>>, %arg6: memref<1x16x64xf32, #tpu.memory_space<vmem>>, %arg7: memref<1x16x64xf32, #tpu.memory_space<vmem>>) attributes {dimension_semantics = [#tpu.dimension_semantics<parallel>], iteration_bounds = array<i64: 2>, scalar_prefetch = 0 : i64, scratch_operands = 0 : i64, tpu.core_type = #tpu.core_type<tc>, window_params = [{transform_indices = @transform_0, window_bounds = array<i64: 1, 16, 576>}, {pipeline_mode = #tpu.pipeline_mode<synchronous>, transform_indices = @transform_1, window_bounds = array<i64: 576, 64>}, {pipeline_mode = #tpu.pipeline_mode<synchronous>, transform_indices = @transform_2, window_bounds = array<i64: 1, 64>}, {pipeline_mode = #tpu.pipeline_mode<synchronous>, transform_indices = @transform_3, window_bounds = array<i64: 1, 64>}, {pipeline_mode = #tpu.pipeline_mode<synchronous>, transform_indices = @transform_4, window_bounds = array<i64: 64, 64>}, {transform_indices = @transform_5, window_bounds = array<i64: 1, 16, 64>}, {transform_indices = @transform_6, window_bounds = array<i64: 1, 16, 64>}]} {
    %c0 = arith.constant 0 : index
    %c0_0 = arith.constant 0 : index
    %c0_1 = arith.constant 0 : index
    %0 = vector.load %arg1[%c0, %c0_0, %c0_1] : memref<1x16x576xf32, #tpu.memory_space<vmem>>, vector<1x16x576xf32>
    %1 = vector.shape_cast %0 : vector<1x16x576xf32> to vector<16x576xf32>
    %c0_2 = arith.constant 0 : index
    %c0_3 = arith.constant 0 : index
    %2 = vector.load %arg2[%c0_2, %c0_3] : memref<576x64xf32, #tpu.memory_space<vmem>>, vector<576x64xf32>
    %cst = arith.constant dense<0.000000e+00> : vector<16x64xf32>
    %3 = tpu.matmul %1, %2, %cst {dimension_numbers = #tpu.dot_dimension_numbers<[1], [0], [0], [1], [0, 0, 1, 1], [], []>} : vector<16x576xf32>, vector<576x64xf32>, vector<16x64xf32> -> vector<16x64xf32>
    %cst_4 = arith.constant dense<0.000000e+00> : vector<64xf32>
    %4 = vector.multi_reduction <add>, %3, %cst_4 [0] : vector<16x64xf32> to vector<64xf32>
    %5 = vector.shape_cast %4 : vector<64xf32> to vector<1x64xf32>
    %6 = arith.mulf %3, %3 : vector<16x64xf32>
    %cst_5 = arith.constant dense<0.000000e+00> : vector<64xf32>
    %7 = vector.multi_reduction <add>, %6, %cst_5 [0] : vector<16x64xf32> to vector<64xf32>
    %8 = vector.shape_cast %7 : vector<64xf32> to vector<1x64xf32>
    %c0_6 = arith.constant 0 : index
    %c0_7 = arith.constant 0 : index
    %9 = vector.load %arg5[%c0_6, %c0_7] : memref<64x64xf32, #tpu.memory_space<vmem>>, vector<64x64xf32>
    %cst_8 = arith.constant dense<0.000000e+00> : vector<1x64xf32>
    %10 = tpu.matmul %5, %9, %cst_8 {dimension_numbers = #tpu.dot_dimension_numbers<[1], [0], [0], [1], [0, 0, 1, 1], [], []>} : vector<1x64xf32>, vector<64x64xf32>, vector<1x64xf32> -> vector<1x64xf32>
    %c0_9 = arith.constant 0 : index
    %c0_10 = arith.constant 0 : index
    %11 = vector.load %arg5[%c0_9, %c0_10] : memref<64x64xf32, #tpu.memory_space<vmem>>, vector<64x64xf32>
    %cst_11 = arith.constant dense<0.000000e+00> : vector<1x64xf32>
    %12 = tpu.matmul %8, %11, %cst_11 {dimension_numbers = #tpu.dot_dimension_numbers<[1], [0], [0], [1], [0, 0, 1, 1], [], []>} : vector<1x64xf32>, vector<64x64xf32>, vector<1x64xf32> -> vector<1x64xf32>
    %cst_12 = arith.constant 3.125000e-02 : f32
    %13 = vector.broadcast %cst_12 : f32 to vector<1x64xf32>
    %14 = arith.mulf %10, %13 : vector<1x64xf32>
    %cst_13 = arith.constant 3.125000e-02 : f32
    %15 = vector.broadcast %cst_13 : f32 to vector<1x64xf32>
    %16 = arith.mulf %12, %15 : vector<1x64xf32>
    %17 = arith.mulf %14, %14 : vector<1x64xf32>
    %18 = arith.subf %16, %17 : vector<1x64xf32>
    %19 = vector.broadcast %14 : vector<1x64xf32> to vector<16x64xf32>
    %20 = arith.subf %3, %19 : vector<16x64xf32>
    %cst_14 = arith.constant 9.99999974E-6 : f32
    %21 = vector.broadcast %cst_14 : f32 to vector<1x64xf32>
    %22 = arith.addf %18, %21 : vector<1x64xf32>
    %23 = math.rsqrt %22 : vector<1x64xf32>
    %24 = vector.broadcast %23 : vector<1x64xf32> to vector<16x64xf32>
    %25 = arith.mulf %20, %24 : vector<16x64xf32>
    %c0_15 = arith.constant 0 : index
    %c0_16 = arith.constant 0 : index
    %26 = vector.load %arg3[%c0_15, %c0_16] : memref<1x64xf32, #tpu.memory_space<vmem>>, vector<1x64xf32>
    %27 = vector.broadcast %26 : vector<1x64xf32> to vector<16x64xf32>
    %28 = arith.mulf %25, %27 : vector<16x64xf32>
    %c0_17 = arith.constant 0 : index
    %c0_18 = arith.constant 0 : index
    %29 = vector.load %arg4[%c0_17, %c0_18] : memref<1x64xf32, #tpu.memory_space<vmem>>, vector<1x64xf32>
    %30 = vector.broadcast %29 : vector<1x64xf32> to vector<16x64xf32>
    %31 = arith.addf %28, %30 : vector<16x64xf32>
    %c0_19 = arith.constant 0 : index
    %c0_20 = arith.constant 0 : index
    %c0_21 = arith.constant 0 : index
    %32 = vector.load %arg6[%c0_19, %c0_20, %c0_21] : memref<1x16x64xf32, #tpu.memory_space<vmem>>, vector<1x16x64xf32>
    %33 = vector.shape_cast %32 : vector<1x16x64xf32> to vector<16x64xf32>
    %34 = arith.addf %31, %33 : vector<16x64xf32>
    %cst_22 = arith.constant 0.000000e+00 : f32
    %35 = vector.broadcast %cst_22 : f32 to vector<16x64xf32>
    %36 = arith.maximumf %34, %35 : vector<16x64xf32>
    %c0_23 = arith.constant 0 : index
    %c0_24 = arith.constant 0 : index
    %c0_25 = arith.constant 0 : index
    %37 = vector.load %arg7[%c0_23, %c0_24, %c0_25] : memref<1x16x64xf32, #tpu.memory_space<vmem>>, vector<1x16x64xf32>
    %38 = vector.shape_cast %37 : vector<1x16x64xf32> to vector<16x64xf32>
    %39 = vector.shape_cast %36 : vector<16x64xf32> to vector<1x16x64xf32>
    tpu.vector_store %arg7[%c0_23, %c0_24, %c0_25], %39 {strides = array<i32>} : memref<1x16x64xf32, #tpu.memory_space<vmem>>, vector<1x16x64xf32>,
    return
  }
  func.func @transform_0(%arg0: i32) -> (i32, i32, i32) {
    %c0_i32 = arith.constant 0 : i32
    %c0_i32_0 = arith.constant 0 : i32
    %c0_i32_1 = arith.constant 0 : i32
    return %arg0, %c0_i32, %c0_i32_0 : i32, i32, i32
  }
  func.func @transform_1(%arg0: i32) -> (i32, i32) {
    %c0_i32 = arith.constant 0 : i32
    %c0_i32_0 = arith.constant 0 : i32
    %c0_i32_1 = arith.constant 0 : i32
    return %c0_i32, %c0_i32_0 : i32, i32
  }
  func.func @transform_2(%arg0: i32) -> (i32, i32) {
    %c0_i32 = arith.constant 0 : i32
    %c0_i32_0 = arith.constant 0 : i32
    %c0_i32_1 = arith.constant 0 : i32
    return %c0_i32, %c0_i32_0 : i32, i32
  }
  func.func @transform_3(%arg0: i32) -> (i32, i32) {
    %c0_i32 = arith.constant 0 : i32
    %c0_i32_0 = arith.constant 0 : i32
    %c0_i32_1 = arith.constant 0 : i32
    return %c0_i32, %c0_i32_0 : i32, i32
  }
  func.func @transform_4(%arg0: i32) -> (i32, i32) {
    %c0_i32 = arith.constant 0 : i32
    %c0_i32_0 = arith.constant 0 : i32
    %c0_i32_1 = arith.constant 0 : i32
    return %c0_i32, %c0_i32_0 : i32, i32
  }
  func.func @transform_5(%arg0: i32) -> (i32, i32, i32) {
    %c0_i32 = arith.constant 0 : i32
    %c0_i32_0 = arith.constant 0 : i32
    %c0_i32_1 = arith.constant 0 : i32
    return %arg0, %c0_i32, %c0_i32_0 : i32, i32, i32
  }
  func.func @transform_6(%arg0: i32) -> (i32, i32, i32) {
    %c0_i32 = arith.constant 0 : i32
    %c0_i32_0 = arith.constant 0 : i32
    %c0_i32_1 = arith.constant 0 : i32
    return %arg0, %c0_i32, %c0_i32_0 : i32, i32, i32
  }
}

module attributes {stable_mosaic.version = 11 : i64} {
  func.func @_conv_gn_downres_kernel(%arg0: i32, %arg1: memref<1x4x576xf32, #tpu.memory_space<vmem>>, %arg2: memref<576x64xf32, #tpu.memory_space<vmem>>, %arg3: memref<1x64xf32, #tpu.memory_space<vmem>>, %arg4: memref<1x64xf32, #tpu.memory_space<vmem>>, %arg5: memref<64x64xf32, #tpu.memory_space<vmem>>, %arg6: memref<1x4x64xf32, #tpu.memory_space<vmem>>, %arg7: memref<64x64xf32, #tpu.memory_space<vmem>>, %arg8: memref<1x64xf32, #tpu.memory_space<vmem>>, %arg9: memref<1x64xf32, #tpu.memory_space<vmem>>, %arg10: memref<1x4x64xf32, #tpu.memory_space<vmem>>) attributes {dimension_semantics = [#tpu.dimension_semantics<parallel>], iteration_bounds = array<i64: 2>, scalar_prefetch = 0 : i64, scratch_operands = 0 : i64, tpu.core_type = #tpu.core_type<tc>, window_params = [{transform_indices = @transform_0, window_bounds = array<i64: 1, 4, 576>}, {pipeline_mode = #tpu.pipeline_mode<synchronous>, transform_indices = @transform_1, window_bounds = array<i64: 576, 64>}, {pipeline_mode = #tpu.pipeline_mode<synchronous>, transform_indices = @transform_2, window_bounds = array<i64: 1, 64>}, {pipeline_mode = #tpu.pipeline_mode<synchronous>, transform_indices = @transform_3, window_bounds = array<i64: 1, 64>}, {pipeline_mode = #tpu.pipeline_mode<synchronous>, transform_indices = @transform_4, window_bounds = array<i64: 64, 64>}, {transform_indices = @transform_5, window_bounds = array<i64: 1, 4, 64>}, {pipeline_mode = #tpu.pipeline_mode<synchronous>, transform_indices = @transform_6, window_bounds = array<i64: 64, 64>}, {pipeline_mode = #tpu.pipeline_mode<synchronous>, transform_indices = @transform_7, window_bounds = array<i64: 1, 64>}, {pipeline_mode = #tpu.pipeline_mode<synchronous>, transform_indices = @transform_8, window_bounds = array<i64: 1, 64>}, {transform_indices = @transform_9, window_bounds = array<i64: 1, 4, 64>}]} {
    %c0 = arith.constant 0 : index
    %c0_0 = arith.constant 0 : index
    %c0_1 = arith.constant 0 : index
    %0 = vector.load %arg1[%c0, %c0_0, %c0_1] : memref<1x4x576xf32, #tpu.memory_space<vmem>>, vector<1x4x576xf32>
    %1 = vector.shape_cast %0 : vector<1x4x576xf32> to vector<4x576xf32>
    %c0_2 = arith.constant 0 : index
    %c0_3 = arith.constant 0 : index
    %2 = vector.load %arg2[%c0_2, %c0_3] : memref<576x64xf32, #tpu.memory_space<vmem>>, vector<576x64xf32>
    %cst = arith.constant dense<0.000000e+00> : vector<4x64xf32>
    %3 = tpu.matmul %1, %2, %cst {dimension_numbers = #tpu.dot_dimension_numbers<[1], [0], [0], [1], [0, 0, 1, 1], [], []>} : vector<4x576xf32>, vector<576x64xf32>, vector<4x64xf32> -> vector<4x64xf32>
    %cst_4 = arith.constant dense<0.000000e+00> : vector<64xf32>
    %4 = vector.multi_reduction <add>, %3, %cst_4 [0] : vector<4x64xf32> to vector<64xf32>
    %5 = vector.shape_cast %4 : vector<64xf32> to vector<1x64xf32>
    %6 = arith.mulf %3, %3 : vector<4x64xf32>
    %cst_5 = arith.constant dense<0.000000e+00> : vector<64xf32>
    %7 = vector.multi_reduction <add>, %6, %cst_5 [0] : vector<4x64xf32> to vector<64xf32>
    %8 = vector.shape_cast %7 : vector<64xf32> to vector<1x64xf32>
    %c0_6 = arith.constant 0 : index
    %c0_7 = arith.constant 0 : index
    %9 = vector.load %arg5[%c0_6, %c0_7] : memref<64x64xf32, #tpu.memory_space<vmem>>, vector<64x64xf32>
    %cst_8 = arith.constant dense<0.000000e+00> : vector<1x64xf32>
    %10 = tpu.matmul %5, %9, %cst_8 {dimension_numbers = #tpu.dot_dimension_numbers<[1], [0], [0], [1], [0, 0, 1, 1], [], []>} : vector<1x64xf32>, vector<64x64xf32>, vector<1x64xf32> -> vector<1x64xf32>
    %c0_9 = arith.constant 0 : index
    %c0_10 = arith.constant 0 : index
    %11 = vector.load %arg5[%c0_9, %c0_10] : memref<64x64xf32, #tpu.memory_space<vmem>>, vector<64x64xf32>
    %cst_11 = arith.constant dense<0.000000e+00> : vector<1x64xf32>
    %12 = tpu.matmul %8, %11, %cst_11 {dimension_numbers = #tpu.dot_dimension_numbers<[1], [0], [0], [1], [0, 0, 1, 1], [], []>} : vector<1x64xf32>, vector<64x64xf32>, vector<1x64xf32> -> vector<1x64xf32>
    %cst_12 = arith.constant 1.250000e-01 : f32
    %13 = vector.broadcast %cst_12 : f32 to vector<1x64xf32>
    %14 = arith.mulf %10, %13 : vector<1x64xf32>
    %cst_13 = arith.constant 1.250000e-01 : f32
    %15 = vector.broadcast %cst_13 : f32 to vector<1x64xf32>
    %16 = arith.mulf %12, %15 : vector<1x64xf32>
    %17 = arith.mulf %14, %14 : vector<1x64xf32>
    %18 = arith.subf %16, %17 : vector<1x64xf32>
    %19 = vector.broadcast %14 : vector<1x64xf32> to vector<4x64xf32>
    %20 = arith.subf %3, %19 : vector<4x64xf32>
    %cst_14 = arith.constant 9.99999974E-6 : f32
    %21 = vector.broadcast %cst_14 : f32 to vector<1x64xf32>
    %22 = arith.addf %18, %21 : vector<1x64xf32>
    %23 = math.rsqrt %22 : vector<1x64xf32>
    %24 = vector.broadcast %23 : vector<1x64xf32> to vector<4x64xf32>
    %25 = arith.mulf %20, %24 : vector<4x64xf32>
    %c0_15 = arith.constant 0 : index
    %c0_16 = arith.constant 0 : index
    %26 = vector.load %arg3[%c0_15, %c0_16] : memref<1x64xf32, #tpu.memory_space<vmem>>, vector<1x64xf32>
    %27 = vector.broadcast %26 : vector<1x64xf32> to vector<4x64xf32>
    %28 = arith.mulf %25, %27 : vector<4x64xf32>
    %c0_17 = arith.constant 0 : index
    %c0_18 = arith.constant 0 : index
    %29 = vector.load %arg4[%c0_17, %c0_18] : memref<1x64xf32, #tpu.memory_space<vmem>>, vector<1x64xf32>
    %30 = vector.broadcast %29 : vector<1x64xf32> to vector<4x64xf32>
    %31 = arith.addf %28, %30 : vector<4x64xf32>
    %c0_19 = arith.constant 0 : index
    %c0_20 = arith.constant 0 : index
    %c0_21 = arith.constant 0 : index
    %32 = vector.load %arg6[%c0_19, %c0_20, %c0_21] : memref<1x4x64xf32, #tpu.memory_space<vmem>>, vector<1x4x64xf32>
    %33 = vector.shape_cast %32 : vector<1x4x64xf32> to vector<4x64xf32>
    %c0_22 = arith.constant 0 : index
    %c0_23 = arith.constant 0 : index
    %34 = vector.load %arg7[%c0_22, %c0_23] : memref<64x64xf32, #tpu.memory_space<vmem>>, vector<64x64xf32>
    %cst_24 = arith.constant dense<0.000000e+00> : vector<4x64xf32>
    %35 = tpu.matmul %33, %34, %cst_24 {dimension_numbers = #tpu.dot_dimension_numbers<[1], [0], [0], [1], [0, 0, 1, 1], [], []>} : vector<4x64xf32>, vector<64x64xf32>, vector<4x64xf32> -> vector<4x64xf32>
    %cst_25 = arith.constant dense<0.000000e+00> : vector<64xf32>
    %36 = vector.multi_reduction <add>, %35, %cst_25 [0] : vector<4x64xf32> to vector<64xf32>
    %37 = vector.shape_cast %36 : vector<64xf32> to vector<1x64xf32>
    %38 = arith.mulf %35, %35 : vector<4x64xf32>
    %cst_26 = arith.constant dense<0.000000e+00> : vector<64xf32>
    %39 = vector.multi_reduction <add>, %38, %cst_26 [0] : vector<4x64xf32> to vector<64xf32>
    %40 = vector.shape_cast %39 : vector<64xf32> to vector<1x64xf32>
    %c0_27 = arith.constant 0 : index
    %c0_28 = arith.constant 0 : index
    %41 = vector.load %arg5[%c0_27, %c0_28] : memref<64x64xf32, #tpu.memory_space<vmem>>, vector<64x64xf32>
    %cst_29 = arith.constant dense<0.000000e+00> : vector<1x64xf32>
    %42 = tpu.matmul %37, %41, %cst_29 {dimension_numbers = #tpu.dot_dimension_numbers<[1], [0], [0], [1], [0, 0, 1, 1], [], []>} : vector<1x64xf32>, vector<64x64xf32>, vector<1x64xf32> -> vector<1x64xf32>
    %c0_30 = arith.constant 0 : index
    %c0_31 = arith.constant 0 : index
    %43 = vector.load %arg5[%c0_30, %c0_31] : memref<64x64xf32, #tpu.memory_space<vmem>>, vector<64x64xf32>
    %cst_32 = arith.constant dense<0.000000e+00> : vector<1x64xf32>
    %44 = tpu.matmul %40, %43, %cst_32 {dimension_numbers = #tpu.dot_dimension_numbers<[1], [0], [0], [1], [0, 0, 1, 1], [], []>} : vector<1x64xf32>, vector<64x64xf32>, vector<1x64xf32> -> vector<1x64xf32>
    %cst_33 = arith.constant 1.250000e-01 : f32
    %45 = vector.broadcast %cst_33 : f32 to vector<1x64xf32>
    %46 = arith.mulf %42, %45 : vector<1x64xf32>
    %cst_34 = arith.constant 1.250000e-01 : f32
    %47 = vector.broadcast %cst_34 : f32 to vector<1x64xf32>
    %48 = arith.mulf %44, %47 : vector<1x64xf32>
    %49 = arith.mulf %46, %46 : vector<1x64xf32>
    %50 = arith.subf %48, %49 : vector<1x64xf32>
    %51 = vector.broadcast %46 : vector<1x64xf32> to vector<4x64xf32>
    %52 = arith.subf %35, %51 : vector<4x64xf32>
    %cst_35 = arith.constant 9.99999974E-6 : f32
    %53 = vector.broadcast %cst_35 : f32 to vector<1x64xf32>
    %54 = arith.addf %50, %53 : vector<1x64xf32>
    %55 = math.rsqrt %54 : vector<1x64xf32>
    %56 = vector.broadcast %55 : vector<1x64xf32> to vector<4x64xf32>
    %57 = arith.mulf %52, %56 : vector<4x64xf32>
    %c0_36 = arith.constant 0 : index
    %c0_37 = arith.constant 0 : index
    %58 = vector.load %arg8[%c0_36, %c0_37] : memref<1x64xf32, #tpu.memory_space<vmem>>, vector<1x64xf32>
    %59 = vector.broadcast %58 : vector<1x64xf32> to vector<4x64xf32>
    %60 = arith.mulf %57, %59 : vector<4x64xf32>
    %c0_38 = arith.constant 0 : index
    %c0_39 = arith.constant 0 : index
    %61 = vector.load %arg9[%c0_38, %c0_39] : memref<1x64xf32, #tpu.memory_space<vmem>>, vector<1x64xf32>
    %62 = vector.broadcast %61 : vector<1x64xf32> to vector<4x64xf32>
    %63 = arith.addf %60, %62 : vector<4x64xf32>
    %64 = arith.addf %31, %63 : vector<4x64xf32>
    %cst_40 = arith.constant 0.000000e+00 : f32
    %65 = vector.broadcast %cst_40 : f32 to vector<4x64xf32>
    %66 = arith.maximumf %64, %65 : vector<4x64xf32>
    %c0_41 = arith.constant 0 : index
    %c0_42 = arith.constant 0 : index
    %c0_43 = arith.constant 0 : index
    %67 = vector.load %arg10[%c0_41, %c0_42, %c0_43] : memref<1x4x64xf32, #tpu.memory_space<vmem>>, vector<1x4x64xf32>
    %68 = vector.shape_cast %67 : vector<1x4x64xf32> to vector<4x64xf32>
    %69 = vector.shape_cast %66 : vector<4x64xf32> to vector<1x4x64xf32>
    tpu.vector_store %arg10[%c0_41, %c0_42, %c0_43], %69 {strides = array<i32>} : memref<1x4x64xf32, #tpu.memory_space<vmem>>, vector<1x4x64xf32>,
    return
  }
  func.func @transform_0(%arg0: i32) -> (i32, i32, i32) {
    %c0_i32 = arith.constant 0 : i32
    %c0_i32_0 = arith.constant 0 : i32
    %c0_i32_1 = arith.constant 0 : i32
    return %arg0, %c0_i32, %c0_i32_0 : i32, i32, i32
  }
  func.func @transform_1(%arg0: i32) -> (i32, i32) {
    %c0_i32 = arith.constant 0 : i32
    %c0_i32_0 = arith.constant 0 : i32
    %c0_i32_1 = arith.constant 0 : i32
    return %c0_i32, %c0_i32_0 : i32, i32
  }
  func.func @transform_2(%arg0: i32) -> (i32, i32) {
    %c0_i32 = arith.constant 0 : i32
    %c0_i32_0 = arith.constant 0 : i32
    %c0_i32_1 = arith.constant 0 : i32
    return %c0_i32, %c0_i32_0 : i32, i32
  }
  func.func @transform_3(%arg0: i32) -> (i32, i32) {
    %c0_i32 = arith.constant 0 : i32
    %c0_i32_0 = arith.constant 0 : i32
    %c0_i32_1 = arith.constant 0 : i32
    return %c0_i32, %c0_i32_0 : i32, i32
  }
  func.func @transform_4(%arg0: i32) -> (i32, i32) {
    %c0_i32 = arith.constant 0 : i32
    %c0_i32_0 = arith.constant 0 : i32
    %c0_i32_1 = arith.constant 0 : i32
    return %c0_i32, %c0_i32_0 : i32, i32
  }
  func.func @transform_5(%arg0: i32) -> (i32, i32, i32) {
    %c0_i32 = arith.constant 0 : i32
    %c0_i32_0 = arith.constant 0 : i32
    %c0_i32_1 = arith.constant 0 : i32
    return %arg0, %c0_i32, %c0_i32_0 : i32, i32, i32
  }
  func.func @transform_6(%arg0: i32) -> (i32, i32) {
    %c0_i32 = arith.constant 0 : i32
    %c0_i32_0 = arith.constant 0 : i32
    %c0_i32_1 = arith.constant 0 : i32
    return %c0_i32, %c0_i32_0 : i32, i32
  }
  func.func @transform_7(%arg0: i32) -> (i32, i32) {
    %c0_i32 = arith.constant 0 : i32
    %c0_i32_0 = arith.constant 0 : i32
    %c0_i32_1 = arith.constant 0 : i32
    return %c0_i32, %c0_i32_0 : i32, i32
  }
  func.func @transform_8(%arg0: i32) -> (i32, i32) {
    %c0_i32 = arith.constant 0 : i32
    %c0_i32_0 = arith.constant 0 : i32
    %c0_i32_1 = arith.constant 0 : i32
    return %c0_i32, %c0_i32_0 : i32, i32
  }
  func.func @transform_9(%arg0: i32) -> (i32, i32, i32) {
    %c0_i32 = arith.constant 0 : i32
    %c0_i32_0 = arith.constant 0 : i32
    %c0_i32_1 = arith.constant 0 : i32
    return %arg0, %c0_i32, %c0_i32_0 : i32, i32, i32
  }
}

module attributes {stable_mosaic.version = 11 : i64} {
  func.func @_conv_gn_kernel(%arg0: i32, %arg1: memref<1x4x576xf32, #tpu.memory_space<vmem>>, %arg2: memref<576x64xf32, #tpu.memory_space<vmem>>, %arg3: memref<1x64xf32, #tpu.memory_space<vmem>>, %arg4: memref<1x64xf32, #tpu.memory_space<vmem>>, %arg5: memref<64x64xf32, #tpu.memory_space<vmem>>, %arg6: memref<1x4x64xf32, #tpu.memory_space<vmem>>) attributes {dimension_semantics = [#tpu.dimension_semantics<parallel>], iteration_bounds = array<i64: 2>, scalar_prefetch = 0 : i64, scratch_operands = 0 : i64, tpu.core_type = #tpu.core_type<tc>, window_params = [{transform_indices = @transform_0, window_bounds = array<i64: 1, 4, 576>}, {pipeline_mode = #tpu.pipeline_mode<synchronous>, transform_indices = @transform_1, window_bounds = array<i64: 576, 64>}, {pipeline_mode = #tpu.pipeline_mode<synchronous>, transform_indices = @transform_2, window_bounds = array<i64: 1, 64>}, {pipeline_mode = #tpu.pipeline_mode<synchronous>, transform_indices = @transform_3, window_bounds = array<i64: 1, 64>}, {pipeline_mode = #tpu.pipeline_mode<synchronous>, transform_indices = @transform_4, window_bounds = array<i64: 64, 64>}, {transform_indices = @transform_5, window_bounds = array<i64: 1, 4, 64>}]} {
    %c0 = arith.constant 0 : index
    %c0_0 = arith.constant 0 : index
    %c0_1 = arith.constant 0 : index
    %0 = vector.load %arg1[%c0, %c0_0, %c0_1] : memref<1x4x576xf32, #tpu.memory_space<vmem>>, vector<1x4x576xf32>
    %1 = vector.shape_cast %0 : vector<1x4x576xf32> to vector<4x576xf32>
    %c0_2 = arith.constant 0 : index
    %c0_3 = arith.constant 0 : index
    %2 = vector.load %arg2[%c0_2, %c0_3] : memref<576x64xf32, #tpu.memory_space<vmem>>, vector<576x64xf32>
    %cst = arith.constant dense<0.000000e+00> : vector<4x64xf32>
    %3 = tpu.matmul %1, %2, %cst {dimension_numbers = #tpu.dot_dimension_numbers<[1], [0], [0], [1], [0, 0, 1, 1], [], []>} : vector<4x576xf32>, vector<576x64xf32>, vector<4x64xf32> -> vector<4x64xf32>
    %cst_4 = arith.constant dense<0.000000e+00> : vector<64xf32>
    %4 = vector.multi_reduction <add>, %3, %cst_4 [0] : vector<4x64xf32> to vector<64xf32>
    %5 = vector.shape_cast %4 : vector<64xf32> to vector<1x64xf32>
    %6 = arith.mulf %3, %3 : vector<4x64xf32>
    %cst_5 = arith.constant dense<0.000000e+00> : vector<64xf32>
    %7 = vector.multi_reduction <add>, %6, %cst_5 [0] : vector<4x64xf32> to vector<64xf32>
    %8 = vector.shape_cast %7 : vector<64xf32> to vector<1x64xf32>
    %c0_6 = arith.constant 0 : index
    %c0_7 = arith.constant 0 : index
    %9 = vector.load %arg5[%c0_6, %c0_7] : memref<64x64xf32, #tpu.memory_space<vmem>>, vector<64x64xf32>
    %cst_8 = arith.constant dense<0.000000e+00> : vector<1x64xf32>
    %10 = tpu.matmul %5, %9, %cst_8 {dimension_numbers = #tpu.dot_dimension_numbers<[1], [0], [0], [1], [0, 0, 1, 1], [], []>} : vector<1x64xf32>, vector<64x64xf32>, vector<1x64xf32> -> vector<1x64xf32>
    %c0_9 = arith.constant 0 : index
    %c0_10 = arith.constant 0 : index
    %11 = vector.load %arg5[%c0_9, %c0_10] : memref<64x64xf32, #tpu.memory_space<vmem>>, vector<64x64xf32>
    %cst_11 = arith.constant dense<0.000000e+00> : vector<1x64xf32>
    %12 = tpu.matmul %8, %11, %cst_11 {dimension_numbers = #tpu.dot_dimension_numbers<[1], [0], [0], [1], [0, 0, 1, 1], [], []>} : vector<1x64xf32>, vector<64x64xf32>, vector<1x64xf32> -> vector<1x64xf32>
    %cst_12 = arith.constant 1.250000e-01 : f32
    %13 = vector.broadcast %cst_12 : f32 to vector<1x64xf32>
    %14 = arith.mulf %10, %13 : vector<1x64xf32>
    %cst_13 = arith.constant 1.250000e-01 : f32
    %15 = vector.broadcast %cst_13 : f32 to vector<1x64xf32>
    %16 = arith.mulf %12, %15 : vector<1x64xf32>
    %17 = arith.mulf %14, %14 : vector<1x64xf32>
    %18 = arith.subf %16, %17 : vector<1x64xf32>
    %19 = vector.broadcast %14 : vector<1x64xf32> to vector<4x64xf32>
    %20 = arith.subf %3, %19 : vector<4x64xf32>
    %cst_14 = arith.constant 9.99999974E-6 : f32
    %21 = vector.broadcast %cst_14 : f32 to vector<1x64xf32>
    %22 = arith.addf %18, %21 : vector<1x64xf32>
    %23 = math.rsqrt %22 : vector<1x64xf32>
    %24 = vector.broadcast %23 : vector<1x64xf32> to vector<4x64xf32>
    %25 = arith.mulf %20, %24 : vector<4x64xf32>
    %c0_15 = arith.constant 0 : index
    %c0_16 = arith.constant 0 : index
    %26 = vector.load %arg3[%c0_15, %c0_16] : memref<1x64xf32, #tpu.memory_space<vmem>>, vector<1x64xf32>
    %27 = vector.broadcast %26 : vector<1x64xf32> to vector<4x64xf32>
    %28 = arith.mulf %25, %27 : vector<4x64xf32>
    %c0_17 = arith.constant 0 : index
    %c0_18 = arith.constant 0 : index
    %29 = vector.load %arg4[%c0_17, %c0_18] : memref<1x64xf32, #tpu.memory_space<vmem>>, vector<1x64xf32>
    %30 = vector.broadcast %29 : vector<1x64xf32> to vector<4x64xf32>
    %31 = arith.addf %28, %30 : vector<4x64xf32>
    %cst_19 = arith.constant 0.000000e+00 : f32
    %32 = vector.broadcast %cst_19 : f32 to vector<4x64xf32>
    %33 = arith.maximumf %31, %32 : vector<4x64xf32>
    %c0_20 = arith.constant 0 : index
    %c0_21 = arith.constant 0 : index
    %c0_22 = arith.constant 0 : index
    %34 = vector.load %arg6[%c0_20, %c0_21, %c0_22] : memref<1x4x64xf32, #tpu.memory_space<vmem>>, vector<1x4x64xf32>
    %35 = vector.shape_cast %34 : vector<1x4x64xf32> to vector<4x64xf32>
    %36 = vector.shape_cast %33 : vector<4x64xf32> to vector<1x4x64xf32>
    tpu.vector_store %arg6[%c0_20, %c0_21, %c0_22], %36 {strides = array<i32>} : memref<1x4x64xf32, #tpu.memory_space<vmem>>, vector<1x4x64xf32>,
    return
  }
  func.func @transform_0(%arg0: i32) -> (i32, i32, i32) {
    %c0_i32 = arith.constant 0 : i32
    %c0_i32_0 = arith.constant 0 : i32
    %c0_i32_1 = arith.constant 0 : i32
    return %arg0, %c0_i32, %c0_i32_0 : i32, i32, i32
  }
  func.func @transform_1(%arg0: i32) -> (i32, i32) {
    %c0_i32 = arith.constant 0 : i32
    %c0_i32_0 = arith.constant 0 : i32
    %c0_i32_1 = arith.constant 0 : i32
    return %c0_i32, %c0_i32_0 : i32, i32
  }
  func.func @transform_2(%arg0: i32) -> (i32, i32) {
    %c0_i32 = arith.constant 0 : i32
    %c0_i32_0 = arith.constant 0 : i32
    %c0_i32_1 = arith.constant 0 : i32
    return %c0_i32, %c0_i32_0 : i32, i32
  }
  func.func @transform_3(%arg0: i32) -> (i32, i32) {
    %c0_i32 = arith.constant 0 : i32
    %c0_i32_0 = arith.constant 0 : i32
    %c0_i32_1 = arith.constant 0 : i32
    return %c0_i32, %c0_i32_0 : i32, i32
  }
  func.func @transform_4(%arg0: i32) -> (i32, i32) {
    %c0_i32 = arith.constant 0 : i32
    %c0_i32_0 = arith.constant 0 : i32
    %c0_i32_1 = arith.constant 0 : i32
    return %c0_i32, %c0_i32_0 : i32, i32
  }
  func.func @transform_5(%arg0: i32) -> (i32, i32, i32) {
    %c0_i32 = arith.constant 0 : i32
    %c0_i32_0 = arith.constant 0 : i32
    %c0_i32_1 = arith.constant 0 : i32
    return %arg0, %c0_i32, %c0_i32_0 : i32, i32, i32
  }
}

module attributes {stable_mosaic.version = 11 : i64} {
  func.func @_conv_gn_kernel(%arg0: i32, %arg1: memref<1x1x576xf32, #tpu.memory_space<vmem>>, %arg2: memref<576x128xf32, #tpu.memory_space<vmem>>, %arg3: memref<1x128xf32, #tpu.memory_space<vmem>>, %arg4: memref<1x128xf32, #tpu.memory_space<vmem>>, %arg5: memref<128x128xf32, #tpu.memory_space<vmem>>, %arg6: memref<1x1x128xf32, #tpu.memory_space<vmem>>) attributes {dimension_semantics = [#tpu.dimension_semantics<parallel>], iteration_bounds = array<i64: 2>, scalar_prefetch = 0 : i64, scratch_operands = 0 : i64, tpu.core_type = #tpu.core_type<tc>, window_params = [{transform_indices = @transform_0, window_bounds = array<i64: 1, 1, 576>}, {pipeline_mode = #tpu.pipeline_mode<synchronous>, transform_indices = @transform_1, window_bounds = array<i64: 576, 128>}, {pipeline_mode = #tpu.pipeline_mode<synchronous>, transform_indices = @transform_2, window_bounds = array<i64: 1, 128>}, {pipeline_mode = #tpu.pipeline_mode<synchronous>, transform_indices = @transform_3, window_bounds = array<i64: 1, 128>}, {pipeline_mode = #tpu.pipeline_mode<synchronous>, transform_indices = @transform_4, window_bounds = array<i64: 128, 128>}, {transform_indices = @transform_5, window_bounds = array<i64: 1, 1, 128>}]} {
    %c0 = arith.constant 0 : index
    %c0_0 = arith.constant 0 : index
    %c0_1 = arith.constant 0 : index
    %0 = vector.load %arg1[%c0, %c0_0, %c0_1] : memref<1x1x576xf32, #tpu.memory_space<vmem>>, vector<1x1x576xf32>
    %1 = vector.shape_cast %0 : vector<1x1x576xf32> to vector<1x576xf32>
    %c0_2 = arith.constant 0 : index
    %c0_3 = arith.constant 0 : index
    %2 = vector.load %arg2[%c0_2, %c0_3] : memref<576x128xf32, #tpu.memory_space<vmem>>, vector<576x128xf32>
    %cst = arith.constant dense<0.000000e+00> : vector<1x128xf32>
    %3 = tpu.matmul %1, %2, %cst {dimension_numbers = #tpu.dot_dimension_numbers<[1], [0], [0], [1], [0, 0, 1, 1], [], []>} : vector<1x576xf32>, vector<576x128xf32>, vector<1x128xf32> -> vector<1x128xf32>
    %cst_4 = arith.constant dense<0.000000e+00> : vector<128xf32>
    %4 = vector.multi_reduction <add>, %3, %cst_4 [0] : vector<1x128xf32> to vector<128xf32>
    %5 = vector.shape_cast %4 : vector<128xf32> to vector<1x128xf32>
    %6 = arith.mulf %3, %3 : vector<1x128xf32>
    %cst_5 = arith.constant dense<0.000000e+00> : vector<128xf32>
    %7 = vector.multi_reduction <add>, %6, %cst_5 [0] : vector<1x128xf32> to vector<128xf32>
    %8 = vector.shape_cast %7 : vector<128xf32> to vector<1x128xf32>
    %c0_6 = arith.constant 0 : index
    %c0_7 = arith.constant 0 : index
    %9 = vector.load %arg5[%c0_6, %c0_7] : memref<128x128xf32, #tpu.memory_space<vmem>>, vector<128x128xf32>
    %cst_8 = arith.constant dense<0.000000e+00> : vector<1x128xf32>
    %10 = tpu.matmul %5, %9, %cst_8 {dimension_numbers = #tpu.dot_dimension_numbers<[1], [0], [0], [1], [0, 0, 1, 1], [], []>} : vector<1x128xf32>, vector<128x128xf32>, vector<1x128xf32> -> vector<1x128xf32>
    %c0_9 = arith.constant 0 : index
    %c0_10 = arith.constant 0 : index
    %11 = vector.load %arg5[%c0_9, %c0_10] : memref<128x128xf32, #tpu.memory_space<vmem>>, vector<128x128xf32>
    %cst_11 = arith.constant dense<0.000000e+00> : vector<1x128xf32>
    %12 = tpu.matmul %8, %11, %cst_11 {dimension_numbers = #tpu.dot_dimension_numbers<[1], [0], [0], [1], [0, 0, 1, 1], [], []>} : vector<1x128xf32>, vector<128x128xf32>, vector<1x128xf32> -> vector<1x128xf32>
    %cst_12 = arith.constant 2.500000e-01 : f32
    %13 = vector.broadcast %cst_12 : f32 to vector<1x128xf32>
    %14 = arith.mulf %10, %13 : vector<1x128xf32>
    %cst_13 = arith.constant 2.500000e-01 : f32
    %15 = vector.broadcast %cst_13 : f32 to vector<1x128xf32>
    %16 = arith.mulf %12, %15 : vector<1x128xf32>
    %17 = arith.mulf %14, %14 : vector<1x128xf32>
    %18 = arith.subf %16, %17 : vector<1x128xf32>
    %19 = arith.subf %3, %14 : vector<1x128xf32>
    %cst_14 = arith.constant 9.99999974E-6 : f32
    %20 = vector.broadcast %cst_14 : f32 to vector<1x128xf32>
    %21 = arith.addf %18, %20 : vector<1x128xf32>
    %22 = math.rsqrt %21 : vector<1x128xf32>
    %23 = arith.mulf %19, %22 : vector<1x128xf32>
    %c0_15 = arith.constant 0 : index
    %c0_16 = arith.constant 0 : index
    %24 = vector.load %arg3[%c0_15, %c0_16] : memref<1x128xf32, #tpu.memory_space<vmem>>, vector<1x128xf32>
    %25 = arith.mulf %23, %24 : vector<1x128xf32>
    %c0_17 = arith.constant 0 : index
    %c0_18 = arith.constant 0 : index
    %26 = vector.load %arg4[%c0_17, %c0_18] : memref<1x128xf32, #tpu.memory_space<vmem>>, vector<1x128xf32>
    %27 = arith.addf %25, %26 : vector<1x128xf32>
    %cst_19 = arith.constant 0.000000e+00 : f32
    %28 = vector.broadcast %cst_19 : f32 to vector<1x128xf32>
    %29 = arith.maximumf %27, %28 : vector<1x128xf32>
    %c0_20 = arith.constant 0 : index
    %c0_21 = arith.constant 0 : index
    %c0_22 = arith.constant 0 : index
    %30 = vector.load %arg6[%c0_20, %c0_21, %c0_22] : memref<1x1x128xf32, #tpu.memory_space<vmem>>, vector<1x1x128xf32>
    %31 = vector.shape_cast %30 : vector<1x1x128xf32> to vector<1x128xf32>
    %32 = vector.shape_cast %29 : vector<1x128xf32> to vector<1x1x128xf32>
    tpu.vector_store %arg6[%c0_20, %c0_21, %c0_22], %32 {strides = array<i32>} : memref<1x1x128xf32, #tpu.memory_space<vmem>>, vector<1x1x128xf32>,
    return
  }
  func.func @transform_0(%arg0: i32) -> (i32, i32, i32) {
    %c0_i32 = arith.constant 0 : i32
    %c0_i32_0 = arith.constant 0 : i32
    %c0_i32_1 = arith.constant 0 : i32
    return %arg0, %c0_i32, %c0_i32_0 : i32, i32, i32
  }
  func.func @transform_1(%arg0: i32) -> (i32, i32) {
    %c0_i32 = arith.constant 0 : i32
    %c0_i32_0 = arith.constant 0 : i32
    %c0_i32_1 = arith.constant 0 : i32
    return %c0_i32, %c0_i32_0 : i32, i32
  }
  func.func @transform_2(%arg0: i32) -> (i32, i32) {
    %c0_i32 = arith.constant 0 : i32
    %c0_i32_0 = arith.constant 0 : i32
    %c0_i32_1 = arith.constant 0 : i32
    return %c0_i32, %c0_i32_0 : i32, i32
  }
  func.func @transform_3(%arg0: i32) -> (i32, i32) {
    %c0_i32 = arith.constant 0 : i32
    %c0_i32_0 = arith.constant 0 : i32
    %c0_i32_1 = arith.constant 0 : i32
    return %c0_i32, %c0_i32_0 : i32, i32
  }
  func.func @transform_4(%arg0: i32) -> (i32, i32) {
    %c0_i32 = arith.constant 0 : i32
    %c0_i32_0 = arith.constant 0 : i32
    %c0_i32_1 = arith.constant 0 : i32
    return %c0_i32, %c0_i32_0 : i32, i32
  }
  func.func @transform_5(%arg0: i32) -> (i32, i32, i32) {
    %c0_i32 = arith.constant 0 : i32
    %c0_i32_0 = arith.constant 0 : i32
    %c0_i32_1 = arith.constant 0 : i32
    return %arg0, %c0_i32, %c0_i32_0 : i32, i32, i32
  }
}

module attributes {stable_mosaic.version = 11 : i64} {
  func.func @_conv_gn_kernel(%arg0: i32, %arg1: memref<1x1x1152xf32, #tpu.memory_space<vmem>>, %arg2: memref<1152x128xf32, #tpu.memory_space<vmem>>, %arg3: memref<1x128xf32, #tpu.memory_space<vmem>>, %arg4: memref<1x128xf32, #tpu.memory_space<vmem>>, %arg5: memref<128x128xf32, #tpu.memory_space<vmem>>, %arg6: memref<1x1x128xf32, #tpu.memory_space<vmem>>) attributes {dimension_semantics = [#tpu.dimension_semantics<parallel>], iteration_bounds = array<i64: 2>, scalar_prefetch = 0 : i64, scratch_operands = 0 : i64, tpu.core_type = #tpu.core_type<tc>, window_params = [{transform_indices = @transform_0, window_bounds = array<i64: 1, 1, 1152>}, {pipeline_mode = #tpu.pipeline_mode<synchronous>, transform_indices = @transform_1, window_bounds = array<i64: 1152, 128>}, {pipeline_mode = #tpu.pipeline_mode<synchronous>, transform_indices = @transform_2, window_bounds = array<i64: 1, 128>}, {pipeline_mode = #tpu.pipeline_mode<synchronous>, transform_indices = @transform_3, window_bounds = array<i64: 1, 128>}, {pipeline_mode = #tpu.pipeline_mode<synchronous>, transform_indices = @transform_4, window_bounds = array<i64: 128, 128>}, {transform_indices = @transform_5, window_bounds = array<i64: 1, 1, 128>}]} {
    %c0 = arith.constant 0 : index
    %c0_0 = arith.constant 0 : index
    %c0_1 = arith.constant 0 : index
    %0 = vector.load %arg1[%c0, %c0_0, %c0_1] : memref<1x1x1152xf32, #tpu.memory_space<vmem>>, vector<1x1x1152xf32>
    %1 = vector.shape_cast %0 : vector<1x1x1152xf32> to vector<1x1152xf32>
    %c0_2 = arith.constant 0 : index
    %c0_3 = arith.constant 0 : index
    %2 = vector.load %arg2[%c0_2, %c0_3] : memref<1152x128xf32, #tpu.memory_space<vmem>>, vector<1152x128xf32>
    %cst = arith.constant dense<0.000000e+00> : vector<1x128xf32>
    %3 = tpu.matmul %1, %2, %cst {dimension_numbers = #tpu.dot_dimension_numbers<[1], [0], [0], [1], [0, 0, 1, 1], [], []>} : vector<1x1152xf32>, vector<1152x128xf32>, vector<1x128xf32> -> vector<1x128xf32>
    %cst_4 = arith.constant dense<0.000000e+00> : vector<128xf32>
    %4 = vector.multi_reduction <add>, %3, %cst_4 [0] : vector<1x128xf32> to vector<128xf32>
    %5 = vector.shape_cast %4 : vector<128xf32> to vector<1x128xf32>
    %6 = arith.mulf %3, %3 : vector<1x128xf32>
    %cst_5 = arith.constant dense<0.000000e+00> : vector<128xf32>
    %7 = vector.multi_reduction <add>, %6, %cst_5 [0] : vector<1x128xf32> to vector<128xf32>
    %8 = vector.shape_cast %7 : vector<128xf32> to vector<1x128xf32>
    %c0_6 = arith.constant 0 : index
    %c0_7 = arith.constant 0 : index
    %9 = vector.load %arg5[%c0_6, %c0_7] : memref<128x128xf32, #tpu.memory_space<vmem>>, vector<128x128xf32>
    %cst_8 = arith.constant dense<0.000000e+00> : vector<1x128xf32>
    %10 = tpu.matmul %5, %9, %cst_8 {dimension_numbers = #tpu.dot_dimension_numbers<[1], [0], [0], [1], [0, 0, 1, 1], [], []>} : vector<1x128xf32>, vector<128x128xf32>, vector<1x128xf32> -> vector<1x128xf32>
    %c0_9 = arith.constant 0 : index
    %c0_10 = arith.constant 0 : index
    %11 = vector.load %arg5[%c0_9, %c0_10] : memref<128x128xf32, #tpu.memory_space<vmem>>, vector<128x128xf32>
    %cst_11 = arith.constant dense<0.000000e+00> : vector<1x128xf32>
    %12 = tpu.matmul %8, %11, %cst_11 {dimension_numbers = #tpu.dot_dimension_numbers<[1], [0], [0], [1], [0, 0, 1, 1], [], []>} : vector<1x128xf32>, vector<128x128xf32>, vector<1x128xf32> -> vector<1x128xf32>
    %cst_12 = arith.constant 2.500000e-01 : f32
    %13 = vector.broadcast %cst_12 : f32 to vector<1x128xf32>
    %14 = arith.mulf %10, %13 : vector<1x128xf32>
    %cst_13 = arith.constant 2.500000e-01 : f32
    %15 = vector.broadcast %cst_13 : f32 to vector<1x128xf32>
    %16 = arith.mulf %12, %15 : vector<1x128xf32>
    %17 = arith.mulf %14, %14 : vector<1x128xf32>
    %18 = arith.subf %16, %17 : vector<1x128xf32>
    %19 = arith.subf %3, %14 : vector<1x128xf32>
    %cst_14 = arith.constant 9.99999974E-6 : f32
    %20 = vector.broadcast %cst_14 : f32 to vector<1x128xf32>
    %21 = arith.addf %18, %20 : vector<1x128xf32>
    %22 = math.rsqrt %21 : vector<1x128xf32>
    %23 = arith.mulf %19, %22 : vector<1x128xf32>
    %c0_15 = arith.constant 0 : index
    %c0_16 = arith.constant 0 : index
    %24 = vector.load %arg3[%c0_15, %c0_16] : memref<1x128xf32, #tpu.memory_space<vmem>>, vector<1x128xf32>
    %25 = arith.mulf %23, %24 : vector<1x128xf32>
    %c0_17 = arith.constant 0 : index
    %c0_18 = arith.constant 0 : index
    %26 = vector.load %arg4[%c0_17, %c0_18] : memref<1x128xf32, #tpu.memory_space<vmem>>, vector<1x128xf32>
    %27 = arith.addf %25, %26 : vector<1x128xf32>
    %cst_19 = arith.constant 0.000000e+00 : f32
    %28 = vector.broadcast %cst_19 : f32 to vector<1x128xf32>
    %29 = arith.maximumf %27, %28 : vector<1x128xf32>
    %c0_20 = arith.constant 0 : index
    %c0_21 = arith.constant 0 : index
    %c0_22 = arith.constant 0 : index
    %30 = vector.load %arg6[%c0_20, %c0_21, %c0_22] : memref<1x1x128xf32, #tpu.memory_space<vmem>>, vector<1x1x128xf32>
    %31 = vector.shape_cast %30 : vector<1x1x128xf32> to vector<1x128xf32>
    %32 = vector.shape_cast %29 : vector<1x128xf32> to vector<1x1x128xf32>
    tpu.vector_store %arg6[%c0_20, %c0_21, %c0_22], %32 {strides = array<i32>} : memref<1x1x128xf32, #tpu.memory_space<vmem>>, vector<1x1x128xf32>,
    return
  }
  func.func @transform_0(%arg0: i32) -> (i32, i32, i32) {
    %c0_i32 = arith.constant 0 : i32
    %c0_i32_0 = arith.constant 0 : i32
    %c0_i32_1 = arith.constant 0 : i32
    return %arg0, %c0_i32, %c0_i32_0 : i32, i32, i32
  }
  func.func @transform_1(%arg0: i32) -> (i32, i32) {
    %c0_i32 = arith.constant 0 : i32
    %c0_i32_0 = arith.constant 0 : i32
    %c0_i32_1 = arith.constant 0 : i32
    return %c0_i32, %c0_i32_0 : i32, i32
  }
  func.func @transform_2(%arg0: i32) -> (i32, i32) {
    %c0_i32 = arith.constant 0 : i32
    %c0_i32_0 = arith.constant 0 : i32
    %c0_i32_1 = arith.constant 0 : i32
    return %c0_i32, %c0_i32_0 : i32, i32
  }
  func.func @transform_3(%arg0: i32) -> (i32, i32) {
    %c0_i32 = arith.constant 0 : i32
    %c0_i32_0 = arith.constant 0 : i32
    %c0_i32_1 = arith.constant 0 : i32
    return %c0_i32, %c0_i32_0 : i32, i32
  }
  func.func @transform_4(%arg0: i32) -> (i32, i32) {
    %c0_i32 = arith.constant 0 : i32
    %c0_i32_0 = arith.constant 0 : i32
    %c0_i32_1 = arith.constant 0 : i32
    return %c0_i32, %c0_i32_0 : i32, i32
  }
  func.func @transform_5(%arg0: i32) -> (i32, i32, i32) {
    %c0_i32 = arith.constant 0 : i32
    %c0_i32_0 = arith.constant 0 : i32
    %c0_i32_1 = arith.constant 0 : i32
    return %arg0, %c0_i32, %c0_i32_0 : i32, i32, i32
  }
}

module attributes {stable_mosaic.version = 11 : i64} {
  func.func @_conv_gn_downres_kernel(%arg0: i32, %arg1: memref<1x1x1152xf32, #tpu.memory_space<vmem>>, %arg2: memref<1152x128xf32, #tpu.memory_space<vmem>>, %arg3: memref<1x128xf32, #tpu.memory_space<vmem>>, %arg4: memref<1x128xf32, #tpu.memory_space<vmem>>, %arg5: memref<128x128xf32, #tpu.memory_space<vmem>>, %arg6: memref<1x1x64xf32, #tpu.memory_space<vmem>>, %arg7: memref<64x128xf32, #tpu.memory_space<vmem>>, %arg8: memref<1x128xf32, #tpu.memory_space<vmem>>, %arg9: memref<1x128xf32, #tpu.memory_space<vmem>>, %arg10: memref<1x1x128xf32, #tpu.memory_space<vmem>>) attributes {dimension_semantics = [#tpu.dimension_semantics<parallel>], iteration_bounds = array<i64: 2>, scalar_prefetch = 0 : i64, scratch_operands = 0 : i64, tpu.core_type = #tpu.core_type<tc>, window_params = [{transform_indices = @transform_0, window_bounds = array<i64: 1, 1, 1152>}, {pipeline_mode = #tpu.pipeline_mode<synchronous>, transform_indices = @transform_1, window_bounds = array<i64: 1152, 128>}, {pipeline_mode = #tpu.pipeline_mode<synchronous>, transform_indices = @transform_2, window_bounds = array<i64: 1, 128>}, {pipeline_mode = #tpu.pipeline_mode<synchronous>, transform_indices = @transform_3, window_bounds = array<i64: 1, 128>}, {pipeline_mode = #tpu.pipeline_mode<synchronous>, transform_indices = @transform_4, window_bounds = array<i64: 128, 128>}, {transform_indices = @transform_5, window_bounds = array<i64: 1, 1, 64>}, {pipeline_mode = #tpu.pipeline_mode<synchronous>, transform_indices = @transform_6, window_bounds = array<i64: 64, 128>}, {pipeline_mode = #tpu.pipeline_mode<synchronous>, transform_indices = @transform_7, window_bounds = array<i64: 1, 128>}, {pipeline_mode = #tpu.pipeline_mode<synchronous>, transform_indices = @transform_8, window_bounds = array<i64: 1, 128>}, {transform_indices = @transform_9, window_bounds = array<i64: 1, 1, 128>}]} {
    %c0 = arith.constant 0 : index
    %c0_0 = arith.constant 0 : index
    %c0_1 = arith.constant 0 : index
    %0 = vector.load %arg1[%c0, %c0_0, %c0_1] : memref<1x1x1152xf32, #tpu.memory_space<vmem>>, vector<1x1x1152xf32>
    %1 = vector.shape_cast %0 : vector<1x1x1152xf32> to vector<1x1152xf32>
    %c0_2 = arith.constant 0 : index
    %c0_3 = arith.constant 0 : index
    %2 = vector.load %arg2[%c0_2, %c0_3] : memref<1152x128xf32, #tpu.memory_space<vmem>>, vector<1152x128xf32>
    %cst = arith.constant dense<0.000000e+00> : vector<1x128xf32>
    %3 = tpu.matmul %1, %2, %cst {dimension_numbers = #tpu.dot_dimension_numbers<[1], [0], [0], [1], [0, 0, 1, 1], [], []>} : vector<1x1152xf32>, vector<1152x128xf32>, vector<1x128xf32> -> vector<1x128xf32>
    %cst_4 = arith.constant dense<0.000000e+00> : vector<128xf32>
    %4 = vector.multi_reduction <add>, %3, %cst_4 [0] : vector<1x128xf32> to vector<128xf32>
    %5 = vector.shape_cast %4 : vector<128xf32> to vector<1x128xf32>
    %6 = arith.mulf %3, %3 : vector<1x128xf32>
    %cst_5 = arith.constant dense<0.000000e+00> : vector<128xf32>
    %7 = vector.multi_reduction <add>, %6, %cst_5 [0] : vector<1x128xf32> to vector<128xf32>
    %8 = vector.shape_cast %7 : vector<128xf32> to vector<1x128xf32>
    %c0_6 = arith.constant 0 : index
    %c0_7 = arith.constant 0 : index
    %9 = vector.load %arg5[%c0_6, %c0_7] : memref<128x128xf32, #tpu.memory_space<vmem>>, vector<128x128xf32>
    %cst_8 = arith.constant dense<0.000000e+00> : vector<1x128xf32>
    %10 = tpu.matmul %5, %9, %cst_8 {dimension_numbers = #tpu.dot_dimension_numbers<[1], [0], [0], [1], [0, 0, 1, 1], [], []>} : vector<1x128xf32>, vector<128x128xf32>, vector<1x128xf32> -> vector<1x128xf32>
    %c0_9 = arith.constant 0 : index
    %c0_10 = arith.constant 0 : index
    %11 = vector.load %arg5[%c0_9, %c0_10] : memref<128x128xf32, #tpu.memory_space<vmem>>, vector<128x128xf32>
    %cst_11 = arith.constant dense<0.000000e+00> : vector<1x128xf32>
    %12 = tpu.matmul %8, %11, %cst_11 {dimension_numbers = #tpu.dot_dimension_numbers<[1], [0], [0], [1], [0, 0, 1, 1], [], []>} : vector<1x128xf32>, vector<128x128xf32>, vector<1x128xf32> -> vector<1x128xf32>
    %cst_12 = arith.constant 2.500000e-01 : f32
    %13 = vector.broadcast %cst_12 : f32 to vector<1x128xf32>
    %14 = arith.mulf %10, %13 : vector<1x128xf32>
    %cst_13 = arith.constant 2.500000e-01 : f32
    %15 = vector.broadcast %cst_13 : f32 to vector<1x128xf32>
    %16 = arith.mulf %12, %15 : vector<1x128xf32>
    %17 = arith.mulf %14, %14 : vector<1x128xf32>
    %18 = arith.subf %16, %17 : vector<1x128xf32>
    %19 = arith.subf %3, %14 : vector<1x128xf32>
    %cst_14 = arith.constant 9.99999974E-6 : f32
    %20 = vector.broadcast %cst_14 : f32 to vector<1x128xf32>
    %21 = arith.addf %18, %20 : vector<1x128xf32>
    %22 = math.rsqrt %21 : vector<1x128xf32>
    %23 = arith.mulf %19, %22 : vector<1x128xf32>
    %c0_15 = arith.constant 0 : index
    %c0_16 = arith.constant 0 : index
    %24 = vector.load %arg3[%c0_15, %c0_16] : memref<1x128xf32, #tpu.memory_space<vmem>>, vector<1x128xf32>
    %25 = arith.mulf %23, %24 : vector<1x128xf32>
    %c0_17 = arith.constant 0 : index
    %c0_18 = arith.constant 0 : index
    %26 = vector.load %arg4[%c0_17, %c0_18] : memref<1x128xf32, #tpu.memory_space<vmem>>, vector<1x128xf32>
    %27 = arith.addf %25, %26 : vector<1x128xf32>
    %c0_19 = arith.constant 0 : index
    %c0_20 = arith.constant 0 : index
    %c0_21 = arith.constant 0 : index
    %28 = vector.load %arg6[%c0_19, %c0_20, %c0_21] : memref<1x1x64xf32, #tpu.memory_space<vmem>>, vector<1x1x64xf32>
    %29 = vector.shape_cast %28 : vector<1x1x64xf32> to vector<1x64xf32>
    %c0_22 = arith.constant 0 : index
    %c0_23 = arith.constant 0 : index
    %30 = vector.load %arg7[%c0_22, %c0_23] : memref<64x128xf32, #tpu.memory_space<vmem>>, vector<64x128xf32>
    %cst_24 = arith.constant dense<0.000000e+00> : vector<1x128xf32>
    %31 = tpu.matmul %29, %30, %cst_24 {dimension_numbers = #tpu.dot_dimension_numbers<[1], [0], [0], [1], [0, 0, 1, 1], [], []>} : vector<1x64xf32>, vector<64x128xf32>, vector<1x128xf32> -> vector<1x128xf32>
    %cst_25 = arith.constant dense<0.000000e+00> : vector<128xf32>
    %32 = vector.multi_reduction <add>, %31, %cst_25 [0] : vector<1x128xf32> to vector<128xf32>
    %33 = vector.shape_cast %32 : vector<128xf32> to vector<1x128xf32>
    %34 = arith.mulf %31, %31 : vector<1x128xf32>
    %cst_26 = arith.constant dense<0.000000e+00> : vector<128xf32>
    %35 = vector.multi_reduction <add>, %34, %cst_26 [0] : vector<1x128xf32> to vector<128xf32>
    %36 = vector.shape_cast %35 : vector<128xf32> to vector<1x128xf32>
    %c0_27 = arith.constant 0 : index
    %c0_28 = arith.constant 0 : index
    %37 = vector.load %arg5[%c0_27, %c0_28] : memref<128x128xf32, #tpu.memory_space<vmem>>, vector<128x128xf32>
    %cst_29 = arith.constant dense<0.000000e+00> : vector<1x128xf32>
    %38 = tpu.matmul %33, %37, %cst_29 {dimension_numbers = #tpu.dot_dimension_numbers<[1], [0], [0], [1], [0, 0, 1, 1], [], []>} : vector<1x128xf32>, vector<128x128xf32>, vector<1x128xf32> -> vector<1x128xf32>
    %c0_30 = arith.constant 0 : index
    %c0_31 = arith.constant 0 : index
    %39 = vector.load %arg5[%c0_30, %c0_31] : memref<128x128xf32, #tpu.memory_space<vmem>>, vector<128x128xf32>
    %cst_32 = arith.constant dense<0.000000e+00> : vector<1x128xf32>
    %40 = tpu.matmul %36, %39, %cst_32 {dimension_numbers = #tpu.dot_dimension_numbers<[1], [0], [0], [1], [0, 0, 1, 1], [], []>} : vector<1x128xf32>, vector<128x128xf32>, vector<1x128xf32> -> vector<1x128xf32>
    %cst_33 = arith.constant 2.500000e-01 : f32
    %41 = vector.broadcast %cst_33 : f32 to vector<1x128xf32>
    %42 = arith.mulf %38, %41 : vector<1x128xf32>
    %cst_34 = arith.constant 2.500000e-01 : f32
    %43 = vector.broadcast %cst_34 : f32 to vector<1x128xf32>
    %44 = arith.mulf %40, %43 : vector<1x128xf32>
    %45 = arith.mulf %42, %42 : vector<1x128xf32>
    %46 = arith.subf %44, %45 : vector<1x128xf32>
    %47 = arith.subf %31, %42 : vector<1x128xf32>
    %cst_35 = arith.constant 9.99999974E-6 : f32
    %48 = vector.broadcast %cst_35 : f32 to vector<1x128xf32>
    %49 = arith.addf %46, %48 : vector<1x128xf32>
    %50 = math.rsqrt %49 : vector<1x128xf32>
    %51 = arith.mulf %47, %50 : vector<1x128xf32>
    %c0_36 = arith.constant 0 : index
    %c0_37 = arith.constant 0 : index
    %52 = vector.load %arg8[%c0_36, %c0_37] : memref<1x128xf32, #tpu.memory_space<vmem>>, vector<1x128xf32>
    %53 = arith.mulf %51, %52 : vector<1x128xf32>
    %c0_38 = arith.constant 0 : index
    %c0_39 = arith.constant 0 : index
    %54 = vector.load %arg9[%c0_38, %c0_39] : memref<1x128xf32, #tpu.memory_space<vmem>>, vector<1x128xf32>
    %55 = arith.addf %53, %54 : vector<1x128xf32>
    %56 = arith.addf %27, %55 : vector<1x128xf32>
    %cst_40 = arith.constant 0.000000e+00 : f32
    %57 = vector.broadcast %cst_40 : f32 to vector<1x128xf32>
    %58 = arith.maximumf %56, %57 : vector<1x128xf32>
    %c0_41 = arith.constant 0 : index
    %c0_42 = arith.constant 0 : index
    %c0_43 = arith.constant 0 : index
    %59 = vector.load %arg10[%c0_41, %c0_42, %c0_43] : memref<1x1x128xf32, #tpu.memory_space<vmem>>, vector<1x1x128xf32>
    %60 = vector.shape_cast %59 : vector<1x1x128xf32> to vector<1x128xf32>
    %61 = vector.shape_cast %58 : vector<1x128xf32> to vector<1x1x128xf32>
    tpu.vector_store %arg10[%c0_41, %c0_42, %c0_43], %61 {strides = array<i32>} : memref<1x1x128xf32, #tpu.memory_space<vmem>>, vector<1x1x128xf32>,
    return
  }
  func.func @transform_0(%arg0: i32) -> (i32, i32, i32) {
    %c0_i32 = arith.constant 0 : i32
    %c0_i32_0 = arith.constant 0 : i32
    %c0_i32_1 = arith.constant 0 : i32
    return %arg0, %c0_i32, %c0_i32_0 : i32, i32, i32
  }
  func.func @transform_1(%arg0: i32) -> (i32, i32) {
    %c0_i32 = arith.constant 0 : i32
    %c0_i32_0 = arith.constant 0 : i32
    %c0_i32_1 = arith.constant 0 : i32
    return %c0_i32, %c0_i32_0 : i32, i32
  }
  func.func @transform_2(%arg0: i32) -> (i32, i32) {
    %c0_i32 = arith.constant 0 : i32
    %c0_i32_0 = arith.constant 0 : i32
    %c0_i32_1 = arith.constant 0 : i32
    return %c0_i32, %c0_i32_0 : i32, i32
  }
  func.func @transform_3(%arg0: i32) -> (i32, i32) {
    %c0_i32 = arith.constant 0 : i32
    %c0_i32_0 = arith.constant 0 : i32
    %c0_i32_1 = arith.constant 0 : i32
    return %c0_i32, %c0_i32_0 : i32, i32
  }
  func.func @transform_4(%arg0: i32) -> (i32, i32) {
    %c0_i32 = arith.constant 0 : i32
    %c0_i32_0 = arith.constant 0 : i32
    %c0_i32_1 = arith.constant 0 : i32
    return %c0_i32, %c0_i32_0 : i32, i32
  }
  func.func @transform_5(%arg0: i32) -> (i32, i32, i32) {
    %c0_i32 = arith.constant 0 : i32
    %c0_i32_0 = arith.constant 0 : i32
    %c0_i32_1 = arith.constant 0 : i32
    return %arg0, %c0_i32, %c0_i32_0 : i32, i32, i32
  }
  func.func @transform_6(%arg0: i32) -> (i32, i32) {
    %c0_i32 = arith.constant 0 : i32
    %c0_i32_0 = arith.constant 0 : i32
    %c0_i32_1 = arith.constant 0 : i32
    return %c0_i32, %c0_i32_0 : i32, i32
  }
  func.func @transform_7(%arg0: i32) -> (i32, i32) {
    %c0_i32 = arith.constant 0 : i32
    %c0_i32_0 = arith.constant 0 : i32
    %c0_i32_1 = arith.constant 0 : i32
    return %c0_i32, %c0_i32_0 : i32, i32
  }
  func.func @transform_8(%arg0: i32) -> (i32, i32) {
    %c0_i32 = arith.constant 0 : i32
    %c0_i32_0 = arith.constant 0 : i32
    %c0_i32_1 = arith.constant 0 : i32
    return %c0_i32, %c0_i32_0 : i32, i32
  }
  func.func @transform_9(%arg0: i32) -> (i32, i32, i32) {
    %c0_i32 = arith.constant 0 : i32
    %c0_i32_0 = arith.constant 0 : i32
    %c0_i32_1 = arith.constant 0 : i32
    return %arg0, %c0_i32, %c0_i32_0 : i32, i32, i32
  }
}

module attributes {stable_mosaic.version = 11 : i64} {
  func.func @_conv_gn_downres_kernel(%arg0: i32, %arg1: memref<1x1x1152xf32, #tpu.memory_space<vmem>>, %arg2: memref<1152x128xf32, #tpu.memory_space<vmem>>, %arg3: memref<1x128xf32, #tpu.memory_space<vmem>>, %arg4: memref<1x128xf32, #tpu.memory_space<vmem>>, %arg5: memref<128x128xf32, #tpu.memory_space<vmem>>, %arg6: memref<1x1x128xf32, #tpu.memory_space<vmem>>, %arg7: memref<128x128xf32, #tpu.memory_space<vmem>>, %arg8: memref<1x128xf32, #tpu.memory_space<vmem>>, %arg9: memref<1x128xf32, #tpu.memory_space<vmem>>, %arg10: memref<1x1x128xf32, #tpu.memory_space<vmem>>) attributes {dimension_semantics = [#tpu.dimension_semantics<parallel>], iteration_bounds = array<i64: 2>, scalar_prefetch = 0 : i64, scratch_operands = 0 : i64, tpu.core_type = #tpu.core_type<tc>, window_params = [{transform_indices = @transform_0, window_bounds = array<i64: 1, 1, 1152>}, {pipeline_mode = #tpu.pipeline_mode<synchronous>, transform_indices = @transform_1, window_bounds = array<i64: 1152, 128>}, {pipeline_mode = #tpu.pipeline_mode<synchronous>, transform_indices = @transform_2, window_bounds = array<i64: 1, 128>}, {pipeline_mode = #tpu.pipeline_mode<synchronous>, transform_indices = @transform_3, window_bounds = array<i64: 1, 128>}, {pipeline_mode = #tpu.pipeline_mode<synchronous>, transform_indices = @transform_4, window_bounds = array<i64: 128, 128>}, {transform_indices = @transform_5, window_bounds = array<i64: 1, 1, 128>}, {pipeline_mode = #tpu.pipeline_mode<synchronous>, transform_indices = @transform_6, window_bounds = array<i64: 128, 128>}, {pipeline_mode = #tpu.pipeline_mode<synchronous>, transform_indices = @transform_7, window_bounds = array<i64: 1, 128>}, {pipeline_mode = #tpu.pipeline_mode<synchronous>, transform_indices = @transform_8, window_bounds = array<i64: 1, 128>}, {transform_indices = @transform_9, window_bounds = array<i64: 1, 1, 128>}]} {
    %c0 = arith.constant 0 : index
    %c0_0 = arith.constant 0 : index
    %c0_1 = arith.constant 0 : index
    %0 = vector.load %arg1[%c0, %c0_0, %c0_1] : memref<1x1x1152xf32, #tpu.memory_space<vmem>>, vector<1x1x1152xf32>
    %1 = vector.shape_cast %0 : vector<1x1x1152xf32> to vector<1x1152xf32>
    %c0_2 = arith.constant 0 : index
    %c0_3 = arith.constant 0 : index
    %2 = vector.load %arg2[%c0_2, %c0_3] : memref<1152x128xf32, #tpu.memory_space<vmem>>, vector<1152x128xf32>
    %cst = arith.constant dense<0.000000e+00> : vector<1x128xf32>
    %3 = tpu.matmul %1, %2, %cst {dimension_numbers = #tpu.dot_dimension_numbers<[1], [0], [0], [1], [0, 0, 1, 1], [], []>} : vector<1x1152xf32>, vector<1152x128xf32>, vector<1x128xf32> -> vector<1x128xf32>
    %cst_4 = arith.constant dense<0.000000e+00> : vector<128xf32>
    %4 = vector.multi_reduction <add>, %3, %cst_4 [0] : vector<1x128xf32> to vector<128xf32>
    %5 = vector.shape_cast %4 : vector<128xf32> to vector<1x128xf32>
    %6 = arith.mulf %3, %3 : vector<1x128xf32>
    %cst_5 = arith.constant dense<0.000000e+00> : vector<128xf32>
    %7 = vector.multi_reduction <add>, %6, %cst_5 [0] : vector<1x128xf32> to vector<128xf32>
    %8 = vector.shape_cast %7 : vector<128xf32> to vector<1x128xf32>
    %c0_6 = arith.constant 0 : index
    %c0_7 = arith.constant 0 : index
    %9 = vector.load %arg5[%c0_6, %c0_7] : memref<128x128xf32, #tpu.memory_space<vmem>>, vector<128x128xf32>
    %cst_8 = arith.constant dense<0.000000e+00> : vector<1x128xf32>
    %10 = tpu.matmul %5, %9, %cst_8 {dimension_numbers = #tpu.dot_dimension_numbers<[1], [0], [0], [1], [0, 0, 1, 1], [], []>} : vector<1x128xf32>, vector<128x128xf32>, vector<1x128xf32> -> vector<1x128xf32>
    %c0_9 = arith.constant 0 : index
    %c0_10 = arith.constant 0 : index
    %11 = vector.load %arg5[%c0_9, %c0_10] : memref<128x128xf32, #tpu.memory_space<vmem>>, vector<128x128xf32>
    %cst_11 = arith.constant dense<0.000000e+00> : vector<1x128xf32>
    %12 = tpu.matmul %8, %11, %cst_11 {dimension_numbers = #tpu.dot_dimension_numbers<[1], [0], [0], [1], [0, 0, 1, 1], [], []>} : vector<1x128xf32>, vector<128x128xf32>, vector<1x128xf32> -> vector<1x128xf32>
    %cst_12 = arith.constant 2.500000e-01 : f32
    %13 = vector.broadcast %cst_12 : f32 to vector<1x128xf32>
    %14 = arith.mulf %10, %13 : vector<1x128xf32>
    %cst_13 = arith.constant 2.500000e-01 : f32
    %15 = vector.broadcast %cst_13 : f32 to vector<1x128xf32>
    %16 = arith.mulf %12, %15 : vector<1x128xf32>
    %17 = arith.mulf %14, %14 : vector<1x128xf32>
    %18 = arith.subf %16, %17 : vector<1x128xf32>
    %19 = arith.subf %3, %14 : vector<1x128xf32>
    %cst_14 = arith.constant 9.99999974E-6 : f32
    %20 = vector.broadcast %cst_14 : f32 to vector<1x128xf32>
    %21 = arith.addf %18, %20 : vector<1x128xf32>
    %22 = math.rsqrt %21 : vector<1x128xf32>
    %23 = arith.mulf %19, %22 : vector<1x128xf32>
    %c0_15 = arith.constant 0 : index
    %c0_16 = arith.constant 0 : index
    %24 = vector.load %arg3[%c0_15, %c0_16] : memref<1x128xf32, #tpu.memory_space<vmem>>, vector<1x128xf32>
    %25 = arith.mulf %23, %24 : vector<1x128xf32>
    %c0_17 = arith.constant 0 : index
    %c0_18 = arith.constant 0 : index
    %26 = vector.load %arg4[%c0_17, %c0_18] : memref<1x128xf32, #tpu.memory_space<vmem>>, vector<1x128xf32>
    %27 = arith.addf %25, %26 : vector<1x128xf32>
    %c0_19 = arith.constant 0 : index
    %c0_20 = arith.constant 0 : index
    %c0_21 = arith.constant 0 : index
    %28 = vector.load %arg6[%c0_19, %c0_20, %c0_21] : memref<1x1x128xf32, #tpu.memory_space<vmem>>, vector<1x1x128xf32>
    %29 = vector.shape_cast %28 : vector<1x1x128xf32> to vector<1x128xf32>
    %c0_22 = arith.constant 0 : index
    %c0_23 = arith.constant 0 : index
    %30 = vector.load %arg7[%c0_22, %c0_23] : memref<128x128xf32, #tpu.memory_space<vmem>>, vector<128x128xf32>
    %cst_24 = arith.constant dense<0.000000e+00> : vector<1x128xf32>
    %31 = tpu.matmul %29, %30, %cst_24 {dimension_numbers = #tpu.dot_dimension_numbers<[1], [0], [0], [1], [0, 0, 1, 1], [], []>} : vector<1x128xf32>, vector<128x128xf32>, vector<1x128xf32> -> vector<1x128xf32>
    %cst_25 = arith.constant dense<0.000000e+00> : vector<128xf32>
    %32 = vector.multi_reduction <add>, %31, %cst_25 [0] : vector<1x128xf32> to vector<128xf32>
    %33 = vector.shape_cast %32 : vector<128xf32> to vector<1x128xf32>
    %34 = arith.mulf %31, %31 : vector<1x128xf32>
    %cst_26 = arith.constant dense<0.000000e+00> : vector<128xf32>
    %35 = vector.multi_reduction <add>, %34, %cst_26 [0] : vector<1x128xf32> to vector<128xf32>
    %36 = vector.shape_cast %35 : vector<128xf32> to vector<1x128xf32>
    %c0_27 = arith.constant 0 : index
    %c0_28 = arith.constant 0 : index
    %37 = vector.load %arg5[%c0_27, %c0_28] : memref<128x128xf32, #tpu.memory_space<vmem>>, vector<128x128xf32>
    %cst_29 = arith.constant dense<0.000000e+00> : vector<1x128xf32>
    %38 = tpu.matmul %33, %37, %cst_29 {dimension_numbers = #tpu.dot_dimension_numbers<[1], [0], [0], [1], [0, 0, 1, 1], [], []>} : vector<1x128xf32>, vector<128x128xf32>, vector<1x128xf32> -> vector<1x128xf32>
    %c0_30 = arith.constant 0 : index
    %c0_31 = arith.constant 0 : index
    %39 = vector.load %arg5[%c0_30, %c0_31] : memref<128x128xf32, #tpu.memory_space<vmem>>, vector<128x128xf32>
    %cst_32 = arith.constant dense<0.000000e+00> : vector<1x128xf32>
    %40 = tpu.matmul %36, %39, %cst_32 {dimension_numbers = #tpu.dot_dimension_numbers<[1], [0], [0], [1], [0, 0, 1, 1], [], []>} : vector<1x128xf32>, vector<128x128xf32>, vector<1x128xf32> -> vector<1x128xf32>
    %cst_33 = arith.constant 2.500000e-01 : f32
    %41 = vector.broadcast %cst_33 : f32 to vector<1x128xf32>
    %42 = arith.mulf %38, %41 : vector<1x128xf32>
    %cst_34 = arith.constant 2.500000e-01 : f32
    %43 = vector.broadcast %cst_34 : f32 to vector<1x128xf32>
    %44 = arith.mulf %40, %43 : vector<1x128xf32>
    %45 = arith.mulf %42, %42 : vector<1x128xf32>
    %46 = arith.subf %44, %45 : vector<1x128xf32>
    %47 = arith.subf %31, %42 : vector<1x128xf32>
    %cst_35 = arith.constant 9.99999974E-6 : f32
    %48 = vector.broadcast %cst_35 : f32 to vector<1x128xf32>
    %49 = arith.addf %46, %48 : vector<1x128xf32>
    %50 = math.rsqrt %49 : vector<1x128xf32>
    %51 = arith.mulf %47, %50 : vector<1x128xf32>
    %c0_36 = arith.constant 0 : index
    %c0_37 = arith.constant 0 : index
    %52 = vector.load %arg8[%c0_36, %c0_37] : memref<1x128xf32, #tpu.memory_space<vmem>>, vector<1x128xf32>
    %53 = arith.mulf %51, %52 : vector<1x128xf32>
    %c0_38 = arith.constant 0 : index
    %c0_39 = arith.constant 0 : index
    %54 = vector.load %arg9[%c0_38, %c0_39] : memref<1x128xf32, #tpu.memory_space<vmem>>, vector<1x128xf32>
    %55 = arith.addf %53, %54 : vector<1x128xf32>
    %56 = arith.addf %27, %55 : vector<1x128xf32>
    %cst_40 = arith.constant 0.000000e+00 : f32
    %57 = vector.broadcast %cst_40 : f32 to vector<1x128xf32>
    %58 = arith.maximumf %56, %57 : vector<1x128xf32>
    %c0_41 = arith.constant 0 : index
    %c0_42 = arith.constant 0 : index
    %c0_43 = arith.constant 0 : index
    %59 = vector.load %arg10[%c0_41, %c0_42, %c0_43] : memref<1x1x128xf32, #tpu.memory_space<vmem>>, vector<1x1x128xf32>
    %60 = vector.shape_cast %59 : vector<1x1x128xf32> to vector<1x128xf32>
    %61 = vector.shape_cast %58 : vector<1x128xf32> to vector<1x1x128xf32>
    tpu.vector_store %arg10[%c0_41, %c0_42, %c0_43], %61 {strides = array<i32>} : memref<1x1x128xf32, #tpu.memory_space<vmem>>, vector<1x1x128xf32>,
    return
  }
  func.func @transform_0(%arg0: i32) -> (i32, i32, i32) {
    %c0_i32 = arith.constant 0 : i32
    %c0_i32_0 = arith.constant 0 : i32
    %c0_i32_1 = arith.constant 0 : i32
    return %arg0, %c0_i32, %c0_i32_0 : i32, i32, i32
  }
  func.func @transform_1(%arg0: i32) -> (i32, i32) {
    %c0_i32 = arith.constant 0 : i32
    %c0_i32_0 = arith.constant 0 : i32
    %c0_i32_1 = arith.constant 0 : i32
    return %c0_i32, %c0_i32_0 : i32, i32
  }
  func.func @transform_2(%arg0: i32) -> (i32, i32) {
    %c0_i32 = arith.constant 0 : i32
    %c0_i32_0 = arith.constant 0 : i32
    %c0_i32_1 = arith.constant 0 : i32
    return %c0_i32, %c0_i32_0 : i32, i32
  }
  func.func @transform_3(%arg0: i32) -> (i32, i32) {
    %c0_i32 = arith.constant 0 : i32
    %c0_i32_0 = arith.constant 0 : i32
    %c0_i32_1 = arith.constant 0 : i32
    return %c0_i32, %c0_i32_0 : i32, i32
  }
  func.func @transform_4(%arg0: i32) -> (i32, i32) {
    %c0_i32 = arith.constant 0 : i32
    %c0_i32_0 = arith.constant 0 : i32
    %c0_i32_1 = arith.constant 0 : i32
    return %c0_i32, %c0_i32_0 : i32, i32
  }
  func.func @transform_5(%arg0: i32) -> (i32, i32, i32) {
    %c0_i32 = arith.constant 0 : i32
    %c0_i32_0 = arith.constant 0 : i32
    %c0_i32_1 = arith.constant 0 : i32
    return %arg0, %c0_i32, %c0_i32_0 : i32, i32, i32
  }
  func.func @transform_6(%arg0: i32) -> (i32, i32) {
    %c0_i32 = arith.constant 0 : i32
    %c0_i32_0 = arith.constant 0 : i32
    %c0_i32_1 = arith.constant 0 : i32
    return %c0_i32, %c0_i32_0 : i32, i32
  }
  func.func @transform_7(%arg0: i32) -> (i32, i32) {
    %c0_i32 = arith.constant 0 : i32
    %c0_i32_0 = arith.constant 0 : i32
    %c0_i32_1 = arith.constant 0 : i32
    return %c0_i32, %c0_i32_0 : i32, i32
  }
  func.func @transform_8(%arg0: i32) -> (i32, i32) {
    %c0_i32 = arith.constant 0 : i32
    %c0_i32_0 = arith.constant 0 : i32
    %c0_i32_1 = arith.constant 0 : i32
    return %c0_i32, %c0_i32_0 : i32, i32
  }
  func.func @transform_9(%arg0: i32) -> (i32, i32, i32) {
    %c0_i32 = arith.constant 0 : i32
    %c0_i32_0 = arith.constant 0 : i32
    %c0_i32_1 = arith.constant 0 : i32
    return %arg0, %c0_i32, %c0_i32_0 : i32, i32, i32
  }
}

</mosaic_0001>

<bundles_post_ra>
// kernel: forward.10
= control target key start
LH: loop header
LB: loop body
LE: loop exit
PB: predicated region body
PF: predicated region fallthrough
CT: control target
= control target key end

     0   :  { %s932_s18 = smov 0   ;;  %s1193_s0 = inlined_call_operand.vmem [shape: f32[2,64,196], index: 0, kind: input, shape index: {}]   ;;  %s1194_s1 = inlined_call_operand.vmem [shape: f32[196,64], index: 1, kind: input, shape index: {}]   ;;  %s1195_s2 = inlined_call_operand.vmem [shape: f32[1,64], index: 2, kind: input, shape index: {}]   ;;  %s1196_s3 = inlined_call_operand.vmem [shape: f32[1,64], index: 3, kind: input, shape index: {}]   ;;  %s1197_s4 = inlined_call_operand.vmem [shape: f32[64,64], index: 4, kind: input, shape index: {}]   ;;  %s1198_s5 = inlined_call_operand.vmem [shape: f32[2,64,64], index: 5, kind: output, shape index: {}]  }
   0x1 LB: > { %s736_s19 = sadd.s32 4294967295, %s897_s18   ;;  %p740_p0 = scmp.ge.s32.totalorder %s897_s18, 1  ;;  %s897_s18 = sphi %s932_s18, %s15_s18  }
   0x2   : > { %p187_p1 = scmp.lt.s32.totalorder %s897_s18, 3 }
   0x4   : > { %p188_p2 = pnand %p740_p0, %p187_p1 }
   0x5   : > { %v241_v0 = vld [vmem:[%s1194_s1] sm:$0xff] (!%p188_p2)  ;;  %v242_v1 = vld [vmem:[%s1194_s1 + $0x8] sm:$0xff] (!%p188_p2)  ;;  %v243_v2 = vld [vmem:[%s1194_s1 + $0x10] sm:$0xff] (!%p188_p2)  ;;  %v899_v3 = vmov (!%p188_p2), 0.0|0.0   ;;  %p215_p3 = scmp.lt.s32.totalorder (!%p188_p2), %s736_s19, 1  ;;  %vm266_vm0 = vcmask (!%p188_p2), 556032  }
   0x6   : > { %191 = sbr.rel (%p188_p2) target bundleno = 571 (0x23b), region = 40  ;;  %818 = vmatprep.subr.bf16.mxu0 (!%p188_p2), %v899_v3  ;;  %v819_v4 = vpack.c.bf16 (!%p188_p2), %v242_v1, %v241_v0  ;;  %v244_v5 = vld [vmem:[%s1194_s1 + $0x18] sm:$0xff] (!%p188_p2)  ;;  %854 = vmatprep.subr.bf16.mxu1 (!%p188_p2), %v899_v3  ;;  %v245_v7 = vld [vmem:[%s1194_s1 + $0x20] sm:$0xff] (!%p188_p2)  ;;  %v246_v8 = vld [vmem:[%s1194_s1 + $0x28] sm:$0xff] (!%p188_p2)  ;;  %v900_v38 = vmov (!%p188_p2), 0.0   ;;  %vm291_vm1 = vcmask (!%p188_p2), 1043456  }
   0x7   : > { %v822_v6 = vpack.c.bf16 (!%p188_p2), %v244_v5, %v243_v2  ;;  %v825_v9 = vpack.c.bf16 (!%p188_p2), %v246_v8, %v245_v7  ;;  %v247_v10 = vld [vmem:[%s1194_s1 + $0x30] sm:$0xff] (!%p188_p2)  ;;  %v248_v11 = vld [vmem:[%s1194_s1 + $0x38] sm:$0xff] (!%p188_p2)  ;;  %v249_v14 = vld [vmem:[%s1194_s1 + $0x40] sm:$0xff] (!%p188_p2)  ;;  %vm901_vm2 = vmmov (!%p188_p2), 0   ;;  %vm400_vm3 = vcmask (!%p188_p2), 523264  }
   0x8   : > { %820 = vmatpush1.bf16.msra.mxu0 (!%p188_p2), %v819_v4  ;;  %v828_v13 = vpack.c.bf16 (!%p188_p2), %v248_v11, %v247_v10  ;;  %v250_v15 = vld [vmem:[%s1194_s1 + $0x48] sm:$0xff] (!%p188_p2)  ;;  %v251_v17 = vld [vmem:[%s1194_s1 + $0x50] sm:$0xff] (!%p188_p2)  ;;  %v252_v18 = vld [vmem:[%s1194_s1 + $0x58] sm:$0xff] (!%p188_p2)  ;;  %796 = vmatprep.mubr.msk.f32.mxu1 (!%p188_p2), %vm901_vm2, %v900_v38 }
   0x9   : > { %821 = vmatprep.subr.bf16.mxu0 (!%p188_p2), %v899_v3  ;;  %v831_v16 = vpack.c.bf16 (!%p188_p2), %v250_v15, %v249_v14  ;;  %v834_v19 = vpack.c.bf16 (!%p188_p2), %v252_v18, %v251_v17  ;;  %v253_v20 = vld [vmem:[%s1194_s1 + $0x60] sm:$0xff] (!%p188_p2)  ;;  %v254_v21 = vld [vmem:[%s1194_s1 + $0x68] sm:$0xff] (!%p188_p2)  ;;  %v255_v23 = vld [vmem:[%s1194_s1 + $0x70] sm:$0xff] (!%p188_p2) }
   0xa   : > { %v837_v22 = vpack.c.bf16 (!%p188_p2), %v254_v21, %v253_v20  ;;  %v256_v24 = vld [vmem:[%s1194_s1 + $0x78] sm:$0xff] (!%p188_p2)  ;;  %v257_v26 = vld [vmem:[%s1194_s1 + $0x80] sm:$0xff] (!%p188_p2)  ;;  %v258_v27 = vld [vmem:[%s1194_s1 + $0x88] sm:$0xff] (!%p188_p2) }
   0xb   : > { %v840_v25 = vpack.c.bf16 (!%p188_p2), %v256_v24, %v255_v23  ;;  %v843_v28 = vpack.c.bf16 (!%p188_p2), %v258_v27, %v257_v26  ;;  %v259_v29 = vld [vmem:[%s1194_s1 + $0x90] sm:$0xff] (!%p188_p2)  ;;  %v260_v30 = vld [vmem:[%s1194_s1 + $0x98] sm:$0xff] (!%p188_p2)  ;;  %v261_v32 = vld [vmem:[%s1194_s1 + $0xa0] sm:$0xff] (!%p188_p2) }
   0xc   : > { %823 = vmatpush1.bf16.msra.mxu0 (!%p188_p2), %v822_v6  ;;  %v846_v31 = vpack.c.bf16 (!%p188_p2), %v260_v30, %v259_v29  ;;  %v262_v33 = vld [vmem:[%s1194_s1 + $0xa8] sm:$0xff] (!%p188_p2)  ;;  %v263_v35 = vld [vmem:[%s1194_s1 + $0xb0] sm:$0xff] (!%p188_p2)  ;;  %v264_v36 = vld [vmem:[%s1194_s1 + $0xb8] sm:$0xff] (!%p188_p2) }
   0xd   : > { %s1200_s19 = smov (!%p215_p3, %s736_s19), 1  ;;  %824 = vmatprep.subr.bf16.mxu0 %v899_v3  ;;  %v849_v34 = vpack.c.bf16 %v262_v33, %v261_v32  ;;  %v852_v37 = vpack.c.bf16 %v264_v36, %v263_v35  ;;  %v265_v39 = vld [vmem:[%s1194_s1 + $0xc0] sm:$0xf]  ;;  %v452_v56 = vld [vmem:[%s1197_s4 + $0x8] sm:$0xff]  ;;  %v453_v58 = vld [vmem:[%s1197_s4 + $0x10] sm:$0xff] }
   0xe   : > { %s760_s7 = sshll.u32 %s1200_s19, 7  ;;  %v451_v55 = vld [vmem:[%s1197_s4] sm:$0xff]  ;;  %v454_v59 = vld [vmem:[%s1197_s4 + $0x18] sm:$0xff]  ;;  %v456_v62 = vld [vmem:[%s1197_s4 + $0x28] sm:$0xff]  ;;  %s761_s26 = sshll.u32 %s1200_s19, 6 }
   0xf   : > { %s967_s10 = scalar_lea.vmem %s1193_s0, %s760_s7  ;;  %v1067_v57 = vpack.c.bf16 %v452_v56, %v451_v55  ;;  %v1077_v60 = vpack.c.bf16 %v454_v59, %v453_v58  ;;  %v455_v61 = vld [vmem:[%s1197_s4 + $0x20] sm:$0xff]  ;;  %v457_v0 = vld [vmem:[%s1197_s4 + $0x30] sm:$0xff]  ;;  %v458_v1 = vld [vmem:[%s1197_s4 + $0x38] sm:$0xff]  ;;  %s224_s29 = scalar_lea.vmem %s1198_s5, %s761_s26 }
  0x10   : > { %v226_v12 = vld [vmem:[%s967_s10 + $0x8] sm:$0xff]  ;;  %826 = vmatpush1.bf16.msra.mxu0 %v825_v9  ;;  %v225_v40 = vld [vmem:[%s967_s10] sm:$0xff]  ;;  %v228_v41 = vld [vmem:[%s967_s10 + $0x18] sm:$0xff]  ;;  %v1087_v63 = vpack.c.bf16 %v456_v62, %v455_v61  ;;  %v1097_v2 = vpack.c.bf16 %v458_v1, %v457_v0 }
  0x11   : > { %746 = vmatprep.mubr.msk.f32.mxu0 %vm266_vm0, %v226_v12  ;;  %827 = vmatprep.subr.bf16.mxu0 %v899_v3  ;;  %v227_v42 = vld [vmem:[%s967_s10 + $0x10] sm:$0xff]  ;;  %v230_v43 = vld [vmem:[%s967_s10 + $0x28] sm:$0xff]  ;;  %v229_v44 = vld [vmem:[%s967_s10 + $0x20] sm:$0xff] }
  0x12   : > { %v232_v45 = vld [vmem:[%s967_s10 + $0x38] sm:$0xff]  ;;  %v231_v46 = vld [vmem:[%s967_s10 + $0x30] sm:$0xff]  ;;  %v234_v47 = vld [vmem:[%s967_s10 + $0x48] sm:$0xff]  ;;  %856 = vmatpush3.bf16.msra.mxu1 %v1067_v57 }
  0x13   : > { %v233_v48 = vld [vmem:[%s967_s10 + $0x40] sm:$0xff]  ;;  %v236_v49 = vld [vmem:[%s967_s10 + $0x58] sm:$0xff]  ;;  %v235_v50 = vld [vmem:[%s967_s10 + $0x50] sm:$0xff]  ;;  %857 = vmatprep.subr.bf16.mxu1 %v899_v3 }
  0x14   : > { %829 = vmatpush1.bf16.msra.mxu0 %v828_v13  ;;  %v238_v51 = vld [vmem:[%s967_s10 + $0x68] sm:$0xff]  ;;  %v237_v52 = vld [vmem:[%s967_s10 + $0x60] sm:$0xff]  ;;  %v240_v53 = vld [vmem:[%s967_s10 + $0x78] sm:$0xff] }
  0x15   : > { %830 = vmatprep.subr.bf16.mxu0 %v899_v3  ;;  %v239_v54 = vld [vmem:[%s967_s10 + $0x70] sm:$0xff] }
  0x16   : > { %859 = vmatpush3.bf16.msra.mxu1 %v1077_v60 }
  0x17   : > { %860 = vmatprep.subr.bf16.mxu1 %v899_v3 }
  0x18   : > { %832 = vmatpush1.bf16.msra.mxu0 %v831_v16 }
  0x19   : > { %833 = vmatprep.subr.bf16.mxu0 %v899_v3 }
  0x1a   : > { %862 = vmatpush3.bf16.msra.mxu1 %v1087_v63 }
  0x1b   : > { %863 = vmatprep.subr.bf16.mxu1 %v899_v3 }
  0x1c   : > { %835 = vmatpush1.bf16.msra.mxu0 %v834_v19 }
  0x1d   : > { %836 = vmatprep.subr.bf16.mxu0 %v899_v3 }
  0x1e   : > { %865 = vmatpush3.bf16.msra.mxu1 %v1097_v2 }
  0x1f   : > { %866 = vmatprep.subr.bf16.mxu1 %v899_v3 }
  0x20   : > { %838 = vmatpush1.bf16.msra.mxu0 %v837_v22 }
  0x21   : > { %839 = vmatprep.subr.bf16.mxu0 %v899_v3 }
  0x24   : > { %841 = vmatpush1.bf16.msra.mxu0 %v840_v25 }
  0x25   : > { %842 = vmatprep.subr.bf16.mxu0 %v899_v3 }
  0x28   : > { %844 = vmatpush1.bf16.msra.mxu0 %v843_v28 }
  0x29   : > { %845 = vmatprep.subr.bf16.mxu0 %v899_v3 }
  0x2c   : > { %847 = vmatpush1.bf16.msra.mxu0 %v846_v31 }
  0x2d   : > { %848 = vmatprep.subr.bf16.mxu0 %v899_v3 }
  0x30   : > { %850 = vmatpush1.bf16.msra.mxu0 %v849_v34 }
  0x31   : > { %851 = vmatprep.subr.bf16.mxu0 %v899_v3 }
  0x34   : > { %853 = vmatpush1.bf16.msra.mxu0 %v852_v37 }
  0x35   : > { %343 = vmatprep.subr.mxu0 %v900_v38 }
  0x38   : > { %745 = vmatpush1.msk.msra.mxu0 %vm291_vm1, %v265_v39 }
  0x39   : > { %360 = vmatmul.mubr.f32.vlgmr.msra.gmra.mrb[0].mxu0 %v225_v40 }
  0x3a   : > { %747 = vmatprep.mubr.msk.f32.mxu0 %vm266_vm0, %v228_v41 }
  0x3d   : > { %365 = vmatmul.mubr.f32.gmra.mrb[2].mxu0 %v227_v42 }
  0x3e   : > { %748 = vmatprep.mubr.msk.f32.mxu0 %vm266_vm0, %v230_v43 }
  0x41   : > { %370 = vmatmul.mubr.f32.gmra.mrb[4].mxu0 %v229_v44 }
  0x42   : > { %749 = vmatprep.mubr.msk.f32.mxu0 %vm266_vm0, %v232_v45 }
  0x45   : > { %375 = vmatmul.mubr.f32.gmra.mrb[6].mxu0 %v231_v46 }
  0x46   : > { %750 = vmatprep.mubr.msk.f32.mxu0 %vm266_vm0, %v234_v47 }
  0x49   : > { %380 = vmatmul.mubr.f32.gmra.mrb[8].mxu0 %v233_v48 }
  0x4a   : > { %751 = vmatprep.mubr.msk.f32.mxu0 %vm266_vm0, %v236_v49 }
  0x4d   : > { %385 = vmatmul.mubr.f32.gmra.mrb[10].mxu0 %v235_v50 }
  0x4e   : > { %752 = vmatprep.mubr.msk.f32.mxu0 %vm266_vm0, %v238_v51 }
  0x51   : > { %390 = vmatmul.mubr.f32.gmra.mrb[12].mxu0 %v237_v52 }
  0x52   : > { %753 = vmatprep.mubr.msk.f32.mxu0 %vm266_vm0, %v240_v53 }
  0x55   : > { %395 = vmatmul.mubr.f32.gmra.mrb[14].mxu0 %v239_v54 }
 0x10c   : > { %v1103_v4 = vpop.f32.mrb[0].mxu0 }
 0x10d   : > { %v363_v5 = vpop.f32.mrb[1].mxu0  ;;  %v422_v6 = vmul.f32 %v1103_v4, %v1103_v4  ;;  %v401_v8 = vsel %vm400_vm3, %v1103_v4, 0.0 }
 0x10f   : > { %v430_v13 = vsel %vm400_vm3, %v422_v6, 0.0 }
 0x110   : > { %v1107_v7 = vpop.f32.mrb[2].mxu0 }
 0x111   : > { %v402_v9 = vsel %vm400_vm3, %v1107_v7, 0.0  ;;  %v423_v10 = vmul.f32 %v1107_v7, %v1107_v7  ;;  %v368_v11 = vpop.f32.mrb[3].mxu0 }
 0x112   : > { %v403_v12 = vadd.f32 %v402_v9, %v401_v8 }
 0x113   : > { %v431_v14 = vsel %vm400_vm3, %v423_v10, 0.0 }
 0x114   : > { %v432_v15 = vadd.f32 %v431_v14, %v430_v13  ;;  %v1117_v16 = vpop.f32.mrb[4].mxu0 }
 0x115   : > { %v404_v17 = vsel %vm400_vm3, %v1117_v16, 0.0  ;;  %v424_v18 = vmul.f32 %v1117_v16, %v1117_v16  ;;  %v373_v19 = vpop.f32.mrb[5].mxu0 }
 0x116   : > { %v405_v20 = vadd.f32 %v404_v17, %v403_v12 }
 0x117   : > { %v433_v21 = vsel %vm400_vm3, %v424_v18, 0.0 }
 0x118   : > { %v434_v22 = vadd.f32 %v433_v21, %v432_v15  ;;  %v1124_v23 = vpop.f32.mrb[6].mxu0 }
 0x119   : > { %v406_v24 = vsel %vm400_vm3, %v1124_v23, 0.0  ;;  %v425_v25 = vmul.f32 %v1124_v23, %v1124_v23  ;;  %v378_v26 = vpop.f32.mrb[7].mxu0 }
 0x11a   : > { %v407_v27 = vadd.f32 %v406_v24, %v405_v20 }
 0x11b   : > { %v435_v28 = vsel %vm400_vm3, %v425_v25, 0.0 }
 0x11c   : > { %v436_v29 = vadd.f32 %v435_v28, %v434_v22  ;;  %v1131_v30 = vpop.f32.mrb[8].mxu0 }
 0x11d   : > { %v408_v31 = vsel %vm400_vm3, %v1131_v30, 0.0  ;;  %v426_v32 = vmul.f32 %v1131_v30, %v1131_v30  ;;  %v383_v33 = vpop.f32.mrb[9].mxu0 }
 0x11e   : > { %v409_v34 = vadd.f32 %v408_v31, %v407_v27 }
 0x11f   : > { %v437_v35 = vsel %vm400_vm3, %v426_v32, 0.0 }
 0x120   : > { %v438_v36 = vadd.f32 %v437_v35, %v436_v29  ;;  %v1138_v37 = vpop.f32.mrb[10].mxu0 }
 0x121   : > { %v410_v39 = vsel %vm400_vm3, %v1138_v37, 0.0  ;;  %v427_v40 = vmul.f32 %v1138_v37, %v1138_v37  ;;  %v388_v41 = vpop.f32.mrb[11].mxu0 }
 0x122   : > { %v411_v42 = vadd.f32 %v410_v39, %v409_v34  ;;  %v757_v39 = vld [vmem:[%s1196_s3] ss:$0 sm:$0xff] }
 0x123   : > { %v439_v43 = vsel %vm400_vm3, %v427_v40, 0.0 }
 0x124   : > { %v440_v44 = vadd.f32 %v439_v43, %v438_v36  ;;  %v1145_v45 = vpop.f32.mrb[12].mxu0 }
 0x125   : > { %v412_v46 = vsel %vm400_vm3, %v1145_v45, 0.0  ;;  %v428_v47 = vmul.f32 %v1145_v45, %v1145_v45  ;;  %v393_v48 = vpop.f32.mrb[13].mxu0 }
 0x126   : > { %v413_v49 = vadd.f32 %v412_v46, %v411_v42 }
 0x127   : > { %v441_v50 = vsel %vm400_vm3, %v428_v47, 0.0 }
 0x128   : > { %v442_v51 = vadd.f32 %v441_v50, %v440_v44  ;;  %v396_v52 = vpop.f32.mrb[14].mxu0 }
 0x129   : > { %v414_v53 = vsel %vm400_vm3, %v396_v52, 0.0  ;;  %v429_v54 = vmul.f32 %v396_v52, %v396_v52  ;;  %v398_v55 = vpop.f32.mrb[15].mxu0 }
 0x12a   : > { %v415_v56 = vadd.f32 %v414_v53, %v413_v49 }
 0x12b   : > { %v443_v58 = vsel %vm400_vm3, %v429_v54, 0.0 }
 0x12c   : > { %v416_v59 = vrot.slane %v415_v56, 4  ;;  %v444_v61 = vadd.f32 %v443_v58, %v442_v51 }
 0x12e   : > { %v417_v62 = vadd.f32 %v416_v59, %v415_v56  ;;  %v445_v5 = vrot.slane %v444_v61, 4 }
 0x130   : > { %v418_v0 = vrot.slane %v417_v62, 2  ;;  %v446_v8 = vadd.f32 %v445_v5, %v444_v61 }
 0x132   : > { %v419_v1 = vadd.f32 %v418_v0, %v417_v62  ;;  %v447_v10 = vrot.slane %v446_v8, 2 }
 0x134   : > { %v420_v6 = vrot.slane %v419_v1, 1  ;;  %v448_v11 = vadd.f32 %v447_v10, %v446_v8 }
 0x136   : > { %v421_v9 = vadd.f32 %v420_v6, %v419_v1  ;;  %v449_v12 = vrot.slane %v448_v11, 1 }
 0x138   : > { %797 = vmatmul.mubr.msk.f32.vlgmr.msra.gmra.mrb[0].mxu1 %vm400_vm3, %v421_v9  ;;  %v450_v13 = vadd.f32 %v449_v12, %v448_v11 }
 0x139   : > { %868 = vmatpush3.bf16.msra.mxu1 %v1067_v57  ;;  %815 = vmatprep.mubr.msk.f32.mxu1 %vm901_vm2, %v900_v38  ;;  %v609_v57 = vlaneseq }
 0x13a   : > { %869 = vmatprep.subr.bf16.mxu1 %v899_v3 }
 0x13b   : > { %v610_v38 = vshrl.u32 %v609_v57, 7 }
 0x13d   : > { %871 = vmatpush3.bf16.msra.mxu1 %v1077_v60  ;;  %v611_v14 = vsub.s32 0, %v610_v38 }
 0x13e   : > { %872 = vmatprep.subr.bf16.mxu1 %v899_v3 }
 0x141   : > { %874 = vmatpush3.bf16.msra.mxu1 %v1087_v63 }
 0x142   : > { %875 = vmatprep.subr.bf16.mxu1 %v899_v3 }
 0x145   : > { %877 = vmatpush3.bf16.msra.mxu1 %v1097_v2 }
 0x148   : > { %816 = vmatmul.mubr.msk.f32.vlgmr.msra.gmra.mrb[2].mxu1 %vm400_vm3, %v450_v13 }
 0x20b   : > { %v528_v15 = vpop.f32.mrb[0].mxu1 }
 0x20c   : > { %v605_v17 = vmul.f32 0.0078125, %v528_v15  ;;  %v798_v18 = vpop.f32.mrb[1].mxu1 }
 0x20e   : > { %v612_v60 = vrot.slane %v605_v17, %v611_v14  ;;  %v607_v26 = vmul.f32 %v605_v17, %v605_v17 }
 0x210   : > { %v613_v19 = vsub.f32 %v1103_v4, %v612_v60  ;;  %v614_v20 = vsub.f32 %v1107_v7, %v612_v60  ;;  %v615_v63 = vsub.f32 %v1117_v16, %v612_v60  ;;  %v616_v3 = vsub.f32 %v1124_v23, %v612_v60  ;;  %v756_v16 = vld [vmem:[%s1195_s2] ss:$0 sm:$0xff] }
 0x211   : > { %v617_v2 = vsub.f32 %v1131_v30, %v612_v60  ;;  %v618_v21 = vsub.f32 %v1138_v37, %v612_v60  ;;  %v619_v22 = vsub.f32 %v1145_v45, %v612_v60  ;;  %v620_v24 = vsub.f32 %v396_v52, %v612_v60 }
 0x21b   : > { %v601_v25 = vpop.f32.mrb[2].mxu1 }
 0x21c   : > { %v606_v27 = vmul.f32 0.0078125, %v601_v25  ;;  %v817_v28 = vpop.f32.mrb[3].mxu1 }
 0x21e   : > { %v608_v29 = vsub.f32 %v606_v27, %v607_v26 }
 0x220   : > { %v621_v4 = vadd.f32 1e-05, %v608_v29 }
 0x222   : > { %889 = vrsqrt.f32 %v621_v4 }
 0x22c   : > { %v890_v7 = vpop.eup %889 }
 0x22d   : > { %v626_v31 = vrot.slane %v890_v7, %v611_v14 }
 0x22f   : > { %v627_v23 = vmul.f32 %v626_v31, %v613_v19  ;;  %v628_v30 = vmul.f32 %v626_v31, %v614_v20  ;;  %v629_v32 = vmul.f32 %v626_v31, %v615_v63  ;;  %v630_v33 = vmul.f32 %v626_v31, %v616_v3 }
 0x230   : > { %v631_v34 = vmul.f32 %v626_v31, %v617_v2  ;;  %v632_v35 = vmul.f32 %v626_v31, %v618_v21  ;;  %v633_v36 = vmul.f32 %v626_v31, %v619_v22  ;;  %v634_v37 = vmul.f32 %v626_v31, %v620_v24 }
 0x231   : > { %v642_v40 = vmul.f32 %v756_v16, %v627_v23  ;;  %v643_v41 = vmul.f32 %v756_v16, %v628_v30  ;;  %v644_v42 = vmul.f32 %v756_v16, %v629_v32  ;;  %v645_v43 = vmul.f32 %v756_v16, %v630_v33 }
 0x232   : > { %v646_v44 = vmul.f32 %v756_v16, %v631_v34  ;;  %v647_v45 = vmul.f32 %v756_v16, %v632_v35  ;;  %v648_v46 = vmul.f32 %v756_v16, %v633_v36  ;;  %v649_v47 = vmul.f32 %v756_v16, %v634_v37 }
 0x233   : > { %v657_v48 = vadd.f32 %v757_v39, %v642_v40  ;;  %v658_v49 = vadd.f32 %v757_v39, %v643_v41  ;;  %v659_v50 = vadd.f32 %v757_v39, %v644_v42  ;;  %v660_v51 = vadd.f32 %v757_v39, %v645_v43 }
 0x234   : > { %v661_v52 = vadd.f32 %v757_v39, %v646_v44  ;;  %v662_v53 = vadd.f32 %v757_v39, %v647_v45  ;;  %v663_v54 = vadd.f32 %v757_v39, %v648_v46  ;;  %v664_v55 = vadd.f32 %v757_v39, %v649_v47 }
 0x235   : > { %v665_v56 = vmax.f32 %v657_v48, 0.0  ;;  %v666_v58 = vmax.f32 %v658_v49, 0.0  ;;  %v667_v59 = vmax.f32 %v659_v50, 0.0  ;;  %v668_v61 = vmax.f32 %v660_v51, 0.0 }
 0x236   : > { %v669_v62 = vmax.f32 %v661_v52, 0.0  ;;  %v670_v0 = vmax.f32 %v662_v53, 0.0  ;;  %v671_v1 = vmax.f32 %v663_v54, 0.0  ;;  %v672_v5 = vmax.f32 %v664_v55, 0.0 }
 0x237   : > { %673 = vst.msk [vmem:[%s224_s29] sm:$0xff] %vm400_vm3, %v665_v56  ;;  %674 = vst.msk [vmem:[%s224_s29 + $0x8] sm:$0xff] %vm400_vm3, %v666_v58 }
 0x238   : > { %675 = vst.msk [vmem:[%s224_s29 + $0x10] sm:$0xff] %vm400_vm3, %v667_v59  ;;  %676 = vst.msk [vmem:[%s224_s29 + $0x18] sm:$0xff] %vm400_vm3, %v668_v61 }
 0x239   : > { %677 = vst.msk [vmem:[%s224_s29 + $0x20] sm:$0xff] %vm400_vm3, %v669_v62  ;;  %678 = vst.msk [vmem:[%s224_s29 + $0x28] sm:$0xff] %vm400_vm3, %v670_v0 }
 0x23a   : > { %679 = vst.msk [vmem:[%s224_s29 + $0x30] sm:$0xff] %vm400_vm3, %v671_v1  ;;  %680 = vst.msk [vmem:[%s224_s29 + $0x38] sm:$0xff] %vm400_vm3, %v672_v5 }
 0x23b PF: > { %s15_s18 = sadd.s32 1, %s897_s18  }
 0x23c   : > { %p12_p4 = scmp.ge.s32.totalorder %s15_s18, 4  }
 0x23e   :  { %14 = sbr.rel (!%p12_p4) target bundleno = 1 (0x1), region = 70 }

// kernel: forward.11
= control target key start
LH: loop header
LB: loop body
LE: loop exit
PB: predicated region body
PF: predicated region fallthrough
CT: control target
= control target key end

     0   :  { %s118_s0 = inlined_call_operand.vmem [shape: f32[9,16,128], index: 0, kind: input, shape index: {}]   ;;  %s119_s1 = inlined_call_operand.vmem [shape: f32[16,128], index: 1, kind: output, shape index: {}]  }
   0x1   :  { %v8_v0 = vld [vmem:[%s118_s0] sm:$0xff]  ;;  %v10_v1 = vld [vmem:[%s118_s0 + $0x10] sm:$0xff]  ;;  %v9_v12 = vld [vmem:[%s118_s0 + $0x8] sm:$0xff] }
   0x2   :  { %v12_v2 = vld [vmem:[%s118_s0 + $0x20] sm:$0xff]  ;;  %v14_v3 = vld [vmem:[%s118_s0 + $0x30] sm:$0xff]  ;;  %v11_v13 = vld [vmem:[%s118_s0 + $0x18] sm:$0xff] }
   0x3   :  { %v16_v4 = vld [vmem:[%s118_s0 + $0x40] sm:$0xff]  ;;  %v18_v5 = vld [vmem:[%s118_s0 + $0x50] sm:$0xff]  ;;  %v26_v6 = vmax.f32 %v8_v0, %v12_v2  ;;  %v27_v10 = vmax.f32 %v10_v1, %v14_v3  ;;  %v13_v14 = vld [vmem:[%s118_s0 + $0x28] sm:$0xff] }
   0x4   :  { %v20_v7 = vld [vmem:[%s118_s0 + $0x60] sm:$0xff]  ;;  %v22_v8 = vld [vmem:[%s118_s0 + $0x70] sm:$0xff]  ;;  %v15_v16 = vld [vmem:[%s118_s0 + $0x38] sm:$0xff]  ;;  %v34_v19 = vmax.f32 %v9_v12, %v13_v14 }
   0x5   :  { %v24_v9 = vld [vmem:[%s118_s0 + $0x80] sm:$0xff]  ;;  %v28_v11 = vmax.f32 %v26_v6, %v16_v4  ;;  %v29_v15 = vmax.f32 %v27_v10, %v18_v5  ;;  %v17_v17 = vld [vmem:[%s118_s0 + $0x48] sm:$0xff]  ;;  %v19_v18 = vld [vmem:[%s118_s0 + $0x58] sm:$0xff]  ;;  %v35_v22 = vmax.f32 %v11_v13, %v15_v16 }
   0x6   :  { %v21_v21 = vld [vmem:[%s118_s0 + $0x68] sm:$0xff]  ;;  %v23_v24 = vld [vmem:[%s118_s0 + $0x78] sm:$0xff]  ;;  %v36_v25 = vmax.f32 %v34_v19, %v17_v17 }
   0x7   :  { %v30_v20 = vmax.f32 %v28_v11, %v20_v7  ;;  %v31_v23 = vmax.f32 %v29_v15, %v22_v8  ;;  %v25_v27 = vld [vmem:[%s118_s0 + $0x88] sm:$0xff]  ;;  %v37_v28 = vmax.f32 %v35_v22, %v19_v18 }
   0x8   :  { %v38_v29 = vmax.f32 %v36_v25, %v21_v21 }
   0x9   :  { %v32_v26 = vmax.f32 %v30_v20, %v24_v9  ;;  %v39_v31 = vmax.f32 %v37_v28, %v23_v24 }
   0xa   :  { %v40_v32 = vmax.f32 %v38_v29, %v25_v27 }
   0xb   :  { %v33_v30 = vmax.f32 %v32_v26, %v31_v23 }
   0xc   :  { %v41_v33 = vmax.f32 %v40_v32, %v39_v31 }
   0xd   :  { %42 = vst [vmem:[%s119_s1] sm:$0xff] %v33_v30 }
   0xe   :  { %43 = vst [vmem:[%s119_s1 + $0x8] sm:$0xff] %v41_v33 }

// kernel: forward.12
= control target key start
LH: loop header
LB: loop body
LE: loop exit
PB: predicated region body
PF: predicated region fallthrough
CT: control target
= control target key end

     0   :  { %s1145_s18 = smov 0   ;;  %s1444_s0 = inlined_call_operand.vmem [shape: f32[2,16,576], index: 0, kind: input, shape index: {}]   ;;  %s1445_s1 = inlined_call_operand.vmem [shape: f32[576,64], index: 1, kind: input, shape index: {}]   ;;  %s1446_s2 = inlined_call_operand.vmem [shape: f32[1,64], index: 2, kind: input, shape index: {}]   ;;  %s1447_s3 = inlined_call_operand.vmem [shape: f32[1,64], index: 3, kind: input, shape index: {}]   ;;  %s1448_s4 = inlined_call_operand.vmem [shape: f32[64,64], index: 4, kind: input, shape index: {}]   ;;  %s1449_s5 = inlined_call_operand.vmem [shape: f32[2,16,64], index: 5, kind: output, shape index: {}]  }
   0x1 LB: > { %s808_s19 = sadd.s32 4294967295, %s1110_s18   ;;  %p812_p0 = scmp.ge.s32.totalorder %s1110_s18, 1  ;;  %s1110_s18 = sphi %s1145_s18, %s15_s18  }
   0x2   : > { %p187_p1 = scmp.lt.s32.totalorder %s1110_s18, 3 }
   0x4   : > { %p188_p2 = pnand %p812_p0, %p187_p1 }
   0x5   : > { %v251_v0 = vld [vmem:[%s1445_s1 + $0x80] sm:$0xff] (!%p188_p2)  ;;  %v252_v1 = vld [vmem:[%s1445_s1 + $0x88] sm:$0xff] (!%p188_p2)  ;;  %v253_v11 = vld [vmem:[%s1445_s1 + $0x90] sm:$0xff] (!%p188_p2)  ;;  %p1218_p3 = scmp.lt.s32.totalorder (!%p188_p2), %s808_s19, 1  ;;  %vm307_vm0 = vcmask (!%p188_p2), 523264   ;;  %vm1113_vm1 = vmmov (!%p188_p2), 0  }
   0x6   : > { %191 = sbr.rel (%p188_p2) target bundleno = 529 (0x211), region = 40  ;;  %v283_v2 = vld [vmem:[%s1445_s1 + $0x180] sm:$0xff] (!%p188_p2)  ;;  %v986_v3 = vpack.c.bf16 (!%p188_p2), %v252_v1, %v251_v0  ;;  %v284_v4 = vld [vmem:[%s1445_s1 + $0x188] sm:$0xff] (!%p188_p2)  ;;  %v254_v13 = vld [vmem:[%s1445_s1 + $0x98] sm:$0xff] (!%p188_p2) }
   0x7   : > { %v235_v5 = vld [vmem:[%s1445_s1] sm:$0xff] (!%p188_p2)  ;;  %v236_v6 = vld [vmem:[%s1445_s1 + $0x8] sm:$0xff] (!%p188_p2)  ;;  %v1018_v7 = vpack.c.bf16 (!%p188_p2), %v284_v4, %v283_v2  ;;  %v285_v14 = vld [vmem:[%s1445_s1 + $0x190] sm:$0xff] (!%p188_p2)  ;;  %v990_v16 = vpack.c.bf16 (!%p188_p2), %v254_v13, %v253_v11 }
   0x8   : > { %v988_v8 = vpack.c.bf16 (!%p188_p2), %v236_v6, %v235_v5  ;;  %v267_v9 = vld [vmem:[%s1445_s1 + $0x100] sm:$0xff] (!%p188_p2)  ;;  %v268_v10 = vld [vmem:[%s1445_s1 + $0x108] sm:$0xff] (!%p188_p2)  ;;  %987 = vmatprep.subr.bf16.mxu0 (!%p188_p2), %v986_v3  ;;  %v286_v15 = vld [vmem:[%s1445_s1 + $0x198] sm:$0xff] (!%p188_p2) }
   0x9   : > { %v1020_v12 = vpack.c.bf16 (!%p188_p2), %v268_v10, %v267_v9  ;;  %1019 = vmatprep.subr.bf16.mxu1 (!%p188_p2), %v1018_v7  ;;  %v1022_v17 = vpack.c.bf16 (!%p188_p2), %v286_v15, %v285_v14  ;;  %v237_v18 = vld [vmem:[%s1445_s1 + $0x10] sm:$0xff] (!%p188_p2)  ;;  %v238_v19 = vld [vmem:[%s1445_s1 + $0x18] sm:$0xff] (!%p188_p2)  ;;  %v255_v23 = vld [vmem:[%s1445_s1 + $0xa0] sm:$0xff] (!%p188_p2) }
   0xa   : > { %989 = vmatpush3.bf16.msra.mxu0 (!%p188_p2), %v988_v8  ;;  %v269_v20 = vld [vmem:[%s1445_s1 + $0x110] sm:$0xff] (!%p188_p2)  ;;  %v992_v21 = vpack.c.bf16 (!%p188_p2), %v238_v19, %v237_v18  ;;  %v270_v22 = vld [vmem:[%s1445_s1 + $0x118] sm:$0xff] (!%p188_p2)  ;;  %v256_v24 = vld [vmem:[%s1445_s1 + $0xa8] sm:$0xff] (!%p188_p2) }
   0xb   : > { %1021 = vmatpush3.bf16.msra.mxu1 (!%p188_p2), %v1020_v12  ;;  %991 = vmatprep.subr.bf16.mxu0 (!%p188_p2), %v990_v16  ;;  %v1024_v25 = vpack.c.bf16 (!%p188_p2), %v270_v22, %v269_v20  ;;  %v994_v26 = vpack.c.bf16 (!%p188_p2), %v256_v24, %v255_v23  ;;  %v287_v27 = vld [vmem:[%s1445_s1 + $0x1a0] sm:$0xff] (!%p188_p2)  ;;  %v288_v28 = vld [vmem:[%s1445_s1 + $0x1a8] sm:$0xff] (!%p188_p2)  ;;  %v257_v35 = vld [vmem:[%s1445_s1 + $0xb0] sm:$0xff] (!%p188_p2) }
   0xc   : > { %1023 = vmatprep.subr.bf16.mxu1 (!%p188_p2), %v1022_v17  ;;  %v239_v29 = vld [vmem:[%s1445_s1 + $0x20] sm:$0xff] (!%p188_p2)  ;;  %v1026_v30 = vpack.c.bf16 (!%p188_p2), %v288_v28, %v287_v27  ;;  %v240_v31 = vld [vmem:[%s1445_s1 + $0x28] sm:$0xff] (!%p188_p2)  ;;  %v258_v36 = vld [vmem:[%s1445_s1 + $0xb8] sm:$0xff] (!%p188_p2) }
   0xd   : > { %v271_v32 = vld [vmem:[%s1445_s1 + $0x120] sm:$0xff]  ;;  %v272_v33 = vld [vmem:[%s1445_s1 + $0x128] sm:$0xff]  ;;  %v996_v34 = vpack.c.bf16 %v240_v31, %v239_v29  ;;  %v289_v37 = vld [vmem:[%s1445_s1 + $0x1b0] sm:$0xff]  ;;  %v998_v39 = vpack.c.bf16 %v258_v36, %v257_v35  ;;  %s1452_s19 = smov (!%p1218_p3, %s808_s19), 1 }
   0xe   : > { %993 = vmatpush3.bf16.msra.mxu0 %v992_v21  ;;  %v1028_v38 = vpack.c.bf16 %v272_v33, %v271_v32  ;;  %v290_v40 = vld [vmem:[%s1445_s1 + $0x1b8] sm:$0xff]  ;;  %v241_v41 = vld [vmem:[%s1445_s1 + $0x30] sm:$0xff]  ;;  %v259_v46 = vld [vmem:[%s1445_s1 + $0xc0] sm:$0xff]  ;;  %s1090_s11 = smul.u32 80, %s1452_s19  ;;  %s824_s29 = sshll.u32 %s1452_s19, 4 }
   0xf   : > { %1025 = vmatpush3.bf16.msra.mxu1 %v1024_v25  ;;  %995 = vmatprep.subr.bf16.mxu0 %v994_v26  ;;  %v242_v42 = vld [vmem:[%s1445_s1 + $0x38] sm:$0xff]  ;;  %v1030_v43 = vpack.c.bf16 %v290_v40, %v289_v37  ;;  %v273_v44 = vld [vmem:[%s1445_s1 + $0x130] sm:$0xff]  ;;  %v260_v47 = vld [vmem:[%s1445_s1 + $0xc8] sm:$0xff]  ;;  %s224_s8 = scalar_lea.vmem %s1449_s5, %s824_s29 }
  0x10   : > { %1027 = vmatprep.subr.bf16.mxu1 %v1026_v30  ;;  %v274_v45 = vld [vmem:[%s1445_s1 + $0x138] sm:$0xff]  ;;  %v291_v48 = vld [vmem:[%s1445_s1 + $0x1c0] sm:$0xff]  ;;  %v292_v49 = vld [vmem:[%s1445_s1 + $0x1c8] sm:$0xff]  ;;  %v1000_v50 = vpack.c.bf16 %v242_v42, %v241_v41  ;;  %v1002_v52 = vpack.c.bf16 %v260_v47, %v259_v46  ;;  %s1319_s7 = scalar_lea.vmem %s1444_s0, %s1090_s11 }
  0x11   : > { %v1032_v51 = vpack.c.bf16 %v274_v45, %v273_v44  ;;  %v243_v53 = vld [vmem:[%s1445_s1 + $0x40] sm:$0xff]  ;;  %v244_v54 = vld [vmem:[%s1445_s1 + $0x48] sm:$0xff]  ;;  %v1034_v56 = vpack.c.bf16 %v292_v49, %v291_v48  ;;  %v261_v58 = vld [vmem:[%s1445_s1 + $0xd0] sm:$0xff] }
  0x12   : > { %997 = vmatpush3.bf16.msra.mxu0 %v996_v34  ;;  %v275_v55 = vld [vmem:[%s1445_s1 + $0x140] sm:$0xff]  ;;  %v276_v57 = vld [vmem:[%s1445_s1 + $0x148] sm:$0xff]  ;;  %v262_v59 = vld [vmem:[%s1445_s1 + $0xd8] sm:$0xff]  ;;  %v1004_v62 = vpack.c.bf16 %v244_v54, %v243_v53 }
  0x13   : > { %1029 = vmatpush3.bf16.msra.mxu1 %v1028_v38  ;;  %999 = vmatprep.subr.bf16.mxu0 %v998_v39  ;;  %v293_v60 = vld [vmem:[%s1445_s1 + $0x1d0] sm:$0xff]  ;;  %v294_v61 = vld [vmem:[%s1445_s1 + $0x1d8] sm:$0xff]  ;;  %v1036_v63 = vpack.c.bf16 %v276_v57, %v275_v55  ;;  %v1006_v0 = vpack.c.bf16 %v262_v59, %v261_v58  ;;  %v263_v6 = vld [vmem:[%s1445_s1 + $0xe0] sm:$0xff]  ;;  %v1112_v57 = vmov 0.0|0.0  }
  0x14   : > { %1031 = vmatprep.subr.bf16.mxu1 %v1030_v43  ;;  %v245_v1 = vld [vmem:[%s1445_s1 + $0x50] sm:$0xff]  ;;  %v246_v2 = vld [vmem:[%s1445_s1 + $0x58] sm:$0xff]  ;;  %v1038_v4 = vpack.c.bf16 %v294_v61, %v293_v60  ;;  %v264_v7 = vld [vmem:[%s1445_s1 + $0xe8] sm:$0xff] }
  0x15   : > { %v277_v3 = vld [vmem:[%s1445_s1 + $0x150] sm:$0xff]  ;;  %v278_v5 = vld [vmem:[%s1445_s1 + $0x158] sm:$0xff]  ;;  %v295_v8 = vld [vmem:[%s1445_s1 + $0x1e0] sm:$0xff]  ;;  %v1008_v10 = vpack.c.bf16 %v246_v2, %v245_v1  ;;  %v1010_v14 = vpack.c.bf16 %v264_v7, %v263_v6 }
  0x16   : > { %1001 = vmatpush3.bf16.msra.mxu0 %v1000_v50  ;;  %v296_v9 = vld [vmem:[%s1445_s1 + $0x1e8] sm:$0xff]  ;;  %v247_v11 = vld [vmem:[%s1445_s1 + $0x60] sm:$0xff]  ;;  %v1040_v13 = vpack.c.bf16 %v278_v5, %v277_v3  ;;  %v228_v17 = vld [vmem:[%s1319_s7 + $0x18] sm:$0xff]  ;;  %v1114_v3 = vmov 0.0  }
  0x17   : > { %1033 = vmatpush3.bf16.msra.mxu1 %v1032_v51  ;;  %1003 = vmatprep.subr.bf16.mxu0 %v1002_v52  ;;  %v248_v12 = vld [vmem:[%s1445_s1 + $0x68] sm:$0xff]  ;;  %v279_v15 = vld [vmem:[%s1445_s1 + $0x160] sm:$0xff]  ;;  %v1042_v18 = vpack.c.bf16 %v296_v9, %v295_v8  ;;  %v265_v20 = vld [vmem:[%s1445_s1 + $0xf0] sm:$0xff] }
  0x18   : > { %1035 = vmatprep.subr.bf16.mxu1 %v1034_v56  ;;  %v226_v16 = vld [vmem:[%s1319_s7 + $0x8] sm:$0xff]  ;;  %v266_v21 = vld [vmem:[%s1445_s1 + $0xf8] sm:$0xff]  ;;  %v297_v22 = vld [vmem:[%s1445_s1 + $0x1f0] sm:$0xff]  ;;  %453 = vmatprep.mubr.f32.mxu1 %v228_v17  ;;  %v1012_v24 = vpack.c.bf16 %v248_v12, %v247_v11 }
  0x19   : > { %v280_v19 = vld [vmem:[%s1445_s1 + $0x168] sm:$0xff]  ;;  %378 = vmatprep.mubr.f32.mxu0 %v226_v16  ;;  %v298_v23 = vld [vmem:[%s1445_s1 + $0x1f8] sm:$0xff]  ;;  %v1014_v26 = vpack.c.bf16 %v266_v21, %v265_v20  ;;  %v249_v27 = vld [vmem:[%s1445_s1 + $0x70] sm:$0xff] }
  0x1a   : > { %1005 = vmatpush3.bf16.msra.mxu0 %v1004_v62  ;;  %v1044_v25 = vpack.c.bf16 %v280_v19, %v279_v15  ;;  %v250_v28 = vld [vmem:[%s1445_s1 + $0x78] sm:$0xff]  ;;  %v281_v29 = vld [vmem:[%s1445_s1 + $0x170] sm:$0xff]  ;;  %v1046_v30 = vpack.c.bf16 %v298_v23, %v297_v22  ;;  %v299_v32 = vld [vmem:[%s1445_s1 + $0x200] sm:$0xff] }
  0x1b   : > { %1037 = vmatpush3.bf16.msra.mxu1 %v1036_v63  ;;  %1007 = vmatprep.subr.bf16.mxu0 %v1006_v0  ;;  %v282_v31 = vld [vmem:[%s1445_s1 + $0x178] sm:$0xff]  ;;  %v300_v33 = vld [vmem:[%s1445_s1 + $0x208] sm:$0xff]  ;;  %v1016_v34 = vpack.c.bf16 %v250_v28, %v249_v27  ;;  %v301_v37 = vld [vmem:[%s1445_s1 + $0x210] sm:$0xff] }
  0x1c   : > { %1039 = vmatprep.subr.bf16.mxu1 %v1038_v4  ;;  %v1048_v35 = vpack.c.bf16 %v282_v31, %v281_v29  ;;  %v1050_v36 = vpack.c.bf16 %v300_v33, %v299_v32  ;;  %v302_v38 = vld [vmem:[%s1445_s1 + $0x218] sm:$0xff]  ;;  %v225_v39 = vld [vmem:[%s1319_s7] sm:$0xff]  ;;  %v227_v40 = vld [vmem:[%s1319_s7 + $0x10] sm:$0xff] }
  0x1d   : > { %v1054_v41 = vpack.c.bf16 %v302_v38, %v301_v37  ;;  %v303_v42 = vld [vmem:[%s1445_s1 + $0x220] sm:$0xff]  ;;  %v304_v43 = vld [vmem:[%s1445_s1 + $0x228] sm:$0xff]  ;;  %v231_v44 = vld [vmem:[%s1319_s7 + $0x30] sm:$0xff] }
  0x1e   : > { %1009 = vmatpush3.bf16.msra.mxu0 %v1008_v10  ;;  %v233_v45 = vld [vmem:[%s1319_s7 + $0x40] sm:$0xff]  ;;  %v230_v46 = vld [vmem:[%s1319_s7 + $0x28] sm:$0xff]  ;;  %v1058_v47 = vpack.c.bf16 %v304_v43, %v303_v42  ;;  %v232_v48 = vld [vmem:[%s1319_s7 + $0x38] sm:$0xff] }
  0x1f   : > { %1041 = vmatpush3.bf16.msra.mxu1 %v1040_v13  ;;  %1011 = vmatprep.subr.bf16.mxu0 %v1010_v14  ;;  %v305_v49 = vld [vmem:[%s1445_s1 + $0x230] sm:$0xff]  ;;  %v306_v50 = vld [vmem:[%s1445_s1 + $0x238] sm:$0xff]  ;;  %v229_v51 = vld [vmem:[%s1319_s7 + $0x20] sm:$0xff] }
  0x20   : > { %1043 = vmatprep.subr.bf16.mxu1 %v1042_v18  ;;  %v1062_v52 = vpack.c.bf16 %v306_v50, %v305_v49  ;;  %v234_v53 = vld [vmem:[%s1319_s7 + $0x48] sm:$0xff]  ;;  %v559_v54 = vld [vmem:[%s1448_s4] sm:$0xff]  ;;  %v561_v58 = vld [vmem:[%s1448_s4 + $0x10] sm:$0xff]  ;;  %v717_v49 = vlaneseq }
  0x21   : > { %v560_v55 = vld [vmem:[%s1448_s4 + $0x8] sm:$0xff]  ;;  %v562_v59 = vld [vmem:[%s1448_s4 + $0x18] sm:$0xff]  ;;  %v563_v61 = vld [vmem:[%s1448_s4 + $0x20] sm:$0xff] }
  0x22   : > { %1013 = vmatpush3.bf16.msra.mxu0 %v1012_v24  ;;  %v1067_v56 = vpack.c.bf16 %v560_v55, %v559_v54  ;;  %v1070_v60 = vpack.c.bf16 %v562_v59, %v561_v58  ;;  %v564_v62 = vld [vmem:[%s1448_s4 + $0x28] sm:$0xff]  ;;  %v565_v0 = vld [vmem:[%s1448_s4 + $0x30] sm:$0xff]  ;;  %v566_v1 = vld [vmem:[%s1448_s4 + $0x38] sm:$0xff] }
  0x23   : > { %1045 = vmatpush3.bf16.msra.mxu1 %v1044_v25  ;;  %1015 = vmatprep.subr.bf16.mxu0 %v1014_v26  ;;  %v1073_v63 = vpack.c.bf16 %v564_v62, %v563_v61  ;;  %v1076_v2 = vpack.c.bf16 %v566_v1, %v565_v0  ;;  %v820_v59 = vld [vmem:[%s1446_s2] ss:$0 sm:$0xff] }
  0x24   : > { %1047 = vmatprep.subr.bf16.mxu1 %v1046_v30  ;;  %v821_v62 = vld [vmem:[%s1447_s3] ss:$0 sm:$0xff] }
  0x26   : > { %1017 = vmatpush3.bf16.msra.mxu0 %v1016_v34 }
  0x27   : > { %1049 = vmatpush3.bf16.msra.mxu1 %v1048_v35  ;;  %1051 = vmatprep.subr.bf16.mxu0 %v1050_v36 }
  0x28   : > { %1066 = vmatprep.subr.bf16.mxu1 %v1112_v57 }
  0x29   : > { %379 = vmatmul.mubr.f32.vlgmr.msra.gmra.mrb[0].mxu0 %v225_v39 }
  0x2a   : > { %454 = vmatmul.mubr.f32.vlgmr.msra.gmra.mrb[0].mxu1 %v227_v40  ;;  %1053 = vmatpush3.bf16.msra.mxu0 %v1050_v36 }
  0x2b   : > { %1055 = vmatprep.subr.bf16.mxu0 %v1054_v41  ;;  %383 = vmatprep.mubr.f32.mxu0 %v231_v44 }
  0x2c   : > { %458 = vmatprep.mubr.f32.mxu1 %v233_v45  ;;  %1068 = vmatpush3.bf16.msra.mxu1 %v1067_v56 }
  0x2d   : > { %384 = vmatmul.mubr.f32.gmra.mrb[2].mxu0 %v230_v46  ;;  %1069 = vmatprep.subr.bf16.mxu1 %v1112_v57 }
  0x2e   : > { %1057 = vmatpush3.bf16.msra.mxu0 %v1054_v41  ;;  %459 = vmatmul.mubr.f32.gmra.mrb[2].mxu1 %v232_v48 }
  0x2f   : > { %1059 = vmatprep.subr.bf16.mxu0 %v1058_v47  ;;  %945 = vmatprep.mubr.msk.f32.mxu0 %vm307_vm0, %v229_v51 }
  0x30   : > { %1071 = vmatpush3.bf16.msra.mxu1 %v1070_v60  ;;  %964 = vmatprep.mubr.msk.f32.mxu1 %vm1113_vm1, %v1114_v3 }
  0x31   : > { %1072 = vmatprep.subr.bf16.mxu1 %v1112_v57 }
  0x32   : > { %1061 = vmatpush3.bf16.msra.mxu0 %v1058_v47 }
  0x33   : > { %1063 = vmatprep.subr.bf16.mxu0 %v1062_v52 }
  0x34   : > { %1074 = vmatpush3.bf16.msra.mxu1 %v1073_v63 }
  0x35   : > { %1075 = vmatprep.subr.bf16.mxu1 %v1112_v57 }
  0x36   : > { %1065 = vmatpush3.bf16.msra.mxu0 %v1062_v52  ;;  %v718_v52 = vshrl.u32 %v717_v49, 7 }
  0x37   : > { %1078 = vmatprep.subr.bf16.mxu0 %v1112_v57 }
  0x38   : > { %1077 = vmatpush3.bf16.msra.mxu1 %v1076_v2 }
  0x39   : > { %946 = vmatmul.mubr.msk.f32.vlgmr.msra.gmra.mrb[4].mxu0 %vm307_vm0, %v234_v53  ;;  %v719_v53 = vsub.s32 0, %v718_v52 }
  0x3a   : > { %1080 = vmatpush3.bf16.msra.mxu0 %v1067_v56  ;;  %983 = vmatprep.mubr.msk.f32.mxu0 %vm1113_vm1, %v1114_v3 }
  0x3b   : > { %1081 = vmatprep.subr.bf16.mxu0 %v1112_v57 }
  0x3e   : > { %1083 = vmatpush3.bf16.msra.mxu0 %v1070_v60 }
  0x3f   : > { %1084 = vmatprep.subr.bf16.mxu0 %v1112_v57 }
  0x42   : > { %1086 = vmatpush3.bf16.msra.mxu0 %v1073_v63 }
  0x43   : > { %1087 = vmatprep.subr.bf16.mxu0 %v1112_v57 }
  0x46   : > { %1089 = vmatpush3.bf16.msra.mxu0 %v1076_v2 }
  0xfc   : > { %v857_v4 = vpop.f32.mrb[0].mxu0 }
  0xfd   : > { %v895_v5 = vpop.f32.mrb[0].mxu1  ;;  %v858_v6 = vpop.f32.mrb[1].mxu0 }
  0xfe   : > { %v859_v7 = vadd.f32 %v858_v6, %v857_v4  ;;  %v896_v8 = vpop.f32.mrb[1].mxu1 }
  0xff   : > { %v897_v9 = vadd.f32 %v896_v8, %v895_v5 }
 0x100   : > { %v860_v10 = vpop.f32.mrb[2].mxu0 }
 0x101   : > { %v898_v11 = vpop.f32.mrb[2].mxu1  ;;  %v861_v12 = vpop.f32.mrb[3].mxu0  ;;  %v456_v13 = vadd.f32 %v897_v9, %v859_v7 }
 0x102   : > { %v862_v14 = vadd.f32 %v861_v12, %v860_v10  ;;  %v899_v15 = vpop.f32.mrb[3].mxu1 }
 0x103   : > { %v900_v16 = vadd.f32 %v899_v15, %v898_v11 }
 0x105   : > { %v461_v17 = vadd.f32 %v900_v16, %v862_v14 }
 0x10c   : > { %v947_v18 = vpop.f32.mrb[4].mxu0 }
 0x10d   : > { %v536_v19 = vadd.f32 %v947_v18, %v461_v17  ;;  %v530_v20 = vpop.f32.mrb[5].mxu0 }
 0x10e   : > { %v531_v21 = vadd.f32 %v530_v20, %v456_v13 }
 0x10f   : > { %v540_v22 = vsel %vm307_vm0, %v536_v19, 0.0  ;;  %v549_v23 = vmul.f32 %v536_v19, %v536_v19 }
 0x110   : > { %v539_v24 = vsel %vm307_vm0, %v531_v21, 0.0  ;;  %v548_v25 = vmul.f32 %v531_v21, %v531_v21 }
 0x111   : > { %v551_v26 = vsel %vm307_vm0, %v549_v23, 0.0  ;;  %v541_v27 = vadd.f32 %v540_v22, %v539_v24 }
 0x112   : > { %v550_v28 = vsel %vm307_vm0, %v548_v25, 0.0 }
 0x113   : > { %v542_v29 = vrot.slane %v541_v27, 4  ;;  %v552_v30 = vadd.f32 %v551_v26, %v550_v28 }
 0x115   : > { %v543_v31 = vadd.f32 %v542_v29, %v541_v27  ;;  %v553_v32 = vrot.slane %v552_v30, 4 }
 0x117   : > { %v544_v33 = vrot.slane %v543_v31, 2  ;;  %v554_v34 = vadd.f32 %v553_v32, %v552_v30 }
 0x119   : > { %v545_v35 = vadd.f32 %v544_v33, %v543_v31  ;;  %v555_v36 = vrot.slane %v554_v34, 2 }
 0x11b   : > { %v546_v37 = vrot.slane %v545_v35, 1  ;;  %v556_v38 = vadd.f32 %v555_v36, %v554_v34 }
 0x11d   : > { %v547_v39 = vadd.f32 %v546_v37, %v545_v35  ;;  %v557_v40 = vrot.slane %v556_v38, 1 }
 0x11f   : > { %965 = vmatmul.mubr.msk.f32.vlgmr.msra.gmra.mrb[4].mxu1 %vm307_vm0, %v547_v39  ;;  %v558_v41 = vadd.f32 %v557_v40, %v556_v38 }
 0x121   : > { %984 = vmatmul.mubr.msk.f32.vlgmr.msra.gmra.mrb[6].mxu0 %vm307_vm0, %v558_v41 }
 0x1f2   : > { %v636_v42 = vpop.f32.mrb[4].mxu1 }
 0x1f3   : > { %v713_v43 = vmul.f32 0.03125, %v636_v42  ;;  %v966_v44 = vpop.f32.mrb[5].mxu1 }
 0x1f4   : > { %v709_v45 = vpop.f32.mrb[6].mxu0 }
 0x1f5   : > { %v715_v46 = vmul.f32 %v713_v43, %v713_v43  ;;  %v714_v47 = vmul.f32 0.03125, %v709_v45  ;;  %v985_v48 = vpop.f32.mrb[7].mxu0  ;;  %v720_v54 = vrot.slane %v713_v43, %v719_v53 }
 0x1f7   : > { %v716_v50 = vsub.f32 %v714_v47, %v715_v46  ;;  %v721_v56 = vsub.f32 %v531_v21, %v720_v54  ;;  %v722_v57 = vsub.f32 %v536_v19, %v720_v54 }
 0x1f9   : > { %v723_v51 = vadd.f32 1e-05, %v716_v50 }
 0x1fb   : > { %1102 = vrsqrt.f32 %v723_v51 }
 0x205   : > { %v1103_v55 = vpop.eup %1102 }
 0x206   : > { %v728_v58 = vrot.slane %v1103_v55, %v719_v53 }
 0x208   : > { %v729_v60 = vmul.f32 %v728_v58, %v721_v56  ;;  %v730_v61 = vmul.f32 %v728_v58, %v722_v57 }
 0x20a   : > { %v738_v63 = vmul.f32 %v820_v59, %v729_v60  ;;  %v739_v0 = vmul.f32 %v820_v59, %v730_v61 }
 0x20c   : > { %v747_v1 = vadd.f32 %v821_v62, %v738_v63  ;;  %v748_v2 = vadd.f32 %v821_v62, %v739_v0 }
 0x20e   : > { %v749_v3 = vmax.f32 %v747_v1, 0.0  ;;  %v750_v4 = vmax.f32 %v748_v2, 0.0 }
 0x210   : > { %751 = vst.msk [vmem:[%s224_s8] sm:$0xff] %vm307_vm0, %v749_v3  ;;  %752 = vst.msk [vmem:[%s224_s8 + $0x8] sm:$0xff] %vm307_vm0, %v750_v4 }
 0x211 PF: > { %s15_s18 = sadd.s32 1, %s1110_s18  }
 0x212   : > { %p12_p4 = scmp.ge.s32.totalorder %s15_s18, 4  }
 0x214   :  { %14 = sbr.rel (!%p12_p4) target bundleno = 1 (0x1), region = 70 }

// kernel: forward.13
= control target key start
LH: loop header
LB: loop body
LE: loop exit
PB: predicated region body
PF: predicated region fallthrough
CT: control target
= control target key end

     0   :  { %s1216_s21 = smov 0   ;;  %s1518_s0 = inlined_call_operand.vmem [shape: f32[2,16,576], index: 0, kind: input, shape index: {}]   ;;  %s1519_s1 = inlined_call_operand.vmem [shape: f32[576,64], index: 1, kind: input, shape index: {}]   ;;  %s1520_s2 = inlined_call_operand.vmem [shape: f32[1,64], index: 2, kind: input, shape index: {}]   ;;  %s1521_s3 = inlined_call_operand.vmem [shape: f32[1,64], index: 3, kind: input, shape index: {}]   ;;  %s1522_s4 = inlined_call_operand.vmem [shape: f32[64,64], index: 4, kind: input, shape index: {}]   ;;  %s1523_s5 = inlined_call_operand.vmem [shape: f32[2,16,64], index: 5, kind: input, shape index: {}]   ;;  %s1524_s6 = inlined_call_operand.vmem [shape: f32[2,16,64], index: 6, kind: output, shape index: {}]  }
   0x1 LB: > { %s871_s22 = sadd.s32 4294967295, %s1176_s21   ;;  %p875_p0 = scmp.ge.s32.totalorder %s1176_s21, 1  ;;  %s1176_s21 = sphi %s1216_s21, %s16_s21  }
   0x2   : > { %p222_p1 = scmp.lt.s32.totalorder %s1176_s21, 3 }
   0x4   : > { %p223_p2 = pnand %p875_p0, %p222_p1 }
   0x5   : > { %v298_v0 = vld [vmem:[%s1519_s1 + $0x80] sm:$0xff] (!%p223_p2)  ;;  %v299_v1 = vld [vmem:[%s1519_s1 + $0x88] sm:$0xff] (!%p223_p2)  ;;  %v300_v11 = vld [vmem:[%s1519_s1 + $0x90] sm:$0xff] (!%p223_p2)  ;;  %p1289_p3 = scmp.lt.s32.totalorder (!%p223_p2), %s871_s22, 1  ;;  %vm354_vm0 = vcmask (!%p223_p2), 523264   ;;  %vm1179_vm1 = vmmov (!%p223_p2), 0  }
   0x6   : > { %226 = sbr.rel (%p223_p2) target bundleno = 531 (0x213), region = 44  ;;  %v330_v2 = vld [vmem:[%s1519_s1 + $0x180] sm:$0xff] (!%p223_p2)  ;;  %v1052_v3 = vpack.c.bf16 (!%p223_p2), %v299_v1, %v298_v0  ;;  %v331_v4 = vld [vmem:[%s1519_s1 + $0x188] sm:$0xff] (!%p223_p2)  ;;  %v301_v13 = vld [vmem:[%s1519_s1 + $0x98] sm:$0xff] (!%p223_p2) }
   0x7   : > { %v282_v5 = vld [vmem:[%s1519_s1] sm:$0xff] (!%p223_p2)  ;;  %v283_v6 = vld [vmem:[%s1519_s1 + $0x8] sm:$0xff] (!%p223_p2)  ;;  %v1084_v7 = vpack.c.bf16 (!%p223_p2), %v331_v4, %v330_v2  ;;  %v332_v14 = vld [vmem:[%s1519_s1 + $0x190] sm:$0xff] (!%p223_p2)  ;;  %v1056_v16 = vpack.c.bf16 (!%p223_p2), %v301_v13, %v300_v11 }
   0x8   : > { %v1054_v8 = vpack.c.bf16 (!%p223_p2), %v283_v6, %v282_v5  ;;  %v314_v9 = vld [vmem:[%s1519_s1 + $0x100] sm:$0xff] (!%p223_p2)  ;;  %v315_v10 = vld [vmem:[%s1519_s1 + $0x108] sm:$0xff] (!%p223_p2)  ;;  %1053 = vmatprep.subr.bf16.mxu0 (!%p223_p2), %v1052_v3  ;;  %v333_v15 = vld [vmem:[%s1519_s1 + $0x198] sm:$0xff] (!%p223_p2) }
   0x9   : > { %v1086_v12 = vpack.c.bf16 (!%p223_p2), %v315_v10, %v314_v9  ;;  %1085 = vmatprep.subr.bf16.mxu1 (!%p223_p2), %v1084_v7  ;;  %v1088_v17 = vpack.c.bf16 (!%p223_p2), %v333_v15, %v332_v14  ;;  %v284_v18 = vld [vmem:[%s1519_s1 + $0x10] sm:$0xff] (!%p223_p2)  ;;  %v285_v19 = vld [vmem:[%s1519_s1 + $0x18] sm:$0xff] (!%p223_p2)  ;;  %v302_v23 = vld [vmem:[%s1519_s1 + $0xa0] sm:$0xff] (!%p223_p2) }
   0xa   : > { %1055 = vmatpush3.bf16.msra.mxu0 (!%p223_p2), %v1054_v8  ;;  %v316_v20 = vld [vmem:[%s1519_s1 + $0x110] sm:$0xff] (!%p223_p2)  ;;  %v1058_v21 = vpack.c.bf16 (!%p223_p2), %v285_v19, %v284_v18  ;;  %v317_v22 = vld [vmem:[%s1519_s1 + $0x118] sm:$0xff] (!%p223_p2)  ;;  %v303_v24 = vld [vmem:[%s1519_s1 + $0xa8] sm:$0xff] (!%p223_p2) }
   0xb   : > { %1087 = vmatpush3.bf16.msra.mxu1 (!%p223_p2), %v1086_v12  ;;  %1057 = vmatprep.subr.bf16.mxu0 (!%p223_p2), %v1056_v16  ;;  %v1090_v25 = vpack.c.bf16 (!%p223_p2), %v317_v22, %v316_v20  ;;  %v1060_v26 = vpack.c.bf16 (!%p223_p2), %v303_v24, %v302_v23  ;;  %v334_v27 = vld [vmem:[%s1519_s1 + $0x1a0] sm:$0xff] (!%p223_p2)  ;;  %v335_v28 = vld [vmem:[%s1519_s1 + $0x1a8] sm:$0xff] (!%p223_p2)  ;;  %v304_v35 = vld [vmem:[%s1519_s1 + $0xb0] sm:$0xff] (!%p223_p2) }
   0xc   : > { %1089 = vmatprep.subr.bf16.mxu1 (!%p223_p2), %v1088_v17  ;;  %v286_v29 = vld [vmem:[%s1519_s1 + $0x20] sm:$0xff] (!%p223_p2)  ;;  %v1092_v30 = vpack.c.bf16 (!%p223_p2), %v335_v28, %v334_v27  ;;  %v287_v31 = vld [vmem:[%s1519_s1 + $0x28] sm:$0xff] (!%p223_p2)  ;;  %v305_v36 = vld [vmem:[%s1519_s1 + $0xb8] sm:$0xff] (!%p223_p2) }
   0xd   : > { %v318_v32 = vld [vmem:[%s1519_s1 + $0x120] sm:$0xff]  ;;  %v319_v33 = vld [vmem:[%s1519_s1 + $0x128] sm:$0xff]  ;;  %v1062_v34 = vpack.c.bf16 %v287_v31, %v286_v29  ;;  %v336_v37 = vld [vmem:[%s1519_s1 + $0x1b0] sm:$0xff]  ;;  %v1064_v39 = vpack.c.bf16 %v305_v36, %v304_v35  ;;  %s1527_s22 = smov (!%p1289_p3, %s871_s22), 1 }
   0xe   : > { %1059 = vmatpush3.bf16.msra.mxu0 %v1058_v21  ;;  %v1094_v38 = vpack.c.bf16 %v319_v33, %v318_v32  ;;  %v337_v40 = vld [vmem:[%s1519_s1 + $0x1b8] sm:$0xff]  ;;  %v288_v41 = vld [vmem:[%s1519_s1 + $0x30] sm:$0xff]  ;;  %v306_v46 = vld [vmem:[%s1519_s1 + $0xc0] sm:$0xff]  ;;  %s1156_s18 = smul.u32 80, %s1527_s22  ;;  %s889_s11 = sshll.u32 %s1527_s22, 4 }
   0xf   : > { %1091 = vmatpush3.bf16.msra.mxu1 %v1090_v25  ;;  %1061 = vmatprep.subr.bf16.mxu0 %v1060_v26  ;;  %v289_v42 = vld [vmem:[%s1519_s1 + $0x38] sm:$0xff]  ;;  %v1096_v43 = vpack.c.bf16 %v337_v40, %v336_v37  ;;  %v320_v44 = vld [vmem:[%s1519_s1 + $0x130] sm:$0xff]  ;;  %v307_v47 = vld [vmem:[%s1519_s1 + $0xc8] sm:$0xff]  ;;  %s266_s17 = scalar_lea.vmem %s1523_s5, %s889_s11  ;;  %s271_s25 = scalar_lea.vmem %s1524_s6, %s889_s11 }
  0x10   : > { %1093 = vmatprep.subr.bf16.mxu1 %v1092_v30  ;;  %v321_v45 = vld [vmem:[%s1519_s1 + $0x138] sm:$0xff]  ;;  %v338_v48 = vld [vmem:[%s1519_s1 + $0x1c0] sm:$0xff]  ;;  %v339_v49 = vld [vmem:[%s1519_s1 + $0x1c8] sm:$0xff]  ;;  %v1066_v50 = vpack.c.bf16 %v289_v42, %v288_v41  ;;  %v1068_v52 = vpack.c.bf16 %v307_v47, %v306_v46  ;;  %s1390_s15 = scalar_lea.vmem %s1518_s0, %s1156_s18 }
  0x11   : > { %v1098_v51 = vpack.c.bf16 %v321_v45, %v320_v44  ;;  %v290_v53 = vld [vmem:[%s1519_s1 + $0x40] sm:$0xff]  ;;  %v291_v54 = vld [vmem:[%s1519_s1 + $0x48] sm:$0xff]  ;;  %v1100_v56 = vpack.c.bf16 %v339_v49, %v338_v48  ;;  %v308_v58 = vld [vmem:[%s1519_s1 + $0xd0] sm:$0xff] }
  0x12   : > { %1063 = vmatpush3.bf16.msra.mxu0 %v1062_v34  ;;  %v322_v55 = vld [vmem:[%s1519_s1 + $0x140] sm:$0xff]  ;;  %v323_v57 = vld [vmem:[%s1519_s1 + $0x148] sm:$0xff]  ;;  %v309_v59 = vld [vmem:[%s1519_s1 + $0xd8] sm:$0xff]  ;;  %v1070_v62 = vpack.c.bf16 %v291_v54, %v290_v53 }
  0x13   : > { %1095 = vmatpush3.bf16.msra.mxu1 %v1094_v38  ;;  %1065 = vmatprep.subr.bf16.mxu0 %v1064_v39  ;;  %v340_v60 = vld [vmem:[%s1519_s1 + $0x1d0] sm:$0xff]  ;;  %v341_v61 = vld [vmem:[%s1519_s1 + $0x1d8] sm:$0xff]  ;;  %v1102_v63 = vpack.c.bf16 %v323_v57, %v322_v55  ;;  %v1072_v0 = vpack.c.bf16 %v309_v59, %v308_v58  ;;  %v310_v6 = vld [vmem:[%s1519_s1 + $0xe0] sm:$0xff]  ;;  %v1178_v57 = vmov 0.0|0.0  }
  0x14   : > { %1097 = vmatprep.subr.bf16.mxu1 %v1096_v43  ;;  %v292_v1 = vld [vmem:[%s1519_s1 + $0x50] sm:$0xff]  ;;  %v293_v2 = vld [vmem:[%s1519_s1 + $0x58] sm:$0xff]  ;;  %v1104_v4 = vpack.c.bf16 %v341_v61, %v340_v60  ;;  %v311_v7 = vld [vmem:[%s1519_s1 + $0xe8] sm:$0xff] }
  0x15   : > { %v324_v3 = vld [vmem:[%s1519_s1 + $0x150] sm:$0xff]  ;;  %v325_v5 = vld [vmem:[%s1519_s1 + $0x158] sm:$0xff]  ;;  %v342_v8 = vld [vmem:[%s1519_s1 + $0x1e0] sm:$0xff]  ;;  %v1074_v10 = vpack.c.bf16 %v293_v2, %v292_v1  ;;  %v1076_v14 = vpack.c.bf16 %v311_v7, %v310_v6 }
  0x16   : > { %1067 = vmatpush3.bf16.msra.mxu0 %v1066_v50  ;;  %v343_v9 = vld [vmem:[%s1519_s1 + $0x1e8] sm:$0xff]  ;;  %v294_v11 = vld [vmem:[%s1519_s1 + $0x60] sm:$0xff]  ;;  %v1106_v13 = vpack.c.bf16 %v325_v5, %v324_v3  ;;  %v275_v17 = vld [vmem:[%s1390_s15 + $0x18] sm:$0xff]  ;;  %v1180_v3 = vmov 0.0  }
  0x17   : > { %1099 = vmatpush3.bf16.msra.mxu1 %v1098_v51  ;;  %1069 = vmatprep.subr.bf16.mxu0 %v1068_v52  ;;  %v295_v12 = vld [vmem:[%s1519_s1 + $0x68] sm:$0xff]  ;;  %v326_v15 = vld [vmem:[%s1519_s1 + $0x160] sm:$0xff]  ;;  %v1108_v18 = vpack.c.bf16 %v343_v9, %v342_v8  ;;  %v312_v20 = vld [vmem:[%s1519_s1 + $0xf0] sm:$0xff] }
  0x18   : > { %1101 = vmatprep.subr.bf16.mxu1 %v1100_v56  ;;  %v273_v16 = vld [vmem:[%s1390_s15 + $0x8] sm:$0xff]  ;;  %v313_v21 = vld [vmem:[%s1519_s1 + $0xf8] sm:$0xff]  ;;  %v344_v22 = vld [vmem:[%s1519_s1 + $0x1f0] sm:$0xff]  ;;  %500 = vmatprep.mubr.f32.mxu1 %v275_v17  ;;  %v1078_v24 = vpack.c.bf16 %v295_v12, %v294_v11 }
  0x19   : > { %v327_v19 = vld [vmem:[%s1519_s1 + $0x168] sm:$0xff]  ;;  %425 = vmatprep.mubr.f32.mxu0 %v273_v16  ;;  %v345_v23 = vld [vmem:[%s1519_s1 + $0x1f8] sm:$0xff]  ;;  %v1080_v26 = vpack.c.bf16 %v313_v21, %v312_v20  ;;  %v296_v27 = vld [vmem:[%s1519_s1 + $0x70] sm:$0xff] }
  0x1a   : > { %1071 = vmatpush3.bf16.msra.mxu0 %v1070_v62  ;;  %v1110_v25 = vpack.c.bf16 %v327_v19, %v326_v15  ;;  %v297_v28 = vld [vmem:[%s1519_s1 + $0x78] sm:$0xff]  ;;  %v328_v29 = vld [vmem:[%s1519_s1 + $0x170] sm:$0xff]  ;;  %v1112_v30 = vpack.c.bf16 %v345_v23, %v344_v22  ;;  %v346_v32 = vld [vmem:[%s1519_s1 + $0x200] sm:$0xff] }
  0x1b   : > { %1103 = vmatpush3.bf16.msra.mxu1 %v1102_v63  ;;  %1073 = vmatprep.subr.bf16.mxu0 %v1072_v0  ;;  %v329_v31 = vld [vmem:[%s1519_s1 + $0x178] sm:$0xff]  ;;  %v347_v33 = vld [vmem:[%s1519_s1 + $0x208] sm:$0xff]  ;;  %v1082_v34 = vpack.c.bf16 %v297_v28, %v296_v27  ;;  %v348_v37 = vld [vmem:[%s1519_s1 + $0x210] sm:$0xff] }
  0x1c   : > { %1105 = vmatprep.subr.bf16.mxu1 %v1104_v4  ;;  %v1114_v35 = vpack.c.bf16 %v329_v31, %v328_v29  ;;  %v1116_v36 = vpack.c.bf16 %v347_v33, %v346_v32  ;;  %v349_v38 = vld [vmem:[%s1519_s1 + $0x218] sm:$0xff]  ;;  %v272_v39 = vld [vmem:[%s1390_s15] sm:$0xff]  ;;  %v274_v40 = vld [vmem:[%s1390_s15 + $0x10] sm:$0xff] }
  0x1d   : > { %v1120_v41 = vpack.c.bf16 %v349_v38, %v348_v37  ;;  %v350_v42 = vld [vmem:[%s1519_s1 + $0x220] sm:$0xff]  ;;  %v351_v43 = vld [vmem:[%s1519_s1 + $0x228] sm:$0xff]  ;;  %v278_v44 = vld [vmem:[%s1390_s15 + $0x30] sm:$0xff] }
  0x1e   : > { %1075 = vmatpush3.bf16.msra.mxu0 %v1074_v10  ;;  %v280_v45 = vld [vmem:[%s1390_s15 + $0x40] sm:$0xff]  ;;  %v277_v46 = vld [vmem:[%s1390_s15 + $0x28] sm:$0xff]  ;;  %v1124_v47 = vpack.c.bf16 %v351_v43, %v350_v42  ;;  %v279_v48 = vld [vmem:[%s1390_s15 + $0x38] sm:$0xff] }
  0x1f   : > { %1107 = vmatpush3.bf16.msra.mxu1 %v1106_v13  ;;  %1077 = vmatprep.subr.bf16.mxu0 %v1076_v14  ;;  %v352_v49 = vld [vmem:[%s1519_s1 + $0x230] sm:$0xff]  ;;  %v353_v50 = vld [vmem:[%s1519_s1 + $0x238] sm:$0xff]  ;;  %v276_v51 = vld [vmem:[%s1390_s15 + $0x20] sm:$0xff] }
  0x20   : > { %1109 = vmatprep.subr.bf16.mxu1 %v1108_v18  ;;  %v1128_v52 = vpack.c.bf16 %v353_v50, %v352_v49  ;;  %v281_v53 = vld [vmem:[%s1390_s15 + $0x48] sm:$0xff]  ;;  %v606_v54 = vld [vmem:[%s1522_s4] sm:$0xff]  ;;  %v608_v58 = vld [vmem:[%s1522_s4 + $0x10] sm:$0xff]  ;;  %v764_v49 = vlaneseq }
  0x21   : > { %v607_v55 = vld [vmem:[%s1522_s4 + $0x8] sm:$0xff]  ;;  %v609_v59 = vld [vmem:[%s1522_s4 + $0x18] sm:$0xff]  ;;  %v610_v61 = vld [vmem:[%s1522_s4 + $0x20] sm:$0xff] }
  0x22   : > { %1079 = vmatpush3.bf16.msra.mxu0 %v1078_v24  ;;  %v1133_v56 = vpack.c.bf16 %v607_v55, %v606_v54  ;;  %v1136_v60 = vpack.c.bf16 %v609_v59, %v608_v58  ;;  %v611_v62 = vld [vmem:[%s1522_s4 + $0x28] sm:$0xff]  ;;  %v612_v0 = vld [vmem:[%s1522_s4 + $0x30] sm:$0xff]  ;;  %v613_v1 = vld [vmem:[%s1522_s4 + $0x38] sm:$0xff] }
  0x23   : > { %1111 = vmatpush3.bf16.msra.mxu1 %v1110_v25  ;;  %1081 = vmatprep.subr.bf16.mxu0 %v1080_v26  ;;  %v1139_v63 = vpack.c.bf16 %v611_v62, %v610_v61  ;;  %v1142_v2 = vpack.c.bf16 %v613_v1, %v612_v0  ;;  %v885_v59 = vld [vmem:[%s1520_s2] ss:$0 sm:$0xff] }
  0x24   : > { %1113 = vmatprep.subr.bf16.mxu1 %v1112_v30  ;;  %v886_v62 = vld [vmem:[%s1521_s3] ss:$0 sm:$0xff] }
  0x25   : > { %v796_v1 = vld [vmem:[%s266_s17] sm:$0xff] }
  0x26   : > { %1083 = vmatpush3.bf16.msra.mxu0 %v1082_v34 }
  0x27   : > { %1115 = vmatpush3.bf16.msra.mxu1 %v1114_v35  ;;  %1117 = vmatprep.subr.bf16.mxu0 %v1116_v36 }
  0x28   : > { %1132 = vmatprep.subr.bf16.mxu1 %v1178_v57 }
  0x29   : > { %426 = vmatmul.mubr.f32.vlgmr.msra.gmra.mrb[0].mxu0 %v272_v39 }
  0x2a   : > { %501 = vmatmul.mubr.f32.vlgmr.msra.gmra.mrb[0].mxu1 %v274_v40  ;;  %1119 = vmatpush3.bf16.msra.mxu0 %v1116_v36 }
  0x2b   : > { %1121 = vmatprep.subr.bf16.mxu0 %v1120_v41  ;;  %430 = vmatprep.mubr.f32.mxu0 %v278_v44 }
  0x2c   : > { %505 = vmatprep.mubr.f32.mxu1 %v280_v45  ;;  %1134 = vmatpush3.bf16.msra.mxu1 %v1133_v56 }
  0x2d   : > { %431 = vmatmul.mubr.f32.gmra.mrb[2].mxu0 %v277_v46  ;;  %1135 = vmatprep.subr.bf16.mxu1 %v1178_v57 }
  0x2e   : > { %1123 = vmatpush3.bf16.msra.mxu0 %v1120_v41  ;;  %506 = vmatmul.mubr.f32.gmra.mrb[2].mxu1 %v279_v48 }
  0x2f   : > { %1125 = vmatprep.subr.bf16.mxu0 %v1124_v47  ;;  %1011 = vmatprep.mubr.msk.f32.mxu0 %vm354_vm0, %v276_v51 }
  0x30   : > { %1137 = vmatpush3.bf16.msra.mxu1 %v1136_v60  ;;  %1030 = vmatprep.mubr.msk.f32.mxu1 %vm1179_vm1, %v1180_v3 }
  0x31   : > { %1138 = vmatprep.subr.bf16.mxu1 %v1178_v57 }
  0x32   : > { %1127 = vmatpush3.bf16.msra.mxu0 %v1124_v47 }
  0x33   : > { %1129 = vmatprep.subr.bf16.mxu0 %v1128_v52 }
  0x34   : > { %1140 = vmatpush3.bf16.msra.mxu1 %v1139_v63 }
  0x35   : > { %1141 = vmatprep.subr.bf16.mxu1 %v1178_v57 }
  0x36   : > { %1131 = vmatpush3.bf16.msra.mxu0 %v1128_v52  ;;  %v765_v52 = vshrl.u32 %v764_v49, 7 }
  0x37   : > { %1144 = vmatprep.subr.bf16.mxu0 %v1178_v57 }
  0x38   : > { %1143 = vmatpush3.bf16.msra.mxu1 %v1142_v2 }
  0x39   : > { %1012 = vmatmul.mubr.msk.f32.vlgmr.msra.gmra.mrb[4].mxu0 %vm354_vm0, %v281_v53  ;;  %v766_v53 = vsub.s32 0, %v765_v52 }
  0x3a   : > { %1146 = vmatpush3.bf16.msra.mxu0 %v1133_v56  ;;  %1049 = vmatprep.mubr.msk.f32.mxu0 %vm1179_vm1, %v1180_v3 }
  0x3b   : > { %1147 = vmatprep.subr.bf16.mxu0 %v1178_v57 }
  0x3e   : > { %1149 = vmatpush3.bf16.msra.mxu0 %v1136_v60 }
  0x3f   : > { %1150 = vmatprep.subr.bf16.mxu0 %v1178_v57 }
  0x42   : > { %1152 = vmatpush3.bf16.msra.mxu0 %v1139_v63 }
  0x43   : > { %1153 = vmatprep.subr.bf16.mxu0 %v1178_v57 }
  0x46   : > { %1155 = vmatpush3.bf16.msra.mxu0 %v1142_v2  ;;  %v797_v2 = vld [vmem:[%s266_s17 + $0x8] sm:$0xff] }
  0xfc   : > { %v923_v4 = vpop.f32.mrb[0].mxu0 }
  0xfd   : > { %v961_v5 = vpop.f32.mrb[0].mxu1  ;;  %v924_v6 = vpop.f32.mrb[1].mxu0 }
  0xfe   : > { %v925_v7 = vadd.f32 %v924_v6, %v923_v4  ;;  %v962_v8 = vpop.f32.mrb[1].mxu1 }
  0xff   : > { %v963_v9 = vadd.f32 %v962_v8, %v961_v5 }
 0x100   : > { %v926_v10 = vpop.f32.mrb[2].mxu0 }
 0x101   : > { %v964_v11 = vpop.f32.mrb[2].mxu1  ;;  %v927_v12 = vpop.f32.mrb[3].mxu0  ;;  %v503_v13 = vadd.f32 %v963_v9, %v925_v7 }
 0x102   : > { %v928_v14 = vadd.f32 %v927_v12, %v926_v10  ;;  %v965_v15 = vpop.f32.mrb[3].mxu1 }
 0x103   : > { %v966_v16 = vadd.f32 %v965_v15, %v964_v11 }
 0x105   : > { %v508_v17 = vadd.f32 %v966_v16, %v928_v14 }
 0x10c   : > { %v1013_v18 = vpop.f32.mrb[4].mxu0 }
 0x10d   : > { %v583_v19 = vadd.f32 %v1013_v18, %v508_v17  ;;  %v577_v20 = vpop.f32.mrb[5].mxu0 }
 0x10e   : > { %v578_v21 = vadd.f32 %v577_v20, %v503_v13 }
 0x10f   : > { %v587_v22 = vsel %vm354_vm0, %v583_v19, 0.0  ;;  %v596_v23 = vmul.f32 %v583_v19, %v583_v19 }
 0x110   : > { %v586_v24 = vsel %vm354_vm0, %v578_v21, 0.0  ;;  %v595_v25 = vmul.f32 %v578_v21, %v578_v21 }
 0x111   : > { %v598_v26 = vsel %vm354_vm0, %v596_v23, 0.0  ;;  %v588_v27 = vadd.f32 %v587_v22, %v586_v24 }
 0x112   : > { %v597_v28 = vsel %vm354_vm0, %v595_v25, 0.0 }
 0x113   : > { %v589_v29 = vrot.slane %v588_v27, 4  ;;  %v599_v30 = vadd.f32 %v598_v26, %v597_v28 }
 0x115   : > { %v590_v31 = vadd.f32 %v589_v29, %v588_v27  ;;  %v600_v32 = vrot.slane %v599_v30, 4 }
 0x117   : > { %v591_v33 = vrot.slane %v590_v31, 2  ;;  %v601_v34 = vadd.f32 %v600_v32, %v599_v30 }
 0x119   : > { %v592_v35 = vadd.f32 %v591_v33, %v590_v31  ;;  %v602_v36 = vrot.slane %v601_v34, 2 }
 0x11b   : > { %v593_v37 = vrot.slane %v592_v35, 1  ;;  %v603_v38 = vadd.f32 %v602_v36, %v601_v34 }
 0x11d   : > { %v594_v39 = vadd.f32 %v593_v37, %v592_v35  ;;  %v604_v40 = vrot.slane %v603_v38, 1 }
 0x11f   : > { %1031 = vmatmul.mubr.msk.f32.vlgmr.msra.gmra.mrb[4].mxu1 %vm354_vm0, %v594_v39  ;;  %v605_v41 = vadd.f32 %v604_v40, %v603_v38 }
 0x121   : > { %1050 = vmatmul.mubr.msk.f32.vlgmr.msra.gmra.mrb[6].mxu0 %vm354_vm0, %v605_v41 }
 0x1f2   : > { %v683_v42 = vpop.f32.mrb[4].mxu1 }
 0x1f3   : > { %v760_v43 = vmul.f32 0.03125, %v683_v42  ;;  %v1032_v44 = vpop.f32.mrb[5].mxu1 }
 0x1f4   : > { %v756_v45 = vpop.f32.mrb[6].mxu0 }
 0x1f5   : > { %v762_v46 = vmul.f32 %v760_v43, %v760_v43  ;;  %v761_v47 = vmul.f32 0.03125, %v756_v45  ;;  %v1051_v48 = vpop.f32.mrb[7].mxu0  ;;  %v767_v54 = vrot.slane %v760_v43, %v766_v53 }
 0x1f7   : > { %v763_v50 = vsub.f32 %v761_v47, %v762_v46  ;;  %v768_v56 = vsub.f32 %v578_v21, %v767_v54  ;;  %v769_v57 = vsub.f32 %v583_v19, %v767_v54 }
 0x1f9   : > { %v770_v51 = vadd.f32 1e-05, %v763_v50 }
 0x1fb   : > { %1168 = vrsqrt.f32 %v770_v51 }
 0x205   : > { %v1169_v55 = vpop.eup %1168 }
 0x206   : > { %v775_v58 = vrot.slane %v1169_v55, %v766_v53 }
 0x208   : > { %v776_v60 = vmul.f32 %v775_v58, %v768_v56  ;;  %v777_v61 = vmul.f32 %v775_v58, %v769_v57 }
 0x20a   : > { %v785_v63 = vmul.f32 %v885_v59, %v776_v60  ;;  %v786_v0 = vmul.f32 %v885_v59, %v777_v61 }
 0x20c   : > { %v794_v3 = vadd.f32 %v886_v62, %v785_v63  ;;  %v795_v4 = vadd.f32 %v886_v62, %v786_v0 }
 0x20e   : > { %v798_v5 = vadd.f32 %v796_v1, %v794_v3  ;;  %v799_v6 = vadd.f32 %v797_v2, %v795_v4 }
 0x210   : > { %v800_v7 = vmax.f32 %v798_v5, 0.0  ;;  %v801_v8 = vmax.f32 %v799_v6, 0.0 }
 0x212   : > { %802 = vst.msk [vmem:[%s271_s25] sm:$0xff] %vm354_vm0, %v800_v7  ;;  %803 = vst.msk [vmem:[%s271_s25 + $0x8] sm:$0xff] %vm354_vm0, %v801_v8 }
 0x213 PF: > { %s16_s21 = sadd.s32 1, %s1176_s21  }
 0x214   : > { %p13_p4 = scmp.ge.s32.totalorder %s16_s21, 4  }
 0x216   :  { %15 = sbr.rel (!%p13_p4) target bundleno = 1 (0x1), region = 77 }

// kernel: forward.14
= control target key start
LH: loop header
LB: loop body
LE: loop exit
PB: predicated region body
PF: predicated region fallthrough
CT: control target
= control target key end

     0   :  { %s1100_s18 = smov 0   ;;  %s1391_s0 = inlined_call_operand.vmem [shape: f32[2,4,576], index: 0, kind: input, shape index: {}]   ;;  %s1392_s1 = inlined_call_operand.vmem [shape: f32[576,64], index: 1, kind: input, shape index: {}]   ;;  %s1393_s2 = inlined_call_operand.vmem [shape: f32[1,64], index: 2, kind: input, shape index: {}]   ;;  %s1394_s3 = inlined_call_operand.vmem [shape: f32[1,64], index: 3, kind: input, shape index: {}]   ;;  %s1395_s4 = inlined_call_operand.vmem [shape: f32[64,64], index: 4, kind: input, shape index: {}]   ;;  %s1396_s5 = inlined_call_operand.vmem [shape: f32[2,4,64], index: 5, kind: output, shape index: {}]  }
   0x1 LB: > { %s775_s19 = sadd.s32 4294967295, %s1065_s18   ;;  %p779_p0 = scmp.ge.s32.totalorder %s1065_s18, 1  ;;  %s1065_s18 = sphi %s1100_s18, %s15_s18  }
   0x2   : > { %p187_p1 = scmp.lt.s32.totalorder %s1065_s18, 3 }
   0x4   : > { %p188_p2 = pnand %p779_p0, %p187_p1 }
   0x5   : > { %v242_v0 = vld [vmem:[%s1392_s1 + $0x80] sm:$0xff] (!%p188_p2)  ;;  %v243_v1 = vld [vmem:[%s1392_s1 + $0x88] sm:$0xff] (!%p188_p2)  ;;  %v244_v11 = vld [vmem:[%s1392_s1 + $0x90] sm:$0xff] (!%p188_p2)  ;;  %p1173_p3 = scmp.lt.s32.totalorder (!%p188_p2), %s775_s19, 1  ;;  %vm1068_vm0 = vmmov (!%p188_p2), 0   ;;  %vm305_vm1 = vcmask (!%p188_p2), 523264  }
   0x6   : > { %191 = sbr.rel (%p188_p2) target bundleno = 526 (0x20e), region = 40  ;;  %v274_v2 = vld [vmem:[%s1392_s1 + $0x180] sm:$0xff] (!%p188_p2)  ;;  %v943_v3 = vpack.c.bf16 (!%p188_p2), %v243_v1, %v242_v0  ;;  %v275_v4 = vld [vmem:[%s1392_s1 + $0x188] sm:$0xff] (!%p188_p2)  ;;  %v245_v13 = vld [vmem:[%s1392_s1 + $0x98] sm:$0xff] (!%p188_p2)  ;;  %vm518_vm2 = vcmask (!%p188_p2), 519168  }
   0x7   : > { %v226_v5 = vld [vmem:[%s1392_s1] sm:$0xff] (!%p188_p2)  ;;  %v227_v6 = vld [vmem:[%s1392_s1 + $0x8] sm:$0xff] (!%p188_p2)  ;;  %v975_v7 = vpack.c.bf16 (!%p188_p2), %v275_v4, %v274_v2  ;;  %v276_v14 = vld [vmem:[%s1392_s1 + $0x190] sm:$0xff] (!%p188_p2)  ;;  %v947_v16 = vpack.c.bf16 (!%p188_p2), %v245_v13, %v244_v11 }
   0x8   : > { %v945_v8 = vpack.c.bf16 (!%p188_p2), %v227_v6, %v226_v5  ;;  %v258_v9 = vld [vmem:[%s1392_s1 + $0x100] sm:$0xff] (!%p188_p2)  ;;  %v259_v10 = vld [vmem:[%s1392_s1 + $0x108] sm:$0xff] (!%p188_p2)  ;;  %944 = vmatprep.subr.bf16.mxu0 (!%p188_p2), %v943_v3  ;;  %v277_v15 = vld [vmem:[%s1392_s1 + $0x198] sm:$0xff] (!%p188_p2) }
   0x9   : > { %v977_v12 = vpack.c.bf16 (!%p188_p2), %v259_v10, %v258_v9  ;;  %976 = vmatprep.subr.bf16.mxu1 (!%p188_p2), %v975_v7  ;;  %v979_v17 = vpack.c.bf16 (!%p188_p2), %v277_v15, %v276_v14  ;;  %v228_v18 = vld [vmem:[%s1392_s1 + $0x10] sm:$0xff] (!%p188_p2)  ;;  %v229_v19 = vld [vmem:[%s1392_s1 + $0x18] sm:$0xff] (!%p188_p2)  ;;  %v246_v23 = vld [vmem:[%s1392_s1 + $0xa0] sm:$0xff] (!%p188_p2) }
   0xa   : > { %946 = vmatpush3.bf16.msra.mxu0 (!%p188_p2), %v945_v8  ;;  %v260_v20 = vld [vmem:[%s1392_s1 + $0x110] sm:$0xff] (!%p188_p2)  ;;  %v949_v21 = vpack.c.bf16 (!%p188_p2), %v229_v19, %v228_v18  ;;  %v261_v22 = vld [vmem:[%s1392_s1 + $0x118] sm:$0xff] (!%p188_p2)  ;;  %v247_v24 = vld [vmem:[%s1392_s1 + $0xa8] sm:$0xff] (!%p188_p2) }
   0xb   : > { %978 = vmatpush3.bf16.msra.mxu1 (!%p188_p2), %v977_v12  ;;  %948 = vmatprep.subr.bf16.mxu0 (!%p188_p2), %v947_v16  ;;  %v981_v25 = vpack.c.bf16 (!%p188_p2), %v261_v22, %v260_v20  ;;  %v951_v26 = vpack.c.bf16 (!%p188_p2), %v247_v24, %v246_v23  ;;  %v278_v27 = vld [vmem:[%s1392_s1 + $0x1a0] sm:$0xff] (!%p188_p2)  ;;  %v279_v28 = vld [vmem:[%s1392_s1 + $0x1a8] sm:$0xff] (!%p188_p2)  ;;  %v248_v35 = vld [vmem:[%s1392_s1 + $0xb0] sm:$0xff] (!%p188_p2) }
   0xc   : > { %980 = vmatprep.subr.bf16.mxu1 (!%p188_p2), %v979_v17  ;;  %v230_v29 = vld [vmem:[%s1392_s1 + $0x20] sm:$0xff] (!%p188_p2)  ;;  %v983_v30 = vpack.c.bf16 (!%p188_p2), %v279_v28, %v278_v27  ;;  %v231_v31 = vld [vmem:[%s1392_s1 + $0x28] sm:$0xff] (!%p188_p2)  ;;  %v249_v36 = vld [vmem:[%s1392_s1 + $0xb8] sm:$0xff] (!%p188_p2) }
   0xd   : > { %v262_v32 = vld [vmem:[%s1392_s1 + $0x120] sm:$0xff]  ;;  %v263_v33 = vld [vmem:[%s1392_s1 + $0x128] sm:$0xff]  ;;  %v953_v34 = vpack.c.bf16 %v231_v31, %v230_v29  ;;  %v280_v37 = vld [vmem:[%s1392_s1 + $0x1b0] sm:$0xff]  ;;  %v955_v39 = vpack.c.bf16 %v249_v36, %v248_v35  ;;  %s1399_s19 = smov (!%p1173_p3, %s775_s19), 1 }
   0xe   : > { %950 = vmatpush3.bf16.msra.mxu0 %v949_v21  ;;  %v985_v38 = vpack.c.bf16 %v263_v33, %v262_v32  ;;  %v281_v40 = vld [vmem:[%s1392_s1 + $0x1b8] sm:$0xff]  ;;  %v232_v41 = vld [vmem:[%s1392_s1 + $0x30] sm:$0xff]  ;;  %v250_v46 = vld [vmem:[%s1392_s1 + $0xc0] sm:$0xff]  ;;  %s1043_s11 = smul.u32 20, %s1399_s19  ;;  %s781_s29 = sshll.u32 %s1399_s19, 2 }
   0xf   : > { %982 = vmatpush3.bf16.msra.mxu1 %v981_v25  ;;  %952 = vmatprep.subr.bf16.mxu0 %v951_v26  ;;  %v233_v42 = vld [vmem:[%s1392_s1 + $0x38] sm:$0xff]  ;;  %v987_v43 = vpack.c.bf16 %v281_v40, %v280_v37  ;;  %v264_v44 = vld [vmem:[%s1392_s1 + $0x130] sm:$0xff]  ;;  %v251_v47 = vld [vmem:[%s1392_s1 + $0xc8] sm:$0xff]  ;;  %s222_s8 = scalar_lea.vmem %s1396_s5, %s781_s29 }
  0x10   : > { %984 = vmatprep.subr.bf16.mxu1 %v983_v30  ;;  %v265_v45 = vld [vmem:[%s1392_s1 + $0x138] sm:$0xff]  ;;  %v282_v48 = vld [vmem:[%s1392_s1 + $0x1c0] sm:$0xff]  ;;  %v283_v49 = vld [vmem:[%s1392_s1 + $0x1c8] sm:$0xff]  ;;  %v957_v50 = vpack.c.bf16 %v233_v42, %v232_v41  ;;  %v959_v52 = vpack.c.bf16 %v251_v47, %v250_v46  ;;  %s1274_s7 = scalar_lea.vmem %s1391_s0, %s1043_s11 }
  0x11   : > { %v989_v51 = vpack.c.bf16 %v265_v45, %v264_v44  ;;  %v234_v53 = vld [vmem:[%s1392_s1 + $0x40] sm:$0xff]  ;;  %v235_v54 = vld [vmem:[%s1392_s1 + $0x48] sm:$0xff]  ;;  %v991_v56 = vpack.c.bf16 %v283_v49, %v282_v48  ;;  %v252_v58 = vld [vmem:[%s1392_s1 + $0xd0] sm:$0xff]  ;;  %v1069_v45 = vmov 0.0  }
  0x12   : > { %954 = vmatpush3.bf16.msra.mxu0 %v953_v34  ;;  %v266_v55 = vld [vmem:[%s1392_s1 + $0x140] sm:$0xff]  ;;  %v267_v57 = vld [vmem:[%s1392_s1 + $0x148] sm:$0xff]  ;;  %v253_v59 = vld [vmem:[%s1392_s1 + $0xd8] sm:$0xff]  ;;  %v961_v62 = vpack.c.bf16 %v235_v54, %v234_v53 }
  0x13   : > { %986 = vmatpush3.bf16.msra.mxu1 %v985_v38  ;;  %956 = vmatprep.subr.bf16.mxu0 %v955_v39  ;;  %v284_v60 = vld [vmem:[%s1392_s1 + $0x1d0] sm:$0xff]  ;;  %v285_v61 = vld [vmem:[%s1392_s1 + $0x1d8] sm:$0xff]  ;;  %v993_v63 = vpack.c.bf16 %v267_v57, %v266_v55  ;;  %v963_v0 = vpack.c.bf16 %v253_v59, %v252_v58  ;;  %v254_v6 = vld [vmem:[%s1392_s1 + $0xe0] sm:$0xff]  ;;  %v1067_v39 = vmov 0.0|0.0  }
  0x14   : > { %988 = vmatprep.subr.bf16.mxu1 %v987_v43  ;;  %v236_v1 = vld [vmem:[%s1392_s1 + $0x50] sm:$0xff]  ;;  %v237_v2 = vld [vmem:[%s1392_s1 + $0x58] sm:$0xff]  ;;  %v995_v4 = vpack.c.bf16 %v285_v61, %v284_v60  ;;  %v255_v7 = vld [vmem:[%s1392_s1 + $0xe8] sm:$0xff] }
  0x15   : > { %v268_v3 = vld [vmem:[%s1392_s1 + $0x150] sm:$0xff]  ;;  %v269_v5 = vld [vmem:[%s1392_s1 + $0x158] sm:$0xff]  ;;  %v286_v8 = vld [vmem:[%s1392_s1 + $0x1e0] sm:$0xff]  ;;  %v965_v10 = vpack.c.bf16 %v237_v2, %v236_v1  ;;  %v967_v14 = vpack.c.bf16 %v255_v7, %v254_v6 }
  0x16   : > { %958 = vmatpush3.bf16.msra.mxu0 %v957_v50  ;;  %v287_v9 = vld [vmem:[%s1392_s1 + $0x1e8] sm:$0xff]  ;;  %v238_v11 = vld [vmem:[%s1392_s1 + $0x60] sm:$0xff]  ;;  %v997_v13 = vpack.c.bf16 %v269_v5, %v268_v3  ;;  %v256_v19 = vld [vmem:[%s1392_s1 + $0xf0] sm:$0xff] }
  0x17   : > { %990 = vmatpush3.bf16.msra.mxu1 %v989_v51  ;;  %960 = vmatprep.subr.bf16.mxu0 %v959_v52  ;;  %v239_v12 = vld [vmem:[%s1392_s1 + $0x68] sm:$0xff]  ;;  %v270_v15 = vld [vmem:[%s1392_s1 + $0x160] sm:$0xff]  ;;  %v999_v18 = vpack.c.bf16 %v287_v9, %v286_v8  ;;  %v257_v20 = vld [vmem:[%s1392_s1 + $0xf8] sm:$0xff] }
  0x18   : > { %992 = vmatprep.subr.bf16.mxu1 %v991_v56  ;;  %v271_v16 = vld [vmem:[%s1392_s1 + $0x168] sm:$0xff]  ;;  %v223_v17 = vld [vmem:[%s1274_s7] sm:$0xff]  ;;  %v288_v23 = vld [vmem:[%s1392_s1 + $0x1f0] sm:$0xff]  ;;  %v969_v26 = vpack.c.bf16 %v239_v12, %v238_v11  ;;  %v971_v28 = vpack.c.bf16 %v257_v20, %v256_v19 }
  0x19   : > { %v301_v21 = vcombine.high %v223_v17, %v223_v17  ;;  %v224_v22 = vld [vmem:[%s1274_s7 + $0x8] sm:$0xff]  ;;  %v289_v24 = vld [vmem:[%s1392_s1 + $0x1f8] sm:$0xff]  ;;  %v1001_v27 = vpack.c.bf16 %v271_v16, %v270_v15  ;;  %v240_v29 = vld [vmem:[%s1392_s1 + $0x70] sm:$0xff] }
  0x1a   : > { %962 = vmatpush3.bf16.msra.mxu0 %v961_v62  ;;  %v302_v25 = vcombine.high %v224_v22, %v224_v22  ;;  %v241_v30 = vld [vmem:[%s1392_s1 + $0x78] sm:$0xff]  ;;  %v1003_v31 = vpack.c.bf16 %v289_v24, %v288_v23  ;;  %v272_v32 = vld [vmem:[%s1392_s1 + $0x170] sm:$0xff]  ;;  %v290_v36 = vld [vmem:[%s1392_s1 + $0x200] sm:$0xff] }
  0x1b   : > { %994 = vmatpush3.bf16.msra.mxu1 %v993_v63  ;;  %964 = vmatprep.subr.bf16.mxu0 %v963_v0  ;;  %v273_v33 = vld [vmem:[%s1392_s1 + $0x178] sm:$0xff]  ;;  %v973_v34 = vpack.c.bf16 %v241_v30, %v240_v29  ;;  %v291_v37 = vld [vmem:[%s1392_s1 + $0x208] sm:$0xff]  ;;  %v292_v40 = vld [vmem:[%s1392_s1 + $0x210] sm:$0xff] }
  0x1c   : > { %996 = vmatprep.subr.bf16.mxu1 %v995_v4  ;;  %372 = vmatprep.mubr.f32.mxu0 %v301_v21  ;;  %v1005_v35 = vpack.c.bf16 %v273_v33, %v272_v32  ;;  %v1008_v38 = vpack.c.bf16 %v291_v37, %v290_v36  ;;  %v293_v41 = vld [vmem:[%s1392_s1 + $0x218] sm:$0xff]  ;;  %v294_v43 = vld [vmem:[%s1392_s1 + $0x220] sm:$0xff]  ;;  %v295_v44 = vld [vmem:[%s1392_s1 + $0x228] sm:$0xff] }
  0x1d   : > { %442 = vmatprep.mubr.f32.mxu1 %v302_v25  ;;  %v1011_v42 = vpack.c.bf16 %v293_v41, %v292_v40  ;;  %v1014_v46 = vpack.c.bf16 %v295_v44, %v294_v43  ;;  %v296_v47 = vld [vmem:[%s1392_s1 + $0x230] sm:$0xff]  ;;  %v297_v48 = vld [vmem:[%s1392_s1 + $0x238] sm:$0xff]  ;;  %v534_v51 = vld [vmem:[%s1395_s4] sm:$0xff] }
  0x1e   : > { %966 = vmatpush3.bf16.msra.mxu0 %v965_v10  ;;  %v1017_v49 = vpack.c.bf16 %v297_v48, %v296_v47  ;;  %v225_v50 = vld [vmem:[%s1274_s7 + $0x10] sm:$0xf]  ;;  %v535_v52 = vld [vmem:[%s1395_s4 + $0x8] sm:$0xff]  ;;  %v537_v55 = vld [vmem:[%s1395_s4 + $0x18] sm:$0xff] }
  0x1f   : > { %998 = vmatpush3.bf16.msra.mxu1 %v997_v13  ;;  %968 = vmatprep.subr.bf16.mxu0 %v967_v14  ;;  %v1020_v53 = vpack.c.bf16 %v535_v52, %v534_v51  ;;  %v536_v54 = vld [vmem:[%s1395_s4 + $0x10] sm:$0xff]  ;;  %v538_v57 = vld [vmem:[%s1395_s4 + $0x20] sm:$0xff]  ;;  %v539_v58 = vld [vmem:[%s1395_s4 + $0x28] sm:$0xff] }
  0x20   : > { %1000 = vmatprep.subr.bf16.mxu1 %v999_v18  ;;  %v1023_v56 = vpack.c.bf16 %v537_v55, %v536_v54  ;;  %v1026_v59 = vpack.c.bf16 %v539_v58, %v538_v57  ;;  %v540_v60 = vld [vmem:[%s1395_s4 + $0x30] sm:$0xff]  ;;  %v541_v61 = vld [vmem:[%s1395_s4 + $0x38] sm:$0xff]  ;;  %v785_v40 = vld [vmem:[%s1393_s2] ss:$0 sm:$0xff] }
  0x21   : > { %v1029_v62 = vpack.c.bf16 %v541_v61, %v540_v60 }
  0x22   : > { %970 = vmatpush3.bf16.msra.mxu0 %v969_v26 }
  0x23   : > { %1002 = vmatpush3.bf16.msra.mxu1 %v1001_v27  ;;  %972 = vmatprep.subr.bf16.mxu0 %v971_v28 }
  0x24   : > { %1004 = vmatprep.subr.bf16.mxu1 %v1003_v31  ;;  %v692_v31 = vlaneseq }
  0x26   : > { %974 = vmatpush3.bf16.msra.mxu0 %v973_v34  ;;  %v693_v34 = vshrl.u32 %v692_v31, 7 }
  0x27   : > { %1006 = vmatpush3.bf16.msra.mxu1 %v1005_v35  ;;  %1007 = vmatprep.subr.bf16.mxu0 %v1067_v39 }
  0x28   : > { %1019 = vmatprep.subr.bf16.mxu1 %v1067_v39  ;;  %v694_v35 = vsub.s32 0, %v693_v34 }
  0x29   : > { %373 = vmatmul.mubr.f32.vlgmr.msra.gmra.mrb[0].mxu0 %v223_v17 }
  0x2a   : > { %443 = vmatmul.mubr.f32.vlgmr.msra.gmra.mrb[0].mxu1 %v224_v22  ;;  %1009 = vmatpush3.bf16.msra.mxu0 %v1008_v38 }
  0x2b   : > { %1010 = vmatprep.subr.bf16.mxu0 %v1067_v39  ;;  %902 = vmatprep.mubr.msk.f32.mxu0 %vm1068_vm0, %v1069_v45 }
  0x2c   : > { %921 = vmatprep.mubr.msk.f32.mxu1 %vm1068_vm0, %v1069_v45  ;;  %1021 = vmatpush3.bf16.msra.mxu1 %v1020_v53 }
  0x2d   : > { %1022 = vmatprep.subr.bf16.mxu1 %v1067_v39 }
  0x2e   : > { %1012 = vmatpush3.bf16.msra.mxu0 %v1011_v42  ;;  %v786_v42 = vld [vmem:[%s1394_s3] ss:$0 sm:$0xff] }
  0x2f   : > { %1013 = vmatprep.subr.bf16.mxu0 %v1067_v39 }
  0x30   : > { %1024 = vmatpush3.bf16.msra.mxu1 %v1023_v56 }
  0x31   : > { %1025 = vmatprep.subr.bf16.mxu1 %v1067_v39 }
  0x32   : > { %1015 = vmatpush3.bf16.msra.mxu0 %v1014_v46 }
  0x33   : > { %1016 = vmatprep.subr.bf16.mxu0 %v1067_v39 }
  0x34   : > { %1027 = vmatpush3.bf16.msra.mxu1 %v1026_v59 }
  0x35   : > { %1028 = vmatprep.subr.bf16.mxu1 %v1067_v39 }
  0x36   : > { %1018 = vmatpush3.bf16.msra.mxu0 %v1017_v49 }
  0x37   : > { %1031 = vmatprep.subr.bf16.mxu0 %v1067_v39 }
  0x38   : > { %1030 = vmatpush3.bf16.msra.mxu1 %v1029_v62 }
  0x39   : > { %903 = vmatmul.mubr.msk.f32.vlgmr.msra.gmra.mrb[2].mxu0 %vm305_vm1, %v225_v50 }
  0x3a   : > { %940 = vmatprep.mubr.msk.f32.mxu0 %vm1068_vm0, %v1069_v45  ;;  %1033 = vmatpush3.bf16.msra.mxu0 %v1020_v53 }
  0x3b   : > { %1034 = vmatprep.subr.bf16.mxu0 %v1067_v39 }
  0x3e   : > { %1036 = vmatpush3.bf16.msra.mxu0 %v1023_v56 }
  0x3f   : > { %1037 = vmatprep.subr.bf16.mxu0 %v1067_v39 }
  0x42   : > { %1039 = vmatpush3.bf16.msra.mxu0 %v1026_v59 }
  0x43   : > { %1040 = vmatprep.subr.bf16.mxu0 %v1067_v39 }
  0x46   : > { %1042 = vmatpush3.bf16.msra.mxu0 %v1029_v62 }
  0xfc   : > { %v821_v63 = vpop.f32.mrb[0].mxu0 }
  0xfd   : > { %v856_v0 = vpop.f32.mrb[0].mxu1  ;;  %v822_v1 = vpop.f32.mrb[1].mxu0 }
  0xfe   : > { %v823_v2 = vadd.f32 %v822_v1, %v821_v63  ;;  %v857_v3 = vpop.f32.mrb[1].mxu1 }
  0xff   : > { %v858_v4 = vadd.f32 %v857_v3, %v856_v0 }
 0x101   : > { %v445_v5 = vadd.f32 %v858_v4, %v823_v2 }
 0x10c   : > { %v514_v6 = vpop.f32.mrb[2].mxu0 }
 0x10d   : > { %v515_v7 = vadd.f32 %v514_v6, %v445_v5  ;;  %v904_v8 = vpop.f32.mrb[3].mxu0 }
 0x10f   : > { %v519_v9 = vsel %vm518_vm2, %v515_v7, 0.0  ;;  %v526_v10 = vmul.f32 %v515_v7, %v515_v7 }
 0x110   : > { %v520_v11 = vrot.slane %v519_v9, 4 }
 0x111   : > { %v527_v12 = vsel %vm518_vm2, %v526_v10, 0.0 }
 0x112   : > { %v521_v13 = vadd.f32 %v520_v11, %v519_v9  ;;  %v528_v14 = vrot.slane %v527_v12, 4 }
 0x114   : > { %v522_v15 = vrot.slane %v521_v13, 2  ;;  %v529_v16 = vadd.f32 %v528_v14, %v527_v12 }
 0x116   : > { %v523_v17 = vadd.f32 %v522_v15, %v521_v13  ;;  %v530_v18 = vrot.slane %v529_v16, 2 }
 0x118   : > { %v524_v19 = vrot.slane %v523_v17, 1  ;;  %v531_v20 = vadd.f32 %v530_v18, %v529_v16 }
 0x11a   : > { %v525_v21 = vadd.f32 %v524_v19, %v523_v17  ;;  %v532_v22 = vrot.slane %v531_v20, 1 }
 0x11c   : > { %922 = vmatmul.mubr.msk.f32.vlgmr.msra.gmra.mrb[2].mxu1 %vm305_vm1, %v525_v21  ;;  %v533_v23 = vadd.f32 %v532_v22, %v531_v20 }
 0x11e   : > { %941 = vmatmul.mubr.msk.f32.vlgmr.msra.gmra.mrb[4].mxu0 %vm305_vm1, %v533_v23 }
 0x1ef   : > { %v611_v24 = vpop.f32.mrb[2].mxu1 }
 0x1f0   : > { %v688_v25 = vmul.f32 0.125, %v611_v24  ;;  %v923_v26 = vpop.f32.mrb[3].mxu1 }
 0x1f1   : > { %v684_v27 = vpop.f32.mrb[4].mxu0 }
 0x1f2   : > { %v690_v28 = vmul.f32 %v688_v25, %v688_v25  ;;  %v689_v29 = vmul.f32 0.125, %v684_v27  ;;  %v942_v30 = vpop.f32.mrb[5].mxu0  ;;  %v695_v36 = vrot.slane %v688_v25, %v694_v35 }
 0x1f4   : > { %v691_v32 = vsub.f32 %v689_v29, %v690_v28  ;;  %v696_v38 = vsub.f32 %v515_v7, %v695_v36 }
 0x1f6   : > { %v697_v33 = vadd.f32 1e-05, %v691_v32 }
 0x1f8   : > { %1057 = vrsqrt.f32 %v697_v33 }
 0x202   : > { %v1058_v37 = vpop.eup %1057 }
 0x203   : > { %v702_v39 = vrot.slane %v1058_v37, %v694_v35 }
 0x205   : > { %v703_v41 = vmul.f32 %v702_v39, %v696_v38 }
 0x207   : > { %v711_v43 = vmul.f32 %v785_v40, %v703_v41 }
 0x209   : > { %v719_v44 = vadd.f32 %v786_v42, %v711_v43 }
 0x20b   : > { %v720_v45 = vmax.f32 %v719_v44, 0.0 }
 0x20d   : > { %721 = vst.msk [vmem:[%s222_s8] sm:$0xf] %vm518_vm2, %v720_v45 }
 0x20e PF: > { %s15_s18 = sadd.s32 1, %s1065_s18  }
 0x20f   : > { %p12_p4 = scmp.ge.s32.totalorder %s15_s18, 4  }
 0x211   :  { %14 = sbr.rel (!%p12_p4) target bundleno = 1 (0x1), region = 70 }

// kernel: forward.15
= control target key start
LH: loop header
LB: loop body
LE: loop exit
PB: predicated region body
PF: predicated region fallthrough
CT: control target
= control target key end

     0   :  { %s1661_s30 = smov 0   ;;  %s2057_s0 = inlined_call_operand.vmem [shape: f32[2,4,576], index: 0, kind: input, shape index: {}]   ;;  %s2058_s1 = inlined_call_operand.vmem [shape: f32[576,64], index: 1, kind: input, shape index: {}]   ;;  %s2059_s2 = inlined_call_operand.vmem [shape: f32[1,64], index: 2, kind: input, shape index: {}]   ;;  %s2060_s3 = inlined_call_operand.vmem [shape: f32[1,64], index: 3, kind: input, shape index: {}]   ;;  %s2061_s4 = inlined_call_operand.vmem [shape: f32[64,64], index: 4, kind: input, shape index: {}]   ;;  %s2062_s5 = inlined_call_operand.vmem [shape: f32[2,4,64], index: 5, kind: input, shape index: {}]   ;;  %s2063_s6 = inlined_call_operand.vmem [shape: f32[64,64], index: 6, kind: input, shape index: {}]   ;;  %s2064_s7 = inlined_call_operand.vmem [shape: f32[1,64], index: 7, kind: input, shape index: {}]   ;;  %s2065_s8 = inlined_call_operand.vmem [shape: f32[1,64], index: 8, kind: input, shape index: {}]   ;;  %s2066_s9 = inlined_call_operand.vmem [shape: f32[2,4,64], index: 9, kind: output, shape index: {}]  }
   0x1 LB: > { %s1188_s10 = sadd.s32 4294967295, %s1606_s30   ;;  %p1192_p0 = scmp.ge.s32.totalorder %s1606_s30, 1  ;;  %s1606_s30 = sphi %s1661_s30, %s19_s30  }
   0x2   : > { %p296_p1 = scmp.lt.s32.totalorder %s1606_s30, 3 }
   0x4   : > { %p297_p2 = pnand %p1192_p0, %p296_p1 }
   0x5   : > { %v367_v0 = vld [vmem:[%s2058_s1 + $0x80] sm:$0xff] (!%p297_p2)  ;;  %v368_v1 = vld [vmem:[%s2058_s1 + $0x88] sm:$0xff] (!%p297_p2)  ;;  %v369_v11 = vld [vmem:[%s2058_s1 + $0x90] sm:$0xff] (!%p297_p2)  ;;  %p1734_p3 = scmp.lt.s32.totalorder (!%p297_p2), %s1188_s10, 1  ;;  %vm1609_vm0 = vmmov (!%p297_p2), 0   ;;  %vm430_vm1 = vcmask (!%p297_p2), 523264  }
   0x6   : > { %300 = sbr.rel (%p297_p2) target bundleno = 769 (0x301), region = 56  ;;  %v399_v2 = vld [vmem:[%s2058_s1 + $0x180] sm:$0xff] (!%p297_p2)  ;;  %v1446_v3 = vpack.c.bf16 (!%p297_p2), %v368_v1, %v367_v0  ;;  %v400_v4 = vld [vmem:[%s2058_s1 + $0x188] sm:$0xff] (!%p297_p2)  ;;  %v370_v13 = vld [vmem:[%s2058_s1 + $0x98] sm:$0xff] (!%p297_p2)  ;;  %vm643_vm2 = vcmask (!%p297_p2), 519168  }
   0x7   : > { %v351_v5 = vld [vmem:[%s2058_s1] sm:$0xff] (!%p297_p2)  ;;  %v352_v6 = vld [vmem:[%s2058_s1 + $0x8] sm:$0xff] (!%p297_p2)  ;;  %v1478_v7 = vpack.c.bf16 (!%p297_p2), %v400_v4, %v399_v2  ;;  %v401_v14 = vld [vmem:[%s2058_s1 + $0x190] sm:$0xff] (!%p297_p2)  ;;  %v1450_v16 = vpack.c.bf16 (!%p297_p2), %v370_v13, %v369_v11 }
   0x8   : > { %v1448_v8 = vpack.c.bf16 (!%p297_p2), %v352_v6, %v351_v5  ;;  %v383_v9 = vld [vmem:[%s2058_s1 + $0x100] sm:$0xff] (!%p297_p2)  ;;  %v384_v10 = vld [vmem:[%s2058_s1 + $0x108] sm:$0xff] (!%p297_p2)  ;;  %1447 = vmatprep.subr.bf16.mxu0 (!%p297_p2), %v1446_v3  ;;  %v402_v15 = vld [vmem:[%s2058_s1 + $0x198] sm:$0xff] (!%p297_p2) }
   0x9   : > { %v1480_v12 = vpack.c.bf16 (!%p297_p2), %v384_v10, %v383_v9  ;;  %1479 = vmatprep.subr.bf16.mxu1 (!%p297_p2), %v1478_v7  ;;  %v1482_v17 = vpack.c.bf16 (!%p297_p2), %v402_v15, %v401_v14  ;;  %v353_v18 = vld [vmem:[%s2058_s1 + $0x10] sm:$0xff] (!%p297_p2)  ;;  %v354_v19 = vld [vmem:[%s2058_s1 + $0x18] sm:$0xff] (!%p297_p2)  ;;  %v371_v23 = vld [vmem:[%s2058_s1 + $0xa0] sm:$0xff] (!%p297_p2) }
   0xa   : > { %1449 = vmatpush3.bf16.msra.mxu0 (!%p297_p2), %v1448_v8  ;;  %v385_v20 = vld [vmem:[%s2058_s1 + $0x110] sm:$0xff] (!%p297_p2)  ;;  %v1452_v21 = vpack.c.bf16 (!%p297_p2), %v354_v19, %v353_v18  ;;  %v386_v22 = vld [vmem:[%s2058_s1 + $0x118] sm:$0xff] (!%p297_p2)  ;;  %v372_v24 = vld [vmem:[%s2058_s1 + $0xa8] sm:$0xff] (!%p297_p2) }
   0xb   : > { %1481 = vmatpush3.bf16.msra.mxu1 (!%p297_p2), %v1480_v12  ;;  %1451 = vmatprep.subr.bf16.mxu0 (!%p297_p2), %v1450_v16  ;;  %v1484_v25 = vpack.c.bf16 (!%p297_p2), %v386_v22, %v385_v20  ;;  %v1454_v26 = vpack.c.bf16 (!%p297_p2), %v372_v24, %v371_v23  ;;  %v403_v27 = vld [vmem:[%s2058_s1 + $0x1a0] sm:$0xff] (!%p297_p2)  ;;  %v404_v28 = vld [vmem:[%s2058_s1 + $0x1a8] sm:$0xff] (!%p297_p2)  ;;  %v373_v35 = vld [vmem:[%s2058_s1 + $0xb0] sm:$0xff] (!%p297_p2) }
   0xc   : > { %1483 = vmatprep.subr.bf16.mxu1 (!%p297_p2), %v1482_v17  ;;  %v355_v29 = vld [vmem:[%s2058_s1 + $0x20] sm:$0xff] (!%p297_p2)  ;;  %v1486_v30 = vpack.c.bf16 (!%p297_p2), %v404_v28, %v403_v27  ;;  %v356_v31 = vld [vmem:[%s2058_s1 + $0x28] sm:$0xff] (!%p297_p2)  ;;  %v374_v36 = vld [vmem:[%s2058_s1 + $0xb8] sm:$0xff] (!%p297_p2) }
   0xd   : > { %v387_v32 = vld [vmem:[%s2058_s1 + $0x120] sm:$0xff]  ;;  %v388_v33 = vld [vmem:[%s2058_s1 + $0x128] sm:$0xff]  ;;  %v1456_v34 = vpack.c.bf16 %v356_v31, %v355_v29  ;;  %v405_v37 = vld [vmem:[%s2058_s1 + $0x1b0] sm:$0xff]  ;;  %v1458_v39 = vpack.c.bf16 %v374_v36, %v373_v35  ;;  %s2069_s10 = smov (!%p1734_p3, %s1188_s10), 1 }
   0xe   : > { %1453 = vmatpush3.bf16.msra.mxu0 %v1452_v21  ;;  %v1488_v38 = vpack.c.bf16 %v388_v33, %v387_v32  ;;  %v406_v40 = vld [vmem:[%s2058_s1 + $0x1b8] sm:$0xff]  ;;  %v357_v41 = vld [vmem:[%s2058_s1 + $0x30] sm:$0xff]  ;;  %v375_v46 = vld [vmem:[%s2058_s1 + $0xc0] sm:$0xff]  ;;  %s1582_s21 = smul.u32 20, %s2069_s10  ;;  %s1194_s25 = sshll.u32 %s2069_s10, 2 }
   0xf   : > { %1485 = vmatpush3.bf16.msra.mxu1 %v1484_v25  ;;  %1455 = vmatprep.subr.bf16.mxu0 %v1454_v26  ;;  %v358_v42 = vld [vmem:[%s2058_s1 + $0x38] sm:$0xff]  ;;  %v1490_v43 = vpack.c.bf16 %v406_v40, %v405_v37  ;;  %v389_v44 = vld [vmem:[%s2058_s1 + $0x130] sm:$0xff]  ;;  %v376_v47 = vld [vmem:[%s2058_s1 + $0xc8] sm:$0xff]  ;;  %s343_s15 = scalar_lea.vmem %s2062_s5, %s1194_s25  ;;  %s347_s18 = scalar_lea.vmem %s2066_s9, %s1194_s25 }
  0x10   : > { %1487 = vmatprep.subr.bf16.mxu1 %v1486_v30  ;;  %v390_v45 = vld [vmem:[%s2058_s1 + $0x138] sm:$0xff]  ;;  %v407_v48 = vld [vmem:[%s2058_s1 + $0x1c0] sm:$0xff]  ;;  %v408_v49 = vld [vmem:[%s2058_s1 + $0x1c8] sm:$0xff]  ;;  %v1460_v50 = vpack.c.bf16 %v358_v42, %v357_v41  ;;  %v1462_v52 = vpack.c.bf16 %v376_v47, %v375_v46  ;;  %s1835_s22 = scalar_lea.vmem %s2057_s0, %s1582_s21 }
  0x11   : > { %v1492_v51 = vpack.c.bf16 %v390_v45, %v389_v44  ;;  %v359_v53 = vld [vmem:[%s2058_s1 + $0x40] sm:$0xff]  ;;  %v360_v54 = vld [vmem:[%s2058_s1 + $0x48] sm:$0xff]  ;;  %v1494_v56 = vpack.c.bf16 %v408_v49, %v407_v48  ;;  %v377_v58 = vld [vmem:[%s2058_s1 + $0xd0] sm:$0xff]  ;;  %v1610_v45 = vmov 0.0  }
  0x12   : > { %1457 = vmatpush3.bf16.msra.mxu0 %v1456_v34  ;;  %v391_v55 = vld [vmem:[%s2058_s1 + $0x140] sm:$0xff]  ;;  %v392_v57 = vld [vmem:[%s2058_s1 + $0x148] sm:$0xff]  ;;  %v378_v59 = vld [vmem:[%s2058_s1 + $0xd8] sm:$0xff]  ;;  %v1464_v62 = vpack.c.bf16 %v360_v54, %v359_v53 }
  0x13   : > { %1489 = vmatpush3.bf16.msra.mxu1 %v1488_v38  ;;  %1459 = vmatprep.subr.bf16.mxu0 %v1458_v39  ;;  %v409_v60 = vld [vmem:[%s2058_s1 + $0x1d0] sm:$0xff]  ;;  %v410_v61 = vld [vmem:[%s2058_s1 + $0x1d8] sm:$0xff]  ;;  %v1496_v63 = vpack.c.bf16 %v392_v57, %v391_v55  ;;  %v1466_v0 = vpack.c.bf16 %v378_v59, %v377_v58  ;;  %v379_v6 = vld [vmem:[%s2058_s1 + $0xe0] sm:$0xff]  ;;  %v1608_v39 = vmov 0.0|0.0  }
  0x14   : > { %1491 = vmatprep.subr.bf16.mxu1 %v1490_v43  ;;  %v361_v1 = vld [vmem:[%s2058_s1 + $0x50] sm:$0xff]  ;;  %v362_v2 = vld [vmem:[%s2058_s1 + $0x58] sm:$0xff]  ;;  %v1498_v4 = vpack.c.bf16 %v410_v61, %v409_v60  ;;  %v380_v7 = vld [vmem:[%s2058_s1 + $0xe8] sm:$0xff] }
  0x15   : > { %v393_v3 = vld [vmem:[%s2058_s1 + $0x150] sm:$0xff]  ;;  %v394_v5 = vld [vmem:[%s2058_s1 + $0x158] sm:$0xff]  ;;  %v411_v8 = vld [vmem:[%s2058_s1 + $0x1e0] sm:$0xff]  ;;  %v1468_v10 = vpack.c.bf16 %v362_v2, %v361_v1  ;;  %v1470_v14 = vpack.c.bf16 %v380_v7, %v379_v6 }
  0x16   : > { %1461 = vmatpush3.bf16.msra.mxu0 %v1460_v50  ;;  %v412_v9 = vld [vmem:[%s2058_s1 + $0x1e8] sm:$0xff]  ;;  %v363_v11 = vld [vmem:[%s2058_s1 + $0x60] sm:$0xff]  ;;  %v1500_v13 = vpack.c.bf16 %v394_v5, %v393_v3  ;;  %v381_v19 = vld [vmem:[%s2058_s1 + $0xf0] sm:$0xff] }
  0x17   : > { %1493 = vmatpush3.bf16.msra.mxu1 %v1492_v51  ;;  %1463 = vmatprep.subr.bf16.mxu0 %v1462_v52  ;;  %v364_v12 = vld [vmem:[%s2058_s1 + $0x68] sm:$0xff]  ;;  %v395_v15 = vld [vmem:[%s2058_s1 + $0x160] sm:$0xff]  ;;  %v1502_v18 = vpack.c.bf16 %v412_v9, %v411_v8  ;;  %v382_v20 = vld [vmem:[%s2058_s1 + $0xf8] sm:$0xff] }
  0x18   : > { %1495 = vmatprep.subr.bf16.mxu1 %v1494_v56  ;;  %v396_v16 = vld [vmem:[%s2058_s1 + $0x168] sm:$0xff]  ;;  %v348_v17 = vld [vmem:[%s1835_s22] sm:$0xff]  ;;  %v413_v23 = vld [vmem:[%s2058_s1 + $0x1f0] sm:$0xff]  ;;  %v1472_v26 = vpack.c.bf16 %v364_v12, %v363_v11  ;;  %v1474_v28 = vpack.c.bf16 %v382_v20, %v381_v19 }
  0x19   : > { %v426_v21 = vcombine.high %v348_v17, %v348_v17  ;;  %v349_v22 = vld [vmem:[%s1835_s22 + $0x8] sm:$0xff]  ;;  %v414_v24 = vld [vmem:[%s2058_s1 + $0x1f8] sm:$0xff]  ;;  %v1504_v27 = vpack.c.bf16 %v396_v16, %v395_v15  ;;  %v365_v29 = vld [vmem:[%s2058_s1 + $0x70] sm:$0xff] }
  0x1a   : > { %1465 = vmatpush3.bf16.msra.mxu0 %v1464_v62  ;;  %v427_v25 = vcombine.high %v349_v22, %v349_v22  ;;  %v366_v30 = vld [vmem:[%s2058_s1 + $0x78] sm:$0xff]  ;;  %v1506_v31 = vpack.c.bf16 %v414_v24, %v413_v23  ;;  %v397_v32 = vld [vmem:[%s2058_s1 + $0x170] sm:$0xff]  ;;  %v415_v36 = vld [vmem:[%s2058_s1 + $0x200] sm:$0xff] }
  0x1b   : > { %1497 = vmatpush3.bf16.msra.mxu1 %v1496_v63  ;;  %1467 = vmatprep.subr.bf16.mxu0 %v1466_v0  ;;  %v398_v33 = vld [vmem:[%s2058_s1 + $0x178] sm:$0xff]  ;;  %v1476_v34 = vpack.c.bf16 %v366_v30, %v365_v29  ;;  %v416_v37 = vld [vmem:[%s2058_s1 + $0x208] sm:$0xff]  ;;  %v417_v40 = vld [vmem:[%s2058_s1 + $0x210] sm:$0xff] }
  0x1c   : > { %1499 = vmatprep.subr.bf16.mxu1 %v1498_v4  ;;  %497 = vmatprep.mubr.f32.mxu0 %v426_v21  ;;  %v1508_v35 = vpack.c.bf16 %v398_v33, %v397_v32  ;;  %v1511_v38 = vpack.c.bf16 %v416_v37, %v415_v36  ;;  %v418_v41 = vld [vmem:[%s2058_s1 + $0x218] sm:$0xff]  ;;  %v419_v43 = vld [vmem:[%s2058_s1 + $0x220] sm:$0xff]  ;;  %v420_v44 = vld [vmem:[%s2058_s1 + $0x228] sm:$0xff] }
  0x1d   : > { %567 = vmatprep.mubr.f32.mxu1 %v427_v25  ;;  %v1514_v42 = vpack.c.bf16 %v418_v41, %v417_v40  ;;  %v1517_v46 = vpack.c.bf16 %v420_v44, %v419_v43  ;;  %v421_v47 = vld [vmem:[%s2058_s1 + $0x230] sm:$0xff]  ;;  %v422_v48 = vld [vmem:[%s2058_s1 + $0x238] sm:$0xff]  ;;  %v659_v51 = vld [vmem:[%s2061_s4] sm:$0xff] }
  0x1e   : > { %1469 = vmatpush3.bf16.msra.mxu0 %v1468_v10  ;;  %v1520_v49 = vpack.c.bf16 %v422_v48, %v421_v47  ;;  %v350_v50 = vld [vmem:[%s1835_s22 + $0x10] sm:$0xf]  ;;  %v660_v52 = vld [vmem:[%s2061_s4 + $0x8] sm:$0xff]  ;;  %v662_v55 = vld [vmem:[%s2061_s4 + $0x18] sm:$0xff] }
  0x1f   : > { %1501 = vmatpush3.bf16.msra.mxu1 %v1500_v13  ;;  %1471 = vmatprep.subr.bf16.mxu0 %v1470_v14  ;;  %v1925_v53 = vpack.c.bf16 %v660_v52, %v659_v51  ;;  %v661_v54 = vld [vmem:[%s2061_s4 + $0x10] sm:$0xff]  ;;  %v663_v57 = vld [vmem:[%s2061_s4 + $0x20] sm:$0xff]  ;;  %v664_v58 = vld [vmem:[%s2061_s4 + $0x28] sm:$0xff] }
  0x20   : > { %1503 = vmatprep.subr.bf16.mxu1 %v1502_v18  ;;  %v1937_v56 = vpack.c.bf16 %v662_v55, %v661_v54  ;;  %v1949_v59 = vpack.c.bf16 %v664_v58, %v663_v57  ;;  %v665_v60 = vld [vmem:[%s2061_s4 + $0x30] sm:$0xff]  ;;  %v666_v61 = vld [vmem:[%s2061_s4 + $0x38] sm:$0xff]  ;;  %v846_v19 = vld [vmem:[%s2063_s6] sm:$0xff] }
  0x21   : > { %v1961_v62 = vpack.c.bf16 %v666_v61, %v665_v60  ;;  %v847_v20 = vld [vmem:[%s2063_s6 + $0x8] sm:$0xff]  ;;  %v850_v30 = vld [vmem:[%s2063_s6 + $0x20] sm:$0xff]  ;;  %v852_v33 = vld [vmem:[%s2063_s6 + $0x30] sm:$0xff] }
  0x22   : > { %1473 = vmatpush3.bf16.msra.mxu0 %v1472_v26  ;;  %v1547_v23 = vpack.c.bf16 %v847_v20, %v846_v19  ;;  %v848_v26 = vld [vmem:[%s2063_s6 + $0x10] sm:$0xff]  ;;  %v845_v36 = vld [vmem:[%s343_s15] sm:$0xf] }
  0x23   : > { %1505 = vmatpush3.bf16.msra.mxu1 %v1504_v27  ;;  %1475 = vmatprep.subr.bf16.mxu0 %v1474_v28  ;;  %v849_v27 = vld [vmem:[%s2063_s6 + $0x18] sm:$0xff]  ;;  %v1199_v19 = vld [vmem:[%s2059_s2] ss:$0 sm:$0xff] }
  0x24   : > { %1507 = vmatprep.subr.bf16.mxu1 %v1506_v31  ;;  %v1550_v29 = vpack.c.bf16 %v849_v27, %v848_v26  ;;  %v851_v31 = vld [vmem:[%s2063_s6 + $0x28] sm:$0xff] }
  0x25   : > { %v1553_v32 = vpack.c.bf16 %v851_v31, %v850_v30 }
  0x26   : > { %1477 = vmatpush3.bf16.msra.mxu0 %v1476_v34  ;;  %v853_v34 = vld [vmem:[%s2063_s6 + $0x38] sm:$0xff] }
  0x27   : > { %1509 = vmatpush3.bf16.msra.mxu1 %v1508_v35  ;;  %1510 = vmatprep.subr.bf16.mxu0 %v1608_v39  ;;  %v1556_v35 = vpack.c.bf16 %v853_v34, %v852_v33 }
  0x28   : > { %1522 = vmatprep.subr.bf16.mxu1 %v1608_v39 }
  0x29   : > { %498 = vmatmul.mubr.f32.vlgmr.msra.gmra.mrb[0].mxu0 %v348_v17 }
  0x2a   : > { %568 = vmatmul.mubr.f32.vlgmr.msra.gmra.mrb[0].mxu1 %v349_v22  ;;  %1512 = vmatpush3.bf16.msra.mxu0 %v1511_v38 }
  0x2b   : > { %1513 = vmatprep.subr.bf16.mxu0 %v1608_v39  ;;  %1348 = vmatprep.mubr.msk.f32.mxu0 %vm1609_vm0, %v1610_v45 }
  0x2c   : > { %1367 = vmatprep.mubr.msk.f32.mxu1 %vm1609_vm0, %v1610_v45  ;;  %1524 = vmatpush3.bf16.msra.mxu1 %v1925_v53 }
  0x2d   : > { %1525 = vmatprep.subr.bf16.mxu1 %v1608_v39 }
  0x2e   : > { %1515 = vmatpush3.bf16.msra.mxu0 %v1514_v42 }
  0x2f   : > { %1516 = vmatprep.subr.bf16.mxu0 %v1608_v39 }
  0x30   : > { %1527 = vmatpush3.bf16.msra.mxu1 %v1937_v56 }
  0x31   : > { %1528 = vmatprep.subr.bf16.mxu1 %v1608_v39 }
  0x32   : > { %1518 = vmatpush3.bf16.msra.mxu0 %v1517_v46 }
  0x33   : > { %1519 = vmatprep.subr.bf16.mxu0 %v1608_v39 }
  0x34   : > { %1530 = vmatpush3.bf16.msra.mxu1 %v1949_v59 }
  0x35   : > { %1531 = vmatprep.subr.bf16.mxu1 %v1608_v39 }
  0x36   : > { %1521 = vmatpush3.bf16.msra.mxu0 %v1520_v49 }
  0x37   : > { %1534 = vmatprep.subr.bf16.mxu0 %v1608_v39 }
  0x38   : > { %1533 = vmatpush3.bf16.msra.mxu1 %v1961_v62 }
  0x39   : > { %1349 = vmatmul.mubr.msk.f32.vlgmr.msra.gmra.mrb[2].mxu0 %vm430_vm1, %v350_v50  ;;  %1546 = vmatprep.subr.bf16.mxu1 %v1608_v39 }
  0x3a   : > { %1386 = vmatprep.mubr.msk.f32.mxu0 %vm1609_vm0, %v1610_v45  ;;  %1536 = vmatpush3.bf16.msra.mxu0 %v1925_v53 }
  0x3b   : > { %1537 = vmatprep.subr.bf16.mxu0 %v1608_v39 }
  0x3e   : > { %1539 = vmatpush3.bf16.msra.mxu0 %v1937_v56 }
  0x3f   : > { %1540 = vmatprep.subr.bf16.mxu0 %v1608_v39 }
  0x42   : > { %1542 = vmatpush3.bf16.msra.mxu0 %v1949_v59 }
  0x43   : > { %1543 = vmatprep.subr.bf16.mxu0 %v1608_v39 }
  0x46   : > { %1545 = vmatpush3.bf16.msra.mxu0 %v1961_v62 }
  0x47   : > { %1558 = vmatprep.subr.bf16.mxu0 %v1608_v39 }
  0xfc   : > { %v1240_v63 = vpop.f32.mrb[0].mxu0 }
  0xfd   : > { %v1275_v0 = vpop.f32.mrb[0].mxu1  ;;  %v1241_v1 = vpop.f32.mrb[1].mxu0 }
  0xfe   : > { %v1242_v2 = vadd.f32 %v1241_v1, %v1240_v63  ;;  %v1276_v3 = vpop.f32.mrb[1].mxu1 }
  0xff   : > { %v1277_v4 = vadd.f32 %v1276_v3, %v1275_v0 }
 0x101   : > { %v570_v5 = vadd.f32 %v1277_v4, %v1242_v2 }
 0x10c   : > { %v639_v6 = vpop.f32.mrb[2].mxu0 }
 0x10d   : > { %v1967_v7 = vadd.f32 %v639_v6, %v570_v5  ;;  %v1350_v8 = vpop.f32.mrb[3].mxu0 }
 0x10f   : > { %v644_v9 = vsel %vm643_vm2, %v1967_v7, 0.0  ;;  %v651_v10 = vmul.f32 %v1967_v7, %v1967_v7 }
 0x110   : > { %v645_v11 = vrot.slane %v644_v9, 4 }
 0x111   : > { %v652_v12 = vsel %vm643_vm2, %v651_v10, 0.0 }
 0x112   : > { %v646_v13 = vadd.f32 %v645_v11, %v644_v9  ;;  %v653_v14 = vrot.slane %v652_v12, 4 }
 0x114   : > { %v647_v15 = vrot.slane %v646_v13, 2  ;;  %v654_v16 = vadd.f32 %v653_v14, %v652_v12 }
 0x116   : > { %v648_v17 = vadd.f32 %v647_v15, %v646_v13  ;;  %v655_v18 = vrot.slane %v654_v16, 2 }
 0x118   : > { %v649_v21 = vrot.slane %v648_v17, 1  ;;  %v656_v22 = vadd.f32 %v655_v18, %v654_v16 }
 0x11a   : > { %v650_v24 = vadd.f32 %v649_v21, %v648_v17  ;;  %v657_v25 = vrot.slane %v656_v22, 1  ;;  %v1204_v21 = vld [vmem:[%s2064_s7] ss:$0 sm:$0xff] }
 0x11c   : > { %1368 = vmatmul.mubr.msk.f32.vlgmr.msra.gmra.mrb[2].mxu1 %vm430_vm1, %v650_v24  ;;  %v658_v28 = vadd.f32 %v657_v25, %v656_v22  ;;  %v1200_v24 = vld [vmem:[%s2060_s3] ss:$0 sm:$0xff] }
 0x11d   : > { %1548 = vmatpush3.bf16.msra.mxu1 %v1547_v23  ;;  %1405 = vmatprep.mubr.msk.f32.mxu1 %vm1609_vm0, %v1610_v45  ;;  %v1205_v25 = vld [vmem:[%s2065_s8] ss:$0 sm:$0xff] }
 0x11e   : > { %1387 = vmatmul.mubr.msk.f32.vlgmr.msra.gmra.mrb[4].mxu0 %vm430_vm1, %v658_v28  ;;  %1549 = vmatprep.subr.bf16.mxu1 %v1608_v39 }
 0x11f   : > { %1560 = vmatpush3.bf16.msra.mxu0 %v1925_v53  ;;  %1424 = vmatprep.mubr.msk.f32.mxu0 %vm1609_vm0, %v1610_v45 }
 0x120   : > { %1561 = vmatprep.subr.bf16.mxu0 %v1608_v39 }
 0x121   : > { %1551 = vmatpush3.bf16.msra.mxu1 %v1550_v29 }
 0x122   : > { %1552 = vmatprep.subr.bf16.mxu1 %v1608_v39 }
 0x123   : > { %1563 = vmatpush3.bf16.msra.mxu0 %v1937_v56 }
 0x124   : > { %1564 = vmatprep.subr.bf16.mxu0 %v1608_v39 }
 0x125   : > { %1554 = vmatpush3.bf16.msra.mxu1 %v1553_v32 }
 0x126   : > { %1555 = vmatprep.subr.bf16.mxu1 %v1608_v39 }
 0x127   : > { %1566 = vmatpush3.bf16.msra.mxu0 %v1949_v59 }
 0x128   : > { %1567 = vmatprep.subr.bf16.mxu0 %v1608_v39 }
 0x129   : > { %1557 = vmatpush3.bf16.msra.mxu1 %v1556_v35 }
 0x12a   : > { %1570 = vmatprep.subr.bf16.mxu1 %v1608_v39 }
 0x12b   : > { %1569 = vmatpush3.bf16.msra.mxu0 %v1961_v62 }
 0x12c   : > { %1406 = vmatmul.mubr.msk.f32.vlgmr.msra.gmra.mrb[4].mxu1 %vm430_vm1, %v845_v36 }
 0x12d   : > { %1572 = vmatpush3.bf16.msra.mxu1 %v1925_v53  ;;  %1443 = vmatprep.mubr.msk.f32.mxu1 %vm1609_vm0, %v1610_v45  ;;  %v817_v45 = vlaneseq }
 0x12e   : > { %1573 = vmatprep.subr.bf16.mxu1 %v1608_v39 }
 0x12f   : > { %v818_v48 = vshrl.u32 %v817_v45, 7 }
 0x131   : > { %1575 = vmatpush3.bf16.msra.mxu1 %v1937_v56  ;;  %v819_v49 = vsub.s32 0, %v818_v48 }
 0x132   : > { %1576 = vmatprep.subr.bf16.mxu1 %v1608_v39 }
 0x135   : > { %1578 = vmatpush3.bf16.msra.mxu1 %v1949_v59 }
 0x136   : > { %1579 = vmatprep.subr.bf16.mxu1 %v1608_v39 }
 0x139   : > { %1581 = vmatpush3.bf16.msra.mxu1 %v1961_v62 }
 0x1ef   : > { %v736_v37 = vpop.f32.mrb[2].mxu1 }
 0x1f0   : > { %v813_v38 = vmul.f32 0.125, %v736_v37  ;;  %v1369_v40 = vpop.f32.mrb[3].mxu1 }
 0x1f1   : > { %v809_v41 = vpop.f32.mrb[4].mxu0 }
 0x1f2   : > { %v815_v42 = vmul.f32 %v813_v38, %v813_v38  ;;  %v814_v43 = vmul.f32 0.125, %v809_v41  ;;  %v1388_v44 = vpop.f32.mrb[5].mxu0  ;;  %v820_v50 = vrot.slane %v813_v38, %v819_v49 }
 0x1f4   : > { %v816_v46 = vsub.f32 %v814_v43, %v815_v42  ;;  %v821_v57 = vsub.f32 %v1967_v7, %v820_v50 }
 0x1f6   : > { %v822_v47 = vadd.f32 1e-05, %v816_v46 }
 0x1f8   : > { %1596 = vrsqrt.f32 %v822_v47 }
 0x1ff   : > { %v923_v51 = vpop.f32.mrb[4].mxu1 }
 0x200   : > { %v927_v52 = vsel %vm643_vm2, %v923_v51, 0.0  ;;  %v934_v39 = vmul.f32 %v923_v51, %v923_v51  ;;  %v1407_v53 = vpop.f32.mrb[5].mxu1 }
 0x201   : > { %v928_v54 = vrot.slane %v927_v52, 4 }
 0x202   : > { %v1597_v55 = vpop.eup %1596  ;;  %v935_v56 = vsel %vm643_vm2, %v934_v39, 0.0 }
 0x203   : > { %v827_v58 = vrot.slane %v1597_v55, %v819_v49  ;;  %v929_v59 = vadd.f32 %v928_v54, %v927_v52  ;;  %v936_v60 = vrot.slane %v935_v56, 4 }
 0x205   : > { %v828_v61 = vmul.f32 %v827_v58, %v821_v57  ;;  %v930_v62 = vrot.slane %v929_v59, 2  ;;  %v937_v63 = vadd.f32 %v936_v60, %v935_v56 }
 0x207   : > { %v931_v0 = vadd.f32 %v930_v62, %v929_v59  ;;  %v938_v1 = vrot.slane %v937_v63, 2  ;;  %v836_v22 = vmul.f32 %v1199_v19, %v828_v61 }
 0x209   : > { %v932_v2 = vrot.slane %v931_v0, 1  ;;  %v939_v3 = vadd.f32 %v938_v1, %v937_v63  ;;  %v844_v27 = vadd.f32 %v1200_v24, %v836_v22 }
 0x20b   : > { %v933_v4 = vadd.f32 %v932_v2, %v931_v0  ;;  %v940_v5 = vrot.slane %v939_v3, 1 }
 0x20d   : > { %v941_v6 = vadd.f32 %v940_v5, %v939_v3  ;;  %1425 = vmatmul.mubr.msk.f32.vlgmr.msra.gmra.mrb[6].mxu0 %vm430_vm1, %v933_v4 }
 0x20f   : > { %1444 = vmatmul.mubr.msk.f32.vlgmr.msra.gmra.mrb[6].mxu1 %vm430_vm1, %v941_v6 }
 0x2e0   : > { %v1011_v8 = vpop.f32.mrb[6].mxu0 }
 0x2e1   : > { %v1088_v9 = vmul.f32 0.125, %v1011_v8  ;;  %v1426_v7 = vpop.f32.mrb[7].mxu0 }
 0x2e2   : > { %v1084_v10 = vpop.f32.mrb[6].mxu1 }
 0x2e3   : > { %v1090_v11 = vmul.f32 %v1088_v9, %v1088_v9  ;;  %v1095_v12 = vrot.slane %v1088_v9, %v819_v49  ;;  %v1089_v13 = vmul.f32 0.125, %v1084_v10  ;;  %v1445_v14 = vpop.f32.mrb[7].mxu1 }
 0x2e5   : > { %v1096_v15 = vsub.f32 %v923_v51, %v1095_v12  ;;  %v1091_v16 = vsub.f32 %v1089_v13, %v1090_v11 }
 0x2e7   : > { %v1097_v17 = vadd.f32 1e-05, %v1091_v16 }
 0x2e9   : > { %1598 = vrsqrt.f32 %v1097_v17 }
 0x2f3   : > { %v1599_v18 = vpop.eup %1598 }
 0x2f4   : > { %v1102_v20 = vrot.slane %v1599_v18, %v819_v49 }
 0x2f6   : > { %v1103_v23 = vmul.f32 %v1102_v20, %v1096_v15 }
 0x2f8   : > { %v1111_v26 = vmul.f32 %v1204_v21, %v1103_v23 }
 0x2fa   : > { %v1119_v28 = vadd.f32 %v1205_v25, %v1111_v26 }
 0x2fc   : > { %v1120_v29 = vadd.f32 %v1119_v28, %v844_v27 }
 0x2fe   : > { %v1121_v30 = vmax.f32 %v1120_v29, 0.0 }
 0x300   : > { %1122 = vst.msk [vmem:[%s347_s18] sm:$0xf] %vm643_vm2, %v1121_v30 }
 0x301 PF: > { %s19_s30 = sadd.s32 1, %s1606_s30  }
 0x302   : > { %p16_p4 = scmp.ge.s32.totalorder %s19_s30, 4  }
 0x304   :  { %18 = sbr.rel (!%p16_p4) target bundleno = 1 (0x1), region = 89 }

// kernel: forward.16
= control target key start
LH: loop header
LB: loop body
LE: loop exit
PB: predicated region body
PF: predicated region fallthrough
CT: control target
= control target key end

     0   :  { %s1138_s18 = smov 0   ;;  %s1476_s0 = inlined_call_operand.vmem [shape: f32[2,1,576], index: 0, kind: input, shape index: {}]   ;;  %s1477_s1 = inlined_call_operand.vmem [shape: f32[576,128], index: 1, kind: input, shape index: {}]   ;;  %s1478_s2 = inlined_call_operand.vmem [shape: f32[1,128], index: 2, kind: input, shape index: {}]   ;;  %s1479_s3 = inlined_call_operand.vmem [shape: f32[1,128], index: 3, kind: input, shape index: {}]   ;;  %s1480_s4 = inlined_call_operand.vmem [shape: f32[128,128], index: 4, kind: input, shape index: {}]   ;;  %s1481_s5 = inlined_call_operand.vmem [shape: f32[2,1,128], index: 5, kind: output, shape index: {}]  }
   0x1 LB: > { %s749_s19 = sadd.s32 4294967295, %s1103_s18   ;;  %p753_p0 = scmp.ge.s32.totalorder %s1103_s18, 1  ;;  %s1103_s18 = sphi %s1138_s18, %s15_s18  }
   0x2   : > { %p186_p1 = scmp.lt.s32.totalorder %s1103_s18, 3 }
   0x4   : > { %p187_p2 = pnand %p753_p0, %p186_p1 }
   0x5   : > { %v235_v0 = vld [vmem:[%s1477_s1 + $0x80] sm:$0xff] (!%p187_p2)  ;;  %v236_v1 = vld [vmem:[%s1477_s1 + $0x88] sm:$0xff] (!%p187_p2)  ;;  %v237_v11 = vld [vmem:[%s1477_s1 + $0x90] sm:$0xff] (!%p187_p2)  ;;  %p1211_p3 = scmp.lt.s32.totalorder (!%p187_p2), %s749_s19, 1  ;;  %v292_v47 = vlaneseq (!%p187_p2)  ;;  %vm1106_vm0 = vmmov (!%p187_p2), 0   ;;  %vm316_vm1 = vcmask (!%p187_p2), 523264  }
   0x6   : > { %190 = sbr.rel (%p187_p2) target bundleno = 511 (0x1ff), region = 40  ;;  %v267_v2 = vld [vmem:[%s1477_s1 + $0x180] sm:$0xff] (!%p187_p2)  ;;  %v959_v3 = vpack.c.bf16 (!%p187_p2), %v236_v1, %v235_v0  ;;  %v268_v4 = vld [vmem:[%s1477_s1 + $0x188] sm:$0xff] (!%p187_p2)  ;;  %v238_v13 = vld [vmem:[%s1477_s1 + $0x98] sm:$0xff] (!%p187_p2) }
   0x7   : > { %v219_v5 = vld [vmem:[%s1477_s1] sm:$0xff] (!%p187_p2)  ;;  %v220_v6 = vld [vmem:[%s1477_s1 + $0x8] sm:$0xff] (!%p187_p2)  ;;  %v991_v7 = vpack.c.bf16 (!%p187_p2), %v268_v4, %v267_v2  ;;  %v269_v14 = vld [vmem:[%s1477_s1 + $0x190] sm:$0xff] (!%p187_p2)  ;;  %v963_v16 = vpack.c.bf16 (!%p187_p2), %v238_v13, %v237_v11  ;;  %v1285_v61 = vshrl.u32 (!%p187_p2), %v292_v47, 7 }
   0x8   : > { %v961_v8 = vpack.c.bf16 (!%p187_p2), %v220_v6, %v219_v5  ;;  %v251_v9 = vld [vmem:[%s1477_s1 + $0x100] sm:$0xff] (!%p187_p2)  ;;  %v252_v10 = vld [vmem:[%s1477_s1 + $0x108] sm:$0xff] (!%p187_p2)  ;;  %960 = vmatprep.subr.bf16.mxu0 (!%p187_p2), %v959_v3  ;;  %v270_v15 = vld [vmem:[%s1477_s1 + $0x198] sm:$0xff] (!%p187_p2) }
   0x9   : > { %v993_v12 = vpack.c.bf16 (!%p187_p2), %v252_v10, %v251_v9  ;;  %992 = vmatprep.subr.bf16.mxu1 (!%p187_p2), %v991_v7  ;;  %v995_v17 = vpack.c.bf16 (!%p187_p2), %v270_v15, %v269_v14  ;;  %v221_v18 = vld [vmem:[%s1477_s1 + $0x10] sm:$0xff] (!%p187_p2)  ;;  %v222_v19 = vld [vmem:[%s1477_s1 + $0x18] sm:$0xff] (!%p187_p2)  ;;  %v239_v23 = vld [vmem:[%s1477_s1 + $0xa0] sm:$0xff] (!%p187_p2)  ;;  %v298_v10 = vsub.s32 (!%p187_p2), 1, %v1285_v61  ;;  %v306_v11 = vsub.s32 (!%p187_p2), 3, %v1285_v61 }
   0xa   : > { %962 = vmatpush3.bf16.msra.mxu0 (!%p187_p2), %v961_v8  ;;  %v253_v20 = vld [vmem:[%s1477_s1 + $0x110] sm:$0xff] (!%p187_p2)  ;;  %v965_v21 = vpack.c.bf16 (!%p187_p2), %v222_v19, %v221_v18  ;;  %v254_v22 = vld [vmem:[%s1477_s1 + $0x118] sm:$0xff] (!%p187_p2)  ;;  %v240_v24 = vld [vmem:[%s1477_s1 + $0xa8] sm:$0xff] (!%p187_p2) }
   0xb   : > { %994 = vmatpush3.bf16.msra.mxu1 (!%p187_p2), %v993_v12  ;;  %964 = vmatprep.subr.bf16.mxu0 (!%p187_p2), %v963_v16  ;;  %v997_v25 = vpack.c.bf16 (!%p187_p2), %v254_v22, %v253_v20  ;;  %v967_v26 = vpack.c.bf16 (!%p187_p2), %v240_v24, %v239_v23  ;;  %v271_v27 = vld [vmem:[%s1477_s1 + $0x1a0] sm:$0xff] (!%p187_p2)  ;;  %v272_v28 = vld [vmem:[%s1477_s1 + $0x1a8] sm:$0xff] (!%p187_p2)  ;;  %v241_v35 = vld [vmem:[%s1477_s1 + $0xb0] sm:$0xff] (!%p187_p2) }
   0xc   : > { %996 = vmatprep.subr.bf16.mxu1 (!%p187_p2), %v995_v17  ;;  %v223_v29 = vld [vmem:[%s1477_s1 + $0x20] sm:$0xff] (!%p187_p2)  ;;  %v999_v30 = vpack.c.bf16 (!%p187_p2), %v272_v28, %v271_v27  ;;  %v224_v31 = vld [vmem:[%s1477_s1 + $0x28] sm:$0xff] (!%p187_p2)  ;;  %v242_v36 = vld [vmem:[%s1477_s1 + $0xb8] sm:$0xff] (!%p187_p2) }
   0xd   : > { %v255_v32 = vld [vmem:[%s1477_s1 + $0x120] sm:$0xff]  ;;  %v256_v33 = vld [vmem:[%s1477_s1 + $0x128] sm:$0xff]  ;;  %v969_v34 = vpack.c.bf16 %v224_v31, %v223_v29  ;;  %v273_v37 = vld [vmem:[%s1477_s1 + $0x1b0] sm:$0xff]  ;;  %v971_v39 = vpack.c.bf16 %v242_v36, %v241_v35  ;;  %s1484_s19 = smov (!%p1211_p3, %s749_s19), 1 }
   0xe   : > { %966 = vmatpush3.bf16.msra.mxu0 %v965_v21  ;;  %v1001_v38 = vpack.c.bf16 %v256_v33, %v255_v32  ;;  %v274_v40 = vld [vmem:[%s1477_s1 + $0x1b8] sm:$0xff]  ;;  %v225_v41 = vld [vmem:[%s1477_s1 + $0x30] sm:$0xff]  ;;  %v243_v46 = vld [vmem:[%s1477_s1 + $0xc0] sm:$0xff]  ;;  %s1083_s11 = smul.u32 5, %s1484_s19  ;;  %s217_s24 = scalar_lea.vmem %s1481_s5, %s1484_s19 }
   0xf   : > { %998 = vmatpush3.bf16.msra.mxu1 %v997_v25  ;;  %968 = vmatprep.subr.bf16.mxu0 %v967_v26  ;;  %v226_v42 = vld [vmem:[%s1477_s1 + $0x38] sm:$0xff]  ;;  %v1003_v43 = vpack.c.bf16 %v274_v40, %v273_v37  ;;  %v257_v44 = vld [vmem:[%s1477_s1 + $0x130] sm:$0xff]  ;;  %v244_v48 = vld [vmem:[%s1477_s1 + $0xc8] sm:$0xff]  ;;  %v294_v37 = vsub.s32 0, %v1285_v61 }
  0x10   : > { %1000 = vmatprep.subr.bf16.mxu1 %v999_v30  ;;  %v258_v45 = vld [vmem:[%s1477_s1 + $0x138] sm:$0xff]  ;;  %v275_v49 = vld [vmem:[%s1477_s1 + $0x1c0] sm:$0xff]  ;;  %v276_v50 = vld [vmem:[%s1477_s1 + $0x1c8] sm:$0xff]  ;;  %v973_v51 = vpack.c.bf16 %v226_v42, %v225_v41  ;;  %v975_v53 = vpack.c.bf16 %v244_v48, %v243_v46  ;;  %s214_s7 = scalar_lea.vmem %s1476_s0, %s1083_s11  ;;  %v1105_v48 = vmov 0.0|0.0  }
  0x11   : > { %v1005_v52 = vpack.c.bf16 %v258_v45, %v257_v44  ;;  %v227_v54 = vld [vmem:[%s1477_s1 + $0x40] sm:$0xff]  ;;  %v228_v55 = vld [vmem:[%s1477_s1 + $0x48] sm:$0xff]  ;;  %v1007_v57 = vpack.c.bf16 %v276_v50, %v275_v49  ;;  %v245_v59 = vld [vmem:[%s1477_s1 + $0xd0] sm:$0xff] }
  0x12   : > { %970 = vmatpush3.bf16.msra.mxu0 %v969_v34  ;;  %v259_v56 = vld [vmem:[%s1477_s1 + $0x140] sm:$0xff]  ;;  %v260_v58 = vld [vmem:[%s1477_s1 + $0x148] sm:$0xff]  ;;  %v246_v60 = vld [vmem:[%s1477_s1 + $0xd8] sm:$0xff]  ;;  %v977_v0 = vpack.c.bf16 %v228_v55, %v227_v54 }
  0x13   : > { %1002 = vmatpush3.bf16.msra.mxu1 %v1001_v38  ;;  %972 = vmatprep.subr.bf16.mxu0 %v971_v39  ;;  %v277_v62 = vld [vmem:[%s1477_s1 + $0x1d0] sm:$0xff]  ;;  %v278_v63 = vld [vmem:[%s1477_s1 + $0x1d8] sm:$0xff]  ;;  %v1009_v1 = vpack.c.bf16 %v260_v58, %v259_v56  ;;  %v979_v2 = vpack.c.bf16 %v246_v60, %v245_v59  ;;  %v247_v8 = vld [vmem:[%s1477_s1 + $0xe0] sm:$0xff]  ;;  %v302_v39 = vsub.s32 2, %v1285_v61 }
  0x14   : > { %1004 = vmatprep.subr.bf16.mxu1 %v1003_v43  ;;  %v229_v3 = vld [vmem:[%s1477_s1 + $0x50] sm:$0xff]  ;;  %v230_v4 = vld [vmem:[%s1477_s1 + $0x58] sm:$0xff]  ;;  %v1011_v6 = vpack.c.bf16 %v278_v63, %v277_v62  ;;  %v248_v9 = vld [vmem:[%s1477_s1 + $0xe8] sm:$0xff] }
  0x15   : > { %v261_v5 = vld [vmem:[%s1477_s1 + $0x150] sm:$0xff]  ;;  %v262_v7 = vld [vmem:[%s1477_s1 + $0x158] sm:$0xff]  ;;  %v279_v12 = vld [vmem:[%s1477_s1 + $0x1e0] sm:$0xff]  ;;  %v981_v14 = vpack.c.bf16 %v230_v4, %v229_v3  ;;  %v983_v17 = vpack.c.bf16 %v248_v9, %v247_v8 }
  0x16   : > { %974 = vmatpush3.bf16.msra.mxu0 %v973_v51  ;;  %v280_v13 = vld [vmem:[%s1477_s1 + $0x1e8] sm:$0xff]  ;;  %v231_v15 = vld [vmem:[%s1477_s1 + $0x60] sm:$0xff]  ;;  %v1013_v16 = vpack.c.bf16 %v262_v7, %v261_v5  ;;  %v249_v23 = vld [vmem:[%s1477_s1 + $0xf0] sm:$0xff] }
  0x17   : > { %1006 = vmatpush3.bf16.msra.mxu1 %v1005_v52  ;;  %976 = vmatprep.subr.bf16.mxu0 %v975_v53  ;;  %v232_v18 = vld [vmem:[%s1477_s1 + $0x68] sm:$0xff]  ;;  %v263_v19 = vld [vmem:[%s1477_s1 + $0x160] sm:$0xff]  ;;  %v1015_v21 = vpack.c.bf16 %v280_v13, %v279_v12  ;;  %v250_v24 = vld [vmem:[%s1477_s1 + $0xf8] sm:$0xff] }
  0x18   : > { %1008 = vmatprep.subr.bf16.mxu1 %v1007_v57  ;;  %v1331_v20 = vld [vmem:[%s214_s7] sm:$0x1f]  ;;  %v264_v22 = vld [vmem:[%s1477_s1 + $0x168] sm:$0xff]  ;;  %v281_v27 = vld [vmem:[%s1477_s1 + $0x1f0] sm:$0xff]  ;;  %v985_v29 = vpack.c.bf16 %v232_v18, %v231_v15  ;;  %v987_v31 = vpack.c.bf16 %v250_v24, %v249_v23  ;;  %v1107_v57 = vmov 0.0  }
  0x19   : > { %v299_v25 = vrot.slane %v1331_v20, %v298_v10  ;;  %v307_v26 = vrot.slane %v1331_v20, %v306_v11  ;;  %v282_v28 = vld [vmem:[%s1477_s1 + $0x1f8] sm:$0xff]  ;;  %v1017_v30 = vpack.c.bf16 %v264_v22, %v263_v19  ;;  %v233_v32 = vld [vmem:[%s1477_s1 + $0x70] sm:$0xff]  ;;  %v283_v41 = vld [vmem:[%s1477_s1 + $0x200] sm:$0xff]  ;;  %v295_v43 = vrot.slane %v1331_v20, %v294_v37 }
  0x1a   : > { %978 = vmatpush3.bf16.msra.mxu0 %v977_v0  ;;  %v234_v33 = vld [vmem:[%s1477_s1 + $0x78] sm:$0xff]  ;;  %v1019_v34 = vpack.c.bf16 %v282_v28, %v281_v27  ;;  %v265_v35 = vld [vmem:[%s1477_s1 + $0x170] sm:$0xff]  ;;  %v284_v42 = vld [vmem:[%s1477_s1 + $0x208] sm:$0xff]  ;;  %v303_v46 = vrot.slane %v1331_v20, %v302_v39 }
  0x1b   : > { %1010 = vmatpush3.bf16.msra.mxu1 %v1009_v1  ;;  %980 = vmatprep.subr.bf16.mxu0 %v979_v2  ;;  %v266_v36 = vld [vmem:[%s1477_s1 + $0x178] sm:$0xff]  ;;  %v989_v38 = vpack.c.bf16 %v234_v33, %v233_v32  ;;  %v532_v44 = vld [vmem:[%s1480_s4] sm:$0xff]  ;;  %v533_v45 = vld [vmem:[%s1480_s4 + $0x8] sm:$0xff]  ;;  %v1024_v47 = vpack.c.bf16 %v284_v42, %v283_v41  ;;  %v310_v2 = vsub.s32 4, %v1285_v61 }
  0x1c   : > { %1012 = vmatprep.subr.bf16.mxu1 %v1011_v6  ;;  %383 = vmatprep.mubr.f32.mxu0 %v299_v25  ;;  %v1021_v40 = vpack.c.bf16 %v266_v36, %v265_v35  ;;  %v285_v49 = vld [vmem:[%s1477_s1 + $0x210] sm:$0xff]  ;;  %v286_v50 = vld [vmem:[%s1477_s1 + $0x218] sm:$0xff]  ;;  %v1036_v51 = vpack.c.bf16 %v533_v45, %v532_v44  ;;  %v287_v55 = vld [vmem:[%s1477_s1 + $0x220] sm:$0xff] }
  0x1d   : > { %453 = vmatprep.mubr.f32.mxu1 %v307_v26  ;;  %v534_v52 = vld [vmem:[%s1480_s4 + $0x10] sm:$0xff]  ;;  %v535_v53 = vld [vmem:[%s1480_s4 + $0x18] sm:$0xff]  ;;  %v1027_v54 = vpack.c.bf16 %v286_v50, %v285_v49  ;;  %v288_v56 = vld [vmem:[%s1477_s1 + $0x228] sm:$0xff]  ;;  %v311_v4 = vrot.slane %v1331_v20, %v310_v2 }
  0x1e   : > { %982 = vmatpush3.bf16.msra.mxu0 %v981_v14  ;;  %v1039_v58 = vpack.c.bf16 %v535_v53, %v534_v52  ;;  %v536_v59 = vld [vmem:[%s1480_s4 + $0x20] sm:$0xff]  ;;  %v537_v60 = vld [vmem:[%s1480_s4 + $0x28] sm:$0xff]  ;;  %v1030_v62 = vpack.c.bf16 %v288_v56, %v287_v55  ;;  %v289_v63 = vld [vmem:[%s1477_s1 + $0x230] sm:$0xff] }
  0x1f   : > { %1014 = vmatpush3.bf16.msra.mxu1 %v1013_v16  ;;  %984 = vmatprep.subr.bf16.mxu0 %v983_v17  ;;  %v290_v0 = vld [vmem:[%s1477_s1 + $0x238] sm:$0xff]  ;;  %v1042_v1 = vpack.c.bf16 %v537_v60, %v536_v59  ;;  %v538_v61 = vld [vmem:[%s1480_s4 + $0x30] sm:$0xff]  ;;  %v540_v7 = vld [vmem:[%s1480_s4 + $0x40] sm:$0xff] }
  0x20   : > { %1016 = vmatprep.subr.bf16.mxu1 %v1015_v21  ;;  %v1033_v3 = vpack.c.bf16 %v290_v0, %v289_v63  ;;  %v539_v5 = vld [vmem:[%s1480_s4 + $0x38] sm:$0xff]  ;;  %v541_v8 = vld [vmem:[%s1480_s4 + $0x48] sm:$0xff]  ;;  %v542_v10 = vld [vmem:[%s1480_s4 + $0x50] sm:$0xff] }
  0x21   : > { %v1045_v6 = vpack.c.bf16 %v539_v5, %v538_v61  ;;  %v1048_v9 = vpack.c.bf16 %v541_v8, %v540_v7  ;;  %v543_v11 = vld [vmem:[%s1480_s4 + $0x58] sm:$0xff]  ;;  %v544_v13 = vld [vmem:[%s1480_s4 + $0x60] sm:$0xff]  ;;  %v545_v14 = vld [vmem:[%s1480_s4 + $0x68] sm:$0xff] }
  0x22   : > { %986 = vmatpush3.bf16.msra.mxu0 %v985_v29  ;;  %v1051_v12 = vpack.c.bf16 %v543_v11, %v542_v10  ;;  %v1054_v15 = vpack.c.bf16 %v545_v14, %v544_v13  ;;  %v546_v16 = vld [vmem:[%s1480_s4 + $0x70] sm:$0xff]  ;;  %v547_v17 = vld [vmem:[%s1480_s4 + $0x78] sm:$0xff]  ;;  %v696_v41 = vld [vmem:[%s1478_s2] sm:$0x1] }
  0x23   : > { %1018 = vmatpush3.bf16.msra.mxu1 %v1017_v30  ;;  %988 = vmatprep.subr.bf16.mxu0 %v987_v31  ;;  %v1057_v18 = vpack.c.bf16 %v547_v17, %v546_v16 }
  0x24   : > { %1020 = vmatprep.subr.bf16.mxu1 %v1019_v34 }
  0x26   : > { %990 = vmatpush3.bf16.msra.mxu0 %v989_v38 }
  0x27   : > { %1022 = vmatpush3.bf16.msra.mxu1 %v1021_v40  ;;  %1023 = vmatprep.subr.bf16.mxu0 %v1105_v48 }
  0x28   : > { %1035 = vmatprep.subr.bf16.mxu1 %v1105_v48 }
  0x29   : > { %384 = vmatmul.mubr.f32.vlgmr.msra.gmra.mrb[0].mxu0 %v295_v43  ;;  %v698_v43 = vld [vmem:[%s1479_s3] sm:$0x1] }
  0x2a   : > { %454 = vmatmul.mubr.f32.vlgmr.msra.gmra.mrb[0].mxu1 %v303_v46  ;;  %1025 = vmatpush3.bf16.msra.mxu0 %v1024_v47 }
  0x2b   : > { %1026 = vmatprep.subr.bf16.mxu0 %v1105_v48  ;;  %886 = vmatprep.mubr.msk.f32.mxu0 %vm1106_vm0, %v1107_v57 }
  0x2c   : > { %1037 = vmatpush3.bf16.msra.mxu1 %v1036_v51  ;;  %921 = vmatprep.mubr.msk.f32.mxu1 %vm1106_vm0, %v1107_v57 }
  0x2d   : > { %1038 = vmatprep.subr.bf16.mxu1 %v1105_v48 }
  0x2e   : > { %1028 = vmatpush3.bf16.msra.mxu0 %v1027_v54 }
  0x2f   : > { %1029 = vmatprep.subr.bf16.mxu0 %v1105_v48 }
  0x30   : > { %1040 = vmatpush3.bf16.msra.mxu1 %v1039_v58 }
  0x31   : > { %1041 = vmatprep.subr.bf16.mxu1 %v1105_v48 }
  0x32   : > { %1031 = vmatpush3.bf16.msra.mxu0 %v1030_v62 }
  0x33   : > { %1032 = vmatprep.subr.bf16.mxu0 %v1105_v48 }
  0x34   : > { %1043 = vmatpush3.bf16.msra.mxu1 %v1042_v1 }
  0x35   : > { %1044 = vmatprep.subr.bf16.mxu1 %v1105_v48 }
  0x36   : > { %1034 = vmatpush3.bf16.msra.mxu0 %v1033_v3 }
  0x37   : > { %1059 = vmatprep.subr.bf16.mxu0 %v1105_v48 }
  0x38   : > { %1046 = vmatpush3.bf16.msra.mxu1 %v1045_v6 }
  0x39   : > { %887 = vmatmul.mubr.msk.f32.vlgmr.msra.gmra.mrb[2].mxu0 %vm316_vm1, %v311_v4  ;;  %1047 = vmatprep.subr.bf16.mxu1 %v1105_v48 }
  0x3a   : > { %1061 = vmatpush3.bf16.msra.mxu0 %v1036_v51  ;;  %956 = vmatprep.mubr.msk.f32.mxu0 %vm1106_vm0, %v1107_v57 }
  0x3b   : > { %1062 = vmatprep.subr.bf16.mxu0 %v1105_v48 }
  0x3c   : > { %1049 = vmatpush3.bf16.msra.mxu1 %v1048_v9 }
  0x3d   : > { %1050 = vmatprep.subr.bf16.mxu1 %v1105_v48 }
  0x3e   : > { %1064 = vmatpush3.bf16.msra.mxu0 %v1039_v58 }
  0x3f   : > { %1065 = vmatprep.subr.bf16.mxu0 %v1105_v48 }
  0x40   : > { %1052 = vmatpush3.bf16.msra.mxu1 %v1051_v12 }
  0x41   : > { %1053 = vmatprep.subr.bf16.mxu1 %v1105_v48 }
  0x42   : > { %1067 = vmatpush3.bf16.msra.mxu0 %v1042_v1 }
  0x43   : > { %1068 = vmatprep.subr.bf16.mxu0 %v1105_v48 }
  0x44   : > { %1055 = vmatpush3.bf16.msra.mxu1 %v1054_v15 }
  0x45   : > { %1056 = vmatprep.subr.bf16.mxu1 %v1105_v48 }
  0x46   : > { %1070 = vmatpush3.bf16.msra.mxu0 %v1045_v6 }
  0x47   : > { %1071 = vmatprep.subr.bf16.mxu0 %v1105_v48 }
  0x48   : > { %1058 = vmatpush3.bf16.msra.mxu1 %v1057_v18 }
  0x4a   : > { %1073 = vmatpush3.bf16.msra.mxu0 %v1048_v9 }
  0x4b   : > { %1074 = vmatprep.subr.bf16.mxu0 %v1105_v48 }
  0x4e   : > { %1076 = vmatpush3.bf16.msra.mxu0 %v1051_v12 }
  0x4f   : > { %1077 = vmatprep.subr.bf16.mxu0 %v1105_v48 }
  0x52   : > { %1079 = vmatpush3.bf16.msra.mxu0 %v1054_v15 }
  0x53   : > { %1080 = vmatprep.subr.bf16.mxu0 %v1105_v48 }
  0x56   : > { %1082 = vmatpush3.bf16.msra.mxu0 %v1057_v18 }
  0xfc   : > { %v789_v19 = vpop.f32.mrb[0].mxu0 }
  0xfd   : > { %v824_v20 = vpop.f32.mrb[0].mxu1  ;;  %v790_v21 = vpop.f32.mrb[1].mxu0 }
  0xfe   : > { %v791_v22 = vadd.f32 %v790_v21, %v789_v19  ;;  %v825_v23 = vpop.f32.mrb[1].mxu1 }
  0xff   : > { %v826_v24 = vadd.f32 %v825_v23, %v824_v20 }
 0x101   : > { %v456_v25 = vadd.f32 %v826_v24, %v791_v22 }
 0x10c   : > { %v525_v26 = vpop.f32.mrb[2].mxu0 }
 0x10d   : > { %v526_v27 = vadd.f32 %v525_v26, %v456_v25  ;;  %v888_v28 = vpop.f32.mrb[3].mxu0 }
 0x10f   : > { %v530_v29 = vmul.f32 %v526_v27, %v526_v27  ;;  %922 = vmatmul.mubr.f32.vlgmr.msra.gmra.mrb[2].mxu1 %v526_v27 }
 0x111   : > { %957 = vmatmul.mubr.f32.vlgmr.msra.gmra.mrb[4].mxu0 %v530_v29 }
 0x1e2   : > { %v614_v30 = vpop.f32.mrb[2].mxu1 }
 0x1e3   : > { %v688_v31 = vmul.f32 0.25, %v614_v30  ;;  %v923_v32 = vpop.f32.mrb[3].mxu1 }
 0x1e4   : > { %v684_v33 = vpop.f32.mrb[4].mxu0 }
 0x1e5   : > { %v690_v34 = vmul.f32 %v688_v31, %v688_v31  ;;  %v689_v35 = vmul.f32 0.25, %v684_v33  ;;  %v958_v36 = vpop.f32.mrb[5].mxu0  ;;  %v692_v39 = vsub.f32 %v526_v27, %v688_v31 }
 0x1e7   : > { %v691_v37 = vsub.f32 %v689_v35, %v690_v34 }
 0x1e9   : > { %v693_v38 = vadd.f32 1e-05, %v691_v37 }
 0x1eb   : > { %1095 = vrsqrt.f32 %v693_v38 }
 0x1f5   : > { %v1096_v40 = vpop.eup %1095 }
 0x1f6   : > { %v695_v42 = vmul.f32 %v1096_v40, %v692_v39 }
 0x1f8   : > { %v697_v44 = vmul.f32 %v696_v41, %v695_v42 }
 0x1fa   : > { %v699_v45 = vadd.f32 %v698_v43, %v697_v44 }
 0x1fc   : > { %v700_v46 = vmax.f32 %v699_v45, 0.0 }
 0x1fe   : > { %701 = vst [vmem:[%s217_s24] sm:$0x1] %v700_v46 }
 0x1ff PF: > { %s15_s18 = sadd.s32 1, %s1103_s18  }
 0x200   : > { %p12_p4 = scmp.ge.s32.totalorder %s15_s18, 4  }
 0x202   :  { %14 = sbr.rel (!%p12_p4) target bundleno = 1 (0x1), region = 70 }

// kernel: forward.18
= control target key start
LH: loop header
LB: loop body
LE: loop exit
PB: predicated region body
PF: predicated region fallthrough
CT: control target
= control target key end

     0   :  { %s1540_s18 = smov 0   ;;  %s2108_s0 = inlined_call_operand.vmem [shape: f32[2,1,1152], index: 0, kind: input, shape index: {}]   ;;  %s2109_s1 = inlined_call_operand.vmem [shape: f32[1152,128], index: 1, kind: input, shape index: {}]   ;;  %s2110_s2 = inlined_call_operand.vmem [shape: f32[1,128], index: 2, kind: input, shape index: {}]   ;;  %s2111_s3 = inlined_call_operand.vmem [shape: f32[1,128], index: 3, kind: input, shape index: {}]   ;;  %s2112_s4 = inlined_call_operand.vmem [shape: f32[128,128], index: 4, kind: input, shape index: {}]   ;;  %s2113_s5 = inlined_call_operand.vmem [shape: f32[2,1,128], index: 5, kind: output, shape index: {}]  }
   0x1 LB: > { %s981_s19 = sadd.s32 4294967295, %s1505_s18   ;;  %p985_p0 = scmp.ge.s32.totalorder %s1505_s18, 1  ;;  %s1505_s18 = sphi %s1540_s18, %s15_s18  }
   0x2   : > { %p186_p1 = scmp.lt.s32.totalorder %s1505_s18, 3 }
   0x4   : > { %p187_p2 = pnand %p985_p0, %p186_p1 }
   0x5   : > { %v236_v0 = vld [vmem:[%s2109_s1 + $0x80] sm:$0xff] (!%p187_p2)  ;;  %v237_v1 = vld [vmem:[%s2109_s1 + $0x88] sm:$0xff] (!%p187_p2)  ;;  %v238_v11 = vld [vmem:[%s2109_s1 + $0x90] sm:$0xff] (!%p187_p2)  ;;  %p1613_p3 = scmp.lt.s32.totalorder (!%p187_p2), %s981_s19, 1  ;;  %v366_v47 = vlaneseq (!%p187_p2)  ;;  %vm1508_vm0 = vmmov (!%p187_p2), 0  }
   0x6   : > { %190 = sbr.rel (%p187_p2) target bundleno = 559 (0x22f), region = 40  ;;  %v268_v2 = vld [vmem:[%s2109_s1 + $0x180] sm:$0xff] (!%p187_p2)  ;;  %v1285_v3 = vpack.c.bf16 (!%p187_p2), %v237_v1, %v236_v0  ;;  %v269_v4 = vld [vmem:[%s2109_s1 + $0x188] sm:$0xff] (!%p187_p2)  ;;  %v239_v13 = vld [vmem:[%s2109_s1 + $0x98] sm:$0xff] (!%p187_p2) }
   0x7   : > { %v220_v5 = vld [vmem:[%s2109_s1] sm:$0xff] (!%p187_p2)  ;;  %v221_v6 = vld [vmem:[%s2109_s1 + $0x8] sm:$0xff] (!%p187_p2)  ;;  %v1317_v7 = vpack.c.bf16 (!%p187_p2), %v269_v4, %v268_v2  ;;  %v270_v14 = vld [vmem:[%s2109_s1 + $0x190] sm:$0xff] (!%p187_p2)  ;;  %v1289_v16 = vpack.c.bf16 (!%p187_p2), %v239_v13, %v238_v11  ;;  %v1687_v61 = vshrl.u32 (!%p187_p2), %v366_v47, 7 }
   0x8   : > { %v1287_v8 = vpack.c.bf16 (!%p187_p2), %v221_v6, %v220_v5  ;;  %v252_v9 = vld [vmem:[%s2109_s1 + $0x100] sm:$0xff] (!%p187_p2)  ;;  %v253_v10 = vld [vmem:[%s2109_s1 + $0x108] sm:$0xff] (!%p187_p2)  ;;  %1286 = vmatprep.subr.bf16.mxu0 (!%p187_p2), %v1285_v3  ;;  %v271_v15 = vld [vmem:[%s2109_s1 + $0x198] sm:$0xff] (!%p187_p2) }
   0x9   : > { %v1319_v12 = vpack.c.bf16 (!%p187_p2), %v253_v10, %v252_v9  ;;  %1318 = vmatprep.subr.bf16.mxu1 (!%p187_p2), %v1317_v7  ;;  %v1321_v17 = vpack.c.bf16 (!%p187_p2), %v271_v15, %v270_v14  ;;  %v222_v18 = vld [vmem:[%s2109_s1 + $0x10] sm:$0xff] (!%p187_p2)  ;;  %v223_v19 = vld [vmem:[%s2109_s1 + $0x18] sm:$0xff] (!%p187_p2)  ;;  %v240_v23 = vld [vmem:[%s2109_s1 + $0xa0] sm:$0xff] (!%p187_p2)  ;;  %v372_v10 = vsub.s32 (!%p187_p2), 1, %v1687_v61  ;;  %v380_v11 = vsub.s32 (!%p187_p2), 3, %v1687_v61 }
   0xa   : > { %1288 = vmatpush3.bf16.msra.mxu0 (!%p187_p2), %v1287_v8  ;;  %v254_v20 = vld [vmem:[%s2109_s1 + $0x110] sm:$0xff] (!%p187_p2)  ;;  %v1291_v21 = vpack.c.bf16 (!%p187_p2), %v223_v19, %v222_v18  ;;  %v255_v22 = vld [vmem:[%s2109_s1 + $0x118] sm:$0xff] (!%p187_p2)  ;;  %v241_v24 = vld [vmem:[%s2109_s1 + $0xa8] sm:$0xff] (!%p187_p2) }
   0xb   : > { %1320 = vmatpush3.bf16.msra.mxu1 (!%p187_p2), %v1319_v12  ;;  %1290 = vmatprep.subr.bf16.mxu0 (!%p187_p2), %v1289_v16  ;;  %v1323_v25 = vpack.c.bf16 (!%p187_p2), %v255_v22, %v254_v20  ;;  %v1293_v26 = vpack.c.bf16 (!%p187_p2), %v241_v24, %v240_v23  ;;  %v272_v27 = vld [vmem:[%s2109_s1 + $0x1a0] sm:$0xff] (!%p187_p2)  ;;  %v273_v28 = vld [vmem:[%s2109_s1 + $0x1a8] sm:$0xff] (!%p187_p2)  ;;  %v242_v35 = vld [vmem:[%s2109_s1 + $0xb0] sm:$0xff] (!%p187_p2) }
   0xc   : > { %1322 = vmatprep.subr.bf16.mxu1 (!%p187_p2), %v1321_v17  ;;  %v224_v29 = vld [vmem:[%s2109_s1 + $0x20] sm:$0xff] (!%p187_p2)  ;;  %v1325_v30 = vpack.c.bf16 (!%p187_p2), %v273_v28, %v272_v27  ;;  %v225_v31 = vld [vmem:[%s2109_s1 + $0x28] sm:$0xff] (!%p187_p2)  ;;  %v243_v36 = vld [vmem:[%s2109_s1 + $0xb8] sm:$0xff] (!%p187_p2) }
   0xd   : > { %v256_v32 = vld [vmem:[%s2109_s1 + $0x120] sm:$0xff]  ;;  %v257_v33 = vld [vmem:[%s2109_s1 + $0x128] sm:$0xff]  ;;  %v1295_v34 = vpack.c.bf16 %v225_v31, %v224_v29  ;;  %v274_v37 = vld [vmem:[%s2109_s1 + $0x1b0] sm:$0xff]  ;;  %v1297_v39 = vpack.c.bf16 %v243_v36, %v242_v35  ;;  %s2116_s19 = smov (!%p1613_p3, %s981_s19), 1 }
   0xe   : > { %1292 = vmatpush3.bf16.msra.mxu0 %v1291_v21  ;;  %v1327_v38 = vpack.c.bf16 %v257_v33, %v256_v32  ;;  %v275_v40 = vld [vmem:[%s2109_s1 + $0x1b8] sm:$0xff]  ;;  %v226_v41 = vld [vmem:[%s2109_s1 + $0x30] sm:$0xff]  ;;  %v244_v46 = vld [vmem:[%s2109_s1 + $0xc0] sm:$0xff]  ;;  %s1485_s11 = smul.u32 9, %s2116_s19  ;;  %s217_s13 = scalar_lea.vmem %s2113_s5, %s2116_s19 }
   0xf   : > { %1324 = vmatpush3.bf16.msra.mxu1 %v1323_v25  ;;  %1294 = vmatprep.subr.bf16.mxu0 %v1293_v26  ;;  %v227_v42 = vld [vmem:[%s2109_s1 + $0x38] sm:$0xff]  ;;  %v1329_v43 = vpack.c.bf16 %v275_v40, %v274_v37  ;;  %v258_v44 = vld [vmem:[%s2109_s1 + $0x130] sm:$0xff]  ;;  %v245_v48 = vld [vmem:[%s2109_s1 + $0xc8] sm:$0xff] }
  0x10   : > { %1326 = vmatprep.subr.bf16.mxu1 %v1325_v30  ;;  %v259_v45 = vld [vmem:[%s2109_s1 + $0x138] sm:$0xff]  ;;  %v276_v49 = vld [vmem:[%s2109_s1 + $0x1c0] sm:$0xff]  ;;  %v277_v50 = vld [vmem:[%s2109_s1 + $0x1c8] sm:$0xff]  ;;  %v1299_v51 = vpack.c.bf16 %v227_v42, %v226_v41  ;;  %v1301_v53 = vpack.c.bf16 %v245_v48, %v244_v46  ;;  %s1716_s7 = scalar_lea.vmem %s2108_s0, %s1485_s11 }
  0x11   : > { %v1331_v52 = vpack.c.bf16 %v259_v45, %v258_v44  ;;  %v228_v54 = vld [vmem:[%s2109_s1 + $0x40] sm:$0xff]  ;;  %v229_v55 = vld [vmem:[%s2109_s1 + $0x48] sm:$0xff]  ;;  %v1333_v57 = vpack.c.bf16 %v277_v50, %v276_v49  ;;  %v246_v59 = vld [vmem:[%s2109_s1 + $0xd0] sm:$0xff] }
  0x12   : > { %1296 = vmatpush3.bf16.msra.mxu0 %v1295_v34  ;;  %v260_v56 = vld [vmem:[%s2109_s1 + $0x140] sm:$0xff]  ;;  %v261_v58 = vld [vmem:[%s2109_s1 + $0x148] sm:$0xff]  ;;  %v247_v60 = vld [vmem:[%s2109_s1 + $0xd8] sm:$0xff]  ;;  %v1303_v0 = vpack.c.bf16 %v229_v55, %v228_v54 }
  0x13   : > { %1328 = vmatpush3.bf16.msra.mxu1 %v1327_v38  ;;  %1298 = vmatprep.subr.bf16.mxu0 %v1297_v39  ;;  %v278_v62 = vld [vmem:[%s2109_s1 + $0x1d0] sm:$0xff]  ;;  %v279_v63 = vld [vmem:[%s2109_s1 + $0x1d8] sm:$0xff]  ;;  %v1335_v1 = vpack.c.bf16 %v261_v58, %v260_v56  ;;  %v1305_v2 = vpack.c.bf16 %v247_v60, %v246_v59  ;;  %v248_v8 = vld [vmem:[%s2109_s1 + $0xe0] sm:$0xff]  ;;  %v368_v39 = vsub.s32 0, %v1687_v61 }
  0x14   : > { %1330 = vmatprep.subr.bf16.mxu1 %v1329_v43  ;;  %v230_v3 = vld [vmem:[%s2109_s1 + $0x50] sm:$0xff]  ;;  %v231_v4 = vld [vmem:[%s2109_s1 + $0x58] sm:$0xff]  ;;  %v1337_v6 = vpack.c.bf16 %v279_v63, %v278_v62  ;;  %v249_v9 = vld [vmem:[%s2109_s1 + $0xe8] sm:$0xff]  ;;  %v376_v43 = vsub.s32 2, %v1687_v61 }
  0x15   : > { %v262_v5 = vld [vmem:[%s2109_s1 + $0x150] sm:$0xff]  ;;  %v263_v7 = vld [vmem:[%s2109_s1 + $0x158] sm:$0xff]  ;;  %v280_v12 = vld [vmem:[%s2109_s1 + $0x1e0] sm:$0xff]  ;;  %v1307_v14 = vpack.c.bf16 %v231_v4, %v230_v3  ;;  %v1309_v17 = vpack.c.bf16 %v249_v9, %v248_v8 }
  0x16   : > { %1300 = vmatpush3.bf16.msra.mxu0 %v1299_v51  ;;  %v281_v13 = vld [vmem:[%s2109_s1 + $0x1e8] sm:$0xff]  ;;  %v232_v15 = vld [vmem:[%s2109_s1 + $0x60] sm:$0xff]  ;;  %v1339_v16 = vpack.c.bf16 %v263_v7, %v262_v5  ;;  %v250_v23 = vld [vmem:[%s2109_s1 + $0xf0] sm:$0xff] }
  0x17   : > { %1332 = vmatpush3.bf16.msra.mxu1 %v1331_v52  ;;  %1302 = vmatprep.subr.bf16.mxu0 %v1301_v53  ;;  %v233_v18 = vld [vmem:[%s2109_s1 + $0x68] sm:$0xff]  ;;  %v264_v19 = vld [vmem:[%s2109_s1 + $0x160] sm:$0xff]  ;;  %v1341_v21 = vpack.c.bf16 %v281_v13, %v280_v12  ;;  %v251_v24 = vld [vmem:[%s2109_s1 + $0xf8] sm:$0xff]  ;;  %v388_v53 = vsub.s32 5, %v1687_v61 }
  0x18   : > { %1334 = vmatprep.subr.bf16.mxu1 %v1333_v57  ;;  %v1736_v20 = vld [vmem:[%s1716_s7] sm:$0xff]  ;;  %v265_v22 = vld [vmem:[%s2109_s1 + $0x168] sm:$0xff]  ;;  %v282_v27 = vld [vmem:[%s2109_s1 + $0x1f0] sm:$0xff]  ;;  %v1311_v29 = vpack.c.bf16 %v233_v18, %v232_v15  ;;  %v1313_v31 = vpack.c.bf16 %v251_v24, %v250_v23  ;;  %v396_v57 = vsub.s32 7, %v1687_v61 }
  0x19   : > { %v373_v25 = vrot.slane %v1736_v20, %v372_v10  ;;  %v381_v26 = vrot.slane %v1736_v20, %v380_v11  ;;  %v283_v28 = vld [vmem:[%s2109_s1 + $0x1f8] sm:$0xff]  ;;  %v1343_v30 = vpack.c.bf16 %v265_v22, %v264_v19  ;;  %v234_v32 = vld [vmem:[%s2109_s1 + $0x70] sm:$0xff]  ;;  %v300_v37 = vld [vmem:[%s2109_s1 + $0x280] sm:$0xff]  ;;  %v369_v54 = vrot.slane %v1736_v20, %v368_v39 }
  0x1a   : > { %1304 = vmatpush3.bf16.msra.mxu0 %v1303_v0  ;;  %v235_v33 = vld [vmem:[%s2109_s1 + $0x78] sm:$0xff]  ;;  %v266_v34 = vld [vmem:[%s2109_s1 + $0x170] sm:$0xff]  ;;  %v1345_v35 = vpack.c.bf16 %v283_v28, %v282_v27  ;;  %v301_v38 = vld [vmem:[%s2109_s1 + $0x288] sm:$0xff]  ;;  %v377_v58 = vrot.slane %v1736_v20, %v376_v43  ;;  %v397_v9 = vrot.slane %v1736_v20, %v396_v57 }
  0x1b   : > { %1336 = vmatpush3.bf16.msra.mxu1 %v1335_v1  ;;  %1306 = vmatprep.subr.bf16.mxu0 %v1305_v2  ;;  %v267_v36 = vld [vmem:[%s2109_s1 + $0x178] sm:$0xff]  ;;  %v332_v40 = vld [vmem:[%s2109_s1 + $0x380] sm:$0xff]  ;;  %v333_v41 = vld [vmem:[%s2109_s1 + $0x388] sm:$0xff]  ;;  %v1315_v42 = vpack.c.bf16 %v235_v33, %v234_v32  ;;  %v1349_v45 = vpack.c.bf16 %v301_v38, %v300_v37 }
  0x1c   : > { %1338 = vmatprep.subr.bf16.mxu1 %v1337_v6  ;;  %475 = vmatprep.mubr.f32.mxu0 %v373_v25  ;;  %v1347_v44 = vpack.c.bf16 %v267_v36, %v266_v34  ;;  %v284_v46 = vld [vmem:[%s2109_s1 + $0x200] sm:$0xff]  ;;  %v285_v47 = vld [vmem:[%s2109_s1 + $0x208] sm:$0xff]  ;;  %v1381_v49 = vpack.c.bf16 %v333_v41, %v332_v40  ;;  %v302_v51 = vld [vmem:[%s2109_s1 + $0x290] sm:$0xff]  ;;  %v389_v6 = vrot.slane %v1736_v20, %v388_v53 }
  0x1d   : > { %545 = vmatprep.mubr.f32.mxu1 %v381_v26  ;;  %v316_v48 = vld [vmem:[%s2109_s1 + $0x300] sm:$0xff]  ;;  %v317_v50 = vld [vmem:[%s2109_s1 + $0x308] sm:$0xff]  ;;  %v303_v52 = vld [vmem:[%s2109_s1 + $0x298] sm:$0xff]  ;;  %v1351_v59 = vpack.c.bf16 %v285_v47, %v284_v46 }
  0x1e   : > { %1308 = vmatpush3.bf16.msra.mxu0 %v1307_v14  ;;  %v334_v55 = vld [vmem:[%s2109_s1 + $0x390] sm:$0xff]  ;;  %v335_v56 = vld [vmem:[%s2109_s1 + $0x398] sm:$0xff]  ;;  %v1383_v60 = vpack.c.bf16 %v317_v50, %v316_v48  ;;  %v1353_v62 = vpack.c.bf16 %v303_v52, %v302_v51  ;;  %v304_v4 = vld [vmem:[%s2109_s1 + $0x2a0] sm:$0xff] }
  0x1f   : > { %1340 = vmatpush3.bf16.msra.mxu1 %v1339_v16  ;;  %1310 = vmatprep.subr.bf16.mxu0 %v1309_v17  ;;  %v286_v63 = vld [vmem:[%s2109_s1 + $0x210] sm:$0xff]  ;;  %v287_v0 = vld [vmem:[%s2109_s1 + $0x218] sm:$0xff]  ;;  %v1385_v2 = vpack.c.bf16 %v335_v56, %v334_v55  ;;  %v305_v5 = vld [vmem:[%s2109_s1 + $0x2a8] sm:$0xff] }
  0x20   : > { %1342 = vmatprep.subr.bf16.mxu1 %v1341_v21  ;;  %v318_v1 = vld [vmem:[%s2109_s1 + $0x310] sm:$0xff]  ;;  %v319_v3 = vld [vmem:[%s2109_s1 + $0x318] sm:$0xff]  ;;  %v336_v7 = vld [vmem:[%s2109_s1 + $0x3a0] sm:$0xff]  ;;  %v1355_v10 = vpack.c.bf16 %v287_v0, %v286_v63  ;;  %v1357_v12 = vpack.c.bf16 %v305_v5, %v304_v4 }
  0x21   : > { %v337_v8 = vld [vmem:[%s2109_s1 + $0x3a8] sm:$0xff]  ;;  %v1387_v11 = vpack.c.bf16 %v319_v3, %v318_v1  ;;  %v288_v13 = vld [vmem:[%s2109_s1 + $0x220] sm:$0xff]  ;;  %v306_v18 = vld [vmem:[%s2109_s1 + $0x2b0] sm:$0xff] }
  0x22   : > { %1312 = vmatpush3.bf16.msra.mxu0 %v1311_v29  ;;  %v289_v14 = vld [vmem:[%s2109_s1 + $0x228] sm:$0xff]  ;;  %v320_v15 = vld [vmem:[%s2109_s1 + $0x320] sm:$0xff]  ;;  %v1389_v16 = vpack.c.bf16 %v337_v8, %v336_v7  ;;  %v307_v19 = vld [vmem:[%s2109_s1 + $0x2b8] sm:$0xff] }
  0x23   : > { %1344 = vmatpush3.bf16.msra.mxu1 %v1343_v30  ;;  %1314 = vmatprep.subr.bf16.mxu0 %v1313_v31  ;;  %v321_v17 = vld [vmem:[%s2109_s1 + $0x328] sm:$0xff]  ;;  %v338_v21 = vld [vmem:[%s2109_s1 + $0x3b0] sm:$0xff]  ;;  %v339_v22 = vld [vmem:[%s2109_s1 + $0x3b8] sm:$0xff]  ;;  %v1359_v23 = vpack.c.bf16 %v289_v14, %v288_v13  ;;  %v1361_v25 = vpack.c.bf16 %v307_v19, %v306_v18  ;;  %v392_v18 = vsub.s32 6, %v1687_v61 }
  0x24   : > { %1346 = vmatprep.subr.bf16.mxu1 %v1345_v35  ;;  %v1391_v24 = vpack.c.bf16 %v321_v17, %v320_v15  ;;  %v290_v26 = vld [vmem:[%s2109_s1 + $0x230] sm:$0xff]  ;;  %v291_v27 = vld [vmem:[%s2109_s1 + $0x238] sm:$0xff]  ;;  %v1393_v29 = vpack.c.bf16 %v339_v22, %v338_v21  ;;  %v308_v31 = vld [vmem:[%s2109_s1 + $0x2c0] sm:$0xff] }
  0x25   : > { %v322_v28 = vld [vmem:[%s2109_s1 + $0x330] sm:$0xff]  ;;  %v323_v30 = vld [vmem:[%s2109_s1 + $0x338] sm:$0xff]  ;;  %v309_v32 = vld [vmem:[%s2109_s1 + $0x2c8] sm:$0xff]  ;;  %v1363_v35 = vpack.c.bf16 %v291_v27, %v290_v26 }
  0x26   : > { %1316 = vmatpush3.bf16.msra.mxu0 %v1315_v42  ;;  %v340_v33 = vld [vmem:[%s2109_s1 + $0x3c0] sm:$0xff]  ;;  %v341_v34 = vld [vmem:[%s2109_s1 + $0x3c8] sm:$0xff]  ;;  %v1395_v36 = vpack.c.bf16 %v323_v30, %v322_v28  ;;  %v1365_v37 = vpack.c.bf16 %v309_v32, %v308_v31  ;;  %v310_v43 = vld [vmem:[%s2109_s1 + $0x2d0] sm:$0xff]  ;;  %v1509_v30 = vmov 0.0  }
  0x27   : > { %1348 = vmatpush3.bf16.msra.mxu1 %v1347_v44  ;;  %1350 = vmatprep.subr.bf16.mxu0 %v1349_v45  ;;  %v292_v38 = vld [vmem:[%s2109_s1 + $0x240] sm:$0xff]  ;;  %v293_v39 = vld [vmem:[%s2109_s1 + $0x248] sm:$0xff]  ;;  %v1397_v41 = vpack.c.bf16 %v341_v34, %v340_v33  ;;  %v311_v44 = vld [vmem:[%s2109_s1 + $0x2d8] sm:$0xff] }
  0x28   : > { %1382 = vmatprep.subr.bf16.mxu1 %v1381_v49  ;;  %v324_v40 = vld [vmem:[%s2109_s1 + $0x340] sm:$0xff]  ;;  %v325_v42 = vld [vmem:[%s2109_s1 + $0x348] sm:$0xff]  ;;  %v342_v45 = vld [vmem:[%s2109_s1 + $0x3d0] sm:$0xff]  ;;  %v1367_v47 = vpack.c.bf16 %v293_v39, %v292_v38  ;;  %v1369_v49 = vpack.c.bf16 %v311_v44, %v310_v43 }
  0x29   : > { %476 = vmatmul.mubr.f32.vlgmr.msra.gmra.mrb[0].mxu0 %v369_v54  ;;  %v343_v46 = vld [vmem:[%s2109_s1 + $0x3d8] sm:$0xff]  ;;  %v1399_v48 = vpack.c.bf16 %v325_v42, %v324_v40  ;;  %v294_v50 = vld [vmem:[%s2109_s1 + $0x250] sm:$0xff]  ;;  %v312_v55 = vld [vmem:[%s2109_s1 + $0x2e0] sm:$0xff] }
  0x2a   : > { %546 = vmatmul.mubr.f32.vlgmr.msra.gmra.mrb[0].mxu1 %v377_v58  ;;  %1352 = vmatpush3.bf16.msra.mxu0 %v1351_v59  ;;  %v295_v51 = vld [vmem:[%s2109_s1 + $0x258] sm:$0xff]  ;;  %v326_v52 = vld [vmem:[%s2109_s1 + $0x350] sm:$0xff]  ;;  %v1401_v53 = vpack.c.bf16 %v343_v46, %v342_v45  ;;  %v313_v56 = vld [vmem:[%s2109_s1 + $0x2e8] sm:$0xff] }
  0x2b   : > { %1384 = vmatpush3.bf16.msra.mxu1 %v1383_v60  ;;  %1354 = vmatprep.subr.bf16.mxu0 %v1353_v62  ;;  %v327_v54 = vld [vmem:[%s2109_s1 + $0x358] sm:$0xff]  ;;  %v344_v57 = vld [vmem:[%s2109_s1 + $0x3e0] sm:$0xff]  ;;  %v345_v58 = vld [vmem:[%s2109_s1 + $0x3e8] sm:$0xff]  ;;  %v1371_v59 = vpack.c.bf16 %v295_v51, %v294_v50  ;;  %v1373_v62 = vpack.c.bf16 %v313_v56, %v312_v55 }
  0x2c   : > { %1386 = vmatprep.subr.bf16.mxu1 %v1385_v2  ;;  %615 = vmatprep.mubr.f32.mxu0 %v389_v6  ;;  %v1403_v60 = vpack.c.bf16 %v327_v54, %v326_v52  ;;  %v296_v63 = vld [vmem:[%s2109_s1 + $0x260] sm:$0xff]  ;;  %v297_v0 = vld [vmem:[%s2109_s1 + $0x268] sm:$0xff]  ;;  %v1405_v2 = vpack.c.bf16 %v345_v58, %v344_v57  ;;  %v314_v4 = vld [vmem:[%s2109_s1 + $0x2f0] sm:$0xff] }
  0x2d   : > { %685 = vmatprep.mubr.f32.mxu1 %v397_v9  ;;  %v328_v1 = vld [vmem:[%s2109_s1 + $0x360] sm:$0xff]  ;;  %v329_v3 = vld [vmem:[%s2109_s1 + $0x368] sm:$0xff]  ;;  %v315_v5 = vld [vmem:[%s2109_s1 + $0x2f8] sm:$0xff]  ;;  %v1375_v8 = vpack.c.bf16 %v297_v0, %v296_v63 }
  0x2e   : > { %1356 = vmatpush3.bf16.msra.mxu0 %v1355_v10  ;;  %v346_v6 = vld [vmem:[%s2109_s1 + $0x3f0] sm:$0xff]  ;;  %v347_v7 = vld [vmem:[%s2109_s1 + $0x3f8] sm:$0xff]  ;;  %v1407_v9 = vpack.c.bf16 %v329_v3, %v328_v1  ;;  %v1377_v10 = vpack.c.bf16 %v315_v5, %v314_v4  ;;  %v348_v21 = vld [vmem:[%s2109_s1 + $0x400] sm:$0xff] }
  0x2f   : > { %1388 = vmatpush3.bf16.msra.mxu1 %v1387_v11  ;;  %1358 = vmatprep.subr.bf16.mxu0 %v1357_v12  ;;  %v298_v11 = vld [vmem:[%s2109_s1 + $0x270] sm:$0xff]  ;;  %v299_v12 = vld [vmem:[%s2109_s1 + $0x278] sm:$0xff]  ;;  %v1409_v13 = vpack.c.bf16 %v347_v7, %v346_v6  ;;  %v349_v22 = vld [vmem:[%s2109_s1 + $0x408] sm:$0xff] }
  0x30   : > { %1390 = vmatprep.subr.bf16.mxu1 %v1389_v16  ;;  %v330_v14 = vld [vmem:[%s2109_s1 + $0x370] sm:$0xff]  ;;  %v331_v15 = vld [vmem:[%s2109_s1 + $0x378] sm:$0xff]  ;;  %v384_v16 = vsub.s32 4, %v1687_v61  ;;  %v1379_v17 = vpack.c.bf16 %v299_v12, %v298_v11  ;;  %v1507_v61 = vmov 0.0|0.0   ;;  %v361_v42 = vld [vmem:[%s2109_s1 + $0x468] sm:$0xff] }
  0x31   : > { %v1411_v19 = vpack.c.bf16 %v331_v15, %v330_v14  ;;  %v350_v26 = vld [vmem:[%s2109_s1 + $0x410] sm:$0xff]  ;;  %v351_v27 = vld [vmem:[%s2109_s1 + $0x418] sm:$0xff]  ;;  %v768_v54 = vld [vmem:[%s2112_s4 + $0x20] sm:$0xff] }
  0x32   : > { %1360 = vmatpush3.bf16.msra.mxu0 %v1359_v23  ;;  %v385_v23 = vrot.slane %v1736_v20, %v384_v16  ;;  %v1417_v28 = vpack.c.bf16 %v351_v27, %v350_v26  ;;  %v354_v32 = vld [vmem:[%s2109_s1 + $0x430] sm:$0xff]  ;;  %v355_v33 = vld [vmem:[%s2109_s1 + $0x438] sm:$0xff]  ;;  %v769_v55 = vld [vmem:[%s2112_s4 + $0x28] sm:$0xff] }
  0x33   : > { %1392 = vmatpush3.bf16.msra.mxu1 %v1391_v24  ;;  %1362 = vmatprep.subr.bf16.mxu0 %v1361_v25  ;;  %v1414_v24 = vpack.c.bf16 %v349_v22, %v348_v21  ;;  %v393_v25 = vrot.slane %v1736_v20, %v392_v18  ;;  %v352_v20 = vld [vmem:[%s2109_s1 + $0x420] sm:$0xff]  ;;  %v1423_v34 = vpack.c.bf16 %v355_v33, %v354_v32  ;;  %v358_v38 = vld [vmem:[%s2109_s1 + $0x450] sm:$0xff]  ;;  %v359_v39 = vld [vmem:[%s2109_s1 + $0x458] sm:$0xff] }
  0x34   : > { %1394 = vmatprep.subr.bf16.mxu1 %v1393_v29  ;;  %v353_v29 = vld [vmem:[%s2109_s1 + $0x428] sm:$0xff]  ;;  %v1429_v40 = vpack.c.bf16 %v359_v39, %v358_v38  ;;  %v362_v44 = vld [vmem:[%s2109_s1 + $0x470] sm:$0xff]  ;;  %v363_v45 = vld [vmem:[%s2109_s1 + $0x478] sm:$0xff]  ;;  %v1444_v56 = vpack.c.bf16 %v769_v55, %v768_v54 }
  0x35   : > { %v1420_v31 = vpack.c.bf16 %v353_v29, %v352_v20  ;;  %v1435_v46 = vpack.c.bf16 %v363_v45, %v362_v44  ;;  %v766_v51 = vld [vmem:[%s2112_s4 + $0x10] sm:$0xff]  ;;  %v767_v52 = vld [vmem:[%s2112_s4 + $0x18] sm:$0xff]  ;;  %v776_v3 = vld [vmem:[%s2112_s4 + $0x60] sm:$0xff] }
  0x36   : > { %1364 = vmatpush3.bf16.msra.mxu0 %v1363_v35  ;;  %v356_v35 = vld [vmem:[%s2109_s1 + $0x440] sm:$0xff]  ;;  %v770_v57 = vld [vmem:[%s2112_s4 + $0x30] sm:$0xff]  ;;  %v771_v58 = vld [vmem:[%s2112_s4 + $0x38] sm:$0xff] }
  0x37   : > { %1396 = vmatpush3.bf16.msra.mxu1 %v1395_v36  ;;  %1366 = vmatprep.subr.bf16.mxu0 %v1365_v37  ;;  %v357_v36 = vld [vmem:[%s2109_s1 + $0x448] sm:$0xff]  ;;  %v774_v0 = vld [vmem:[%s2112_s4 + $0x50] sm:$0xff]  ;;  %v775_v1 = vld [vmem:[%s2112_s4 + $0x58] sm:$0xff] }
  0x38   : > { %1398 = vmatprep.subr.bf16.mxu1 %v1397_v41  ;;  %v1426_v37 = vpack.c.bf16 %v357_v36, %v356_v35  ;;  %v360_v41 = vld [vmem:[%s2109_s1 + $0x460] sm:$0xff]  ;;  %v777_v4 = vld [vmem:[%s2112_s4 + $0x68] sm:$0xff]  ;;  %v778_v6 = vld [vmem:[%s2112_s4 + $0x70] sm:$0xff] }
  0x39   : > { %v1432_v43 = vpack.c.bf16 %v361_v42, %v360_v41  ;;  %v1456_v5 = vpack.c.bf16 %v777_v4, %v776_v3  ;;  %v779_v7 = vld [vmem:[%s2112_s4 + $0x78] sm:$0xff]  ;;  %v928_v38 = vld [vmem:[%s2110_s2] sm:$0x1] }
  0x3a   : > { %1368 = vmatpush3.bf16.msra.mxu0 %v1367_v47  ;;  %v986_v47 = vld [vmem:[%s1716_s7 + $0x8] ss:$0 sm:$0xff] }
  0x3b   : > { %1400 = vmatpush3.bf16.msra.mxu1 %v1399_v48  ;;  %1370 = vmatprep.subr.bf16.mxu0 %v1369_v49  ;;  %v764_v48 = vld [vmem:[%s2112_s4] sm:$0xff]  ;;  %v765_v49 = vld [vmem:[%s2112_s4 + $0x8] sm:$0xff] }
  0x3c   : > { %1402 = vmatprep.subr.bf16.mxu1 %v1401_v53  ;;  %v1438_v50 = vpack.c.bf16 %v765_v49, %v764_v48  ;;  %v1441_v53 = vpack.c.bf16 %v767_v52, %v766_v51 }
  0x3e   : > { %1372 = vmatpush3.bf16.msra.mxu0 %v1371_v59  ;;  %v1447_v59 = vpack.c.bf16 %v771_v58, %v770_v57 }
  0x3f   : > { %1404 = vmatpush3.bf16.msra.mxu1 %v1403_v60  ;;  %1374 = vmatprep.subr.bf16.mxu0 %v1373_v62  ;;  %v772_v60 = vld [vmem:[%s2112_s4 + $0x40] sm:$0xff]  ;;  %v773_v62 = vld [vmem:[%s2112_s4 + $0x48] sm:$0xff] }
  0x40   : > { %1406 = vmatprep.subr.bf16.mxu1 %v1405_v2  ;;  %v1450_v63 = vpack.c.bf16 %v773_v62, %v772_v60  ;;  %v1453_v2 = vpack.c.bf16 %v775_v1, %v774_v0 }
  0x42   : > { %1376 = vmatpush3.bf16.msra.mxu0 %v1375_v8  ;;  %v1459_v8 = vpack.c.bf16 %v779_v7, %v778_v6 }
  0x43   : > { %1408 = vmatpush3.bf16.msra.mxu1 %v1407_v9  ;;  %1378 = vmatprep.subr.bf16.mxu0 %v1377_v10 }
  0x44   : > { %1410 = vmatprep.subr.bf16.mxu1 %v1409_v13 }
  0x46   : > { %1380 = vmatpush3.bf16.msra.mxu0 %v1379_v17 }
  0x47   : > { %1412 = vmatpush3.bf16.msra.mxu1 %v1411_v19  ;;  %1413 = vmatprep.subr.bf16.mxu0 %v1507_v61 }
  0x48   : > { %1437 = vmatprep.subr.bf16.mxu1 %v1507_v61 }
  0x49   : > { %616 = vmatmul.mubr.f32.vlgmr.msra.gmra.mrb[2].mxu0 %v385_v23 }
  0x4a   : > { %1415 = vmatpush3.bf16.msra.mxu0 %v1414_v24  ;;  %686 = vmatmul.mubr.f32.vlgmr.msra.gmra.mrb[2].mxu1 %v393_v25 }
  0x4b   : > { %1416 = vmatprep.subr.bf16.mxu0 %v1507_v61  ;;  %1212 = vmatprep.mubr.msk.f32.mxu0 %vm1508_vm0, %v1509_v30 }
  0x4c   : > { %1247 = vmatprep.mubr.msk.f32.mxu1 %vm1508_vm0, %v1509_v30  ;;  %1439 = vmatpush3.bf16.msra.mxu1 %v1438_v50 }
  0x4d   : > { %1440 = vmatprep.subr.bf16.mxu1 %v1507_v61 }
  0x4e   : > { %1418 = vmatpush3.bf16.msra.mxu0 %v1417_v28 }
  0x4f   : > { %1419 = vmatprep.subr.bf16.mxu0 %v1507_v61 }
  0x50   : > { %1442 = vmatpush3.bf16.msra.mxu1 %v1441_v53 }
  0x51   : > { %1443 = vmatprep.subr.bf16.mxu1 %v1507_v61 }
  0x52   : > { %1421 = vmatpush3.bf16.msra.mxu0 %v1420_v31 }
  0x53   : > { %1422 = vmatprep.subr.bf16.mxu0 %v1507_v61 }
  0x54   : > { %1445 = vmatpush3.bf16.msra.mxu1 %v1444_v56 }
  0x55   : > { %1446 = vmatprep.subr.bf16.mxu1 %v1507_v61 }
  0x56   : > { %1424 = vmatpush3.bf16.msra.mxu0 %v1423_v34 }
  0x57   : > { %1425 = vmatprep.subr.bf16.mxu0 %v1507_v61 }
  0x58   : > { %1448 = vmatpush3.bf16.msra.mxu1 %v1447_v59 }
  0x59   : > { %1449 = vmatprep.subr.bf16.mxu1 %v1507_v61 }
  0x5a   : > { %1427 = vmatpush3.bf16.msra.mxu0 %v1426_v37 }
  0x5b   : > { %1428 = vmatprep.subr.bf16.mxu0 %v1507_v61 }
  0x5c   : > { %1451 = vmatpush3.bf16.msra.mxu1 %v1450_v63 }
  0x5d   : > { %1452 = vmatprep.subr.bf16.mxu1 %v1507_v61 }
  0x5e   : > { %1430 = vmatpush3.bf16.msra.mxu0 %v1429_v40  ;;  %v930_v40 = vld [vmem:[%s2111_s3] sm:$0x1] }
  0x5f   : > { %1431 = vmatprep.subr.bf16.mxu0 %v1507_v61 }
  0x60   : > { %1454 = vmatpush3.bf16.msra.mxu1 %v1453_v2 }
  0x61   : > { %1455 = vmatprep.subr.bf16.mxu1 %v1507_v61 }
  0x62   : > { %1433 = vmatpush3.bf16.msra.mxu0 %v1432_v43 }
  0x63   : > { %1434 = vmatprep.subr.bf16.mxu0 %v1507_v61 }
  0x64   : > { %1457 = vmatpush3.bf16.msra.mxu1 %v1456_v5 }
  0x65   : > { %1458 = vmatprep.subr.bf16.mxu1 %v1507_v61 }
  0x66   : > { %1436 = vmatpush3.bf16.msra.mxu0 %v1435_v46 }
  0x67   : > { %1461 = vmatprep.subr.bf16.mxu0 %v1507_v61 }
  0x68   : > { %1460 = vmatpush3.bf16.msra.mxu1 %v1459_v8 }
  0x69   : > { %1213 = vmatmul.mubr.f32.vlgmr.msra.gmra.mrb[4].mxu0 %v986_v47 }
  0x6a   : > { %1282 = vmatprep.mubr.msk.f32.mxu0 %vm1508_vm0, %v1509_v30  ;;  %1463 = vmatpush3.bf16.msra.mxu0 %v1438_v50 }
  0x6b   : > { %1464 = vmatprep.subr.bf16.mxu0 %v1507_v61 }
  0x6e   : > { %1466 = vmatpush3.bf16.msra.mxu0 %v1441_v53 }
  0x6f   : > { %1467 = vmatprep.subr.bf16.mxu0 %v1507_v61 }
  0x72   : > { %1469 = vmatpush3.bf16.msra.mxu0 %v1444_v56 }
  0x73   : > { %1470 = vmatprep.subr.bf16.mxu0 %v1507_v61 }
  0x76   : > { %1472 = vmatpush3.bf16.msra.mxu0 %v1447_v59 }
  0x77   : > { %1473 = vmatprep.subr.bf16.mxu0 %v1507_v61 }
  0x7a   : > { %1475 = vmatpush3.bf16.msra.mxu0 %v1450_v63 }
  0x7b   : > { %1476 = vmatprep.subr.bf16.mxu0 %v1507_v61 }
  0x7e   : > { %1478 = vmatpush3.bf16.msra.mxu0 %v1453_v2 }
  0x7f   : > { %1479 = vmatprep.subr.bf16.mxu0 %v1507_v61 }
  0x82   : > { %1481 = vmatpush3.bf16.msra.mxu0 %v1456_v5 }
  0x83   : > { %1482 = vmatprep.subr.bf16.mxu0 %v1507_v61 }
  0x86   : > { %1484 = vmatpush3.bf16.msra.mxu0 %v1459_v8 }
  0xfc   : > { %v1021_v9 = vpop.f32.mrb[0].mxu0 }
  0xfd   : > { %v1056_v10 = vpop.f32.mrb[0].mxu1  ;;  %v1022_v11 = vpop.f32.mrb[1].mxu0 }
  0xfe   : > { %v1023_v12 = vadd.f32 %v1022_v11, %v1021_v9  ;;  %v1057_v13 = vpop.f32.mrb[1].mxu1 }
  0xff   : > { %v1058_v14 = vadd.f32 %v1057_v13, %v1056_v10 }
 0x101   : > { %v548_v15 = vadd.f32 %v1058_v14, %v1023_v12 }
 0x11c   : > { %v1091_v16 = vpop.f32.mrb[2].mxu0 }
 0x11d   : > { %v1092_v17 = vpop.f32.mrb[3].mxu0  ;;  %v1126_v18 = vpop.f32.mrb[2].mxu1 }
 0x11e   : > { %v1093_v19 = vadd.f32 %v1092_v17, %v1091_v16  ;;  %v1127_v21 = vpop.f32.mrb[3].mxu1 }
 0x11f   : > { %v1128_v22 = vadd.f32 %v1127_v21, %v1126_v18 }
 0x120   : > { %v618_v23 = vadd.f32 %v1093_v19, %v548_v15 }
 0x122   : > { %v688_v24 = vadd.f32 %v1128_v22, %v618_v23 }
 0x13c   : > { %v757_v25 = vpop.f32.mrb[4].mxu0 }
 0x13d   : > { %v758_v61 = vadd.f32 %v757_v25, %v688_v24  ;;  %v1214_v26 = vpop.f32.mrb[5].mxu0 }
 0x13f   : > { %v762_v27 = vmul.f32 %v758_v61, %v758_v61  ;;  %1248 = vmatmul.mubr.f32.vlgmr.msra.gmra.mrb[4].mxu1 %v758_v61 }
 0x141   : > { %1283 = vmatmul.mubr.f32.vlgmr.msra.gmra.mrb[6].mxu0 %v762_v27 }
 0x212   : > { %v846_v28 = vpop.f32.mrb[4].mxu1 }
 0x213   : > { %v920_v20 = vmul.f32 0.25, %v846_v28  ;;  %v1249_v29 = vpop.f32.mrb[5].mxu1 }
 0x214   : > { %v916_v30 = vpop.f32.mrb[6].mxu0 }
 0x215   : > { %v922_v31 = vmul.f32 %v920_v20, %v920_v20  ;;  %v921_v32 = vmul.f32 0.25, %v916_v30  ;;  %v1284_v33 = vpop.f32.mrb[7].mxu0  ;;  %v924_v36 = vsub.f32 %v758_v61, %v920_v20 }
 0x217   : > { %v923_v34 = vsub.f32 %v921_v32, %v922_v31 }
 0x219   : > { %v925_v35 = vadd.f32 1e-05, %v923_v34 }
 0x21b   : > { %1497 = vrsqrt.f32 %v925_v35 }
 0x225   : > { %v1498_v37 = vpop.eup %1497 }
 0x226   : > { %v927_v39 = vmul.f32 %v1498_v37, %v924_v36 }
 0x228   : > { %v929_v41 = vmul.f32 %v928_v38, %v927_v39 }
 0x22a   : > { %v931_v42 = vadd.f32 %v930_v40, %v929_v41 }
 0x22c   : > { %v932_v43 = vmax.f32 %v931_v42, 0.0 }
 0x22e   : > { %933 = vst [vmem:[%s217_s13] sm:$0x1] %v932_v43 }
 0x22f PF: > { %s15_s18 = sadd.s32 1, %s1505_s18  }
 0x230   : > { %p12_p4 = scmp.ge.s32.totalorder %s15_s18, 4  }
 0x232   :  { %14 = sbr.rel (!%p12_p4) target bundleno = 1 (0x1), region = 70 }

// kernel: forward.17
= control target key start
LH: loop header
LB: loop body
LE: loop exit
PB: predicated region body
PF: predicated region fallthrough
CT: control target
= control target key end

     0   :  { %s2125_s30 = smov 0   ;;  %s2810_s0 = inlined_call_operand.vmem [shape: f32[2,1,1152], index: 0, kind: input, shape index: {}]   ;;  %s2811_s1 = inlined_call_operand.vmem [shape: f32[1152,128], index: 1, kind: input, shape index: {}]   ;;  %s2812_s2 = inlined_call_operand.vmem [shape: f32[1,128], index: 2, kind: input, shape index: {}]   ;;  %s2813_s3 = inlined_call_operand.vmem [shape: f32[1,128], index: 3, kind: input, shape index: {}]   ;;  %s2814_s4 = inlined_call_operand.vmem [shape: f32[128,128], index: 4, kind: input, shape index: {}]   ;;  %s2815_s5 = inlined_call_operand.vmem [shape: f32[2,1,64], index: 5, kind: input, shape index: {}]   ;;  %s2816_s6 = inlined_call_operand.vmem [shape: f32[64,128], index: 6, kind: input, shape index: {}]   ;;  %s2817_s7 = inlined_call_operand.vmem [shape: f32[1,128], index: 7, kind: input, shape index: {}]   ;;  %s2818_s8 = inlined_call_operand.vmem [shape: f32[1,128], index: 8, kind: input, shape index: {}]   ;;  %s2819_s9 = inlined_call_operand.vmem [shape: f32[2,1,128], index: 9, kind: output, shape index: {}]  }
   0x1 LB: > { %s1351_s10 = sadd.s32 4294967295, %s2070_s30   ;;  %p1355_p0 = scmp.ge.s32.totalorder %s2070_s30, 1  ;;  %s2070_s30 = sphi %s2125_s30, %s19_s30  }
   0x2   : > { %p294_p1 = scmp.lt.s32.totalorder %s2070_s30, 3 }
   0x4   : > { %p295_p2 = pnand %p1355_p0, %p294_p1 }
   0x5   : > { %v358_v0 = vld [vmem:[%s2811_s1 + $0x80] sm:$0xff] (!%p295_p2)  ;;  %v359_v1 = vld [vmem:[%s2811_s1 + $0x88] sm:$0xff] (!%p295_p2)  ;;  %v360_v11 = vld [vmem:[%s2811_s1 + $0x90] sm:$0xff] (!%p295_p2)  ;;  %p2198_p3 = scmp.lt.s32.totalorder (!%p295_p2), %s1351_s10, 1  ;;  %v488_v47 = vlaneseq (!%p295_p2)  ;;  %vm2073_vm0 = vmmov (!%p295_p2), 0   ;;  %vm1063_vm1 = vcmask (!%p295_p2), 523264  }
   0x6   : > { %298 = sbr.rel (%p295_p2) target bundleno = 789 (0x315), region = 56  ;;  %v390_v2 = vld [vmem:[%s2811_s1 + $0x180] sm:$0xff] (!%p295_p2)  ;;  %v1788_v3 = vpack.c.bf16 (!%p295_p2), %v359_v1, %v358_v0  ;;  %v391_v4 = vld [vmem:[%s2811_s1 + $0x188] sm:$0xff] (!%p295_p2)  ;;  %v361_v13 = vld [vmem:[%s2811_s1 + $0x98] sm:$0xff] (!%p295_p2) }
   0x7   : > { %v342_v5 = vld [vmem:[%s2811_s1] sm:$0xff] (!%p295_p2)  ;;  %v343_v6 = vld [vmem:[%s2811_s1 + $0x8] sm:$0xff] (!%p295_p2)  ;;  %v1820_v7 = vpack.c.bf16 (!%p295_p2), %v391_v4, %v390_v2  ;;  %v392_v14 = vld [vmem:[%s2811_s1 + $0x190] sm:$0xff] (!%p295_p2)  ;;  %v1792_v16 = vpack.c.bf16 (!%p295_p2), %v361_v13, %v360_v11  ;;  %v2272_v61 = vshrl.u32 (!%p295_p2), %v488_v47, 7 }
   0x8   : > { %v1790_v8 = vpack.c.bf16 (!%p295_p2), %v343_v6, %v342_v5  ;;  %v374_v9 = vld [vmem:[%s2811_s1 + $0x100] sm:$0xff] (!%p295_p2)  ;;  %v375_v10 = vld [vmem:[%s2811_s1 + $0x108] sm:$0xff] (!%p295_p2)  ;;  %1789 = vmatprep.subr.bf16.mxu0 (!%p295_p2), %v1788_v3  ;;  %v393_v15 = vld [vmem:[%s2811_s1 + $0x198] sm:$0xff] (!%p295_p2) }
   0x9   : > { %v1822_v12 = vpack.c.bf16 (!%p295_p2), %v375_v10, %v374_v9  ;;  %1821 = vmatprep.subr.bf16.mxu1 (!%p295_p2), %v1820_v7  ;;  %v1824_v17 = vpack.c.bf16 (!%p295_p2), %v393_v15, %v392_v14  ;;  %v344_v18 = vld [vmem:[%s2811_s1 + $0x10] sm:$0xff] (!%p295_p2)  ;;  %v345_v19 = vld [vmem:[%s2811_s1 + $0x18] sm:$0xff] (!%p295_p2)  ;;  %v362_v23 = vld [vmem:[%s2811_s1 + $0xa0] sm:$0xff] (!%p295_p2)  ;;  %v494_v10 = vsub.s32 (!%p295_p2), 1, %v2272_v61  ;;  %v502_v11 = vsub.s32 (!%p295_p2), 3, %v2272_v61 }
   0xa   : > { %1791 = vmatpush3.bf16.msra.mxu0 (!%p295_p2), %v1790_v8  ;;  %v376_v20 = vld [vmem:[%s2811_s1 + $0x110] sm:$0xff] (!%p295_p2)  ;;  %v1794_v21 = vpack.c.bf16 (!%p295_p2), %v345_v19, %v344_v18  ;;  %v377_v22 = vld [vmem:[%s2811_s1 + $0x118] sm:$0xff] (!%p295_p2)  ;;  %v363_v24 = vld [vmem:[%s2811_s1 + $0xa8] sm:$0xff] (!%p295_p2) }
   0xb   : > { %1823 = vmatpush3.bf16.msra.mxu1 (!%p295_p2), %v1822_v12  ;;  %1793 = vmatprep.subr.bf16.mxu0 (!%p295_p2), %v1792_v16  ;;  %v1826_v25 = vpack.c.bf16 (!%p295_p2), %v377_v22, %v376_v20  ;;  %v1796_v26 = vpack.c.bf16 (!%p295_p2), %v363_v24, %v362_v23  ;;  %v394_v27 = vld [vmem:[%s2811_s1 + $0x1a0] sm:$0xff] (!%p295_p2)  ;;  %v395_v28 = vld [vmem:[%s2811_s1 + $0x1a8] sm:$0xff] (!%p295_p2)  ;;  %v364_v35 = vld [vmem:[%s2811_s1 + $0xb0] sm:$0xff] (!%p295_p2) }
   0xc   : > { %1825 = vmatprep.subr.bf16.mxu1 (!%p295_p2), %v1824_v17  ;;  %v346_v29 = vld [vmem:[%s2811_s1 + $0x20] sm:$0xff] (!%p295_p2)  ;;  %v1828_v30 = vpack.c.bf16 (!%p295_p2), %v395_v28, %v394_v27  ;;  %v347_v31 = vld [vmem:[%s2811_s1 + $0x28] sm:$0xff] (!%p295_p2)  ;;  %v365_v36 = vld [vmem:[%s2811_s1 + $0xb8] sm:$0xff] (!%p295_p2) }
   0xd   : > { %v378_v32 = vld [vmem:[%s2811_s1 + $0x120] sm:$0xff]  ;;  %v379_v33 = vld [vmem:[%s2811_s1 + $0x128] sm:$0xff]  ;;  %v1798_v34 = vpack.c.bf16 %v347_v31, %v346_v29  ;;  %v396_v37 = vld [vmem:[%s2811_s1 + $0x1b0] sm:$0xff]  ;;  %v1800_v39 = vpack.c.bf16 %v365_v36, %v364_v35  ;;  %s2822_s10 = smov (!%p2198_p3, %s1351_s10), 1 }
   0xe   : > { %1795 = vmatpush3.bf16.msra.mxu0 %v1794_v21  ;;  %v1830_v38 = vpack.c.bf16 %v379_v33, %v378_v32  ;;  %v397_v40 = vld [vmem:[%s2811_s1 + $0x1b8] sm:$0xff]  ;;  %v348_v41 = vld [vmem:[%s2811_s1 + $0x30] sm:$0xff]  ;;  %v366_v46 = vld [vmem:[%s2811_s1 + $0xc0] sm:$0xff]  ;;  %s2048_s21 = smul.u32 9, %s2822_s10  ;;  %s336_s24 = scalar_lea.vmem %s2815_s5, %s2822_s10 }
   0xf   : > { %1827 = vmatpush3.bf16.msra.mxu1 %v1826_v25  ;;  %1797 = vmatprep.subr.bf16.mxu0 %v1796_v26  ;;  %v349_v42 = vld [vmem:[%s2811_s1 + $0x38] sm:$0xff]  ;;  %v1832_v43 = vpack.c.bf16 %v397_v40, %v396_v37  ;;  %v380_v44 = vld [vmem:[%s2811_s1 + $0x130] sm:$0xff]  ;;  %v367_v48 = vld [vmem:[%s2811_s1 + $0xc8] sm:$0xff] }
  0x10   : > { %1829 = vmatprep.subr.bf16.mxu1 %v1828_v30  ;;  %v381_v45 = vld [vmem:[%s2811_s1 + $0x138] sm:$0xff]  ;;  %v398_v49 = vld [vmem:[%s2811_s1 + $0x1c0] sm:$0xff]  ;;  %v399_v50 = vld [vmem:[%s2811_s1 + $0x1c8] sm:$0xff]  ;;  %v1802_v51 = vpack.c.bf16 %v349_v42, %v348_v41  ;;  %v1804_v53 = vpack.c.bf16 %v367_v48, %v366_v46  ;;  %s2301_s22 = scalar_lea.vmem %s2810_s0, %s2048_s21 }
  0x11   : > { %v1834_v52 = vpack.c.bf16 %v381_v45, %v380_v44  ;;  %v350_v54 = vld [vmem:[%s2811_s1 + $0x40] sm:$0xff]  ;;  %v351_v55 = vld [vmem:[%s2811_s1 + $0x48] sm:$0xff]  ;;  %v1836_v57 = vpack.c.bf16 %v399_v50, %v398_v49  ;;  %v368_v59 = vld [vmem:[%s2811_s1 + $0xd0] sm:$0xff] }
  0x12   : > { %1799 = vmatpush3.bf16.msra.mxu0 %v1798_v34  ;;  %v382_v56 = vld [vmem:[%s2811_s1 + $0x140] sm:$0xff]  ;;  %v383_v58 = vld [vmem:[%s2811_s1 + $0x148] sm:$0xff]  ;;  %v369_v60 = vld [vmem:[%s2811_s1 + $0xd8] sm:$0xff]  ;;  %v1806_v0 = vpack.c.bf16 %v351_v55, %v350_v54 }
  0x13   : > { %1831 = vmatpush3.bf16.msra.mxu1 %v1830_v38  ;;  %1801 = vmatprep.subr.bf16.mxu0 %v1800_v39  ;;  %v400_v62 = vld [vmem:[%s2811_s1 + $0x1d0] sm:$0xff]  ;;  %v401_v63 = vld [vmem:[%s2811_s1 + $0x1d8] sm:$0xff]  ;;  %v1838_v1 = vpack.c.bf16 %v383_v58, %v382_v56  ;;  %v1808_v2 = vpack.c.bf16 %v369_v60, %v368_v59  ;;  %v370_v8 = vld [vmem:[%s2811_s1 + $0xe0] sm:$0xff]  ;;  %v490_v39 = vsub.s32 0, %v2272_v61 }
  0x14   : > { %1833 = vmatprep.subr.bf16.mxu1 %v1832_v43  ;;  %v352_v3 = vld [vmem:[%s2811_s1 + $0x50] sm:$0xff]  ;;  %v353_v4 = vld [vmem:[%s2811_s1 + $0x58] sm:$0xff]  ;;  %v1840_v6 = vpack.c.bf16 %v401_v63, %v400_v62  ;;  %v371_v9 = vld [vmem:[%s2811_s1 + $0xe8] sm:$0xff]  ;;  %v498_v43 = vsub.s32 2, %v2272_v61 }
  0x15   : > { %v384_v5 = vld [vmem:[%s2811_s1 + $0x150] sm:$0xff]  ;;  %v385_v7 = vld [vmem:[%s2811_s1 + $0x158] sm:$0xff]  ;;  %v402_v12 = vld [vmem:[%s2811_s1 + $0x1e0] sm:$0xff]  ;;  %v1810_v14 = vpack.c.bf16 %v353_v4, %v352_v3  ;;  %v1812_v17 = vpack.c.bf16 %v371_v9, %v370_v8 }
  0x16   : > { %1803 = vmatpush3.bf16.msra.mxu0 %v1802_v51  ;;  %v403_v13 = vld [vmem:[%s2811_s1 + $0x1e8] sm:$0xff]  ;;  %v354_v15 = vld [vmem:[%s2811_s1 + $0x60] sm:$0xff]  ;;  %v1842_v16 = vpack.c.bf16 %v385_v7, %v384_v5  ;;  %v372_v23 = vld [vmem:[%s2811_s1 + $0xf0] sm:$0xff] }
  0x17   : > { %1835 = vmatpush3.bf16.msra.mxu1 %v1834_v52  ;;  %1805 = vmatprep.subr.bf16.mxu0 %v1804_v53  ;;  %v355_v18 = vld [vmem:[%s2811_s1 + $0x68] sm:$0xff]  ;;  %v386_v19 = vld [vmem:[%s2811_s1 + $0x160] sm:$0xff]  ;;  %v1844_v21 = vpack.c.bf16 %v403_v13, %v402_v12  ;;  %v373_v24 = vld [vmem:[%s2811_s1 + $0xf8] sm:$0xff]  ;;  %v510_v53 = vsub.s32 5, %v2272_v61 }
  0x18   : > { %1837 = vmatprep.subr.bf16.mxu1 %v1836_v57  ;;  %v2321_v20 = vld [vmem:[%s2301_s22] sm:$0xff]  ;;  %v387_v22 = vld [vmem:[%s2811_s1 + $0x168] sm:$0xff]  ;;  %v404_v27 = vld [vmem:[%s2811_s1 + $0x1f0] sm:$0xff]  ;;  %v1814_v29 = vpack.c.bf16 %v355_v18, %v354_v15  ;;  %v1816_v31 = vpack.c.bf16 %v373_v24, %v372_v23  ;;  %v518_v57 = vsub.s32 7, %v2272_v61 }
  0x19   : > { %v495_v25 = vrot.slane %v2321_v20, %v494_v10  ;;  %v503_v26 = vrot.slane %v2321_v20, %v502_v11  ;;  %v405_v28 = vld [vmem:[%s2811_s1 + $0x1f8] sm:$0xff]  ;;  %v1846_v30 = vpack.c.bf16 %v387_v22, %v386_v19  ;;  %v356_v32 = vld [vmem:[%s2811_s1 + $0x70] sm:$0xff]  ;;  %v422_v37 = vld [vmem:[%s2811_s1 + $0x280] sm:$0xff]  ;;  %v491_v54 = vrot.slane %v2321_v20, %v490_v39 }
  0x1a   : > { %1807 = vmatpush3.bf16.msra.mxu0 %v1806_v0  ;;  %v357_v33 = vld [vmem:[%s2811_s1 + $0x78] sm:$0xff]  ;;  %v388_v34 = vld [vmem:[%s2811_s1 + $0x170] sm:$0xff]  ;;  %v1848_v35 = vpack.c.bf16 %v405_v28, %v404_v27  ;;  %v423_v38 = vld [vmem:[%s2811_s1 + $0x288] sm:$0xff]  ;;  %v499_v58 = vrot.slane %v2321_v20, %v498_v43  ;;  %v519_v9 = vrot.slane %v2321_v20, %v518_v57 }
  0x1b   : > { %1839 = vmatpush3.bf16.msra.mxu1 %v1838_v1  ;;  %1809 = vmatprep.subr.bf16.mxu0 %v1808_v2  ;;  %v389_v36 = vld [vmem:[%s2811_s1 + $0x178] sm:$0xff]  ;;  %v454_v40 = vld [vmem:[%s2811_s1 + $0x380] sm:$0xff]  ;;  %v455_v41 = vld [vmem:[%s2811_s1 + $0x388] sm:$0xff]  ;;  %v1818_v42 = vpack.c.bf16 %v357_v33, %v356_v32  ;;  %v1852_v45 = vpack.c.bf16 %v423_v38, %v422_v37 }
  0x1c   : > { %1841 = vmatprep.subr.bf16.mxu1 %v1840_v6  ;;  %597 = vmatprep.mubr.f32.mxu0 %v495_v25  ;;  %v1850_v44 = vpack.c.bf16 %v389_v36, %v388_v34  ;;  %v406_v46 = vld [vmem:[%s2811_s1 + $0x200] sm:$0xff]  ;;  %v407_v47 = vld [vmem:[%s2811_s1 + $0x208] sm:$0xff]  ;;  %v1884_v49 = vpack.c.bf16 %v455_v41, %v454_v40  ;;  %v424_v51 = vld [vmem:[%s2811_s1 + $0x290] sm:$0xff]  ;;  %v511_v6 = vrot.slane %v2321_v20, %v510_v53 }
  0x1d   : > { %667 = vmatprep.mubr.f32.mxu1 %v503_v26  ;;  %v438_v48 = vld [vmem:[%s2811_s1 + $0x300] sm:$0xff]  ;;  %v439_v50 = vld [vmem:[%s2811_s1 + $0x308] sm:$0xff]  ;;  %v425_v52 = vld [vmem:[%s2811_s1 + $0x298] sm:$0xff]  ;;  %v1854_v59 = vpack.c.bf16 %v407_v47, %v406_v46 }
  0x1e   : > { %1811 = vmatpush3.bf16.msra.mxu0 %v1810_v14  ;;  %v456_v55 = vld [vmem:[%s2811_s1 + $0x390] sm:$0xff]  ;;  %v457_v56 = vld [vmem:[%s2811_s1 + $0x398] sm:$0xff]  ;;  %v1886_v60 = vpack.c.bf16 %v439_v50, %v438_v48  ;;  %v1856_v62 = vpack.c.bf16 %v425_v52, %v424_v51  ;;  %v426_v4 = vld [vmem:[%s2811_s1 + $0x2a0] sm:$0xff] }
  0x1f   : > { %1843 = vmatpush3.bf16.msra.mxu1 %v1842_v16  ;;  %1813 = vmatprep.subr.bf16.mxu0 %v1812_v17  ;;  %v408_v63 = vld [vmem:[%s2811_s1 + $0x210] sm:$0xff]  ;;  %v409_v0 = vld [vmem:[%s2811_s1 + $0x218] sm:$0xff]  ;;  %v1888_v2 = vpack.c.bf16 %v457_v56, %v456_v55  ;;  %v427_v5 = vld [vmem:[%s2811_s1 + $0x2a8] sm:$0xff] }
  0x20   : > { %1845 = vmatprep.subr.bf16.mxu1 %v1844_v21  ;;  %v440_v1 = vld [vmem:[%s2811_s1 + $0x310] sm:$0xff]  ;;  %v441_v3 = vld [vmem:[%s2811_s1 + $0x318] sm:$0xff]  ;;  %v458_v7 = vld [vmem:[%s2811_s1 + $0x3a0] sm:$0xff]  ;;  %v1858_v10 = vpack.c.bf16 %v409_v0, %v408_v63  ;;  %v1860_v12 = vpack.c.bf16 %v427_v5, %v426_v4 }
  0x21   : > { %v459_v8 = vld [vmem:[%s2811_s1 + $0x3a8] sm:$0xff]  ;;  %v1890_v11 = vpack.c.bf16 %v441_v3, %v440_v1  ;;  %v410_v13 = vld [vmem:[%s2811_s1 + $0x220] sm:$0xff]  ;;  %v428_v18 = vld [vmem:[%s2811_s1 + $0x2b0] sm:$0xff] }
  0x22   : > { %1815 = vmatpush3.bf16.msra.mxu0 %v1814_v29  ;;  %v411_v14 = vld [vmem:[%s2811_s1 + $0x228] sm:$0xff]  ;;  %v442_v15 = vld [vmem:[%s2811_s1 + $0x320] sm:$0xff]  ;;  %v1892_v16 = vpack.c.bf16 %v459_v8, %v458_v7  ;;  %v429_v19 = vld [vmem:[%s2811_s1 + $0x2b8] sm:$0xff] }
  0x23   : > { %1847 = vmatpush3.bf16.msra.mxu1 %v1846_v30  ;;  %1817 = vmatprep.subr.bf16.mxu0 %v1816_v31  ;;  %v443_v17 = vld [vmem:[%s2811_s1 + $0x328] sm:$0xff]  ;;  %v460_v21 = vld [vmem:[%s2811_s1 + $0x3b0] sm:$0xff]  ;;  %v461_v22 = vld [vmem:[%s2811_s1 + $0x3b8] sm:$0xff]  ;;  %v1862_v23 = vpack.c.bf16 %v411_v14, %v410_v13  ;;  %v1864_v25 = vpack.c.bf16 %v429_v19, %v428_v18  ;;  %v514_v18 = vsub.s32 6, %v2272_v61 }
  0x24   : > { %1849 = vmatprep.subr.bf16.mxu1 %v1848_v35  ;;  %v1894_v24 = vpack.c.bf16 %v443_v17, %v442_v15  ;;  %v412_v26 = vld [vmem:[%s2811_s1 + $0x230] sm:$0xff]  ;;  %v413_v27 = vld [vmem:[%s2811_s1 + $0x238] sm:$0xff]  ;;  %v1896_v29 = vpack.c.bf16 %v461_v22, %v460_v21  ;;  %v430_v31 = vld [vmem:[%s2811_s1 + $0x2c0] sm:$0xff] }
  0x25   : > { %v444_v28 = vld [vmem:[%s2811_s1 + $0x330] sm:$0xff]  ;;  %v445_v30 = vld [vmem:[%s2811_s1 + $0x338] sm:$0xff]  ;;  %v431_v32 = vld [vmem:[%s2811_s1 + $0x2c8] sm:$0xff]  ;;  %v1866_v35 = vpack.c.bf16 %v413_v27, %v412_v26 }
  0x26   : > { %1819 = vmatpush3.bf16.msra.mxu0 %v1818_v42  ;;  %v462_v33 = vld [vmem:[%s2811_s1 + $0x3c0] sm:$0xff]  ;;  %v463_v34 = vld [vmem:[%s2811_s1 + $0x3c8] sm:$0xff]  ;;  %v1898_v36 = vpack.c.bf16 %v445_v30, %v444_v28  ;;  %v1868_v37 = vpack.c.bf16 %v431_v32, %v430_v31  ;;  %v432_v43 = vld [vmem:[%s2811_s1 + $0x2d0] sm:$0xff]  ;;  %v2074_v30 = vmov 0.0  }
  0x27   : > { %1851 = vmatpush3.bf16.msra.mxu1 %v1850_v44  ;;  %1853 = vmatprep.subr.bf16.mxu0 %v1852_v45  ;;  %v414_v38 = vld [vmem:[%s2811_s1 + $0x240] sm:$0xff]  ;;  %v415_v39 = vld [vmem:[%s2811_s1 + $0x248] sm:$0xff]  ;;  %v1900_v41 = vpack.c.bf16 %v463_v34, %v462_v33  ;;  %v433_v44 = vld [vmem:[%s2811_s1 + $0x2d8] sm:$0xff] }
  0x28   : > { %1885 = vmatprep.subr.bf16.mxu1 %v1884_v49  ;;  %v446_v40 = vld [vmem:[%s2811_s1 + $0x340] sm:$0xff]  ;;  %v447_v42 = vld [vmem:[%s2811_s1 + $0x348] sm:$0xff]  ;;  %v464_v45 = vld [vmem:[%s2811_s1 + $0x3d0] sm:$0xff]  ;;  %v1870_v47 = vpack.c.bf16 %v415_v39, %v414_v38  ;;  %v1872_v49 = vpack.c.bf16 %v433_v44, %v432_v43 }
  0x29   : > { %598 = vmatmul.mubr.f32.vlgmr.msra.gmra.mrb[0].mxu0 %v491_v54  ;;  %v465_v46 = vld [vmem:[%s2811_s1 + $0x3d8] sm:$0xff]  ;;  %v1902_v48 = vpack.c.bf16 %v447_v42, %v446_v40  ;;  %v416_v50 = vld [vmem:[%s2811_s1 + $0x250] sm:$0xff]  ;;  %v434_v55 = vld [vmem:[%s2811_s1 + $0x2e0] sm:$0xff] }
  0x2a   : > { %668 = vmatmul.mubr.f32.vlgmr.msra.gmra.mrb[0].mxu1 %v499_v58  ;;  %1855 = vmatpush3.bf16.msra.mxu0 %v1854_v59  ;;  %v417_v51 = vld [vmem:[%s2811_s1 + $0x258] sm:$0xff]  ;;  %v448_v52 = vld [vmem:[%s2811_s1 + $0x350] sm:$0xff]  ;;  %v1904_v53 = vpack.c.bf16 %v465_v46, %v464_v45  ;;  %v435_v56 = vld [vmem:[%s2811_s1 + $0x2e8] sm:$0xff] }
  0x2b   : > { %1887 = vmatpush3.bf16.msra.mxu1 %v1886_v60  ;;  %1857 = vmatprep.subr.bf16.mxu0 %v1856_v62  ;;  %v449_v54 = vld [vmem:[%s2811_s1 + $0x358] sm:$0xff]  ;;  %v466_v57 = vld [vmem:[%s2811_s1 + $0x3e0] sm:$0xff]  ;;  %v467_v58 = vld [vmem:[%s2811_s1 + $0x3e8] sm:$0xff]  ;;  %v1874_v59 = vpack.c.bf16 %v417_v51, %v416_v50  ;;  %v1876_v62 = vpack.c.bf16 %v435_v56, %v434_v55 }
  0x2c   : > { %1889 = vmatprep.subr.bf16.mxu1 %v1888_v2  ;;  %737 = vmatprep.mubr.f32.mxu0 %v511_v6  ;;  %v1906_v60 = vpack.c.bf16 %v449_v54, %v448_v52  ;;  %v418_v63 = vld [vmem:[%s2811_s1 + $0x260] sm:$0xff]  ;;  %v419_v0 = vld [vmem:[%s2811_s1 + $0x268] sm:$0xff]  ;;  %v1908_v2 = vpack.c.bf16 %v467_v58, %v466_v57  ;;  %v436_v4 = vld [vmem:[%s2811_s1 + $0x2f0] sm:$0xff] }
  0x2d   : > { %807 = vmatprep.mubr.f32.mxu1 %v519_v9  ;;  %v450_v1 = vld [vmem:[%s2811_s1 + $0x360] sm:$0xff]  ;;  %v451_v3 = vld [vmem:[%s2811_s1 + $0x368] sm:$0xff]  ;;  %v437_v5 = vld [vmem:[%s2811_s1 + $0x2f8] sm:$0xff]  ;;  %v1878_v8 = vpack.c.bf16 %v419_v0, %v418_v63 }
  0x2e   : > { %1859 = vmatpush3.bf16.msra.mxu0 %v1858_v10  ;;  %v468_v6 = vld [vmem:[%s2811_s1 + $0x3f0] sm:$0xff]  ;;  %v469_v7 = vld [vmem:[%s2811_s1 + $0x3f8] sm:$0xff]  ;;  %v1910_v9 = vpack.c.bf16 %v451_v3, %v450_v1  ;;  %v1880_v10 = vpack.c.bf16 %v437_v5, %v436_v4  ;;  %v470_v21 = vld [vmem:[%s2811_s1 + $0x400] sm:$0xff] }
  0x2f   : > { %1891 = vmatpush3.bf16.msra.mxu1 %v1890_v11  ;;  %1861 = vmatprep.subr.bf16.mxu0 %v1860_v12  ;;  %v420_v11 = vld [vmem:[%s2811_s1 + $0x270] sm:$0xff]  ;;  %v421_v12 = vld [vmem:[%s2811_s1 + $0x278] sm:$0xff]  ;;  %v1912_v13 = vpack.c.bf16 %v469_v7, %v468_v6  ;;  %v471_v22 = vld [vmem:[%s2811_s1 + $0x408] sm:$0xff] }
  0x30   : > { %1893 = vmatprep.subr.bf16.mxu1 %v1892_v16  ;;  %v452_v14 = vld [vmem:[%s2811_s1 + $0x370] sm:$0xff]  ;;  %v453_v15 = vld [vmem:[%s2811_s1 + $0x378] sm:$0xff]  ;;  %v506_v16 = vsub.s32 4, %v2272_v61  ;;  %v1882_v17 = vpack.c.bf16 %v421_v12, %v420_v11  ;;  %v2072_v61 = vmov 0.0|0.0   ;;  %v483_v42 = vld [vmem:[%s2811_s1 + $0x468] sm:$0xff] }
  0x31   : > { %v1914_v19 = vpack.c.bf16 %v453_v15, %v452_v14  ;;  %v472_v26 = vld [vmem:[%s2811_s1 + $0x410] sm:$0xff]  ;;  %v473_v27 = vld [vmem:[%s2811_s1 + $0x418] sm:$0xff]  ;;  %v890_v54 = vld [vmem:[%s2814_s4 + $0x20] sm:$0xff] }
  0x32   : > { %1863 = vmatpush3.bf16.msra.mxu0 %v1862_v23  ;;  %v507_v23 = vrot.slane %v2321_v20, %v506_v16  ;;  %v1920_v28 = vpack.c.bf16 %v473_v27, %v472_v26  ;;  %v476_v32 = vld [vmem:[%s2811_s1 + $0x430] sm:$0xff]  ;;  %v477_v33 = vld [vmem:[%s2811_s1 + $0x438] sm:$0xff]  ;;  %v891_v55 = vld [vmem:[%s2814_s4 + $0x28] sm:$0xff] }
  0x33   : > { %1895 = vmatpush3.bf16.msra.mxu1 %v1894_v24  ;;  %1865 = vmatprep.subr.bf16.mxu0 %v1864_v25  ;;  %v1917_v24 = vpack.c.bf16 %v471_v22, %v470_v21  ;;  %v515_v25 = vrot.slane %v2321_v20, %v514_v18  ;;  %v474_v20 = vld [vmem:[%s2811_s1 + $0x420] sm:$0xff]  ;;  %v1926_v34 = vpack.c.bf16 %v477_v33, %v476_v32  ;;  %v480_v38 = vld [vmem:[%s2811_s1 + $0x450] sm:$0xff]  ;;  %v481_v39 = vld [vmem:[%s2811_s1 + $0x458] sm:$0xff] }
  0x34   : > { %1897 = vmatprep.subr.bf16.mxu1 %v1896_v29  ;;  %v475_v29 = vld [vmem:[%s2811_s1 + $0x428] sm:$0xff]  ;;  %v1932_v40 = vpack.c.bf16 %v481_v39, %v480_v38  ;;  %v484_v44 = vld [vmem:[%s2811_s1 + $0x470] sm:$0xff]  ;;  %v485_v45 = vld [vmem:[%s2811_s1 + $0x478] sm:$0xff]  ;;  %v2649_v56 = vpack.c.bf16 %v891_v55, %v890_v54 }
  0x35   : > { %v1923_v31 = vpack.c.bf16 %v475_v29, %v474_v20  ;;  %v1938_v46 = vpack.c.bf16 %v485_v45, %v484_v44  ;;  %v888_v51 = vld [vmem:[%s2814_s4 + $0x10] sm:$0xff]  ;;  %v889_v52 = vld [vmem:[%s2814_s4 + $0x18] sm:$0xff]  ;;  %v898_v3 = vld [vmem:[%s2814_s4 + $0x60] sm:$0xff] }
  0x36   : > { %1867 = vmatpush3.bf16.msra.mxu0 %v1866_v35  ;;  %v478_v35 = vld [vmem:[%s2811_s1 + $0x440] sm:$0xff]  ;;  %v892_v57 = vld [vmem:[%s2814_s4 + $0x30] sm:$0xff]  ;;  %v893_v58 = vld [vmem:[%s2814_s4 + $0x38] sm:$0xff] }
  0x37   : > { %1899 = vmatpush3.bf16.msra.mxu1 %v1898_v36  ;;  %1869 = vmatprep.subr.bf16.mxu0 %v1868_v37  ;;  %v479_v36 = vld [vmem:[%s2811_s1 + $0x448] sm:$0xff]  ;;  %v896_v0 = vld [vmem:[%s2814_s4 + $0x50] sm:$0xff]  ;;  %v897_v1 = vld [vmem:[%s2814_s4 + $0x58] sm:$0xff] }
  0x38   : > { %1901 = vmatprep.subr.bf16.mxu1 %v1900_v41  ;;  %v1929_v37 = vpack.c.bf16 %v479_v36, %v478_v35  ;;  %v482_v41 = vld [vmem:[%s2811_s1 + $0x460] sm:$0xff]  ;;  %v899_v4 = vld [vmem:[%s2814_s4 + $0x68] sm:$0xff]  ;;  %v900_v6 = vld [vmem:[%s2814_s4 + $0x70] sm:$0xff] }
  0x39   : > { %v1935_v43 = vpack.c.bf16 %v483_v42, %v482_v41  ;;  %v2697_v5 = vpack.c.bf16 %v899_v4, %v898_v3  ;;  %v901_v7 = vld [vmem:[%s2814_s4 + $0x78] sm:$0xff]  ;;  %v1056_v26 = vld [vmem:[%s2816_s6 + $0x8] sm:$0xff]  ;;  %v1059_v35 = vld [vmem:[%s2816_s6 + $0x20] sm:$0xff] }
  0x3a   : > { %1871 = vmatpush3.bf16.msra.mxu0 %v1870_v47  ;;  %v1356_v47 = vld [vmem:[%s2301_s22 + $0x8] ss:$0 sm:$0xff]  ;;  %v1058_v32 = vld [vmem:[%s2816_s6 + $0x18] sm:$0xff]  ;;  %v1061_v38 = vld [vmem:[%s2816_s6 + $0x30] sm:$0xff]  ;;  %s339_s22 = scalar_lea.vmem %s2819_s9, %s2822_s10 }
  0x3b   : > { %1903 = vmatpush3.bf16.msra.mxu1 %v1902_v48  ;;  %1873 = vmatprep.subr.bf16.mxu0 %v1872_v49  ;;  %v886_v48 = vld [vmem:[%s2814_s4] sm:$0xff]  ;;  %v887_v49 = vld [vmem:[%s2814_s4 + $0x8] sm:$0xff]  ;;  %v1062_v39 = vld [vmem:[%s2816_s6 + $0x38] sm:$0xff] }
  0x3c   : > { %1905 = vmatprep.subr.bf16.mxu1 %v1904_v53  ;;  %v2627_v50 = vpack.c.bf16 %v887_v49, %v886_v48  ;;  %v2638_v53 = vpack.c.bf16 %v889_v52, %v888_v51  ;;  %v1060_v36 = vld [vmem:[%s2816_s6 + $0x28] sm:$0xff]  ;;  %v1054_v41 = vld [vmem:[%s336_s24] sm:$0x1] }
  0x3d   : > { %v1288_v4 = vld [vmem:[%s2817_s7] sm:$0x1] }
  0x3e   : > { %1875 = vmatpush3.bf16.msra.mxu0 %v1874_v59  ;;  %v2661_v59 = vpack.c.bf16 %v893_v58, %v892_v57 }
  0x3f   : > { %1907 = vmatpush3.bf16.msra.mxu1 %v1906_v60  ;;  %1877 = vmatprep.subr.bf16.mxu0 %v1876_v62  ;;  %v894_v60 = vld [vmem:[%s2814_s4 + $0x40] sm:$0xff]  ;;  %v895_v62 = vld [vmem:[%s2814_s4 + $0x48] sm:$0xff] }
  0x40   : > { %1909 = vmatprep.subr.bf16.mxu1 %v1908_v2  ;;  %v2673_v63 = vpack.c.bf16 %v895_v62, %v894_v60  ;;  %v2685_v2 = vpack.c.bf16 %v897_v1, %v896_v0 }
  0x42   : > { %1879 = vmatpush3.bf16.msra.mxu0 %v1878_v8  ;;  %v2709_v8 = vpack.c.bf16 %v901_v7, %v900_v6  ;;  %v1052_v7 = vld [vmem:[%s2813_s3] sm:$0x1] }
  0x43   : > { %1911 = vmatpush3.bf16.msra.mxu1 %v1910_v9  ;;  %1881 = vmatprep.subr.bf16.mxu0 %v1880_v10 }
  0x44   : > { %1913 = vmatprep.subr.bf16.mxu1 %v1912_v13 }
  0x46   : > { %1883 = vmatpush3.bf16.msra.mxu0 %v1882_v17 }
  0x47   : > { %1915 = vmatpush3.bf16.msra.mxu1 %v1914_v19  ;;  %1916 = vmatprep.subr.bf16.mxu0 %v2072_v61 }
  0x48   : > { %1940 = vmatprep.subr.bf16.mxu1 %v2072_v61 }
  0x49   : > { %738 = vmatmul.mubr.f32.vlgmr.msra.gmra.mrb[2].mxu0 %v507_v23 }
  0x4a   : > { %1918 = vmatpush3.bf16.msra.mxu0 %v1917_v24  ;;  %808 = vmatmul.mubr.f32.vlgmr.msra.gmra.mrb[2].mxu1 %v515_v25  ;;  %v1055_v25 = vld [vmem:[%s2816_s6] sm:$0xff] }
  0x4b   : > { %1919 = vmatprep.subr.bf16.mxu0 %v2072_v61  ;;  %1626 = vmatprep.mubr.msk.f32.mxu0 %vm2073_vm0, %v2074_v30 }
  0x4c   : > { %1661 = vmatprep.mubr.msk.f32.mxu1 %vm2073_vm0, %v2074_v30  ;;  %1942 = vmatpush3.bf16.msra.mxu1 %v2627_v50 }
  0x4d   : > { %1943 = vmatprep.subr.bf16.mxu1 %v2072_v61 }
  0x4e   : > { %1921 = vmatpush3.bf16.msra.mxu0 %v1920_v28  ;;  %v1989_v28 = vpack.c.bf16 %v1056_v26, %v1055_v25 }
  0x4f   : > { %1922 = vmatprep.subr.bf16.mxu0 %v2072_v61 }
  0x50   : > { %1945 = vmatpush3.bf16.msra.mxu1 %v2638_v53 }
  0x51   : > { %1946 = vmatprep.subr.bf16.mxu1 %v2072_v61 }
  0x52   : > { %1924 = vmatpush3.bf16.msra.mxu0 %v1923_v31  ;;  %v1057_v31 = vld [vmem:[%s2816_s6 + $0x10] sm:$0xff] }
  0x53   : > { %1925 = vmatprep.subr.bf16.mxu0 %v2072_v61 }
  0x54   : > { %1948 = vmatpush3.bf16.msra.mxu1 %v2649_v56 }
  0x55   : > { %1949 = vmatprep.subr.bf16.mxu1 %v2072_v61 }
  0x56   : > { %1927 = vmatpush3.bf16.msra.mxu0 %v1926_v34  ;;  %v1992_v34 = vpack.c.bf16 %v1058_v32, %v1057_v31 }
  0x57   : > { %1928 = vmatprep.subr.bf16.mxu0 %v2072_v61 }
  0x58   : > { %1951 = vmatpush3.bf16.msra.mxu1 %v2661_v59 }
  0x59   : > { %1952 = vmatprep.subr.bf16.mxu1 %v2072_v61 }
  0x5a   : > { %1930 = vmatpush3.bf16.msra.mxu0 %v1929_v37  ;;  %v1995_v37 = vpack.c.bf16 %v1060_v36, %v1059_v35 }
  0x5b   : > { %1931 = vmatprep.subr.bf16.mxu0 %v2072_v61 }
  0x5c   : > { %1954 = vmatpush3.bf16.msra.mxu1 %v2673_v63 }
  0x5d   : > { %1955 = vmatprep.subr.bf16.mxu1 %v2072_v61 }
  0x5e   : > { %1933 = vmatpush3.bf16.msra.mxu0 %v1932_v40  ;;  %v1998_v40 = vpack.c.bf16 %v1062_v39, %v1061_v38 }
  0x5f   : > { %1934 = vmatprep.subr.bf16.mxu0 %v2072_v61 }
  0x60   : > { %1957 = vmatpush3.bf16.msra.mxu1 %v2685_v2 }
  0x61   : > { %1958 = vmatprep.subr.bf16.mxu1 %v2072_v61 }
  0x62   : > { %1936 = vmatpush3.bf16.msra.mxu0 %v1935_v43 }
  0x63   : > { %1937 = vmatprep.subr.bf16.mxu0 %v2072_v61 }
  0x64   : > { %1960 = vmatpush3.bf16.msra.mxu1 %v2697_v5 }
  0x65   : > { %1961 = vmatprep.subr.bf16.mxu1 %v2072_v61 }
  0x66   : > { %1939 = vmatpush3.bf16.msra.mxu0 %v1938_v46 }
  0x67   : > { %1964 = vmatprep.subr.bf16.mxu0 %v2072_v61 }
  0x68   : > { %1963 = vmatpush3.bf16.msra.mxu1 %v2709_v8 }
  0x69   : > { %1627 = vmatmul.mubr.f32.vlgmr.msra.gmra.mrb[4].mxu0 %v1356_v47  ;;  %1988 = vmatprep.subr.bf16.mxu1 %v2072_v61 }
  0x6a   : > { %1696 = vmatprep.mubr.msk.f32.mxu0 %vm2073_vm0, %v2074_v30  ;;  %1966 = vmatpush3.bf16.msra.mxu0 %v2627_v50 }
  0x6b   : > { %1967 = vmatprep.subr.bf16.mxu0 %v2072_v61 }
  0x6e   : > { %1969 = vmatpush3.bf16.msra.mxu0 %v2638_v53 }
  0x6f   : > { %1970 = vmatprep.subr.bf16.mxu0 %v2072_v61 }
  0x72   : > { %1972 = vmatpush3.bf16.msra.mxu0 %v2649_v56 }
  0x73   : > { %1973 = vmatprep.subr.bf16.mxu0 %v2072_v61 }
  0x76   : > { %1975 = vmatpush3.bf16.msra.mxu0 %v2661_v59 }
  0x77   : > { %1976 = vmatprep.subr.bf16.mxu0 %v2072_v61 }
  0x7a   : > { %1978 = vmatpush3.bf16.msra.mxu0 %v2673_v63 }
  0x7b   : > { %1979 = vmatprep.subr.bf16.mxu0 %v2072_v61 }
  0x7e   : > { %1981 = vmatpush3.bf16.msra.mxu0 %v2685_v2 }
  0x7f   : > { %1982 = vmatprep.subr.bf16.mxu0 %v2072_v61 }
  0x82   : > { %1984 = vmatpush3.bf16.msra.mxu0 %v2697_v5 }
  0x83   : > { %1985 = vmatprep.subr.bf16.mxu0 %v2072_v61 }
  0x86   : > { %1987 = vmatpush3.bf16.msra.mxu0 %v2709_v8 }
  0x87   : > { %2024 = vmatprep.subr.bf16.mxu0 %v2072_v61 }
  0xfc   : > { %v1392_v9 = vpop.f32.mrb[0].mxu0 }
  0xfd   : > { %v1427_v10 = vpop.f32.mrb[0].mxu1  ;;  %v1393_v11 = vpop.f32.mrb[1].mxu0 }
  0xfe   : > { %v1394_v12 = vadd.f32 %v1393_v11, %v1392_v9  ;;  %v1428_v13 = vpop.f32.mrb[1].mxu1 }
  0xff   : > { %v1429_v14 = vadd.f32 %v1428_v13, %v1427_v10 }
 0x101   : > { %v670_v15 = vadd.f32 %v1429_v14, %v1394_v12 }
 0x11c   : > { %v1462_v16 = vpop.f32.mrb[2].mxu0 }
 0x11d   : > { %v1463_v17 = vpop.f32.mrb[3].mxu0  ;;  %v1497_v18 = vpop.f32.mrb[2].mxu1 }
 0x11e   : > { %v1464_v19 = vadd.f32 %v1463_v17, %v1462_v16  ;;  %v1498_v21 = vpop.f32.mrb[3].mxu1 }
 0x11f   : > { %v1499_v22 = vadd.f32 %v1498_v21, %v1497_v18 }
 0x120   : > { %v740_v23 = vadd.f32 %v1464_v19, %v670_v15 }
 0x122   : > { %v810_v24 = vadd.f32 %v1499_v22, %v740_v23 }
 0x13c   : > { %v879_v27 = vpop.f32.mrb[4].mxu0 }
 0x13d   : > { %v2723_v20 = vadd.f32 %v879_v27, %v810_v24  ;;  %v1628_v29 = vpop.f32.mrb[5].mxu0 }
 0x13f   : > { %v884_v33 = vmul.f32 %v2723_v20, %v2723_v20  ;;  %1662 = vmatmul.mubr.f32.vlgmr.msra.gmra.mrb[4].mxu1 %v2723_v20 }
 0x140   : > { %1990 = vmatpush3.bf16.msra.mxu1 %v1989_v28  ;;  %1715 = vmatprep.mubr.msk.f32.mxu1 %vm2073_vm0, %v2074_v30 }
 0x141   : > { %1697 = vmatmul.mubr.f32.vlgmr.msra.gmra.mrb[6].mxu0 %v884_v33  ;;  %1991 = vmatprep.subr.bf16.mxu1 %v2072_v61 }
 0x142   : > { %2026 = vmatpush3.bf16.msra.mxu0 %v2627_v50  ;;  %1785 = vmatprep.mubr.msk.f32.mxu0 %vm2073_vm0, %v2074_v30 }
 0x143   : > { %2027 = vmatprep.subr.bf16.mxu0 %v2072_v61 }
 0x144   : > { %1993 = vmatpush3.bf16.msra.mxu1 %v1992_v34 }
 0x145   : > { %1994 = vmatprep.subr.bf16.mxu1 %v2072_v61 }
 0x146   : > { %2029 = vmatpush3.bf16.msra.mxu0 %v2638_v53 }
 0x147   : > { %2030 = vmatprep.subr.bf16.mxu0 %v2072_v61 }
 0x148   : > { %1996 = vmatpush3.bf16.msra.mxu1 %v1995_v37 }
 0x149   : > { %1997 = vmatprep.subr.bf16.mxu1 %v2072_v61 }
 0x14a   : > { %2032 = vmatpush3.bf16.msra.mxu0 %v2649_v56 }
 0x14b   : > { %2033 = vmatprep.subr.bf16.mxu0 %v2072_v61 }
 0x14c   : > { %1999 = vmatpush3.bf16.msra.mxu1 %v1998_v40 }
 0x14d   : > { %2000 = vmatprep.subr.bf16.mxu1 %v2072_v61 }
 0x14e   : > { %2035 = vmatpush3.bf16.msra.mxu0 %v2661_v59 }
 0x14f   : > { %1716 = vmatmul.mubr.msk.f32.vlgmr.msra.gmra.mrb[6].mxu1 %vm1063_vm1, %v1054_v41  ;;  %2036 = vmatprep.subr.bf16.mxu0 %v2072_v61 }
 0x150   : > { %2002 = vmatpush3.bf16.msra.mxu1 %v2627_v50  ;;  %1750 = vmatprep.mubr.msk.f32.mxu1 %vm2073_vm0, %v2074_v30 }
 0x151   : > { %2003 = vmatprep.subr.bf16.mxu1 %v2072_v61 }
 0x152   : > { %2038 = vmatpush3.bf16.msra.mxu0 %v2673_v63 }
 0x153   : > { %2039 = vmatprep.subr.bf16.mxu0 %v2072_v61 }
 0x154   : > { %2005 = vmatpush3.bf16.msra.mxu1 %v2638_v53 }
 0x155   : > { %2006 = vmatprep.subr.bf16.mxu1 %v2072_v61 }
 0x156   : > { %2041 = vmatpush3.bf16.msra.mxu0 %v2685_v2 }
 0x157   : > { %2042 = vmatprep.subr.bf16.mxu0 %v2072_v61 }
 0x158   : > { %2008 = vmatpush3.bf16.msra.mxu1 %v2649_v56 }
 0x159   : > { %2009 = vmatprep.subr.bf16.mxu1 %v2072_v61 }
 0x15a   : > { %2044 = vmatpush3.bf16.msra.mxu0 %v2697_v5 }
 0x15b   : > { %2045 = vmatprep.subr.bf16.mxu0 %v2072_v61 }
 0x15c   : > { %2011 = vmatpush3.bf16.msra.mxu1 %v2661_v59 }
 0x15d   : > { %2012 = vmatprep.subr.bf16.mxu1 %v2072_v61 }
 0x15e   : > { %2047 = vmatpush3.bf16.msra.mxu0 %v2709_v8 }
 0x160   : > { %2014 = vmatpush3.bf16.msra.mxu1 %v2673_v63 }
 0x161   : > { %2015 = vmatprep.subr.bf16.mxu1 %v2072_v61 }
 0x164   : > { %2017 = vmatpush3.bf16.msra.mxu1 %v2685_v2  ;;  %v1050_v2 = vld [vmem:[%s2812_s2] sm:$0x1] }
 0x165   : > { %2018 = vmatprep.subr.bf16.mxu1 %v2072_v61 }
 0x168   : > { %2020 = vmatpush3.bf16.msra.mxu1 %v2697_v5 }
 0x169   : > { %2021 = vmatprep.subr.bf16.mxu1 %v2072_v61 }
 0x16c   : > { %2023 = vmatpush3.bf16.msra.mxu1 %v2709_v8  ;;  %v1290_v8 = vld [vmem:[%s2818_s8] sm:$0x1] }
 0x212   : > { %v968_v30 = vpop.f32.mrb[4].mxu1 }
 0x213   : > { %v1042_v42 = vmul.f32 0.25, %v968_v30  ;;  %v1663_v43 = vpop.f32.mrb[5].mxu1 }
 0x214   : > { %v1038_v44 = vpop.f32.mrb[6].mxu0 }
 0x215   : > { %v1044_v45 = vmul.f32 %v1042_v42, %v1042_v42  ;;  %v1043_v46 = vmul.f32 0.25, %v1038_v44  ;;  %v1698_v47 = vpop.f32.mrb[7].mxu0  ;;  %v1046_v53 = vsub.f32 %v2723_v20, %v1042_v42 }
 0x217   : > { %v1045_v48 = vsub.f32 %v1043_v46, %v1044_v45 }
 0x219   : > { %v1047_v49 = vadd.f32 1e-05, %v1045_v48 }
 0x21b   : > { %2060 = vrsqrt.f32 %v1047_v49 }
 0x222   : > { %v1133_v50 = vpop.f32.mrb[6].mxu1 }
 0x223   : > { %v1138_v51 = vmul.f32 %v1133_v50, %v1133_v50  ;;  %v1717_v52 = vpop.f32.mrb[7].mxu1  ;;  %1751 = vmatmul.mubr.f32.vlgmr.msra.gmra.mrb[8].mxu1 %v1133_v50 }
 0x225   : > { %v2061_v54 = vpop.eup %2060  ;;  %1786 = vmatmul.mubr.f32.vlgmr.msra.gmra.mrb[8].mxu0 %v1138_v51 }
 0x226   : > { %v1049_v61 = vmul.f32 %v2061_v54, %v1046_v53 }
 0x228   : > { %v1051_v5 = vmul.f32 %v1050_v2, %v1049_v61 }
 0x22a   : > { %v1053_v10 = vadd.f32 %v1052_v7, %v1051_v5 }
 0x2f6   : > { %v1206_v55 = vpop.f32.mrb[8].mxu1 }
 0x2f7   : > { %v1280_v56 = vmul.f32 0.25, %v1206_v55  ;;  %v1752_v57 = vpop.f32.mrb[9].mxu1 }
 0x2f8   : > { %v1276_v58 = vpop.f32.mrb[8].mxu0 }
 0x2f9   : > { %v1282_v59 = vmul.f32 %v1280_v56, %v1280_v56  ;;  %v1284_v60 = vsub.f32 %v1133_v50, %v1280_v56  ;;  %v1281_v62 = vmul.f32 0.25, %v1276_v58  ;;  %v1787_v63 = vpop.f32.mrb[9].mxu0 }
 0x2fb   : > { %v1283_v0 = vsub.f32 %v1281_v62, %v1282_v59 }
 0x2fd   : > { %v1285_v1 = vadd.f32 1e-05, %v1283_v0 }
 0x2ff   : > { %2062 = vrsqrt.f32 %v1285_v1 }
 0x309   : > { %v2063_v3 = vpop.eup %2062 }
 0x30a   : > { %v1287_v6 = vmul.f32 %v2063_v3, %v1284_v60 }
 0x30c   : > { %v1289_v9 = vmul.f32 %v1288_v4, %v1287_v6 }
 0x30e   : > { %v1291_v11 = vadd.f32 %v1290_v8, %v1289_v9 }
 0x310   : > { %v1292_v12 = vadd.f32 %v1291_v11, %v1053_v10 }
 0x312   : > { %v1293_v13 = vmax.f32 %v1292_v12, 0.0 }
 0x314   : > { %1294 = vst [vmem:[%s339_s22] sm:$0x1] %v1293_v13 }
 0x315 PF: > { %s19_s30 = sadd.s32 1, %s2070_s30  }
 0x316   : > { %p16_p4 = scmp.ge.s32.totalorder %s19_s30, 4  }
 0x318   :  { %18 = sbr.rel (!%p16_p4) target bundleno = 1 (0x1), region = 89 }

// kernel: forward.19
= control target key start
LH: loop header
LB: loop body
LE: loop exit
PB: predicated region body
PF: predicated region fallthrough
CT: control target
= control target key end

     0   :  { %s2164_s30 = smov 0   ;;  %s2877_s0 = inlined_call_operand.vmem [shape: f32[2,1,1152], index: 0, kind: input, shape index: {}]   ;;  %s2878_s1 = inlined_call_operand.vmem [shape: f32[1152,128], index: 1, kind: input, shape index: {}]   ;;  %s2879_s2 = inlined_call_operand.vmem [shape: f32[1,128], index: 2, kind: input, shape index: {}]   ;;  %s2880_s3 = inlined_call_operand.vmem [shape: f32[1,128], index: 3, kind: input, shape index: {}]   ;;  %s2881_s4 = inlined_call_operand.vmem [shape: f32[128,128], index: 4, kind: input, shape index: {}]   ;;  %s2882_s5 = inlined_call_operand.vmem [shape: f32[2,1,128], index: 5, kind: input, shape index: {}]   ;;  %s2883_s6 = inlined_call_operand.vmem [shape: f32[128,128], index: 6, kind: input, shape index: {}]   ;;  %s2884_s7 = inlined_call_operand.vmem [shape: f32[1,128], index: 7, kind: input, shape index: {}]   ;;  %s2885_s8 = inlined_call_operand.vmem [shape: f32[1,128], index: 8, kind: input, shape index: {}]   ;;  %s2886_s9 = inlined_call_operand.vmem [shape: f32[2,1,128], index: 9, kind: output, shape index: {}]  }
   0x1 LB: > { %s1355_s10 = sadd.s32 4294967295, %s2109_s30   ;;  %p1359_p0 = scmp.ge.s32.totalorder %s2109_s30, 1  ;;  %s2109_s30 = sphi %s2164_s30, %s19_s30  }
   0x2   : > { %p294_p1 = scmp.lt.s32.totalorder %s2109_s30, 3 }
   0x4   : > { %p295_p2 = pnand %p1359_p0, %p294_p1 }
   0x5   : > { %v358_v0 = vld [vmem:[%s2878_s1 + $0x80] sm:$0xff] (!%p295_p2)  ;;  %v359_v1 = vld [vmem:[%s2878_s1 + $0x88] sm:$0xff] (!%p295_p2)  ;;  %v360_v11 = vld [vmem:[%s2878_s1 + $0x90] sm:$0xff] (!%p295_p2)  ;;  %p2237_p3 = scmp.lt.s32.totalorder (!%p295_p2), %s1355_s10, 1  ;;  %v488_v47 = vlaneseq (!%p295_p2)  ;;  %vm2112_vm0 = vmmov (!%p295_p2), 0  }
   0x6   : > { %298 = sbr.rel (%p295_p2) target bundleno = 805 (0x325), region = 56  ;;  %v390_v2 = vld [vmem:[%s2878_s1 + $0x180] sm:$0xff] (!%p295_p2)  ;;  %v1815_v3 = vpack.c.bf16 (!%p295_p2), %v359_v1, %v358_v0  ;;  %v391_v4 = vld [vmem:[%s2878_s1 + $0x188] sm:$0xff] (!%p295_p2)  ;;  %v361_v13 = vld [vmem:[%s2878_s1 + $0x98] sm:$0xff] (!%p295_p2) }
   0x7   : > { %v342_v5 = vld [vmem:[%s2878_s1] sm:$0xff] (!%p295_p2)  ;;  %v343_v6 = vld [vmem:[%s2878_s1 + $0x8] sm:$0xff] (!%p295_p2)  ;;  %v1847_v7 = vpack.c.bf16 (!%p295_p2), %v391_v4, %v390_v2  ;;  %v392_v14 = vld [vmem:[%s2878_s1 + $0x190] sm:$0xff] (!%p295_p2)  ;;  %v1819_v16 = vpack.c.bf16 (!%p295_p2), %v361_v13, %v360_v11  ;;  %v2311_v61 = vshrl.u32 (!%p295_p2), %v488_v47, 7 }
   0x8   : > { %v1817_v8 = vpack.c.bf16 (!%p295_p2), %v343_v6, %v342_v5  ;;  %v374_v9 = vld [vmem:[%s2878_s1 + $0x100] sm:$0xff] (!%p295_p2)  ;;  %v375_v10 = vld [vmem:[%s2878_s1 + $0x108] sm:$0xff] (!%p295_p2)  ;;  %1816 = vmatprep.subr.bf16.mxu0 (!%p295_p2), %v1815_v3  ;;  %v393_v15 = vld [vmem:[%s2878_s1 + $0x198] sm:$0xff] (!%p295_p2) }
   0x9   : > { %v1849_v12 = vpack.c.bf16 (!%p295_p2), %v375_v10, %v374_v9  ;;  %1848 = vmatprep.subr.bf16.mxu1 (!%p295_p2), %v1847_v7  ;;  %v1851_v17 = vpack.c.bf16 (!%p295_p2), %v393_v15, %v392_v14  ;;  %v344_v18 = vld [vmem:[%s2878_s1 + $0x10] sm:$0xff] (!%p295_p2)  ;;  %v345_v19 = vld [vmem:[%s2878_s1 + $0x18] sm:$0xff] (!%p295_p2)  ;;  %v362_v23 = vld [vmem:[%s2878_s1 + $0xa0] sm:$0xff] (!%p295_p2)  ;;  %v494_v10 = vsub.s32 (!%p295_p2), 1, %v2311_v61  ;;  %v502_v11 = vsub.s32 (!%p295_p2), 3, %v2311_v61 }
   0xa   : > { %1818 = vmatpush3.bf16.msra.mxu0 (!%p295_p2), %v1817_v8  ;;  %v376_v20 = vld [vmem:[%s2878_s1 + $0x110] sm:$0xff] (!%p295_p2)  ;;  %v1821_v21 = vpack.c.bf16 (!%p295_p2), %v345_v19, %v344_v18  ;;  %v377_v22 = vld [vmem:[%s2878_s1 + $0x118] sm:$0xff] (!%p295_p2)  ;;  %v363_v24 = vld [vmem:[%s2878_s1 + $0xa8] sm:$0xff] (!%p295_p2) }
   0xb   : > { %1850 = vmatpush3.bf16.msra.mxu1 (!%p295_p2), %v1849_v12  ;;  %1820 = vmatprep.subr.bf16.mxu0 (!%p295_p2), %v1819_v16  ;;  %v1853_v25 = vpack.c.bf16 (!%p295_p2), %v377_v22, %v376_v20  ;;  %v1823_v26 = vpack.c.bf16 (!%p295_p2), %v363_v24, %v362_v23  ;;  %v394_v27 = vld [vmem:[%s2878_s1 + $0x1a0] sm:$0xff] (!%p295_p2)  ;;  %v395_v28 = vld [vmem:[%s2878_s1 + $0x1a8] sm:$0xff] (!%p295_p2)  ;;  %v364_v35 = vld [vmem:[%s2878_s1 + $0xb0] sm:$0xff] (!%p295_p2) }
   0xc   : > { %1852 = vmatprep.subr.bf16.mxu1 (!%p295_p2), %v1851_v17  ;;  %v346_v29 = vld [vmem:[%s2878_s1 + $0x20] sm:$0xff] (!%p295_p2)  ;;  %v1855_v30 = vpack.c.bf16 (!%p295_p2), %v395_v28, %v394_v27  ;;  %v347_v31 = vld [vmem:[%s2878_s1 + $0x28] sm:$0xff] (!%p295_p2)  ;;  %v365_v36 = vld [vmem:[%s2878_s1 + $0xb8] sm:$0xff] (!%p295_p2) }
   0xd   : > { %v378_v32 = vld [vmem:[%s2878_s1 + $0x120] sm:$0xff]  ;;  %v379_v33 = vld [vmem:[%s2878_s1 + $0x128] sm:$0xff]  ;;  %v1825_v34 = vpack.c.bf16 %v347_v31, %v346_v29  ;;  %v396_v37 = vld [vmem:[%s2878_s1 + $0x1b0] sm:$0xff]  ;;  %v1827_v39 = vpack.c.bf16 %v365_v36, %v364_v35  ;;  %s2889_s10 = smov (!%p2237_p3, %s1355_s10), 1 }
   0xe   : > { %1822 = vmatpush3.bf16.msra.mxu0 %v1821_v21  ;;  %v1857_v38 = vpack.c.bf16 %v379_v33, %v378_v32  ;;  %v397_v40 = vld [vmem:[%s2878_s1 + $0x1b8] sm:$0xff]  ;;  %v348_v41 = vld [vmem:[%s2878_s1 + $0x30] sm:$0xff]  ;;  %v366_v46 = vld [vmem:[%s2878_s1 + $0xc0] sm:$0xff]  ;;  %s2087_s21 = smul.u32 9, %s2889_s10  ;;  %s336_s19 = scalar_lea.vmem %s2882_s5, %s2889_s10 }
   0xf   : > { %1854 = vmatpush3.bf16.msra.mxu1 %v1853_v25  ;;  %1824 = vmatprep.subr.bf16.mxu0 %v1823_v26  ;;  %v349_v42 = vld [vmem:[%s2878_s1 + $0x38] sm:$0xff]  ;;  %v1859_v43 = vpack.c.bf16 %v397_v40, %v396_v37  ;;  %v380_v44 = vld [vmem:[%s2878_s1 + $0x130] sm:$0xff]  ;;  %v367_v48 = vld [vmem:[%s2878_s1 + $0xc8] sm:$0xff]  ;;  %s339_s11 = scalar_lea.vmem %s2886_s9, %s2889_s10 }
  0x10   : > { %1856 = vmatprep.subr.bf16.mxu1 %v1855_v30  ;;  %v381_v45 = vld [vmem:[%s2878_s1 + $0x138] sm:$0xff]  ;;  %v398_v49 = vld [vmem:[%s2878_s1 + $0x1c0] sm:$0xff]  ;;  %v399_v50 = vld [vmem:[%s2878_s1 + $0x1c8] sm:$0xff]  ;;  %v1829_v51 = vpack.c.bf16 %v349_v42, %v348_v41  ;;  %v1831_v53 = vpack.c.bf16 %v367_v48, %v366_v46  ;;  %s2340_s22 = scalar_lea.vmem %s2877_s0, %s2087_s21 }
  0x11   : > { %v1861_v52 = vpack.c.bf16 %v381_v45, %v380_v44  ;;  %v350_v54 = vld [vmem:[%s2878_s1 + $0x40] sm:$0xff]  ;;  %v351_v55 = vld [vmem:[%s2878_s1 + $0x48] sm:$0xff]  ;;  %v1863_v57 = vpack.c.bf16 %v399_v50, %v398_v49  ;;  %v368_v59 = vld [vmem:[%s2878_s1 + $0xd0] sm:$0xff] }
  0x12   : > { %1826 = vmatpush3.bf16.msra.mxu0 %v1825_v34  ;;  %v382_v56 = vld [vmem:[%s2878_s1 + $0x140] sm:$0xff]  ;;  %v383_v58 = vld [vmem:[%s2878_s1 + $0x148] sm:$0xff]  ;;  %v369_v60 = vld [vmem:[%s2878_s1 + $0xd8] sm:$0xff]  ;;  %v1833_v0 = vpack.c.bf16 %v351_v55, %v350_v54 }
  0x13   : > { %1858 = vmatpush3.bf16.msra.mxu1 %v1857_v38  ;;  %1828 = vmatprep.subr.bf16.mxu0 %v1827_v39  ;;  %v400_v62 = vld [vmem:[%s2878_s1 + $0x1d0] sm:$0xff]  ;;  %v401_v63 = vld [vmem:[%s2878_s1 + $0x1d8] sm:$0xff]  ;;  %v1865_v1 = vpack.c.bf16 %v383_v58, %v382_v56  ;;  %v1835_v2 = vpack.c.bf16 %v369_v60, %v368_v59  ;;  %v370_v8 = vld [vmem:[%s2878_s1 + $0xe0] sm:$0xff]  ;;  %v490_v39 = vsub.s32 0, %v2311_v61 }
  0x14   : > { %1860 = vmatprep.subr.bf16.mxu1 %v1859_v43  ;;  %v352_v3 = vld [vmem:[%s2878_s1 + $0x50] sm:$0xff]  ;;  %v353_v4 = vld [vmem:[%s2878_s1 + $0x58] sm:$0xff]  ;;  %v1867_v6 = vpack.c.bf16 %v401_v63, %v400_v62  ;;  %v371_v9 = vld [vmem:[%s2878_s1 + $0xe8] sm:$0xff]  ;;  %v498_v43 = vsub.s32 2, %v2311_v61 }
  0x15   : > { %v384_v5 = vld [vmem:[%s2878_s1 + $0x150] sm:$0xff]  ;;  %v385_v7 = vld [vmem:[%s2878_s1 + $0x158] sm:$0xff]  ;;  %v402_v12 = vld [vmem:[%s2878_s1 + $0x1e0] sm:$0xff]  ;;  %v1837_v14 = vpack.c.bf16 %v353_v4, %v352_v3  ;;  %v1839_v17 = vpack.c.bf16 %v371_v9, %v370_v8 }
  0x16   : > { %1830 = vmatpush3.bf16.msra.mxu0 %v1829_v51  ;;  %v403_v13 = vld [vmem:[%s2878_s1 + $0x1e8] sm:$0xff]  ;;  %v354_v15 = vld [vmem:[%s2878_s1 + $0x60] sm:$0xff]  ;;  %v1869_v16 = vpack.c.bf16 %v385_v7, %v384_v5  ;;  %v372_v23 = vld [vmem:[%s2878_s1 + $0xf0] sm:$0xff] }
  0x17   : > { %1862 = vmatpush3.bf16.msra.mxu1 %v1861_v52  ;;  %1832 = vmatprep.subr.bf16.mxu0 %v1831_v53  ;;  %v355_v18 = vld [vmem:[%s2878_s1 + $0x68] sm:$0xff]  ;;  %v386_v19 = vld [vmem:[%s2878_s1 + $0x160] sm:$0xff]  ;;  %v1871_v21 = vpack.c.bf16 %v403_v13, %v402_v12  ;;  %v373_v24 = vld [vmem:[%s2878_s1 + $0xf8] sm:$0xff]  ;;  %v510_v53 = vsub.s32 5, %v2311_v61 }
  0x18   : > { %1864 = vmatprep.subr.bf16.mxu1 %v1863_v57  ;;  %v2360_v20 = vld [vmem:[%s2340_s22] sm:$0xff]  ;;  %v387_v22 = vld [vmem:[%s2878_s1 + $0x168] sm:$0xff]  ;;  %v404_v27 = vld [vmem:[%s2878_s1 + $0x1f0] sm:$0xff]  ;;  %v1841_v29 = vpack.c.bf16 %v355_v18, %v354_v15  ;;  %v1843_v31 = vpack.c.bf16 %v373_v24, %v372_v23  ;;  %v518_v57 = vsub.s32 7, %v2311_v61 }
  0x19   : > { %v495_v25 = vrot.slane %v2360_v20, %v494_v10  ;;  %v503_v26 = vrot.slane %v2360_v20, %v502_v11  ;;  %v405_v28 = vld [vmem:[%s2878_s1 + $0x1f8] sm:$0xff]  ;;  %v1873_v30 = vpack.c.bf16 %v387_v22, %v386_v19  ;;  %v356_v32 = vld [vmem:[%s2878_s1 + $0x70] sm:$0xff]  ;;  %v422_v37 = vld [vmem:[%s2878_s1 + $0x280] sm:$0xff]  ;;  %v491_v54 = vrot.slane %v2360_v20, %v490_v39 }
  0x1a   : > { %1834 = vmatpush3.bf16.msra.mxu0 %v1833_v0  ;;  %v357_v33 = vld [vmem:[%s2878_s1 + $0x78] sm:$0xff]  ;;  %v388_v34 = vld [vmem:[%s2878_s1 + $0x170] sm:$0xff]  ;;  %v1875_v35 = vpack.c.bf16 %v405_v28, %v404_v27  ;;  %v423_v38 = vld [vmem:[%s2878_s1 + $0x288] sm:$0xff]  ;;  %v499_v58 = vrot.slane %v2360_v20, %v498_v43  ;;  %v519_v9 = vrot.slane %v2360_v20, %v518_v57 }
  0x1b   : > { %1866 = vmatpush3.bf16.msra.mxu1 %v1865_v1  ;;  %1836 = vmatprep.subr.bf16.mxu0 %v1835_v2  ;;  %v389_v36 = vld [vmem:[%s2878_s1 + $0x178] sm:$0xff]  ;;  %v454_v40 = vld [vmem:[%s2878_s1 + $0x380] sm:$0xff]  ;;  %v455_v41 = vld [vmem:[%s2878_s1 + $0x388] sm:$0xff]  ;;  %v1845_v42 = vpack.c.bf16 %v357_v33, %v356_v32  ;;  %v1879_v45 = vpack.c.bf16 %v423_v38, %v422_v37 }
  0x1c   : > { %1868 = vmatprep.subr.bf16.mxu1 %v1867_v6  ;;  %597 = vmatprep.mubr.f32.mxu0 %v495_v25  ;;  %v1877_v44 = vpack.c.bf16 %v389_v36, %v388_v34  ;;  %v406_v46 = vld [vmem:[%s2878_s1 + $0x200] sm:$0xff]  ;;  %v407_v47 = vld [vmem:[%s2878_s1 + $0x208] sm:$0xff]  ;;  %v1911_v49 = vpack.c.bf16 %v455_v41, %v454_v40  ;;  %v424_v51 = vld [vmem:[%s2878_s1 + $0x290] sm:$0xff]  ;;  %v511_v6 = vrot.slane %v2360_v20, %v510_v53 }
  0x1d   : > { %667 = vmatprep.mubr.f32.mxu1 %v503_v26  ;;  %v438_v48 = vld [vmem:[%s2878_s1 + $0x300] sm:$0xff]  ;;  %v439_v50 = vld [vmem:[%s2878_s1 + $0x308] sm:$0xff]  ;;  %v425_v52 = vld [vmem:[%s2878_s1 + $0x298] sm:$0xff]  ;;  %v1881_v59 = vpack.c.bf16 %v407_v47, %v406_v46 }
  0x1e   : > { %1838 = vmatpush3.bf16.msra.mxu0 %v1837_v14  ;;  %v456_v55 = vld [vmem:[%s2878_s1 + $0x390] sm:$0xff]  ;;  %v457_v56 = vld [vmem:[%s2878_s1 + $0x398] sm:$0xff]  ;;  %v1913_v60 = vpack.c.bf16 %v439_v50, %v438_v48  ;;  %v1883_v62 = vpack.c.bf16 %v425_v52, %v424_v51  ;;  %v426_v4 = vld [vmem:[%s2878_s1 + $0x2a0] sm:$0xff] }
  0x1f   : > { %1870 = vmatpush3.bf16.msra.mxu1 %v1869_v16  ;;  %1840 = vmatprep.subr.bf16.mxu0 %v1839_v17  ;;  %v408_v63 = vld [vmem:[%s2878_s1 + $0x210] sm:$0xff]  ;;  %v409_v0 = vld [vmem:[%s2878_s1 + $0x218] sm:$0xff]  ;;  %v1915_v2 = vpack.c.bf16 %v457_v56, %v456_v55  ;;  %v427_v5 = vld [vmem:[%s2878_s1 + $0x2a8] sm:$0xff] }
  0x20   : > { %1872 = vmatprep.subr.bf16.mxu1 %v1871_v21  ;;  %v440_v1 = vld [vmem:[%s2878_s1 + $0x310] sm:$0xff]  ;;  %v441_v3 = vld [vmem:[%s2878_s1 + $0x318] sm:$0xff]  ;;  %v458_v7 = vld [vmem:[%s2878_s1 + $0x3a0] sm:$0xff]  ;;  %v1885_v10 = vpack.c.bf16 %v409_v0, %v408_v63  ;;  %v1887_v12 = vpack.c.bf16 %v427_v5, %v426_v4 }
  0x21   : > { %v459_v8 = vld [vmem:[%s2878_s1 + $0x3a8] sm:$0xff]  ;;  %v1917_v11 = vpack.c.bf16 %v441_v3, %v440_v1  ;;  %v410_v13 = vld [vmem:[%s2878_s1 + $0x220] sm:$0xff]  ;;  %v428_v18 = vld [vmem:[%s2878_s1 + $0x2b0] sm:$0xff] }
  0x22   : > { %1842 = vmatpush3.bf16.msra.mxu0 %v1841_v29  ;;  %v411_v14 = vld [vmem:[%s2878_s1 + $0x228] sm:$0xff]  ;;  %v442_v15 = vld [vmem:[%s2878_s1 + $0x320] sm:$0xff]  ;;  %v1919_v16 = vpack.c.bf16 %v459_v8, %v458_v7  ;;  %v429_v19 = vld [vmem:[%s2878_s1 + $0x2b8] sm:$0xff] }
  0x23   : > { %1874 = vmatpush3.bf16.msra.mxu1 %v1873_v30  ;;  %1844 = vmatprep.subr.bf16.mxu0 %v1843_v31  ;;  %v443_v17 = vld [vmem:[%s2878_s1 + $0x328] sm:$0xff]  ;;  %v460_v21 = vld [vmem:[%s2878_s1 + $0x3b0] sm:$0xff]  ;;  %v461_v22 = vld [vmem:[%s2878_s1 + $0x3b8] sm:$0xff]  ;;  %v1889_v23 = vpack.c.bf16 %v411_v14, %v410_v13  ;;  %v1891_v25 = vpack.c.bf16 %v429_v19, %v428_v18  ;;  %v514_v18 = vsub.s32 6, %v2311_v61 }
  0x24   : > { %1876 = vmatprep.subr.bf16.mxu1 %v1875_v35  ;;  %v1921_v24 = vpack.c.bf16 %v443_v17, %v442_v15  ;;  %v412_v26 = vld [vmem:[%s2878_s1 + $0x230] sm:$0xff]  ;;  %v413_v27 = vld [vmem:[%s2878_s1 + $0x238] sm:$0xff]  ;;  %v1923_v29 = vpack.c.bf16 %v461_v22, %v460_v21  ;;  %v430_v31 = vld [vmem:[%s2878_s1 + $0x2c0] sm:$0xff] }
  0x25   : > { %v444_v28 = vld [vmem:[%s2878_s1 + $0x330] sm:$0xff]  ;;  %v445_v30 = vld [vmem:[%s2878_s1 + $0x338] sm:$0xff]  ;;  %v431_v32 = vld [vmem:[%s2878_s1 + $0x2c8] sm:$0xff]  ;;  %v1893_v35 = vpack.c.bf16 %v413_v27, %v412_v26 }
  0x26   : > { %1846 = vmatpush3.bf16.msra.mxu0 %v1845_v42  ;;  %v462_v33 = vld [vmem:[%s2878_s1 + $0x3c0] sm:$0xff]  ;;  %v463_v34 = vld [vmem:[%s2878_s1 + $0x3c8] sm:$0xff]  ;;  %v1925_v36 = vpack.c.bf16 %v445_v30, %v444_v28  ;;  %v1895_v37 = vpack.c.bf16 %v431_v32, %v430_v31  ;;  %v432_v43 = vld [vmem:[%s2878_s1 + $0x2d0] sm:$0xff]  ;;  %v2113_v30 = vmov 0.0  }
  0x27   : > { %1878 = vmatpush3.bf16.msra.mxu1 %v1877_v44  ;;  %1880 = vmatprep.subr.bf16.mxu0 %v1879_v45  ;;  %v414_v38 = vld [vmem:[%s2878_s1 + $0x240] sm:$0xff]  ;;  %v415_v39 = vld [vmem:[%s2878_s1 + $0x248] sm:$0xff]  ;;  %v1927_v41 = vpack.c.bf16 %v463_v34, %v462_v33  ;;  %v433_v44 = vld [vmem:[%s2878_s1 + $0x2d8] sm:$0xff] }
  0x28   : > { %1912 = vmatprep.subr.bf16.mxu1 %v1911_v49  ;;  %v446_v40 = vld [vmem:[%s2878_s1 + $0x340] sm:$0xff]  ;;  %v447_v42 = vld [vmem:[%s2878_s1 + $0x348] sm:$0xff]  ;;  %v464_v45 = vld [vmem:[%s2878_s1 + $0x3d0] sm:$0xff]  ;;  %v1897_v47 = vpack.c.bf16 %v415_v39, %v414_v38  ;;  %v1899_v49 = vpack.c.bf16 %v433_v44, %v432_v43 }
  0x29   : > { %598 = vmatmul.mubr.f32.vlgmr.msra.gmra.mrb[0].mxu0 %v491_v54  ;;  %v465_v46 = vld [vmem:[%s2878_s1 + $0x3d8] sm:$0xff]  ;;  %v1929_v48 = vpack.c.bf16 %v447_v42, %v446_v40  ;;  %v416_v50 = vld [vmem:[%s2878_s1 + $0x250] sm:$0xff]  ;;  %v434_v55 = vld [vmem:[%s2878_s1 + $0x2e0] sm:$0xff] }
  0x2a   : > { %668 = vmatmul.mubr.f32.vlgmr.msra.gmra.mrb[0].mxu1 %v499_v58  ;;  %1882 = vmatpush3.bf16.msra.mxu0 %v1881_v59  ;;  %v417_v51 = vld [vmem:[%s2878_s1 + $0x258] sm:$0xff]  ;;  %v448_v52 = vld [vmem:[%s2878_s1 + $0x350] sm:$0xff]  ;;  %v1931_v53 = vpack.c.bf16 %v465_v46, %v464_v45  ;;  %v435_v56 = vld [vmem:[%s2878_s1 + $0x2e8] sm:$0xff] }
  0x2b   : > { %1914 = vmatpush3.bf16.msra.mxu1 %v1913_v60  ;;  %1884 = vmatprep.subr.bf16.mxu0 %v1883_v62  ;;  %v449_v54 = vld [vmem:[%s2878_s1 + $0x358] sm:$0xff]  ;;  %v466_v57 = vld [vmem:[%s2878_s1 + $0x3e0] sm:$0xff]  ;;  %v467_v58 = vld [vmem:[%s2878_s1 + $0x3e8] sm:$0xff]  ;;  %v1901_v59 = vpack.c.bf16 %v417_v51, %v416_v50  ;;  %v1903_v62 = vpack.c.bf16 %v435_v56, %v434_v55 }
  0x2c   : > { %1916 = vmatprep.subr.bf16.mxu1 %v1915_v2  ;;  %737 = vmatprep.mubr.f32.mxu0 %v511_v6  ;;  %v1933_v60 = vpack.c.bf16 %v449_v54, %v448_v52  ;;  %v418_v63 = vld [vmem:[%s2878_s1 + $0x260] sm:$0xff]  ;;  %v419_v0 = vld [vmem:[%s2878_s1 + $0x268] sm:$0xff]  ;;  %v1935_v2 = vpack.c.bf16 %v467_v58, %v466_v57  ;;  %v436_v4 = vld [vmem:[%s2878_s1 + $0x2f0] sm:$0xff] }
  0x2d   : > { %807 = vmatprep.mubr.f32.mxu1 %v519_v9  ;;  %v450_v1 = vld [vmem:[%s2878_s1 + $0x360] sm:$0xff]  ;;  %v451_v3 = vld [vmem:[%s2878_s1 + $0x368] sm:$0xff]  ;;  %v437_v5 = vld [vmem:[%s2878_s1 + $0x2f8] sm:$0xff]  ;;  %v1905_v8 = vpack.c.bf16 %v419_v0, %v418_v63 }
  0x2e   : > { %1886 = vmatpush3.bf16.msra.mxu0 %v1885_v10  ;;  %v468_v6 = vld [vmem:[%s2878_s1 + $0x3f0] sm:$0xff]  ;;  %v469_v7 = vld [vmem:[%s2878_s1 + $0x3f8] sm:$0xff]  ;;  %v1937_v9 = vpack.c.bf16 %v451_v3, %v450_v1  ;;  %v1907_v10 = vpack.c.bf16 %v437_v5, %v436_v4  ;;  %v470_v21 = vld [vmem:[%s2878_s1 + $0x400] sm:$0xff] }
  0x2f   : > { %1918 = vmatpush3.bf16.msra.mxu1 %v1917_v11  ;;  %1888 = vmatprep.subr.bf16.mxu0 %v1887_v12  ;;  %v420_v11 = vld [vmem:[%s2878_s1 + $0x270] sm:$0xff]  ;;  %v421_v12 = vld [vmem:[%s2878_s1 + $0x278] sm:$0xff]  ;;  %v1939_v13 = vpack.c.bf16 %v469_v7, %v468_v6  ;;  %v471_v22 = vld [vmem:[%s2878_s1 + $0x408] sm:$0xff] }
  0x30   : > { %1920 = vmatprep.subr.bf16.mxu1 %v1919_v16  ;;  %v452_v14 = vld [vmem:[%s2878_s1 + $0x370] sm:$0xff]  ;;  %v453_v15 = vld [vmem:[%s2878_s1 + $0x378] sm:$0xff]  ;;  %v506_v16 = vsub.s32 4, %v2311_v61  ;;  %v1909_v17 = vpack.c.bf16 %v421_v12, %v420_v11  ;;  %v2111_v61 = vmov 0.0|0.0   ;;  %v483_v42 = vld [vmem:[%s2878_s1 + $0x468] sm:$0xff] }
  0x31   : > { %v1941_v19 = vpack.c.bf16 %v453_v15, %v452_v14  ;;  %v472_v26 = vld [vmem:[%s2878_s1 + $0x410] sm:$0xff]  ;;  %v473_v27 = vld [vmem:[%s2878_s1 + $0x418] sm:$0xff]  ;;  %v890_v54 = vld [vmem:[%s2881_s4 + $0x20] sm:$0xff] }
  0x32   : > { %1890 = vmatpush3.bf16.msra.mxu0 %v1889_v23  ;;  %v507_v23 = vrot.slane %v2360_v20, %v506_v16  ;;  %v1947_v28 = vpack.c.bf16 %v473_v27, %v472_v26  ;;  %v476_v32 = vld [vmem:[%s2878_s1 + $0x430] sm:$0xff]  ;;  %v477_v33 = vld [vmem:[%s2878_s1 + $0x438] sm:$0xff]  ;;  %v891_v55 = vld [vmem:[%s2881_s4 + $0x28] sm:$0xff] }
  0x33   : > { %1922 = vmatpush3.bf16.msra.mxu1 %v1921_v24  ;;  %1892 = vmatprep.subr.bf16.mxu0 %v1891_v25  ;;  %v1944_v24 = vpack.c.bf16 %v471_v22, %v470_v21  ;;  %v515_v25 = vrot.slane %v2360_v20, %v514_v18  ;;  %v474_v20 = vld [vmem:[%s2878_s1 + $0x420] sm:$0xff]  ;;  %v1953_v34 = vpack.c.bf16 %v477_v33, %v476_v32  ;;  %v480_v38 = vld [vmem:[%s2878_s1 + $0x450] sm:$0xff]  ;;  %v481_v39 = vld [vmem:[%s2878_s1 + $0x458] sm:$0xff] }
  0x34   : > { %1924 = vmatprep.subr.bf16.mxu1 %v1923_v29  ;;  %v475_v29 = vld [vmem:[%s2878_s1 + $0x428] sm:$0xff]  ;;  %v1959_v40 = vpack.c.bf16 %v481_v39, %v480_v38  ;;  %v484_v44 = vld [vmem:[%s2878_s1 + $0x470] sm:$0xff]  ;;  %v485_v45 = vld [vmem:[%s2878_s1 + $0x478] sm:$0xff]  ;;  %v2688_v56 = vpack.c.bf16 %v891_v55, %v890_v54 }
  0x35   : > { %v1950_v31 = vpack.c.bf16 %v475_v29, %v474_v20  ;;  %v1965_v46 = vpack.c.bf16 %v485_v45, %v484_v44  ;;  %v888_v51 = vld [vmem:[%s2881_s4 + $0x10] sm:$0xff]  ;;  %v889_v52 = vld [vmem:[%s2881_s4 + $0x18] sm:$0xff]  ;;  %v898_v3 = vld [vmem:[%s2881_s4 + $0x60] sm:$0xff] }
  0x36   : > { %1894 = vmatpush3.bf16.msra.mxu0 %v1893_v35  ;;  %v478_v35 = vld [vmem:[%s2878_s1 + $0x440] sm:$0xff]  ;;  %v892_v57 = vld [vmem:[%s2881_s4 + $0x30] sm:$0xff]  ;;  %v893_v58 = vld [vmem:[%s2881_s4 + $0x38] sm:$0xff] }
  0x37   : > { %1926 = vmatpush3.bf16.msra.mxu1 %v1925_v36  ;;  %1896 = vmatprep.subr.bf16.mxu0 %v1895_v37  ;;  %v479_v36 = vld [vmem:[%s2878_s1 + $0x448] sm:$0xff]  ;;  %v896_v0 = vld [vmem:[%s2881_s4 + $0x50] sm:$0xff]  ;;  %v897_v1 = vld [vmem:[%s2881_s4 + $0x58] sm:$0xff] }
  0x38   : > { %1928 = vmatprep.subr.bf16.mxu1 %v1927_v41  ;;  %v1956_v37 = vpack.c.bf16 %v479_v36, %v478_v35  ;;  %v482_v41 = vld [vmem:[%s2878_s1 + $0x460] sm:$0xff]  ;;  %v899_v4 = vld [vmem:[%s2881_s4 + $0x68] sm:$0xff]  ;;  %v900_v6 = vld [vmem:[%s2881_s4 + $0x70] sm:$0xff] }
  0x39   : > { %v1962_v43 = vpack.c.bf16 %v483_v42, %v482_v41  ;;  %v2736_v5 = vpack.c.bf16 %v899_v4, %v898_v3  ;;  %v901_v7 = vld [vmem:[%s2881_s4 + $0x78] sm:$0xff]  ;;  %v1056_v26 = vld [vmem:[%s2883_s6 + $0x8] sm:$0xff]  ;;  %v1059_v35 = vld [vmem:[%s2883_s6 + $0x20] sm:$0xff] }
  0x3a   : > { %1898 = vmatpush3.bf16.msra.mxu0 %v1897_v47  ;;  %v1360_v47 = vld [vmem:[%s2340_s22 + $0x8] ss:$0 sm:$0xff]  ;;  %v1058_v32 = vld [vmem:[%s2883_s6 + $0x18] sm:$0xff]  ;;  %v1061_v38 = vld [vmem:[%s2883_s6 + $0x30] sm:$0xff] }
  0x3b   : > { %1930 = vmatpush3.bf16.msra.mxu1 %v1929_v48  ;;  %1900 = vmatprep.subr.bf16.mxu0 %v1899_v49  ;;  %v886_v48 = vld [vmem:[%s2881_s4] sm:$0xff]  ;;  %v887_v49 = vld [vmem:[%s2881_s4 + $0x8] sm:$0xff]  ;;  %v1062_v39 = vld [vmem:[%s2883_s6 + $0x38] sm:$0xff] }
  0x3c   : > { %1932 = vmatprep.subr.bf16.mxu1 %v1931_v53  ;;  %v2666_v50 = vpack.c.bf16 %v887_v49, %v886_v48  ;;  %v2677_v53 = vpack.c.bf16 %v889_v52, %v888_v51  ;;  %v1060_v36 = vld [vmem:[%s2883_s6 + $0x28] sm:$0xff]  ;;  %v1063_v41 = vld [vmem:[%s2883_s6 + $0x40] sm:$0xff]  ;;  %v1065_v44 = vld [vmem:[%s2883_s6 + $0x50] sm:$0xff] }
  0x3d   : > { %v1064_v42 = vld [vmem:[%s2883_s6 + $0x48] sm:$0xff]  ;;  %v1066_v45 = vld [vmem:[%s2883_s6 + $0x58] sm:$0xff]  ;;  %v1069_v51 = vld [vmem:[%s2883_s6 + $0x70] sm:$0xff] }
  0x3e   : > { %1902 = vmatpush3.bf16.msra.mxu0 %v1901_v59  ;;  %v2700_v59 = vpack.c.bf16 %v893_v58, %v892_v57  ;;  %v1068_v48 = vld [vmem:[%s2883_s6 + $0x68] sm:$0xff]  ;;  %v1070_v52 = vld [vmem:[%s2883_s6 + $0x78] sm:$0xff]  ;;  %v1054_v55 = vld [vmem:[%s336_s19] sm:$0x1] }
  0x3f   : > { %1934 = vmatpush3.bf16.msra.mxu1 %v1933_v60  ;;  %1904 = vmatprep.subr.bf16.mxu0 %v1903_v62  ;;  %v894_v60 = vld [vmem:[%s2881_s4 + $0x40] sm:$0xff]  ;;  %v895_v62 = vld [vmem:[%s2881_s4 + $0x48] sm:$0xff]  ;;  %v2037_v54 = vpack.c.bf16 %v1070_v52, %v1069_v51 }
  0x40   : > { %1936 = vmatprep.subr.bf16.mxu1 %v1935_v2  ;;  %v2712_v63 = vpack.c.bf16 %v895_v62, %v894_v60  ;;  %v2724_v2 = vpack.c.bf16 %v897_v1, %v896_v0 }
  0x42   : > { %1906 = vmatpush3.bf16.msra.mxu0 %v1905_v8  ;;  %v2748_v8 = vpack.c.bf16 %v901_v7, %v900_v6 }
  0x43   : > { %1938 = vmatpush3.bf16.msra.mxu1 %v1937_v9  ;;  %1908 = vmatprep.subr.bf16.mxu0 %v1907_v10 }
  0x44   : > { %1940 = vmatprep.subr.bf16.mxu1 %v1939_v13 }
  0x46   : > { %1910 = vmatpush3.bf16.msra.mxu0 %v1909_v17 }
  0x47   : > { %1942 = vmatpush3.bf16.msra.mxu1 %v1941_v19  ;;  %1943 = vmatprep.subr.bf16.mxu0 %v2111_v61 }
  0x48   : > { %1967 = vmatprep.subr.bf16.mxu1 %v2111_v61 }
  0x49   : > { %738 = vmatmul.mubr.f32.vlgmr.msra.gmra.mrb[2].mxu0 %v507_v23 }
  0x4a   : > { %1945 = vmatpush3.bf16.msra.mxu0 %v1944_v24  ;;  %808 = vmatmul.mubr.f32.vlgmr.msra.gmra.mrb[2].mxu1 %v515_v25  ;;  %v1055_v25 = vld [vmem:[%s2883_s6] sm:$0xff] }
  0x4b   : > { %1946 = vmatprep.subr.bf16.mxu0 %v2111_v61  ;;  %1637 = vmatprep.mubr.msk.f32.mxu0 %vm2112_vm0, %v2113_v30 }
  0x4c   : > { %1672 = vmatprep.mubr.msk.f32.mxu1 %vm2112_vm0, %v2113_v30  ;;  %1969 = vmatpush3.bf16.msra.mxu1 %v2666_v50 }
  0x4d   : > { %1970 = vmatprep.subr.bf16.mxu1 %v2111_v61 }
  0x4e   : > { %1948 = vmatpush3.bf16.msra.mxu0 %v1947_v28  ;;  %v2016_v28 = vpack.c.bf16 %v1056_v26, %v1055_v25 }
  0x4f   : > { %1949 = vmatprep.subr.bf16.mxu0 %v2111_v61 }
  0x50   : > { %1972 = vmatpush3.bf16.msra.mxu1 %v2677_v53 }
  0x51   : > { %1973 = vmatprep.subr.bf16.mxu1 %v2111_v61 }
  0x52   : > { %1951 = vmatpush3.bf16.msra.mxu0 %v1950_v31  ;;  %v1057_v31 = vld [vmem:[%s2883_s6 + $0x10] sm:$0xff] }
  0x53   : > { %1952 = vmatprep.subr.bf16.mxu0 %v2111_v61 }
  0x54   : > { %1975 = vmatpush3.bf16.msra.mxu1 %v2688_v56 }
  0x55   : > { %1976 = vmatprep.subr.bf16.mxu1 %v2111_v61 }
  0x56   : > { %1954 = vmatpush3.bf16.msra.mxu0 %v1953_v34  ;;  %v2019_v34 = vpack.c.bf16 %v1058_v32, %v1057_v31 }
  0x57   : > { %1955 = vmatprep.subr.bf16.mxu0 %v2111_v61 }
  0x58   : > { %1978 = vmatpush3.bf16.msra.mxu1 %v2700_v59 }
  0x59   : > { %1979 = vmatprep.subr.bf16.mxu1 %v2111_v61 }
  0x5a   : > { %1957 = vmatpush3.bf16.msra.mxu0 %v1956_v37  ;;  %v2022_v37 = vpack.c.bf16 %v1060_v36, %v1059_v35 }
  0x5b   : > { %1958 = vmatprep.subr.bf16.mxu0 %v2111_v61 }
  0x5c   : > { %1981 = vmatpush3.bf16.msra.mxu1 %v2712_v63 }
  0x5d   : > { %1982 = vmatprep.subr.bf16.mxu1 %v2111_v61 }
  0x5e   : > { %1960 = vmatpush3.bf16.msra.mxu0 %v1959_v40  ;;  %v2025_v40 = vpack.c.bf16 %v1062_v39, %v1061_v38 }
  0x5f   : > { %1961 = vmatprep.subr.bf16.mxu0 %v2111_v61 }
  0x60   : > { %1984 = vmatpush3.bf16.msra.mxu1 %v2724_v2 }
  0x61   : > { %1985 = vmatprep.subr.bf16.mxu1 %v2111_v61 }
  0x62   : > { %1963 = vmatpush3.bf16.msra.mxu0 %v1962_v43  ;;  %v2028_v43 = vpack.c.bf16 %v1064_v42, %v1063_v41 }
  0x63   : > { %1964 = vmatprep.subr.bf16.mxu0 %v2111_v61 }
  0x64   : > { %1987 = vmatpush3.bf16.msra.mxu1 %v2736_v5 }
  0x65   : > { %1988 = vmatprep.subr.bf16.mxu1 %v2111_v61 }
  0x66   : > { %1966 = vmatpush3.bf16.msra.mxu0 %v1965_v46  ;;  %v2031_v46 = vpack.c.bf16 %v1066_v45, %v1065_v44 }
  0x67   : > { %1991 = vmatprep.subr.bf16.mxu0 %v2111_v61 }
  0x68   : > { %1990 = vmatpush3.bf16.msra.mxu1 %v2748_v8 }
  0x69   : > { %1638 = vmatmul.mubr.f32.vlgmr.msra.gmra.mrb[4].mxu0 %v1360_v47  ;;  %2015 = vmatprep.subr.bf16.mxu1 %v2111_v61  ;;  %v1067_v47 = vld [vmem:[%s2883_s6 + $0x60] sm:$0xff] }
  0x6a   : > { %1707 = vmatprep.mubr.msk.f32.mxu0 %vm2112_vm0, %v2113_v30  ;;  %1993 = vmatpush3.bf16.msra.mxu0 %v2666_v50  ;;  %v2034_v49 = vpack.c.bf16 %v1068_v48, %v1067_v47 }
  0x6b   : > { %1994 = vmatprep.subr.bf16.mxu0 %v2111_v61 }
  0x6e   : > { %1996 = vmatpush3.bf16.msra.mxu0 %v2677_v53 }
  0x6f   : > { %1997 = vmatprep.subr.bf16.mxu0 %v2111_v61 }
  0x72   : > { %1999 = vmatpush3.bf16.msra.mxu0 %v2688_v56 }
  0x73   : > { %2000 = vmatprep.subr.bf16.mxu0 %v2111_v61 }
  0x76   : > { %2002 = vmatpush3.bf16.msra.mxu0 %v2700_v59 }
  0x77   : > { %2003 = vmatprep.subr.bf16.mxu0 %v2111_v61 }
  0x7a   : > { %2005 = vmatpush3.bf16.msra.mxu0 %v2712_v63 }
  0x7b   : > { %2006 = vmatprep.subr.bf16.mxu0 %v2111_v61 }
  0x7e   : > { %2008 = vmatpush3.bf16.msra.mxu0 %v2724_v2 }
  0x7f   : > { %2009 = vmatprep.subr.bf16.mxu0 %v2111_v61 }
  0x82   : > { %2011 = vmatpush3.bf16.msra.mxu0 %v2736_v5 }
  0x83   : > { %2012 = vmatprep.subr.bf16.mxu0 %v2111_v61 }
  0x86   : > { %2014 = vmatpush3.bf16.msra.mxu0 %v2748_v8 }
  0x87   : > { %2039 = vmatprep.subr.bf16.mxu0 %v2111_v61 }
  0xfc   : > { %v1395_v9 = vpop.f32.mrb[0].mxu0 }
  0xfd   : > { %v1430_v10 = vpop.f32.mrb[0].mxu1  ;;  %v1396_v11 = vpop.f32.mrb[1].mxu0 }
  0xfe   : > { %v1397_v12 = vadd.f32 %v1396_v11, %v1395_v9  ;;  %v1431_v13 = vpop.f32.mrb[1].mxu1 }
  0xff   : > { %v1432_v14 = vadd.f32 %v1431_v13, %v1430_v10 }
 0x101   : > { %v670_v15 = vadd.f32 %v1432_v14, %v1397_v12  ;;  %v1050_v14 = vld [vmem:[%s2879_s2] sm:$0x1] }
 0x11c   : > { %v1465_v16 = vpop.f32.mrb[2].mxu0 }
 0x11d   : > { %v1466_v17 = vpop.f32.mrb[3].mxu0  ;;  %v1500_v18 = vpop.f32.mrb[2].mxu1 }
 0x11e   : > { %v1467_v19 = vadd.f32 %v1466_v17, %v1465_v16  ;;  %v1501_v21 = vpop.f32.mrb[3].mxu1  ;;  %v1292_v16 = vld [vmem:[%s2884_s7] sm:$0x1] }
 0x11f   : > { %v1502_v22 = vadd.f32 %v1501_v21, %v1500_v18  ;;  %v1294_v21 = vld [vmem:[%s2885_s8] sm:$0x1] }
 0x120   : > { %v740_v23 = vadd.f32 %v1467_v19, %v670_v15  ;;  %v1052_v19 = vld [vmem:[%s2880_s3] sm:$0x1] }
 0x122   : > { %v810_v24 = vadd.f32 %v1502_v22, %v740_v23 }
 0x13c   : > { %v879_v27 = vpop.f32.mrb[4].mxu0 }
 0x13d   : > { %v2762_v20 = vadd.f32 %v879_v27, %v810_v24  ;;  %v1639_v29 = vpop.f32.mrb[5].mxu0 }
 0x13f   : > { %v884_v33 = vmul.f32 %v2762_v20, %v2762_v20  ;;  %1673 = vmatmul.mubr.f32.vlgmr.msra.gmra.mrb[4].mxu1 %v2762_v20 }
 0x140   : > { %2017 = vmatpush3.bf16.msra.mxu1 %v2016_v28  ;;  %1742 = vmatprep.mubr.msk.f32.mxu1 %vm2112_vm0, %v2113_v30 }
 0x141   : > { %1708 = vmatmul.mubr.f32.vlgmr.msra.gmra.mrb[6].mxu0 %v884_v33  ;;  %2018 = vmatprep.subr.bf16.mxu1 %v2111_v61 }
 0x142   : > { %2041 = vmatpush3.bf16.msra.mxu0 %v2666_v50  ;;  %1777 = vmatprep.mubr.msk.f32.mxu0 %vm2112_vm0, %v2113_v30 }
 0x143   : > { %2042 = vmatprep.subr.bf16.mxu0 %v2111_v61 }
 0x144   : > { %2020 = vmatpush3.bf16.msra.mxu1 %v2019_v34 }
 0x145   : > { %2021 = vmatprep.subr.bf16.mxu1 %v2111_v61 }
 0x146   : > { %2044 = vmatpush3.bf16.msra.mxu0 %v2677_v53 }
 0x147   : > { %2045 = vmatprep.subr.bf16.mxu0 %v2111_v61 }
 0x148   : > { %2023 = vmatpush3.bf16.msra.mxu1 %v2022_v37 }
 0x149   : > { %2024 = vmatprep.subr.bf16.mxu1 %v2111_v61 }
 0x14a   : > { %2047 = vmatpush3.bf16.msra.mxu0 %v2688_v56 }
 0x14b   : > { %2048 = vmatprep.subr.bf16.mxu0 %v2111_v61 }
 0x14c   : > { %2026 = vmatpush3.bf16.msra.mxu1 %v2025_v40 }
 0x14d   : > { %2027 = vmatprep.subr.bf16.mxu1 %v2111_v61 }
 0x14e   : > { %2050 = vmatpush3.bf16.msra.mxu0 %v2700_v59 }
 0x14f   : > { %2051 = vmatprep.subr.bf16.mxu0 %v2111_v61 }
 0x150   : > { %2029 = vmatpush3.bf16.msra.mxu1 %v2028_v43 }
 0x151   : > { %2030 = vmatprep.subr.bf16.mxu1 %v2111_v61 }
 0x152   : > { %2053 = vmatpush3.bf16.msra.mxu0 %v2712_v63 }
 0x153   : > { %2054 = vmatprep.subr.bf16.mxu0 %v2111_v61 }
 0x154   : > { %2032 = vmatpush3.bf16.msra.mxu1 %v2031_v46 }
 0x155   : > { %2033 = vmatprep.subr.bf16.mxu1 %v2111_v61 }
 0x156   : > { %2056 = vmatpush3.bf16.msra.mxu0 %v2724_v2 }
 0x157   : > { %2057 = vmatprep.subr.bf16.mxu0 %v2111_v61 }
 0x158   : > { %2035 = vmatpush3.bf16.msra.mxu1 %v2034_v49 }
 0x159   : > { %2036 = vmatprep.subr.bf16.mxu1 %v2111_v61 }
 0x15a   : > { %2059 = vmatpush3.bf16.msra.mxu0 %v2736_v5 }
 0x15b   : > { %2060 = vmatprep.subr.bf16.mxu0 %v2111_v61 }
 0x15c   : > { %2038 = vmatpush3.bf16.msra.mxu1 %v2037_v54 }
 0x15d   : > { %2063 = vmatprep.subr.bf16.mxu1 %v2111_v61 }
 0x15e   : > { %2062 = vmatpush3.bf16.msra.mxu0 %v2748_v8 }
 0x15f   : > { %1743 = vmatmul.mubr.f32.vlgmr.msra.gmra.mrb[6].mxu1 %v1054_v55 }
 0x160   : > { %2065 = vmatpush3.bf16.msra.mxu1 %v2666_v50  ;;  %1812 = vmatprep.mubr.msk.f32.mxu1 %vm2112_vm0, %v2113_v30 }
 0x161   : > { %2066 = vmatprep.subr.bf16.mxu1 %v2111_v61 }
 0x164   : > { %2068 = vmatpush3.bf16.msra.mxu1 %v2677_v53 }
 0x165   : > { %2069 = vmatprep.subr.bf16.mxu1 %v2111_v61 }
 0x168   : > { %2071 = vmatpush3.bf16.msra.mxu1 %v2688_v56 }
 0x169   : > { %2072 = vmatprep.subr.bf16.mxu1 %v2111_v61 }
 0x16c   : > { %2074 = vmatpush3.bf16.msra.mxu1 %v2700_v59 }
 0x16d   : > { %2075 = vmatprep.subr.bf16.mxu1 %v2111_v61 }
 0x170   : > { %2077 = vmatpush3.bf16.msra.mxu1 %v2712_v63 }
 0x171   : > { %2078 = vmatprep.subr.bf16.mxu1 %v2111_v61 }
 0x174   : > { %2080 = vmatpush3.bf16.msra.mxu1 %v2724_v2 }
 0x175   : > { %2081 = vmatprep.subr.bf16.mxu1 %v2111_v61 }
 0x178   : > { %2083 = vmatpush3.bf16.msra.mxu1 %v2736_v5 }
 0x179   : > { %2084 = vmatprep.subr.bf16.mxu1 %v2111_v61 }
 0x17c   : > { %2086 = vmatpush3.bf16.msra.mxu1 %v2748_v8 }
 0x212   : > { %v968_v30 = vpop.f32.mrb[4].mxu1 }
 0x213   : > { %v1042_v50 = vmul.f32 0.25, %v968_v30  ;;  %v1674_v53 = vpop.f32.mrb[5].mxu1 }
 0x214   : > { %v1038_v56 = vpop.f32.mrb[6].mxu0 }
 0x215   : > { %v1044_v57 = vmul.f32 %v1042_v50, %v1042_v50  ;;  %v1043_v58 = vmul.f32 0.25, %v1038_v56  ;;  %v1709_v59 = vpop.f32.mrb[7].mxu0  ;;  %v1046_v63 = vsub.f32 %v2762_v20, %v1042_v50 }
 0x217   : > { %v1045_v60 = vsub.f32 %v1043_v58, %v1044_v57 }
 0x219   : > { %v1047_v62 = vadd.f32 1e-05, %v1045_v60 }
 0x21b   : > { %2099 = vrsqrt.f32 %v1047_v62 }
 0x225   : > { %v2100_v0 = vpop.eup %2099 }
 0x226   : > { %v1049_v1 = vmul.f32 %v2100_v0, %v1046_v63 }
 0x228   : > { %v1051_v17 = vmul.f32 %v1050_v14, %v1049_v1 }
 0x22a   : > { %v1053_v23 = vadd.f32 %v1052_v19, %v1051_v17 }
 0x232   : > { %v1137_v2 = vpop.f32.mrb[6].mxu1 }
 0x233   : > { %v1142_v3 = vmul.f32 %v1137_v2, %v1137_v2  ;;  %v1744_v4 = vpop.f32.mrb[7].mxu1  ;;  %1778 = vmatmul.mubr.f32.vlgmr.msra.gmra.mrb[8].mxu0 %v1137_v2 }
 0x235   : > { %1813 = vmatmul.mubr.f32.vlgmr.msra.gmra.mrb[8].mxu1 %v1142_v3 }
 0x306   : > { %v1210_v61 = vpop.f32.mrb[8].mxu0 }
 0x307   : > { %v1284_v5 = vmul.f32 0.25, %v1210_v61  ;;  %v1779_v6 = vpop.f32.mrb[9].mxu0 }
 0x308   : > { %v1280_v7 = vpop.f32.mrb[8].mxu1 }
 0x309   : > { %v1286_v8 = vmul.f32 %v1284_v5, %v1284_v5  ;;  %v1288_v9 = vsub.f32 %v1137_v2, %v1284_v5  ;;  %v1285_v10 = vmul.f32 0.25, %v1280_v7  ;;  %v1814_v11 = vpop.f32.mrb[9].mxu1 }
 0x30b   : > { %v1287_v12 = vsub.f32 %v1285_v10, %v1286_v8 }
 0x30d   : > { %v1289_v13 = vadd.f32 1e-05, %v1287_v12 }
 0x30f   : > { %2101 = vrsqrt.f32 %v1289_v13 }
 0x319   : > { %v2102_v15 = vpop.eup %2101 }
 0x31a   : > { %v1291_v18 = vmul.f32 %v2102_v15, %v1288_v9 }
 0x31c   : > { %v1293_v22 = vmul.f32 %v1292_v16, %v1291_v18 }
 0x31e   : > { %v1295_v24 = vadd.f32 %v1294_v21, %v1293_v22 }
 0x320   : > { %v1296_v25 = vadd.f32 %v1295_v24, %v1053_v23 }
 0x322   : > { %v1297_v26 = vmax.f32 %v1296_v25, 0.0 }
 0x324   : > { %1298 = vst [vmem:[%s339_s11] sm:$0x1] %v1297_v26 }
 0x325 PF: > { %s19_s30 = sadd.s32 1, %s2109_s30  }
 0x326   : > { %p16_p4 = scmp.ge.s32.totalorder %s19_s30, 4  }
 0x328   :  { %18 = sbr.rel (!%p16_p4) target bundleno = 1 (0x1), region = 89 }

</bundles_post_ra>
